<compile_context>
chip_gen: v7x
topology: tpu7x:2x2x1
jax: 0.10.0
libtpu: 0.0.40
codegen_flags: <defaults>
</compile_context>

<pallas_src>
import functools

import jax
import jax.numpy as jnp
import numpy as np
from jax.experimental import pallas as pl
from jax.experimental.pallas import tpu as pltpu


# ---------------------------------------------------------------------------
# In-kernel building blocks (activations stay register/VMEM-resident values)
# ---------------------------------------------------------------------------
def _interleave_rows(even, odd):
    """rows -> [even[0], odd[0], even[1], odd[1], ...] (single sublane interleave)."""
    h, n = even.shape
    return jnp.stack([even, odd], axis=1).reshape(2 * h, n)


def _shift_up(a):
    """a[i] -> a[i+1]; last row becomes zero (the kh=0 tap reads one row below the image)."""
    return jnp.concatenate([a[1:], jnp.zeros((1, a.shape[1]), a.dtype)], axis=0)


def _dc_layer(x_lo, x_hi, mlo_ref, mhi_ref, b_ref, act):
    """One ConvTranspose2d(k=3, s=2, p=1, op=1), row-polyphase / column-block-Toeplitz form.

    x_lo : (H, W*Cin)  bf16   input image rows r
    x_hi : (H, W*Cin)  bf16   input image rows r+1 (zero beyond the image)
    mlo  : (W*Cin, 2*(2W*Cout)) bf16 = [M_even (kh=1) | M_odd_lo (kh=2)]   (merged x_lo matmul)
    mhi  : (W*Cin, 2W*Cout)     bf16 = M_odd_hi (kh=0)
    b    : (1, 2W*Cout) f32
    Returns (even, odd) f32, each (H, 2W*Cout): output image rows 2r and 2r+1.
    """
    n_out = mhi_ref.shape[1]
    lo = jnp.dot(x_lo, mlo_ref[...], preferred_element_type=jnp.float32)   # (H, 2*n_out)
    hi = jnp.dot(x_hi, mhi_ref[...], preferred_element_type=jnp.float32)   # (H, n_out)
    b = b_ref[...]
    even = act(lo[:, :n_out] + b)
    odd = act(lo[:, n_out:] + hi + b)
    return even, odd


def _decoder_kernel(x_ref,
                    mlo1, mhi1, b1, mlo2, mhi2, b2,
                    mlo3, mhi3, b3, mlo4, mhi4, b4,
                    o_ref, *, h0):
    relu = lambda v: jnp.maximum(v, 0.0)

    x_all = x_ref[0]                                   # (h0+1, w0*c0) f32, last row = zero pad
    x_lo = x_all[0:h0].astype(jnp.bfloat16)
    x_hi = x_all[1:h0 + 1].astype(jnp.bfloat16)

    # Layers 1-3 (ReLU): compute even/odd row blocks, interleave in-register, keep as bf16 values.
    for mlo, mhi, bias in ((mlo1, mhi1, b1), (mlo2, mhi2, b2), (mlo3, mhi3, b3)):
        e, o = _dc_layer(x_lo, x_hi, mlo, mhi, bias, relu)
        a = _interleave_rows(e, o)                     # (2H, n) f32, image-row order
        x_lo = a.astype(jnp.bfloat16)
        x_hi = _shift_up(a).astype(jnp.bfloat16)

    # Layer 4 (sigmoid): lane-dense output [even row 2r | odd row 2r+1] concatenated along lanes.
    e, o = _dc_layer(x_lo, x_hi, mlo4, mhi4, b4, jax.nn.sigmoid)
    o_ref[0] = jnp.concatenate([e, o], axis=-1)


# ---------------------------------------------------------------------------
# Parameters (PyTorch layout) + hoisted packing into polyphase/Toeplitz form
# ---------------------------------------------------------------------------
def init_decoder_params(key, in_channels=10, n_maps=32, out_channels=1, n_layers=4, scale=1.0):
    chans = [in_channels] + [n_maps] * (n_layers - 1) + [out_channels]
    params = []
    for i in range(n_layers):
        cin, cout = chans[i], chans[i + 1]
        key, kw_, kb_ = jax.random.split(key, 3)
        bound = scale / (cin * 9) ** 0.5
        w = jax.random.uniform(kw_, (cin, cout, 3, 3), jnp.float32, -bound, bound)
        b = jax.random.uniform(kb_, (cout,), jnp.float32, -bound, bound)
        params.append((w, b))
    return params


def pack_decoder_params(params, w0):
    """One-time (hoisted) weight preprocessing.

    ConvTranspose2d(k=3, s=2, p=1, op=1): out(2i-1+kh, 2j-1+kw) += x[i, j, ci] * W[ci, co, kh, kw].
    Even output rows use kh=1 only; odd rows use kh=2 (row r) and kh=0 (row r+1).  The (j, kw)
    column structure is unrolled into block-Toeplitz matrices mapping a lane-flattened input row
    (W*Cin) to a lane-flattened output row (2W*Cout):
        M[kh][j*Cin + ci, q*Cout + co] = W[ci, co, kh, kw]   with q = 2j - 1 + kw, 0 <= q < 2W.
    The even and odd-lo matrices are concatenated along N so both x_lo products are one matmul.
    """
    packed = []
    win = w0
    for w, b in params:
        w_np = np.asarray(w, np.float32)
        b_np = np.asarray(b, np.float32)
        cin, cout = w_np.shape[0], w_np.shape[1]
        wout = 2 * win
        mats = np.zeros((3, win * cin, wout * cout), np.float32)
        for idx, kh in enumerate((1, 2, 0)):   # [even | odd-from-row-r | odd-from-row-r+1]
            for j in range(win):
                for kw in range(3):
                    q = 2 * j - 1 + kw
                    if 0 <= q < wout:
                        mats[idx, j * cin:(j + 1) * cin, q * cout:(q + 1) * cout] = w_np[:, :, kh, kw]
        m_lo = np.concatenate([mats[0], mats[1]], axis=1)     # (W*Cin, 2*(2W*Cout))
        m_hi = mats[2]                                        # (W*Cin, 2W*Cout)
        bias_row = np.tile(b_np, wout).reshape(1, wout * cout)
        packed.append((jnp.asarray(m_lo, jnp.bfloat16),
                       jnp.asarray(m_hi, jnp.bfloat16),
                       jnp.asarray(bias_row, jnp.float32)))
        win = wout
    return packed


# ---------------------------------------------------------------------------
# Forward wrapper (single fused pallas_call)
# ---------------------------------------------------------------------------
def decoder_forward(x_nchw, packed, out_shapes):
    """DecoderLayer.forward: (N, Cin, H, W) -> (N, Cout, 16H, 16W), all 4 layers in one kernel."""
    n, c0, h0, w0 = x_nchw.shape
    n_layers = len(packed)
    if n_layers != 4:
        raise NotImplementedError("fused kernel is specialized to the module default n_layers=4")

    # The reference module only crops a layer's output when BOTH spatial dims mismatch its
    # out_shape; verify that never happens for intermediate layers at these shapes.
    # TODO(synk): intermediate-layer cropping (both-dims-mismatch case) inside the fused kernel.
    for i in range(n_layers - 1):
        nat = (h0 * 2 ** (i + 1), w0 * 2 ** (i + 1))
        tgt = tuple(out_shapes[-(i + 1)])
        if nat[0] != tgt[0] and nat[1] != tgt[1]:
            raise NotImplementedError(
                f"layer {i}: cannot crop intermediate activation {nat} -> {tgt} in fused kernel")

    # NCHW -> lane-dense image rows (N, H, W*C) + one zero pad row (layer 1's r+1 reads).
    x_rows = jnp.transpose(x_nchw, (0, 2, 3, 1)).reshape(n, h0, w0 * c0)
    x_rows = jnp.pad(x_rows, ((0, 0), (0, 1), (0, 0)))

    k_last = packed[-1][1].shape[1]        # 2 * W_last * Cout (lane width of one output image row)
    h_half = 8 * h0                        # number of output row pairs
    h_out, w_out = 16 * h0, 16 * w0
    cout = k_last // w_out

    in_specs = [pl.BlockSpec((1, h0 + 1, w0 * c0), lambda b: (b, 0, 0))]
    args = [x_rows]
    for m_lo, m_hi, bias in packed:
        in_specs += [pl.BlockSpec(m_lo.shape, lambda b: (0, 0)),
                     pl.BlockSpec(m_hi.shape, lambda b: (0, 0)),
                     pl.BlockSpec(bias.shape, lambda b: (0, 0))]
        args += [m_lo, m_hi, bias]

    out = pl.pallas_call(
        functools.partial(_decoder_kernel, h0=h0),
        out_shape=jax.ShapeDtypeStruct((n, h_half, 2 * k_last), jnp.float32),
        grid=(n,),
        in_specs=in_specs,
        out_specs=pl.BlockSpec((1, h_half, 2 * k_last), lambda b: (b, 0, 0)),
        compiler_params=pltpu.CompilerParams(dimension_semantics=("parallel",)),
    )(*args)

    # out[b, r, :k_last] = image row 2r, out[b, r, k_last:] = image row 2r+1 (cols lane-flattened),
    # so a plain reshape recovers NHWC; then back to NCHW.
    y = out.reshape(n, h_out, w_out, cout)
    y = jnp.transpose(y, (0, 3, 1, 2))

    # Final-layer crop, mirroring DeConvLayer.forward (fires only when BOTH dims mismatch).
    th, tw = out_shapes[-n_layers]
    if y.shape[2] != th and y.shape[3] != tw:
        y = y[:, :, y.shape[2] - th:, y.shape[3] - tw:]
    return y


# ---------------------------------------------------------------------------
# f32 numpy reference of the PyTorch module (for a tolerance check)
# ---------------------------------------------------------------------------
def _ref_conv_transpose(x, w, b):
    n, cin, h, win = x.shape
    cout = w.shape[1]
    hout, wout = 2 * h, 2 * win
    out = np.zeros((n, cout, hout, wout), np.float32)
    for i in range(h):
        for j in range(win):
            patch = x[:, :, i, j]                     # (n, cin)
            for kh in range(3):
                oh = 2 * i - 1 + kh
                if not 0 <= oh < hout:
                    continue
                for kw in range(3):
                    ow = 2 * j - 1 + kw
                    if 0 <= ow < wout:
                        out[:, :, oh, ow] += patch @ w[:, :, kh, kw]
    return out + b.reshape(1, cout, 1, 1)


def _ref_decoder(x, params, out_shapes):
    a = np.asarray(x, np.float32)
    n_layers = len(params)
    for i, (w, b) in enumerate(params):
        a = _ref_conv_transpose(a, np.asarray(w, np.float32), np.asarray(b, np.float32))
        th, tw = out_shapes[-(i + 1)]
        if (a.shape[2] != th) and (a.shape[3] != tw):
            a = a[:, :, a.shape[2] - th:, a.shape[3] - tw:]
        a = np.maximum(a, 0.0) if i < n_layers - 1 else 1.0 / (1.0 + np.exp(-a))
    return a


if __name__ == "__main__":
    key = jax.random.PRNGKey(0)
    k_x, k_p = jax.random.split(key)

    # Module defaults: in_channels=10, n_maps=32, out_channels=1, n_layers=4; input 4x4 -> 64x64.
    x = jax.random.normal(k_x, (2, 10, 4, 4), jnp.float32)
    out_shapes = ((64, 64), (32, 32), (16, 16), (8, 8))
    # scale=3 keeps activations O(1) through the stack so the bf16-vs-f32 check is meaningful.
    params = init_decoder_params(k_p, in_channels=10, n_maps=32, out_channels=1,
                                 n_layers=4, scale=3.0)
    packed = pack_decoder_params(params, w0=x.shape[3])      # hoisted one-time weight prep

    fwd = jax.jit(functools.partial(decoder_forward, out_shapes=out_shapes))
    y = jax.block_until_ready(fwd(x, packed))

    assert y.shape == (2, 1, 64, 64), y.shape
    y_np = np.asarray(y)
    assert np.all(np.isfinite(y_np))
    assert np.all((y_np >= 0.0) & (y_np <= 1.0))

    # Compare against the f32 reference (bf16 MXU operands -> loose tolerance).
    y_ref = _ref_decoder(np.asarray(x),
                         [(np.asarray(w), np.asarray(b)) for w, b in params],
                         out_shapes)
    assert np.max(np.abs(y_np - y_ref)) < 3e-2, float(np.max(np.abs(y_np - y_ref)))

    print("KERNEL_OK")
</pallas_src>

<mosaic_0001>
module attributes {stable_mosaic.version = 11 : i64} {
  func.func @_decoder_kernel(%arg0: i32, %arg1: memref<1x5x40xf32, #tpu.memory_space<vmem>>, %arg2: memref<40x512xbf16, #tpu.memory_space<vmem>>, %arg3: memref<40x256xbf16, #tpu.memory_space<vmem>>, %arg4: memref<1x256xf32, #tpu.memory_space<vmem>>, %arg5: memref<256x1024xbf16, #tpu.memory_space<vmem>>, %arg6: memref<256x512xbf16, #tpu.memory_space<vmem>>, %arg7: memref<1x512xf32, #tpu.memory_space<vmem>>, %arg8: memref<512x2048xbf16, #tpu.memory_space<vmem>>, %arg9: memref<512x1024xbf16, #tpu.memory_space<vmem>>, %arg10: memref<1x1024xf32, #tpu.memory_space<vmem>>, %arg11: memref<1024x128xbf16, #tpu.memory_space<vmem>>, %arg12: memref<1024x64xbf16, #tpu.memory_space<vmem>>, %arg13: memref<1x64xf32, #tpu.memory_space<vmem>>, %arg14: memref<1x32x128xf32, #tpu.memory_space<vmem>>) attributes {dimension_semantics = [#tpu.dimension_semantics<parallel>], iteration_bounds = array<i64: 2>, scalar_prefetch = 0 : i64, scratch_operands = 0 : i64, tpu.core_type = #tpu.core_type<tc>, window_params = [{transform_indices = @transform_0, window_bounds = array<i64: 1, 5, 40>}, {pipeline_mode = #tpu.pipeline_mode<synchronous>, transform_indices = @transform_1, window_bounds = array<i64: 40, 512>}, {pipeline_mode = #tpu.pipeline_mode<synchronous>, transform_indices = @transform_2, window_bounds = array<i64: 40, 256>}, {pipeline_mode = #tpu.pipeline_mode<synchronous>, transform_indices = @transform_3, window_bounds = array<i64: 1, 256>}, {pipeline_mode = #tpu.pipeline_mode<synchronous>, transform_indices = @transform_4, window_bounds = array<i64: 256, 1024>}, {pipeline_mode = #tpu.pipeline_mode<synchronous>, transform_indices = @transform_5, window_bounds = array<i64: 256, 512>}, {pipeline_mode = #tpu.pipeline_mode<synchronous>, transform_indices = @transform_6, window_bounds = array<i64: 1, 512>}, {pipeline_mode = #tpu.pipeline_mode<synchronous>, transform_indices = @transform_7, window_bounds = array<i64: 512, 2048>}, {pipeline_mode = #tpu.pipeline_mode<synchronous>, transform_indices = @transform_8, window_bounds = array<i64: 512, 1024>}, {pipeline_mode = #tpu.pipeline_mode<synchronous>, transform_indices = @transform_9, window_bounds = array<i64: 1, 1024>}, {pipeline_mode = #tpu.pipeline_mode<synchronous>, transform_indices = @transform_10, window_bounds = array<i64: 1024, 128>}, {pipeline_mode = #tpu.pipeline_mode<synchronous>, transform_indices = @transform_11, window_bounds = array<i64: 1024, 64>}, {pipeline_mode = #tpu.pipeline_mode<synchronous>, transform_indices = @transform_12, window_bounds = array<i64: 1, 64>}, {transform_indices = @transform_13, window_bounds = array<i64: 1, 32, 128>}]} {
    %c0 = arith.constant 0 : index
    %c0_0 = arith.constant 0 : index
    %c0_1 = arith.constant 0 : index
    %0 = vector.load %arg1[%c0, %c0_0, %c0_1] : memref<1x5x40xf32, #tpu.memory_space<vmem>>, vector<1x5x40xf32>
    %1 = vector.shape_cast %0 : vector<1x5x40xf32> to vector<5x40xf32>
    %2 = vector.extract_strided_slice %1 {offsets = [0, 0], sizes = [4, 40], strides = [1, 1]} : vector<5x40xf32> to vector<4x40xf32>
    %3 = arith.truncf %2 : vector<4x40xf32> to vector<4x40xbf16>
    %4 = vector.extract_strided_slice %1 {offsets = [1, 0], sizes = [4, 40], strides = [1, 1]} : vector<5x40xf32> to vector<4x40xf32>
    %5 = arith.truncf %4 : vector<4x40xf32> to vector<4x40xbf16>
    %c0_2 = arith.constant 0 : index
    %c0_3 = arith.constant 0 : index
    %6 = vector.load %arg2[%c0_2, %c0_3] : memref<40x512xbf16, #tpu.memory_space<vmem>>, vector<40x512xbf16>
    %cst = arith.constant dense<0.000000e+00> : vector<4x512xf32>
    %7 = tpu.matmul %3, %6, %cst {dimension_numbers = #tpu.dot_dimension_numbers<[1], [0], [0], [1], [0, 0, 1, 1], [], []>} : vector<4x40xbf16>, vector<40x512xbf16>, vector<4x512xf32> -> vector<4x512xf32>
    %c0_4 = arith.constant 0 : index
    %c0_5 = arith.constant 0 : index
    %8 = vector.load %arg3[%c0_4, %c0_5] : memref<40x256xbf16, #tpu.memory_space<vmem>>, vector<40x256xbf16>
    %cst_6 = arith.constant dense<0.000000e+00> : vector<4x256xf32>
    %9 = tpu.matmul %5, %8, %cst_6 {dimension_numbers = #tpu.dot_dimension_numbers<[1], [0], [0], [1], [0, 0, 1, 1], [], []>} : vector<4x40xbf16>, vector<40x256xbf16>, vector<4x256xf32> -> vector<4x256xf32>
    %c0_7 = arith.constant 0 : index
    %c0_8 = arith.constant 0 : index
    %10 = vector.load %arg4[%c0_7, %c0_8] : memref<1x256xf32, #tpu.memory_space<vmem>>, vector<1x256xf32>
    %11 = vector.extract_strided_slice %7 {offsets = [0, 0], sizes = [4, 256], strides = [1, 1]} : vector<4x512xf32> to vector<4x256xf32>
    %12 = vector.broadcast %10 : vector<1x256xf32> to vector<4x256xf32>
    %13 = arith.addf %11, %12 : vector<4x256xf32>
    %cst_9 = arith.constant 0.000000e+00 : f32
    %14 = vector.broadcast %cst_9 : f32 to vector<4x256xf32>
    %15 = arith.maximumf %13, %14 : vector<4x256xf32>
    %16 = vector.extract_strided_slice %7 {offsets = [0, 256], sizes = [4, 256], strides = [1, 1]} : vector<4x512xf32> to vector<4x256xf32>
    %17 = arith.addf %16, %9 : vector<4x256xf32>
    %18 = vector.broadcast %10 : vector<1x256xf32> to vector<4x256xf32>
    %19 = arith.addf %17, %18 : vector<4x256xf32>
    %cst_10 = arith.constant 0.000000e+00 : f32
    %20 = vector.broadcast %cst_10 : f32 to vector<4x256xf32>
    %21 = arith.maximumf %19, %20 : vector<4x256xf32>
    %22 = vector.shape_cast %15 : vector<4x256xf32> to vector<4x1x256xf32>
    %23 = vector.shape_cast %21 : vector<4x256xf32> to vector<4x1x256xf32>
    %24 = tpu.concatenate %22, %23 in 1 : vector<4x1x256xf32>, vector<4x1x256xf32> -> vector<4x2x256xf32>
    %25 = vector.shape_cast %24 : vector<4x2x256xf32> to vector<8x256xf32>
    %26 = arith.truncf %25 : vector<8x256xf32> to vector<8x256xbf16>
    %27 = vector.extract_strided_slice %25 {offsets = [1, 0], sizes = [7, 256], strides = [1, 1]} : vector<8x256xf32> to vector<7x256xf32>
    %cst_11 = arith.constant 0.000000e+00 : f32
    %28 = vector.broadcast %cst_11 : f32 to vector<1x256xf32>
    %29 = tpu.concatenate %27, %28 in 0 : vector<7x256xf32>, vector<1x256xf32> -> vector<8x256xf32>
    %30 = arith.truncf %29 : vector<8x256xf32> to vector<8x256xbf16>
    %c0_12 = arith.constant 0 : index
    %c0_13 = arith.constant 0 : index
    %31 = vector.load %arg5[%c0_12, %c0_13] : memref<256x1024xbf16, #tpu.memory_space<vmem>>, vector<256x1024xbf16>
    %cst_14 = arith.constant dense<0.000000e+00> : vector<8x1024xf32>
    %32 = tpu.matmul %26, %31, %cst_14 {dimension_numbers = #tpu.dot_dimension_numbers<[1], [0], [0], [1], [0, 0, 1, 1], [], []>} : vector<8x256xbf16>, vector<256x1024xbf16>, vector<8x1024xf32> -> vector<8x1024xf32>
    %c0_15 = arith.constant 0 : index
    %c0_16 = arith.constant 0 : index
    %33 = vector.load %arg6[%c0_15, %c0_16] : memref<256x512xbf16, #tpu.memory_space<vmem>>, vector<256x512xbf16>
    %cst_17 = arith.constant dense<0.000000e+00> : vector<8x512xf32>
    %34 = tpu.matmul %30, %33, %cst_17 {dimension_numbers = #tpu.dot_dimension_numbers<[1], [0], [0], [1], [0, 0, 1, 1], [], []>} : vector<8x256xbf16>, vector<256x512xbf16>, vector<8x512xf32> -> vector<8x512xf32>
    %c0_18 = arith.constant 0 : index
    %c0_19 = arith.constant 0 : index
    %35 = vector.load %arg7[%c0_18, %c0_19] : memref<1x512xf32, #tpu.memory_space<vmem>>, vector<1x512xf32>
    %36 = vector.extract_strided_slice %32 {offsets = [0, 0], sizes = [8, 512], strides = [1, 1]} : vector<8x1024xf32> to vector<8x512xf32>
    %37 = vector.broadcast %35 : vector<1x512xf32> to vector<8x512xf32>
    %38 = arith.addf %36, %37 : vector<8x512xf32>
    %cst_20 = arith.constant 0.000000e+00 : f32
    %39 = vector.broadcast %cst_20 : f32 to vector<8x512xf32>
    %40 = arith.maximumf %38, %39 : vector<8x512xf32>
    %41 = vector.extract_strided_slice %32 {offsets = [0, 512], sizes = [8, 512], strides = [1, 1]} : vector<8x1024xf32> to vector<8x512xf32>
    %42 = arith.addf %41, %34 : vector<8x512xf32>
    %43 = vector.broadcast %35 : vector<1x512xf32> to vector<8x512xf32>
    %44 = arith.addf %42, %43 : vector<8x512xf32>
    %cst_21 = arith.constant 0.000000e+00 : f32
    %45 = vector.broadcast %cst_21 : f32 to vector<8x512xf32>
    %46 = arith.maximumf %44, %45 : vector<8x512xf32>
    %47 = vector.shape_cast %40 : vector<8x512xf32> to vector<8x1x512xf32>
    %48 = vector.shape_cast %46 : vector<8x512xf32> to vector<8x1x512xf32>
    %49 = tpu.concatenate %47, %48 in 1 : vector<8x1x512xf32>, vector<8x1x512xf32> -> vector<8x2x512xf32>
    %50 = vector.shape_cast %49 : vector<8x2x512xf32> to vector<16x512xf32>
    %51 = arith.truncf %50 : vector<16x512xf32> to vector<16x512xbf16>
    %52 = vector.extract_strided_slice %50 {offsets = [1, 0], sizes = [15, 512], strides = [1, 1]} : vector<16x512xf32> to vector<15x512xf32>
    %cst_22 = arith.constant 0.000000e+00 : f32
    %53 = vector.broadcast %cst_22 : f32 to vector<1x512xf32>
    %54 = tpu.concatenate %52, %53 in 0 : vector<15x512xf32>, vector<1x512xf32> -> vector<16x512xf32>
    %55 = arith.truncf %54 : vector<16x512xf32> to vector<16x512xbf16>
    %c0_23 = arith.constant 0 : index
    %c0_24 = arith.constant 0 : index
    %56 = vector.load %arg8[%c0_23, %c0_24] : memref<512x2048xbf16, #tpu.memory_space<vmem>>, vector<512x2048xbf16>
    %cst_25 = arith.constant dense<0.000000e+00> : vector<16x2048xf32>
    %57 = tpu.matmul %51, %56, %cst_25 {dimension_numbers = #tpu.dot_dimension_numbers<[1], [0], [0], [1], [0, 0, 1, 1], [], []>} : vector<16x512xbf16>, vector<512x2048xbf16>, vector<16x2048xf32> -> vector<16x2048xf32>
    %c0_26 = arith.constant 0 : index
    %c0_27 = arith.constant 0 : index
    %58 = vector.load %arg9[%c0_26, %c0_27] : memref<512x1024xbf16, #tpu.memory_space<vmem>>, vector<512x1024xbf16>
    %cst_28 = arith.constant dense<0.000000e+00> : vector<16x1024xf32>
    %59 = tpu.matmul %55, %58, %cst_28 {dimension_numbers = #tpu.dot_dimension_numbers<[1], [0], [0], [1], [0, 0, 1, 1], [], []>} : vector<16x512xbf16>, vector<512x1024xbf16>, vector<16x1024xf32> -> vector<16x1024xf32>
    %c0_29 = arith.constant 0 : index
    %c0_30 = arith.constant 0 : index
    %60 = vector.load %arg10[%c0_29, %c0_30] : memref<1x1024xf32, #tpu.memory_space<vmem>>, vector<1x1024xf32>
    %61 = vector.extract_strided_slice %57 {offsets = [0, 0], sizes = [16, 1024], strides = [1, 1]} : vector<16x2048xf32> to vector<16x1024xf32>
    %62 = vector.broadcast %60 : vector<1x1024xf32> to vector<16x1024xf32>
    %63 = arith.addf %61, %62 : vector<16x1024xf32>
    %cst_31 = arith.constant 0.000000e+00 : f32
    %64 = vector.broadcast %cst_31 : f32 to vector<16x1024xf32>
    %65 = arith.maximumf %63, %64 : vector<16x1024xf32>
    %66 = vector.extract_strided_slice %57 {offsets = [0, 1024], sizes = [16, 1024], strides = [1, 1]} : vector<16x2048xf32> to vector<16x1024xf32>
    %67 = arith.addf %66, %59 : vector<16x1024xf32>
    %68 = vector.broadcast %60 : vector<1x1024xf32> to vector<16x1024xf32>
    %69 = arith.addf %67, %68 : vector<16x1024xf32>
    %cst_32 = arith.constant 0.000000e+00 : f32
    %70 = vector.broadcast %cst_32 : f32 to vector<16x1024xf32>
    %71 = arith.maximumf %69, %70 : vector<16x1024xf32>
    %72 = vector.shape_cast %65 : vector<16x1024xf32> to vector<16x1x1024xf32>
    %73 = vector.shape_cast %71 : vector<16x1024xf32> to vector<16x1x1024xf32>
    %74 = tpu.concatenate %72, %73 in 1 : vector<16x1x1024xf32>, vector<16x1x1024xf32> -> vector<16x2x1024xf32>
    %75 = vector.shape_cast %74 : vector<16x2x1024xf32> to vector<32x1024xf32>
    %76 = arith.truncf %75 : vector<32x1024xf32> to vector<32x1024xbf16>
    %77 = vector.extract_strided_slice %75 {offsets = [1, 0], sizes = [31, 1024], strides = [1, 1]} : vector<32x1024xf32> to vector<31x1024xf32>
    %cst_33 = arith.constant 0.000000e+00 : f32
    %78 = vector.broadcast %cst_33 : f32 to vector<1x1024xf32>
    %79 = tpu.concatenate %77, %78 in 0 : vector<31x1024xf32>, vector<1x1024xf32> -> vector<32x1024xf32>
    %80 = arith.truncf %79 : vector<32x1024xf32> to vector<32x1024xbf16>
    %c0_34 = arith.constant 0 : index
    %c0_35 = arith.constant 0 : index
    %81 = vector.load %arg11[%c0_34, %c0_35] : memref<1024x128xbf16, #tpu.memory_space<vmem>>, vector<1024x128xbf16>
    %cst_36 = arith.constant dense<0.000000e+00> : vector<32x128xf32>
    %82 = tpu.matmul %76, %81, %cst_36 {dimension_numbers = #tpu.dot_dimension_numbers<[1], [0], [0], [1], [0, 0, 1, 1], [], []>} : vector<32x1024xbf16>, vector<1024x128xbf16>, vector<32x128xf32> -> vector<32x128xf32>
    %c0_37 = arith.constant 0 : index
    %c0_38 = arith.constant 0 : index
    %83 = vector.load %arg12[%c0_37, %c0_38] : memref<1024x64xbf16, #tpu.memory_space<vmem>>, vector<1024x64xbf16>
    %cst_39 = arith.constant dense<0.000000e+00> : vector<32x64xf32>
    %84 = tpu.matmul %80, %83, %cst_39 {dimension_numbers = #tpu.dot_dimension_numbers<[1], [0], [0], [1], [0, 0, 1, 1], [], []>} : vector<32x1024xbf16>, vector<1024x64xbf16>, vector<32x64xf32> -> vector<32x64xf32>
    %c0_40 = arith.constant 0 : index
    %c0_41 = arith.constant 0 : index
    %85 = vector.load %arg13[%c0_40, %c0_41] : memref<1x64xf32, #tpu.memory_space<vmem>>, vector<1x64xf32>
    %86 = vector.extract_strided_slice %82 {offsets = [0, 0], sizes = [32, 64], strides = [1, 1]} : vector<32x128xf32> to vector<32x64xf32>
    %87 = vector.broadcast %85 : vector<1x64xf32> to vector<32x64xf32>
    %88 = arith.addf %86, %87 : vector<32x64xf32>
    %89 = arith.negf %88 : vector<32x64xf32>
    %90 = math.exp %89 : vector<32x64xf32>
    %cst_42 = arith.constant 1.000000e+00 : f32
    %91 = vector.broadcast %cst_42 : f32 to vector<32x64xf32>
    %92 = arith.addf %91, %90 : vector<32x64xf32>
    %93 = arith.divf %91, %92 : vector<32x64xf32>
    %94 = vector.extract_strided_slice %82 {offsets = [0, 64], sizes = [32, 64], strides = [1, 1]} : vector<32x128xf32> to vector<32x64xf32>
    %95 = arith.addf %94, %84 : vector<32x64xf32>
    %96 = vector.broadcast %85 : vector<1x64xf32> to vector<32x64xf32>
    %97 = arith.addf %95, %96 : vector<32x64xf32>
    %98 = arith.negf %97 : vector<32x64xf32>
    %99 = math.exp %98 : vector<32x64xf32>
    %cst_43 = arith.constant 1.000000e+00 : f32
    %100 = vector.broadcast %cst_43 : f32 to vector<32x64xf32>
    %101 = arith.addf %100, %99 : vector<32x64xf32>
    %102 = arith.divf %100, %101 : vector<32x64xf32>
    %103 = tpu.concatenate %93, %102 in 1 : vector<32x64xf32>, vector<32x64xf32> -> vector<32x128xf32>
    %c0_44 = arith.constant 0 : index
    %c0_45 = arith.constant 0 : index
    %c0_46 = arith.constant 0 : index
    %104 = vector.load %arg14[%c0_44, %c0_45, %c0_46] : memref<1x32x128xf32, #tpu.memory_space<vmem>>, vector<1x32x128xf32>
    %105 = vector.shape_cast %104 : vector<1x32x128xf32> to vector<32x128xf32>
    %106 = vector.shape_cast %103 : vector<32x128xf32> to vector<1x32x128xf32>
    tpu.vector_store %arg14[%c0_44, %c0_45, %c0_46], %106 {strides = array<i32>} : memref<1x32x128xf32, #tpu.memory_space<vmem>>, vector<1x32x128xf32>,
    return
  }
  func.func @transform_0(%arg0: i32) -> (i32, i32, i32) {
    %c0_i32 = arith.constant 0 : i32
    %c0_i32_0 = arith.constant 0 : i32
    %c0_i32_1 = arith.constant 0 : i32
    return %arg0, %c0_i32, %c0_i32_0 : i32, i32, i32
  }
  func.func @transform_1(%arg0: i32) -> (i32, i32) {
    %c0_i32 = arith.constant 0 : i32
    %c0_i32_0 = arith.constant 0 : i32
    %c0_i32_1 = arith.constant 0 : i32
    return %c0_i32, %c0_i32_0 : i32, i32
  }
  func.func @transform_2(%arg0: i32) -> (i32, i32) {
    %c0_i32 = arith.constant 0 : i32
    %c0_i32_0 = arith.constant 0 : i32
    %c0_i32_1 = arith.constant 0 : i32
    return %c0_i32, %c0_i32_0 : i32, i32
  }
  func.func @transform_3(%arg0: i32) -> (i32, i32) {
    %c0_i32 = arith.constant 0 : i32
    %c0_i32_0 = arith.constant 0 : i32
    %c0_i32_1 = arith.constant 0 : i32
    return %c0_i32, %c0_i32_0 : i32, i32
  }
  func.func @transform_4(%arg0: i32) -> (i32, i32) {
    %c0_i32 = arith.constant 0 : i32
    %c0_i32_0 = arith.constant 0 : i32
    %c0_i32_1 = arith.constant 0 : i32
    return %c0_i32, %c0_i32_0 : i32, i32
  }
  func.func @transform_5(%arg0: i32) -> (i32, i32) {
    %c0_i32 = arith.constant 0 : i32
    %c0_i32_0 = arith.constant 0 : i32
    %c0_i32_1 = arith.constant 0 : i32
    return %c0_i32, %c0_i32_0 : i32, i32
  }
  func.func @transform_6(%arg0: i32) -> (i32, i32) {
    %c0_i32 = arith.constant 0 : i32
    %c0_i32_0 = arith.constant 0 : i32
    %c0_i32_1 = arith.constant 0 : i32
    return %c0_i32, %c0_i32_0 : i32, i32
  }
  func.func @transform_7(%arg0: i32) -> (i32, i32) {
    %c0_i32 = arith.constant 0 : i32
    %c0_i32_0 = arith.constant 0 : i32
    %c0_i32_1 = arith.constant 0 : i32
    return %c0_i32, %c0_i32_0 : i32, i32
  }
  func.func @transform_8(%arg0: i32) -> (i32, i32) {
    %c0_i32 = arith.constant 0 : i32
    %c0_i32_0 = arith.constant 0 : i32
    %c0_i32_1 = arith.constant 0 : i32
    return %c0_i32, %c0_i32_0 : i32, i32
  }
  func.func @transform_9(%arg0: i32) -> (i32, i32) {
    %c0_i32 = arith.constant 0 : i32
    %c0_i32_0 = arith.constant 0 : i32
    %c0_i32_1 = arith.constant 0 : i32
    return %c0_i32, %c0_i32_0 : i32, i32
  }
  func.func @transform_10(%arg0: i32) -> (i32, i32) {
    %c0_i32 = arith.constant 0 : i32
    %c0_i32_0 = arith.constant 0 : i32
    %c0_i32_1 = arith.constant 0 : i32
    return %c0_i32, %c0_i32_0 : i32, i32
  }
  func.func @transform_11(%arg0: i32) -> (i32, i32) {
    %c0_i32 = arith.constant 0 : i32
    %c0_i32_0 = arith.constant 0 : i32
    %c0_i32_1 = arith.constant 0 : i32
    return %c0_i32, %c0_i32_0 : i32, i32
  }
  func.func @transform_12(%arg0: i32) -> (i32, i32) {
    %c0_i32 = arith.constant 0 : i32
    %c0_i32_0 = arith.constant 0 : i32
    %c0_i32_1 = arith.constant 0 : i32
    return %c0_i32, %c0_i32_0 : i32, i32
  }
  func.func @transform_13(%arg0: i32) -> (i32, i32, i32) {
    %c0_i32 = arith.constant 0 : i32
    %c0_i32_0 = arith.constant 0 : i32
    %c0_i32_1 = arith.constant 0 : i32
    return %arg0, %c0_i32, %c0_i32_0 : i32, i32, i32
  }
}

</mosaic_0001>

<bundles_post_ra>
// kernel: decoder_forward.1
= control target key start
LH: loop header
LB: loop body
LE: loop exit
PB: predicated region body
PF: predicated region fallthrough
CT: control target
= control target key end

     0   :  { %s19311_s0 = inlined_call_operand.vmem [shape: f32[2,5,40], index: 0, kind: input, shape index: {}]   ;;  %s19312_s1 = inlined_call_operand.hbm [shape: bf16[40,512], index: 1, kind: input, shape index: {}]   ;;  %s19313_s2 = inlined_call_operand.hbm [shape: bf16[40,256], index: 2, kind: input, shape index: {}]   ;;  %s19314_s3 = inlined_call_operand.hbm [shape: f32[1,256], index: 3, kind: input, shape index: {}]   ;;  %s19315_s4 = inlined_call_operand.hbm [shape: bf16[256,1024], index: 4, kind: input, shape index: {}]   ;;  %s19316_s5 = inlined_call_operand.hbm [shape: bf16[256,512], index: 5, kind: input, shape index: {}]   ;;  %s19317_s6 = inlined_call_operand.hbm [shape: f32[1,512], index: 6, kind: input, shape index: {}]   ;;  %s19318_s7 = inlined_call_operand.hbm [shape: bf16[512,2048], index: 7, kind: input, shape index: {}]   ;;  %s19319_s8 = inlined_call_operand.hbm [shape: bf16[512,1024], index: 8, kind: input, shape index: {}]   ;;  %s19320_s9 = inlined_call_operand.hbm [shape: f32[1,1024], index: 9, kind: input, shape index: {}]   ;;  %s19321_s10 = inlined_call_operand.hbm [shape: bf16[1024,128], index: 10, kind: input, shape index: {}]   ;;  %s19322_s11 = inlined_call_operand.vmem [shape: bf16[1024,64], index: 11, kind: input, shape index: {}]   ;;  %s19323_s12 = inlined_call_operand.hbm [shape: f32[1,64], index: 12, kind: input, shape index: {}]   ;;  %s19324_s13 = inlined_call_operand.vmem [shape: f32[2,32,128], index: 13, kind: output, shape index: {}]  }
   0x1   :  { %19402 = sst [smem:[#allocation58_spill]] %s19313_s2 }
   0x2   :  { %19403 = sst [smem:[#allocation59_spill]] %s19315_s4 }
   0x3   :  { %19404 = sst [smem:[#allocation60_spill]] %s19324_s13 }
   0x4   :  { %18 = vsyncpa [#allocation3], 0 }
   0x5   :  { %19 = vsyncpa [#allocation5], 0 }
   0x6   :  { %20 = vsyncpa [#allocation8], 0 }
   0x7   :  { %21 = vsyncpa [#allocation11], 0 }
   0x8   :  { %22 = vsyncpa [#allocation14], 0 }
   0x9   :  { %23 = vsyncpa [#allocation17], 0  ;;  %s16243_s25 = smov 0  }
   0xa LB: > { %19405 = sst [smem:[#allocation25_spill]] %s16146_s25  ;;  %s16148_s26 = smov [#allocation4]   ;;  %s16146_s25 = sphi %s16243_s25, %s29_s25  }
   0xb   : > { %s363_s27 = sshll.u32 %s16148_s26, 4  ;;  %s16249_s28 = sadd.s32 4294967295, %s16146_s25   ;;  %s16254_s27 = int_to_ptr.vmem [resolvable:$true] %s363_s27 }
   0xc   : > { %p13831_p0 = scmp.ge.s32.totalorder %s16146_s25, 1  ;;  %p338_p1 = scmp.lt.s32.totalorder %s16146_s25, 3 }
   0xd   : > { %p19326_p2 = scmp.eq.s32.totalorder %s16249_s28, 0  ;;  %s16149_s30 = smov [#allocation7]  }
   0xe   : > { %p16256_p3 = pnand %p13831_p0, %p338_p1  ;;  %s387_s14 = sshll.u32 %s16149_s30, 4  ;;  %s16262_s14 = int_to_ptr.vmem [resolvable:$true] %s387_s14 }
   0xf   : > { %s16150_s16 = smov [#allocation10]   ;;  %s19408_s2 = sld [smem:[#allocation58_spill]] }
  0x10   : > { %s19406_s29 = scalar_select %p16256_p3, 1, 0 }
  0x11   : > { %p15439_p4 = pneg %p16256_p3  ;;  %s16270_s17 = sshll.u32 %s16150_s16, 4  ;;  %s415_s17 = int_to_ptr.vmem [resolvable:$true] %s16270_s17 }
  0x13   : > { %p16266_p5 = pnand %p19326_p2, %p15439_p4 }
  0x15   : > { %s15808_s20 = scalar_lea.hbm %s19408_s2, 640  ;;  %p16280_p7 = pneg %p16266_p5 }
  0x16   : > { %p15809_p6 = scmp.ne.s32.totalorder %s19408_s2, %s15808_s20  ;;  %p15815_p10 = scmp.lt.u32.totalorder %s15808_s20, %s19408_s2 }
  0x18   : > { %p15811_p8 = pnand %p16280_p7, %p15809_p6 }
  0x1a   : > { %p15812_p9 = pneg %p15811_p8 }
  0x1c   : > { %p15817_p11 = pnand %p15815_p10, %p15812_p9 }
  0x1e   : > { %15820 = shalt.err (!%p15817_p11)
}
  0x1f   : > { %s15821_s30 = scalar_lea.vmem %s16254_s27, 640  ;;  %p15829_p1 = scmp.lt.s32.totalorder %s16254_s27, %s16254_s27 }
  0x20   : > { %p15822_p12 = scmp.ne.s32.totalorder %s16254_s27, %s15821_s30  ;;  %p15830_p4 = scmp.lt.s32.totalorder %s15821_s30, %s15821_s30 }
  0x22   : > { %p15824_p13 = pnand %p15822_p12, %p16280_p7  ;;  %p15831_p6 = por %p15830_p4, %p15829_p1 }
  0x24   : > { %p15825_p0 = pneg %p15824_p13 }
  0x26   : > { %p15832_p8 = pnand %p15831_p6, %p15825_p0 }
  0x28   : > { %15835 = shalt.err (!%p15832_p8)
}
  0x29   : > { %s16151_s16 = smov 128   ;;  %s16152_s18 = smov 8  }
  0x2a   : > { %15445 = dma.hbm_to_vmem [thread:$0]  (!%p16266_p5), %s19408_s2, 640, %s16254_s27, [#allocation5], %s16151_s16, %s16151_s16, %s16152_s18  }
  0x2b   : > { %s19410_s4 = sld [smem:[#allocation59_spill]] }
  0x31   : > { %s15836_s24 = scalar_lea.hbm %s19410_s4, 16384 }
  0x32   : > { %p15837_p9 = scmp.ne.s32.totalorder %s19410_s4, %s15836_s24  ;;  %p15843_p12 = scmp.lt.u32.totalorder %s15836_s24, %s19410_s4 }
  0x34   : > { %p15839_p10 = pnand %p15837_p9, %p16280_p7 }
  0x36   : > { %p15840_p11 = pneg %p15839_p10 }
  0x38   : > { %p15845_p13 = pnand %p15843_p12, %p15840_p11 }
  0x3a   : > { %15848 = shalt.err (!%p15845_p13)
}
  0x3b   : > { %s15849_s27 = scalar_lea.vmem %s16262_s14, 16384  ;;  %p15857_p6 = scmp.lt.s32.totalorder %s16262_s14, %s16262_s14 }
  0x3c   : > { %p15850_p0 = scmp.ne.s32.totalorder %s16262_s14, %s15849_s27  ;;  %p15858_p8 = scmp.lt.s32.totalorder %s15849_s27, %s15849_s27 }
  0x3e   : > { %p15852_p1 = pnand %p15850_p0, %p16280_p7  ;;  %p15859_p9 = por %p15858_p8, %p15857_p6 }
  0x40   : > { %p15853_p4 = pneg %p15852_p1 }
  0x42   : > { %p15860_p10 = pnand %p15859_p9, %p15853_p4 }
  0x44   : > { %15863 = shalt.err (!%p15860_p10)
}
  0x45   : > { %s16153_s25 = smov 512   ;;  %s16154_s13 = smov 32  }
  0x46   : > { %15451 = dma.hbm_to_vmem [thread:$0]  (!%p16266_p5), %s19410_s4, 16384, %s16262_s14, [#allocation8], %s16153_s25, %s16153_s25, %s16154_s13  }
  0x47   : > { %s16155_s19 = smov [#allocation13]   ;;  %s15864_s24 = scalar_lea.hbm %s19317_s6, 64 }
  0x48   : > { %s437_s20 = sshll.u32 %s16155_s19, 4  ;;  %p15865_p11 = scmp.ne.s32.totalorder %s19317_s6, %s15864_s24  ;;  %s438_s20 = int_to_ptr.vmem [resolvable:$true] %s437_s20 }
  0x49   : > { %p15871_p0 = scmp.lt.u32.totalorder %s15864_s24, %s19317_s6 }
  0x4a   : > { %p15867_p12 = pnand %p15865_p11, %p16280_p7 }
  0x4c   : > { %p15868_p13 = pneg %p15867_p12 }
  0x4e   : > { %p15873_p1 = pnand %p15871_p0, %p15868_p13 }
  0x50   : > { %15876 = shalt.err (!%p15873_p1)
}
  0x51   : > { %s15877_s14 = scalar_lea.vmem %s415_s17, 64  ;;  %p15885_p9 = scmp.lt.s32.totalorder %s415_s17, %s415_s17 }
  0x52   : > { %p15878_p4 = scmp.ne.s32.totalorder %s415_s17, %s15877_s14  ;;  %p15886_p10 = scmp.lt.s32.totalorder %s15877_s14, %s15877_s14 }
  0x54   : > { %p15880_p6 = pnand %p15878_p4, %p16280_p7  ;;  %p15887_p2 = por %p15886_p10, %p15885_p9 }
  0x56   : > { %p15881_p8 = pneg %p15880_p6 }
  0x58   : > { %p15888_p3 = pnand %p15887_p2, %p15881_p8 }
  0x5a   : > { %15891 = shalt.err (!%p15888_p3)
}
  0x5b   : > { %15457 = dma.hbm_to_vmem [thread:$0]  (!%p16266_p5), %s19317_s6, 64, %s415_s17, [#allocation11]  }
  0x5c   : > { %s15892_s21 = scalar_lea.hbm %s19319_s8, 32768 }
  0x5d   : > { %p15893_p11 = scmp.ne.s32.totalorder %s19319_s8, %s15892_s21  ;;  %p15899_p3 = scmp.lt.u32.totalorder %s15892_s21, %s19319_s8 }
  0x5f   : > { %p15895_p12 = pnand %p15893_p11, %p16280_p7 }
  0x61   : > { %p15896_p2 = pneg %p15895_p12 }
  0x63   : > { %p15901_p13 = pnand %p15899_p3, %p15896_p2 }
  0x65   : > { %15904 = shalt.err (!%p15901_p13)
}
  0x66   : > { %s15905_s27 = scalar_lea.vmem %s438_s20, 32768  ;;  %p15913_p6 = scmp.lt.s32.totalorder %s438_s20, %s438_s20 }
  0x67   : > { %p15906_p0 = scmp.ne.s32.totalorder %s438_s20, %s15905_s27  ;;  %p15914_p8 = scmp.lt.s32.totalorder %s15905_s27, %s15905_s27 }
  0x69   : > { %p15908_p1 = pnand %p15906_p0, %p16280_p7  ;;  %p15915_p9 = por %p15914_p8, %p15913_p6 }
  0x6b   : > { %p15909_p4 = pneg %p15908_p1 }
  0x6d   : > { %p15916_p10 = pnand %p15915_p9, %p15909_p4 }
  0x6f   : > { %15919 = shalt.err (!%p15916_p10)
}
  0x70   : > { %15463 = dma.hbm_to_vmem [thread:$0]  (!%p16266_p5), %s19319_s8, 32768, %s438_s20, [#allocation14], %s16153_s25, %s16153_s25, %s16154_s13  }
  0x71   : > { %s16156_s16 = smov [#allocation16]   ;;  %s16157_s2 = smov [#allocation2]  }
  0x72   : > { %s461_s18 = sshll.u32 %s16156_s16, 4  ;;  %s350_s19 = sshll.u32 %s16157_s2, 4  ;;  %s462_s18 = int_to_ptr.vmem [resolvable:$true] %s461_s18  ;;  %s351_s19 = int_to_ptr.vmem [resolvable:$true] %s350_s19 }
  0x73   : > { %s15920_s24 = scalar_lea.hbm %s19321_s10, 8192 }
  0x74   : > { %p15921_p11 = scmp.ne.s32.totalorder %s19321_s10, %s15920_s24  ;;  %p15927_p3 = scmp.lt.u32.totalorder %s15920_s24, %s19321_s10 }
  0x76   : > { %p15923_p12 = pnand %p15921_p11, %p16280_p7 }
  0x78   : > { %p15924_p2 = pneg %p15923_p12 }
  0x7a   : > { %p15929_p13 = pnand %p15927_p3, %p15924_p2 }
  0x7c   : > { %15932 = shalt.err (!%p15929_p13)
}
  0x7d   : > { %s15933_s25 = scalar_lea.vmem %s462_s18, 8192  ;;  %p15941_p6 = scmp.lt.s32.totalorder %s462_s18, %s462_s18 }
  0x7e   : > { %p15934_p0 = scmp.ne.s32.totalorder %s462_s18, %s15933_s25  ;;  %p15942_p8 = scmp.lt.s32.totalorder %s15933_s25, %s15933_s25 }
  0x80   : > { %p15936_p1 = pnand %p15934_p0, %p16280_p7  ;;  %p15943_p9 = por %p15942_p8, %p15941_p6 }
  0x82   : > { %p15937_p4 = pneg %p15936_p1 }
  0x84   : > { %p15944_p10 = pnand %p15943_p9, %p15937_p4 }
  0x86   : > { %15947 = shalt.err (!%p15944_p10)
}
  0x87   : > { %s19328_s13 = smov 64   ;;  %s16159_s20 = smov 4  }
  0x88   : > { %15469 = dma.hbm_to_vmem [thread:$0]  (!%p16266_p5), %s19321_s10, 8192, %s462_s18, [#allocation17], %s19328_s13, %s19328_s13, %s16159_s20  }
  0x89   : > { %s15948_s22 = scalar_lea.hbm %s19312_s1, 1280 }
  0x8a   : > { %p15949_p11 = scmp.ne.s32.totalorder %s19312_s1, %s15948_s22  ;;  %p15955_p3 = scmp.lt.u32.totalorder %s15948_s22, %s19312_s1 }
  0x8c   : > { %p15951_p12 = pnand %p15949_p11, %p16280_p7 }
  0x8e   : > { %p15952_p2 = pneg %p15951_p12 }
  0x90   : > { %p15957_p13 = pnand %p15955_p3, %p15952_p2 }
  0x92   : > { %15960 = shalt.err (!%p15957_p13)
}
  0x93   : > { %s15961_s17 = scalar_lea.vmem %s351_s19, 1280  ;;  %p15969_p6 = scmp.lt.s32.totalorder %s351_s19, %s351_s19 }
  0x94   : > { %p15962_p0 = scmp.ne.s32.totalorder %s351_s19, %s15961_s17  ;;  %p15970_p8 = scmp.lt.s32.totalorder %s15961_s17, %s15961_s17 }
  0x96   : > { %p15964_p1 = pnand %p15962_p0, %p16280_p7  ;;  %p15971_p9 = por %p15970_p8, %p15969_p6 }
  0x98   : > { %p15965_p4 = pneg %p15964_p1 }
  0x9a   : > { %p15972_p10 = pnand %p15971_p9, %p15965_p4 }
  0x9c   : > { %15975 = shalt.err (!%p15972_p10)
}
  0x9d   : > { %s16160_s18 = smov 256   ;;  %s16161_s25 = smov 16  }
  0x9e   : > { %15442 = dma.hbm_to_vmem [thread:$0]  (!%p16266_p5), %s19312_s1, 1280, %s351_s19, [#allocation3], %s16160_s18, %s16160_s18, %s16161_s25  }
  0x9f   : > { %s16162_s16 = smov [#allocation6]   ;;  %s16163_s21 = smov [#allocation9]  }
  0xa0   : > { %s377_s2 = sshll.u32 %s16162_s16, 4  ;;  %s400_s22 = sshll.u32 %s16163_s21, 4  ;;  %s378_s2 = int_to_ptr.vmem [resolvable:$true] %s377_s2  ;;  %s401_s22 = int_to_ptr.vmem [resolvable:$true] %s400_s22 }
  0xa1   : > { %s15976_s30 = scalar_lea.hbm %s19314_s3, 32 }
  0xa2   : > { %p15977_p11 = scmp.ne.s32.totalorder %s19314_s3, %s15976_s30  ;;  %p15983_p3 = scmp.lt.u32.totalorder %s15976_s30, %s19314_s3 }
  0xa4   : > { %p15979_p12 = pnand %p15977_p11, %p16280_p7 }
  0xa6   : > { %p15980_p2 = pneg %p15979_p12 }
  0xa8   : > { %p15985_p13 = pnand %p15983_p3, %p15980_p2 }
  0xaa   : > { %15988 = shalt.err (!%p15985_p13)
}
  0xab   : > { %s15989_s19 = scalar_lea.vmem %s378_s2, 32  ;;  %p15997_p6 = scmp.lt.s32.totalorder %s378_s2, %s378_s2 }
  0xac   : > { %p15990_p0 = scmp.ne.s32.totalorder %s378_s2, %s15989_s19  ;;  %p15998_p8 = scmp.lt.s32.totalorder %s15989_s19, %s15989_s19 }
  0xae   : > { %p15992_p1 = pnand %p15990_p0, %p16280_p7  ;;  %p15999_p9 = por %p15998_p8, %p15997_p6 }
  0xb0   : > { %p15993_p4 = pneg %p15992_p1 }
  0xb2   : > { %p16000_p10 = pnand %p15999_p9, %p15993_p4 }
  0xb4   : > { %16003 = shalt.err (!%p16000_p10)
}
  0xb5   : > { %15448 = dma.hbm_to_vmem [thread:$0]  (!%p16266_p5), %s19314_s3, 32, %s378_s2, [#allocation5]  }
  0xb6   : > { %s16004_s16 = scalar_lea.hbm %s19316_s5, 8192 }
  0xb7   : > { %p16005_p11 = scmp.ne.s32.totalorder %s19316_s5, %s16004_s16  ;;  %p16011_p3 = scmp.lt.u32.totalorder %s16004_s16, %s19316_s5 }
  0xb9   : > { %p16007_p12 = pnand %p16005_p11, %p16280_p7 }
  0xbb   : > { %p16008_p2 = pneg %p16007_p12 }
  0xbd   : > { %p16013_p13 = pnand %p16011_p3, %p16008_p2 }
  0xbf   : > { %16016 = shalt.err (!%p16013_p13)
}
  0xc0   : > { %s16017_s27 = scalar_lea.vmem %s401_s22, 8192  ;;  %p16025_p6 = scmp.lt.s32.totalorder %s401_s22, %s401_s22 }
  0xc1   : > { %p16018_p0 = scmp.ne.s32.totalorder %s401_s22, %s16017_s27  ;;  %p16026_p8 = scmp.lt.s32.totalorder %s16017_s27, %s16017_s27 }
  0xc3   : > { %p16020_p1 = pnand %p16018_p0, %p16280_p7  ;;  %p16027_p9 = por %p16026_p8, %p16025_p6 }
  0xc5   : > { %p16021_p4 = pneg %p16020_p1 }
  0xc7   : > { %p16028_p10 = pnand %p16027_p9, %p16021_p4 }
  0xc9   : > { %16031 = shalt.err (!%p16028_p10)
}
  0xca   : > { %15454 = dma.hbm_to_vmem [thread:$0]  (!%p16266_p5), %s19316_s5, 8192, %s401_s22, [#allocation8], %s16160_s18, %s16160_s18, %s16161_s25  }
  0xcb   : > { %s16164_s19 = smov [#allocation12]   ;;  %s16032_s13 = scalar_lea.hbm %s19318_s7, 65536 }
  0xcc   : > { %s424_s20 = sshll.u32 %s16164_s19, 4  ;;  %p16033_p11 = scmp.ne.s32.totalorder %s19318_s7, %s16032_s13  ;;  %s425_s20 = int_to_ptr.vmem [resolvable:$true] %s424_s20 }
  0xcd   : > { %p16039_p3 = scmp.lt.u32.totalorder %s16032_s13, %s19318_s7 }
  0xce   : > { %p16035_p12 = pnand %p16033_p11, %p16280_p7 }
  0xd0   : > { %p16036_p2 = pneg %p16035_p12 }
  0xd2   : > { %p16041_p13 = pnand %p16039_p3, %p16036_p2 }
  0xd4   : > { %16044 = shalt.err (!%p16041_p13)
}
  0xd5   : > { %s16045_s18 = scalar_lea.vmem %s425_s20, 65536  ;;  %p16053_p6 = scmp.lt.s32.totalorder %s425_s20, %s425_s20 }
  0xd6   : > { %p16046_p0 = scmp.ne.s32.totalorder %s425_s20, %s16045_s18  ;;  %p16054_p8 = scmp.lt.s32.totalorder %s16045_s18, %s16045_s18 }
  0xd8   : > { %p16048_p1 = pnand %p16046_p0, %p16280_p7  ;;  %p16055_p9 = por %p16054_p8, %p16053_p6 }
  0xda   : > { %p16049_p4 = pneg %p16048_p1 }
  0xdc   : > { %p16056_p10 = pnand %p16055_p9, %p16049_p4 }
  0xde   : > { %16059 = shalt.err (!%p16056_p10)
}
  0xdf   : > { %s16165_s25 = smov 1024   ;;  %s19411_s22 = smov 64  }
  0xe0   : > { %15460 = dma.hbm_to_vmem [thread:$0]  (!%p16266_p5), %s19318_s7, 65536, %s425_s20, [#allocation11], %s16165_s25, %s16165_s25, %s19411_s22  }
  0xe1   : > { %s16166_s2 = smov [#allocation15]   ;;  %s16167_s19 = smov [#allocation18]  }
  0xe2   : > { %s451_s17 = sshll.u32 %s16166_s2, 4  ;;  %s478_s14 = sshll.u32 %s16167_s19, 4  ;;  %s452_s17 = int_to_ptr.vmem [resolvable:$true] %s451_s17  ;;  %s479_s14 = int_to_ptr.vmem [resolvable:$true] %s478_s14 }
  0xe3   : > { %s16060_s16 = scalar_lea.hbm %s19320_s9, 128 }
  0xe4   : > { %p16061_p11 = scmp.ne.s32.totalorder %s19320_s9, %s16060_s16  ;;  %p16067_p3 = scmp.lt.u32.totalorder %s16060_s16, %s19320_s9 }
  0xe6   : > { %p16063_p12 = pnand %p16061_p11, %p16280_p7 }
  0xe8   : > { %p16064_p2 = pneg %p16063_p12 }
  0xea   : > { %p16069_p13 = pnand %p16067_p3, %p16064_p2 }
  0xec   : > { %16072 = shalt.err (!%p16069_p13)
}
  0xed   : > { %s16073_s20 = scalar_lea.vmem %s452_s17, 128  ;;  %p16081_p6 = scmp.lt.s32.totalorder %s452_s17, %s452_s17 }
  0xee   : > { %p16074_p0 = scmp.ne.s32.totalorder %s452_s17, %s16073_s20  ;;  %p16082_p8 = scmp.lt.s32.totalorder %s16073_s20, %s16073_s20 }
  0xf0   : > { %p16076_p1 = pnand %p16074_p0, %p16280_p7  ;;  %p16083_p9 = por %p16082_p8, %p16081_p6 }
  0xf2   : > { %p16077_p4 = pneg %p16076_p1 }
  0xf4   : > { %p16084_p10 = pnand %p16083_p9, %p16077_p4 }
  0xf6   : > { %16087 = shalt.err (!%p16084_p10)
}
  0xf7   : > { %15466 = dma.hbm_to_vmem [thread:$0]  (!%p16266_p5), %s19320_s9, 128, %s452_s17, [#allocation14]  }
  0xf8   : > { %s16088_s2 = scalar_lea.hbm %s19323_s12, 16 }
  0xf9   : > { %p16089_p11 = scmp.ne.s32.totalorder %s19323_s12, %s16088_s2  ;;  %p16095_p3 = scmp.lt.u32.totalorder %s16088_s2, %s19323_s12 }
  0xfb   : > { %p16091_p12 = pnand %p16089_p11, %p16280_p7 }
  0xfd   : > { %p16092_p2 = pneg %p16091_p12 }
  0xff   : > { %p16097_p13 = pnand %p16095_p3, %p16092_p2 }
 0x101   : > { %16100 = shalt.err (!%p16097_p13)
}
 0x102   : > { %s16101_s21 = scalar_lea.vmem %s479_s14, 16  ;;  %s16108_s17 = scalar_lea.vmem %s479_s14, 32 }
 0x103   : > { %p16102_p0 = scmp.ne.s32.totalorder %s479_s14, %s16101_s21  ;;  %p16109_p6 = scmp.lt.s32.totalorder %s479_s14, %s479_s14 }
 0x104   : > { %p16110_p8 = scmp.lt.s32.totalorder %s16108_s17, %s16101_s21 }
 0x105   : > { %p16104_p1 = pnand %p16102_p0, %p16280_p7 }
 0x106   : > { %p16111_p9 = por %p16110_p8, %p16109_p6 }
 0x107   : > { %p16105_p4 = pneg %p16104_p1 }
 0x109   : > { %p16112_p10 = pnand %p16111_p9, %p16105_p4 }
 0x10b   : > { %16115 = shalt.err (!%p16112_p10)
}
 0x10c   : > { %15472 = dma.hbm_to_vmem [thread:$0]  (!%p16266_p5), %s19323_s12, 16, %s479_s14, [#allocation17]  }
 0x10d   : > { %p19412_p11 = scmp.ne.s32.totalorder %s19406_s29, 0 }
 0x10f   : > { %498 = sbr.rel (%p19412_p11) target bundleno = 2491 (0x9bb), region = 72 }
 0x116   : > { %p19413_p12 = scmp.eq.s32.totalorder %s16249_s28, 0 }
 0x118   : > { %16121 = dma.done.wait (%p19413_p12), [#allocation3], 1280   ;;  %p19414_p7 = pmov %p19413_p12 }
 0x11a   : > { %16123 = vsyncadd (%p19414_p7), [#allocation3], 4294966016  ;;  %p19415_p2 = pmov %p19414_p7 }
 0x11c   : > { %16125 = dma.done.wait (%p19415_p2), [#allocation5], 672   ;;  %p19416_p3 = pmov %p19415_p2 }
 0x11d   : > { %p19417_p13 = pmov %p19415_p2 }
 0x11e   : > { %16127 = vsyncadd (%p19416_p3), [#allocation5], 4294966624 }
 0x11f   : > { %16129 = dma.done.wait (%p19417_p13), [#allocation8], 24576   ;;  %p19418_p5 = pmov %p19415_p2 }
 0x120   : > { %p19419_p0 = pmov %p19415_p2 }
 0x121   : > { %16131 = vsyncadd (%p19418_p5), [#allocation8], 4294942720 }
 0x122   : > { %16133 = dma.done.wait (%p19419_p0), [#allocation11], 65600   ;;  %p19420_p1 = pmov %p19419_p0 }
 0x123   : > { %p19421_p4 = pmov %p19419_p0 }
 0x124   : > { %16135 = vsyncadd (%p19420_p1), [#allocation11], 4294901696 }
 0x125   : > { %16137 = dma.done.wait (%p19421_p4), [#allocation14], 32896   ;;  %p19422_p6 = pmov %p19419_p0 }
 0x126   : > { %p19423_p8 = pmov %p19419_p0 }
 0x127   : > { %16139 = vsyncadd (%p19422_p6), [#allocation14], 4294934400 }
 0x128   : > { %16141 = dma.done.wait (%p19423_p8), [#allocation17], 8208   ;;  %p19424_p9 = pmov %p19419_p0 }
 0x129   : > { %p581_p10 = scmp.lt.s32.totalorder %s16249_s28, 1  ;;  %v16168_v0 = vmov 0   ;;  %v15528_v1 = vld [vmem:[#allocation2 + $0x4] ss:$16 sps:$4 sm:$0xff]   ;;  %v15530_v2 = vld [vmem:[#allocation2] ss:$16 sps:$4 sm:$0xff]  }
 0x12a   : > { %16143 = vsyncadd (%p19424_p9), [#allocation17], 4294959088  ;;  %702 = vmatprep.mubr.bf16.mxu0 %v16168_v0  ;;  %743 = vmatprep.mubr.bf16.mxu1 %v16168_v0  ;;  %v15531_v3 = vld [vmem:[#allocation2 + $0x24] ss:$16 sps:$4 sm:$0xff]   ;;  %v15533_v4 = vld [vmem:[#allocation2 + $0x20] ss:$16 sps:$4 sm:$0xff]  }
 0x12b   : > { %s19706_s28 = smov (!%p581_p10, %s16249_s28), 1  ;;  %670 = vmatprep.subr.bf16.mxu0 %v15528_v1  ;;  %v601_v5 = vld [vmem:[#allocation2 + $0x40] sm:$0xff]  ;;  %v15536_v6 = vld [vmem:[#allocation2 + $0xc] ss:$16 sps:$4 sm:$0xff]   ;;  %v15538_v9 = vld [vmem:[#allocation2 + $0x8] ss:$16 sps:$4 sm:$0xff]  }
 0x12c   : > { %s13856_s29 = sshll.u32 %s19706_s28, 3  ;;  %671 = vmatpush1.bf16.msra.mxu0 %v15530_v2  ;;  %v13868_v7 = vcombine.high %v601_v5, %v601_v5  ;;  %v13867_v8 = vcombine.low %v601_v5, %v601_v5  ;;  %vm657_vm0 = vcmask 1043456   ;;  %711 = vmatprep.subr.bf16.mxu1 %v15536_v6  ;;  %v15542_v11 = vld [vmem:[#allocation2 + $0x2c] ss:$16 sps:$4 sm:$0xff]   ;;  %v15544_v12 = vld [vmem:[#allocation2 + $0x28] ss:$16 sps:$4 sm:$0xff]  }
 0x12d   : > { %s584_s14 = scalar_lea.vmem %s19311_s0, %s13856_s29  ;;  %672 = vmatprep.subr.bf16.mxu0 %v15531_v3  ;;  %712 = vmatpush1.bf16.msra.mxu1 %v15538_v9  ;;  %v15541_v14 = vld [vmem:[#allocation4 + $0x4] ss:$8 sps:$4 sm:$0xff]   ;;  %v602_v15 = vld [vmem:[#allocation2 + $0x48] sm:$0xff]  ;;  %vm653_vm1 = vcmask 326656   ;;  %v15539_v21 = vld [vmem:[#allocation4] ss:$8 sps:$4 sm:$0xff]  }
 0x12e   : > { %v591_v10 = vld [vmem:[%s584_s14] sm:$0x1f]  ;;  %v659_v13 = vsel %vm657_vm0, %v13867_v8, 0  ;;  %713 = vmatprep.subr.bf16.mxu1 %v15542_v11  ;;  %v13870_v16 = vcombine.high %v602_v15, %v602_v15  ;;  %v13869_v17 = vcombine.low %v602_v15, %v602_v15  ;;  %v756_v27 = vld [vmem:[#allocation4 + $0x20] sm:$0xff]  ;;  %vm994_vm2 = vcmask 1040384   ;;  %s16172_s26 = smov 64  }
 0x12f   : > { %v1074_v18 = vld [vmem:[#allocation7] sm:$0xff]  ;;  %v592_v20 = vpack.c.bf16 %v591_v10, %v591_v10  ;;  %v15547_v23 = vld [vmem:[#allocation4 + $0x14] ss:$8 sps:$4 sm:$0xff]   ;;  %v13880_v36 = vcombine.high %v756_v27, %v756_v27  ;;  %v13879_v37 = vcombine.low %v756_v27, %v756_v27  ;;  %vm1069_vm3 = vcmask 1046528   ;;  %s15106_s29 = sshll.u32 %s19706_s28, 5  ;;  %s19703_s14 = sld [smem:[#allocation60_spill]] }
 0x130   : > { %673 = vmatpush1.bf16.msra.mxu0 %v15533_v4  ;;  %v1078_v19 = vld [vmem:[#allocation7 + $0x20] sm:$0xff]  ;;  %v665_v22 = vsel %vm657_vm0, %v13869_v17, 0  ;;  %v1075_v31 = vld [vmem:[#allocation7 + $0x8] sm:$0xff]  ;;  %vm16634_vm4 = vmpackc.low %vm1069_vm3, %vm1069_vm3  ;;  %vm16171_vm5 = vmmov 1   ;;  %vm13658_vm7 = vcmask 523264  }
 0x131   : > { %13871 = vmatprep.subr.msk.bf16.mxu0 %vm657_vm0, %v13868_v7  ;;  %714 = vmatpush1.bf16.msra.mxu1 %v15544_v12  ;;  %v13884_v24 = vcombine.high %v1074_v18, %v1078_v19  ;;  %v1082_v25 = vld [vmem:[#allocation7 + $0x40] sm:$0xff]  ;;  %v759_v29 = vshll.u32 %v592_v20, 16  ;;  %v13883_v30 = vcombine.low %v1074_v18, %v1078_v19  ;;  %v1079_v32 = vld [vmem:[#allocation7 + $0x28] sm:$0xff]  ;;  %v757_v38 = vshrl.u32 %v592_v20, 16  ;;  %vm17474_vm6 = vmpackc.low %vm1069_vm3, %vm16171_vm5 }
 0x132   : > { %13873 = vmatprep.subr.msk.bf16.mxu1 %vm657_vm0, %v13870_v16  ;;  %v1086_v26 = vld [vmem:[#allocation7 + $0x60] sm:$0xff]  ;;  %v1083_v43 = vld [vmem:[#allocation7 + $0x48] sm:$0xff]  ;;  %v792_v46 = vsel %vm657_vm0, %v13879_v37, 0  ;;  %v13886_v47 = vcombine.high %v1075_v31, %v1079_v32  ;;  %v13885_v52 = vcombine.low %v1075_v31, %v1079_v32 }
 0x133   : > { %v15545_v28 = vld [vmem:[#allocation4 + $0x10] ss:$8 sps:$4 sm:$0xff]   ;;  %v13892_v33 = vcombine.high %v1082_v25, %v1086_v26  ;;  %v761_v39 = vrot.slane %v759_v29, 1  ;;  %v13891_v40 = vcombine.low %v1082_v25, %v1086_v26 }
 0x134   : > { %675 = vmatpush1.bf16.msra.mxu0 %v659_v13  ;;  %v1090_v34 = vld [vmem:[#allocation7 + $0x80] sm:$0xff]  ;;  %v1087_v44 = vld [vmem:[#allocation7 + $0x68] sm:$0xff] }
 0x135   : > { %797 = vmatprep.subr.bf16.mxu0 %v15541_v14  ;;  %716 = vmatpush1.bf16.msra.mxu1 %v665_v22  ;;  %v1094_v35 = vld [vmem:[#allocation7 + $0xa0] sm:$0xff]  ;;  %v762_v48 = vor.u32 %v761_v39, %v757_v38  ;;  %v1091_v53 = vld [vmem:[#allocation7 + $0x88] sm:$0xff]  ;;  %v13894_v56 = vcombine.high %v1083_v43, %v1087_v44  ;;  %v13893_v58 = vcombine.low %v1083_v43, %v1087_v44  ;;  %s589_s18 = scalar_lea.vmem %s19703_s14, %s15106_s29 }
 0x136   : > { %1842 = vmatprep.subr.bf16.mxu1 %v13884_v24  ;;  %v1098_v41 = vld [vmem:[#allocation7 + $0xc0] sm:$0xff]  ;;  %v13900_v45 = vcombine.high %v1090_v34, %v1094_v35  ;;  %v13899_v49 = vcombine.low %v1090_v34, %v1094_v35  ;;  %v1095_v54 = vld [vmem:[#allocation7 + $0xa8] sm:$0xff] }
 0x137   : > { %13872 = vmatmul.mubr.msk.bf16.vlgmr.msra.gmra.mrb[0].mxu0 %vm653_vm1, %v592_v20  ;;  %v1102_v42 = vld [vmem:[#allocation7 + $0xe0] sm:$0xff]  ;;  %v1099_v59 = vld [vmem:[#allocation7 + $0xc8] sm:$0xff]  ;;  %v13902_v62 = vcombine.high %v1091_v53, %v1095_v54 }
 0x138   : > { %798 = vmatpush1.bf16.msra.mxu0 %v15539_v21  ;;  %829 = vmatprep.mubr.bf16.mxu0 %v16168_v0  ;;  %v1106_v50 = vld [vmem:[#allocation7 + $0x100] sm:$0xff]  ;;  %v13908_v55 = vcombine.high %v1098_v41, %v1102_v42  ;;  %v13907_v57 = vcombine.low %v1098_v41, %v1102_v42  ;;  %v1103_v60 = vld [vmem:[#allocation7 + $0xe8] sm:$0xff]  ;;  %v13901_v0 = vcombine.low %v1091_v53, %v1095_v54 }
 0x139   : > { %799 = vmatprep.subr.bf16.mxu0 %v15547_v23  ;;  %13874 = vmatmul.mubr.msk.bf16.vlgmr.msra.gmra.mrb[0].mxu1 %vm653_vm1, %v592_v20  ;;  %v1110_v51 = vld [vmem:[#allocation7 + $0x120] sm:$0xff]  ;;  %v1107_v1 = vld [vmem:[#allocation7 + $0x108] sm:$0xff]  ;;  %v13910_v3 = vcombine.high %v1099_v59, %v1103_v60  ;;  %v13909_v4 = vcombine.low %v1099_v59, %v1103_v60 }
 0x13a   : > { %1843 = vmatpush1.bf16.msra.mxu1 %v13883_v30  ;;  %v13916_v61 = vcombine.high %v1106_v50, %v1110_v51  ;;  %v13915_v63 = vcombine.low %v1106_v50, %v1110_v51  ;;  %v1111_v2 = vld [vmem:[#allocation7 + $0x128] sm:$0xff]  ;;  %v1114_v7 = vld [vmem:[#allocation7 + $0x140] sm:$0xff] }
 0x13b   : > { %1844 = vmatprep.subr.bf16.mxu1 %v13892_v33  ;;  %v13918_v5 = vcombine.high %v1107_v1, %v1111_v2  ;;  %v13917_v6 = vcombine.low %v1107_v1, %v1111_v2  ;;  %v1118_v8 = vld [vmem:[#allocation7 + $0x160] sm:$0xff]  ;;  %v1115_v10 = vld [vmem:[#allocation7 + $0x148] sm:$0xff] }
 0x13c   : > { %800 = vmatpush1.bf16.msra.mxu0 %v15545_v28  ;;  %v13924_v9 = vcombine.high %v1114_v7, %v1118_v8  ;;  %v1119_v11 = vld [vmem:[#allocation7 + $0x168] sm:$0xff]  ;;  %v13923_v12 = vcombine.low %v1114_v7, %v1118_v8  ;;  %v1122_v15 = vld [vmem:[#allocation7 + $0x180] sm:$0xff] }
 0x13d   : > { %13881 = vmatprep.subr.msk.bf16.mxu0 %vm657_vm0, %v13880_v36  ;;  %v13925_v13 = vcombine.low %v1115_v10, %v1119_v11  ;;  %v13926_v14 = vcombine.high %v1115_v10, %v1119_v11  ;;  %v1126_v16 = vld [vmem:[#allocation7 + $0x1a0] sm:$0xff]  ;;  %v1123_v17 = vld [vmem:[#allocation7 + $0x188] sm:$0xff] }
 0x13e   : > { %1845 = vmatpush1.bf16.msra.mxu1 %v13891_v40  ;;  %v13932_v18 = vcombine.high %v1122_v15, %v1126_v16  ;;  %v1127_v19 = vld [vmem:[#allocation7 + $0x1a8] sm:$0xff]  ;;  %v13931_v20 = vcombine.low %v1122_v15, %v1126_v16  ;;  %v1130_v23 = vld [vmem:[#allocation7 + $0x1c0] sm:$0xff] }
 0x13f   : > { %1846 = vmatprep.subr.bf16.mxu1 %v13900_v45  ;;  %v13933_v21 = vcombine.low %v1123_v17, %v1127_v19  ;;  %v13934_v22 = vcombine.high %v1123_v17, %v1127_v19  ;;  %v1134_v24 = vld [vmem:[#allocation7 + $0x1e0] sm:$0xff]  ;;  %v1131_v25 = vld [vmem:[#allocation7 + $0x1c8] sm:$0xff] }
 0x140   : > { %802 = vmatpush1.bf16.msra.mxu0 %v792_v46  ;;  %v13940_v26 = vcombine.high %v1130_v23, %v1134_v24  ;;  %v1135_v27 = vld [vmem:[#allocation7 + $0x1e8] sm:$0xff]  ;;  %v13939_v28 = vcombine.low %v1130_v23, %v1134_v24  ;;  %v1138_v31 = vld [vmem:[#allocation7 + $0x200] sm:$0xff] }
 0x141   : > { %1883 = vmatprep.subr.bf16.mxu0 %v13886_v47  ;;  %v13941_v29 = vcombine.low %v1131_v25, %v1135_v27  ;;  %v13942_v30 = vcombine.high %v1131_v25, %v1135_v27  ;;  %v1142_v32 = vld [vmem:[#allocation7 + $0x220] sm:$0xff]  ;;  %v1139_v33 = vld [vmem:[#allocation7 + $0x208] sm:$0xff] }
 0x142   : > { %1847 = vmatpush1.bf16.msra.mxu1 %v13899_v49  ;;  %v13948_v34 = vcombine.high %v1138_v31, %v1142_v32  ;;  %v1143_v35 = vld [vmem:[#allocation7 + $0x228] sm:$0xff]  ;;  %v13947_v36 = vcombine.low %v1138_v31, %v1142_v32  ;;  %v1146_v39 = vld [vmem:[#allocation7 + $0x240] sm:$0xff]  ;;  %v16545_v31 = vld [vmem:[#allocation7 + $0x10] sm:$0xff] }
 0x143   : > { %13882 = vmatmul.mubr.msk.bf16.vlgmr.msra.gmra.mrb[4].mxu0 %vm653_vm1, %v762_v48  ;;  %1848 = vmatprep.subr.bf16.mxu1 %v13908_v55  ;;  %v13949_v37 = vcombine.low %v1139_v33, %v1143_v35  ;;  %v13950_v38 = vcombine.high %v1139_v33, %v1143_v35  ;;  %v1150_v40 = vld [vmem:[#allocation7 + $0x260] sm:$0xff]  ;;  %v1147_v41 = vld [vmem:[#allocation7 + $0x248] sm:$0xff]  ;;  %v16547_v32 = vld [vmem:[#allocation7 + $0x30] sm:$0xff] }
 0x144   : > { %1884 = vmatpush1.bf16.msra.mxu0 %v13885_v52  ;;  %v13956_v42 = vcombine.high %v1146_v39, %v1150_v40  ;;  %v1151_v43 = vld [vmem:[#allocation7 + $0x268] sm:$0xff]  ;;  %v13955_v44 = vcombine.low %v1146_v39, %v1150_v40  ;;  %v1154_v47 = vld [vmem:[#allocation7 + $0x280] sm:$0xff]  ;;  %v16549_v33 = vld [vmem:[#allocation7 + $0x18] sm:$0xff]  ;;  %v13888_v35 = vcombine.high %v16545_v31, %v16547_v32  ;;  %v840_v39 = vlaneseq }
 0x145   : > { %1885 = vmatprep.subr.bf16.mxu0 %v13894_v56  ;;  %v13957_v45 = vcombine.low %v1147_v41, %v1151_v43  ;;  %v13958_v46 = vcombine.high %v1147_v41, %v1151_v43  ;;  %v1158_v48 = vld [vmem:[#allocation7 + $0x2a0] sm:$0xff]  ;;  %v1155_v49 = vld [vmem:[#allocation7 + $0x288] sm:$0xff] }
 0x146   : > { %1849 = vmatpush1.bf16.msra.mxu1 %v13907_v57  ;;  %v13964_v50 = vcombine.high %v1154_v47, %v1158_v48  ;;  %v1159_v51 = vld [vmem:[#allocation7 + $0x2a8] sm:$0xff]  ;;  %v13963_v52 = vcombine.low %v1154_v47, %v1158_v48  ;;  %v1162_v55 = vld [vmem:[#allocation7 + $0x2c0] sm:$0xff]  ;;  %v16561_v40 = vshrl.u32 %v840_v39, 7  ;;  %v16169_v47 = vmov 1966171168  }
 0x147   : > { %1850 = vmatprep.subr.bf16.mxu1 %v13916_v61  ;;  %v13965_v53 = vcombine.low %v1155_v49, %v1159_v51  ;;  %v13966_v54 = vcombine.high %v1155_v49, %v1159_v51  ;;  %v1166_v56 = vld [vmem:[#allocation7 + $0x2e0] sm:$0xff]  ;;  %v1163_v57 = vld [vmem:[#allocation7 + $0x2c8] sm:$0xff]  ;;  %v864_v48 = vunpack.c.l.s4 %v16169_v47 }
 0x148   : > { %1886 = vmatpush1.bf16.msra.mxu0 %v13893_v58  ;;  %v13972_v58 = vcombine.high %v1162_v55, %v1166_v56  ;;  %v1167_v59 = vld [vmem:[#allocation7 + $0x2e8] sm:$0xff]  ;;  %v13971_v60 = vcombine.low %v1162_v55, %v1166_v56  ;;  %v1178_v7 = vld [vmem:[#allocation7 + $0x340] sm:$0xff]  ;;  %v16564_v41 = vsub.s32 0, %v16561_v40  ;;  %v16567_v43 = vsub.s32 1, %v16561_v40 }
 0x149   : > { %1887 = vmatprep.subr.bf16.mxu0 %v13902_v62  ;;  %v13973_v61 = vcombine.low %v1163_v57, %v1167_v59  ;;  %v13974_v62 = vcombine.high %v1163_v57, %v1167_v59  ;;  %v1171_v1 = vld [vmem:[#allocation7 + $0x308] sm:$0xff]  ;;  %v1182_v8 = vld [vmem:[#allocation7 + $0x360] sm:$0xff]  ;;  %v865_v57 = vunpack.c.0.s8 %v864_v48 }
 0x14a   : > { %1851 = vmatpush1.bf16.msra.mxu1 %v13915_v63  ;;  %v1170_v63 = vld [vmem:[#allocation7 + $0x300] sm:$0xff]  ;;  %v13987_v10 = vcombine.low %v1178_v7, %v1182_v8  ;;  %v13988_v11 = vcombine.high %v1178_v7, %v1182_v8  ;;  %v1191_v19 = vld [vmem:[#allocation7 + $0x3a8] sm:$0xff] }
 0x14b   : > { %1852 = vmatprep.subr.bf16.mxu1 %v13924_v9  ;;  %v1179_v9 = vld [vmem:[#allocation7 + $0x348] sm:$0xff] }
 0x14c   : > { %1888 = vmatpush1.bf16.msra.mxu0 %v13901_v0  ;;  %v1174_v0 = vld [vmem:[#allocation7 + $0x320] sm:$0xff]  ;;  %v1195_v23 = vld [vmem:[#allocation7 + $0x3c8] sm:$0xff] }
 0x14d   : > { %1889 = vmatprep.subr.bf16.mxu0 %v13910_v3  ;;  %v13980_v2 = vcombine.high %v1170_v63, %v1174_v0  ;;  %v1175_v3 = vld [vmem:[#allocation7 + $0x328] sm:$0xff] }
 0x14e   : > { %1853 = vmatpush1.bf16.msra.mxu1 %v13923_v12  ;;  %v1183_v12 = vld [vmem:[#allocation7 + $0x368] sm:$0xff] }
 0x14f   : > { %1854 = vmatprep.subr.bf16.mxu1 %v13932_v18  ;;  %v13989_v15 = vcombine.low %v1179_v9, %v1183_v12  ;;  %v13990_v16 = vcombine.high %v1179_v9, %v1183_v12  ;;  %v1187_v18 = vld [vmem:[#allocation7 + $0x388] sm:$0xff] }
 0x150   : > { %1890 = vmatpush1.bf16.msra.mxu0 %v13909_v4  ;;  %v13979_v4 = vcombine.low %v1170_v63, %v1174_v0  ;;  %v1199_v24 = vld [vmem:[#allocation7 + $0x3e8] sm:$0xff] }
 0x151   : > { %1891 = vmatprep.subr.bf16.mxu0 %v13918_v5  ;;  %v13981_v5 = vcombine.low %v1171_v1, %v1175_v3 }
 0x152   : > { %1855 = vmatpush1.bf16.msra.mxu1 %v13931_v20  ;;  %v1194_v20 = vld [vmem:[#allocation7 + $0x3c0] sm:$0xff] }
 0x153   : > { %1856 = vmatprep.subr.bf16.mxu1 %v13940_v26  ;;  %v13997_v26 = vcombine.low %v1187_v18, %v1191_v19 }
 0x154   : > { %1892 = vmatpush1.bf16.msra.mxu0 %v13917_v6  ;;  %v13982_v6 = vcombine.high %v1171_v1, %v1175_v3 }
 0x155   : > { %1893 = vmatprep.subr.bf16.mxu0 %v13926_v14  ;;  %v1190_v14 = vld [vmem:[#allocation7 + $0x3a0] sm:$0xff] }
 0x156   : > { %1857 = vmatpush1.bf16.msra.mxu1 %v13939_v28  ;;  %v14006_v28 = vcombine.high %v1195_v23, %v1199_v24 }
 0x157   : > { %1858 = vmatprep.subr.bf16.mxu1 %v13948_v34  ;;  %v13887_v34 = vcombine.low %v16545_v31, %v16547_v32 }
 0x158   : > { %1894 = vmatpush1.bf16.msra.mxu0 %v13925_v13  ;;  %v1186_v13 = vld [vmem:[#allocation7 + $0x380] sm:$0xff] }
 0x159   : > { %1895 = vmatprep.subr.bf16.mxu0 %v13934_v22  ;;  %v13996_v17 = vcombine.high %v1186_v13, %v1190_v14  ;;  %v1198_v22 = vld [vmem:[#allocation7 + $0x3e0] sm:$0xff]  ;;  %v13995_v25 = vcombine.low %v1186_v13, %v1190_v14 }
 0x15a   : > { %1859 = vmatpush1.bf16.msra.mxu1 %v13947_v36  ;;  %v14004_v27 = vcombine.high %v1194_v20, %v1198_v22  ;;  %v16555_v36 = vld [vmem:[#allocation7 + $0x38] sm:$0xff] }
 0x15b   : > { %1860 = vmatprep.subr.bf16.mxu1 %v13956_v42  ;;  %v838_v42 = vld [vmem:[#allocation6] sm:$0x3] }
 0x15c   : > { %1896 = vmatpush1.bf16.msra.mxu0 %v13933_v21  ;;  %v13998_v21 = vcombine.high %v1187_v18, %v1191_v19 }
 0x15d   : > { %1897 = vmatprep.subr.bf16.mxu0 %v13942_v30  ;;  %v14005_v30 = vcombine.low %v1195_v23, %v1199_v24 }
 0x15e   : > { %1861 = vmatpush1.bf16.msra.mxu1 %v13955_v44  ;;  %v843_v44 = vrot.slane %v838_v42, %v16564_v41 }
 0x15f   : > { %1862 = vmatprep.subr.bf16.mxu1 %v13964_v50 }
 0x160   : > { %1898 = vmatpush1.bf16.msra.mxu0 %v13941_v29  ;;  %v14003_v29 = vcombine.low %v1194_v20, %v1198_v22 }
 0x161   : > { %1899 = vmatprep.subr.bf16.mxu0 %v13950_v38  ;;  %v13890_v38 = vcombine.high %v16549_v33, %v16555_v36 }
 0x162   : > { %1863 = vmatpush1.bf16.msra.mxu1 %v13963_v52 }
 0x163   : > { %1864 = vmatprep.subr.bf16.mxu1 %v13972_v58 }
 0x164   : > { %1900 = vmatpush1.bf16.msra.mxu0 %v13949_v37  ;;  %v13889_v37 = vcombine.low %v16549_v33, %v16555_v36  ;;  %v1108_v36 = vld [vmem:[#allocation7 + $0x110] sm:$0xff] }
 0x165   : > { %1901 = vmatprep.subr.bf16.mxu0 %v13958_v46 }
 0x166   : > { %1865 = vmatpush1.bf16.msra.mxu1 %v13971_v60 }
 0x167   : > { %1866 = vmatprep.subr.bf16.mxu1 %v13980_v2 }
 0x168   : > { %1902 = vmatpush1.bf16.msra.mxu0 %v13957_v45  ;;  %v847_v45 = vrot.slane %v838_v42, %v16567_v43 }
 0x169   : > { %1903 = vmatprep.subr.bf16.mxu0 %v13966_v54 }
 0x16a   : > { %1867 = vmatpush1.bf16.msra.mxu1 %v13979_v4 }
 0x16b   : > { %1868 = vmatprep.subr.bf16.mxu1 %v13988_v11 }
 0x16c   : > { %1904 = vmatpush1.bf16.msra.mxu0 %v13965_v53 }
 0x16d   : > { %1905 = vmatprep.subr.bf16.mxu0 %v13974_v62  ;;  %v16572_v62 = vsub.s32 %v865_v57, %v16561_v40 }
 0x16e   : > { %1869 = vmatpush1.bf16.msra.mxu1 %v13987_v10  ;;  %v16170_v10 = vmov 1983009808  }
 0x16f   : > { %1870 = vmatprep.subr.bf16.mxu1 %v13996_v17  ;;  %v1013_v11 = vunpack.c.l.s4 %v16170_v10  ;;  %v1084_v10 = vld [vmem:[#allocation7 + $0x50] sm:$0xff] }
 0x170   : > { %1906 = vmatpush1.bf16.msra.mxu0 %v13973_v61 }
 0x171   : > { %1907 = vmatprep.subr.bf16.mxu0 %v13982_v6 }
 0x172   : > { %1871 = vmatpush1.bf16.msra.mxu1 %v13995_v25 }
 0x173   : > { %1872 = vmatprep.subr.bf16.mxu1 %v14004_v27 }
 0x174   : > { %1908 = vmatpush1.bf16.msra.mxu0 %v13981_v5 }
 0x175   : > { %1909 = vmatprep.subr.bf16.mxu0 %v13990_v16  ;;  %v1014_v16 = vunpack.c.0.s8 %v1013_v11  ;;  %v1088_v11 = vld [vmem:[#allocation7 + $0x70] sm:$0xff] }
 0x176   : > { %1873 = vmatpush1.bf16.msra.mxu1 %v14003_v29 }
 0x177   : > { %1924 = vmatprep.subr.bf16.mxu1 %v13888_v35  ;;  %v16583_v25 = vsub.s32 %v1014_v16, %v16561_v40  ;;  %v1092_v16 = vld [vmem:[#allocation7 + $0x90] sm:$0xff] }
 0x178   : > { %1910 = vmatpush1.bf16.msra.mxu0 %v13989_v15 }
 0x179   : > { %1911 = vmatprep.subr.bf16.mxu0 %v13998_v21  ;;  %19425 = vst [vmem:[#allocation26_spill] sm:$0xff] %v16583_v25 }
 0x17c   : > { %1912 = vmatpush1.bf16.msra.mxu0 %v13997_v26 }
 0x17d   : > { %1913 = vmatprep.subr.bf16.mxu0 %v14006_v28 }
 0x180   : > { %1914 = vmatpush1.bf16.msra.mxu0 %v14005_v30 }
 0x181   : > { %1965 = vmatprep.subr.bf16.mxu0 %v13890_v38 }
 0x20a   : > { %v704_v46 = vpop.f32.mrb[0].mxu0 }
 0x20b   : > { %v850_v49 = vadd.f32 %v843_v44, %v704_v46  ;;  %v706_v50 = vpop.f32.mrb[1].mxu0 }
 0x20c   : > { %v851_v51 = vadd.f32 %v847_v45, %v706_v50  ;;  %v708_v52 = vpop.f32.mrb[2].mxu0  ;;  %v745_v55 = vpop.f32.mrb[0].mxu1 }
 0x20d   : > { %v852_v53 = vmax.f32 %v850_v49, 0.0  ;;  %v709_v54 = vpop.f32.mrb[3].mxu0  ;;  %v747_v58 = vpop.f32.mrb[1].mxu1 }
 0x20e   : > { %v853_v56 = vmax.f32 %v851_v51, 0.0  ;;  %v749_v59 = vpop.f32.mrb[2].mxu1 }
 0x20f   : > { %v750_v61 = vpop.f32.mrb[3].mxu1 }
 0x210   : > { %v862_v60 = vcombine.low %v852_v53, %v853_v56 }
 0x212   : > { %v869_v63 = vrot.slane %v862_v60, %v16572_v62 }
 0x214   : > { %v870_v7 = vcombine.high %v869_v63, %v869_v63  ;;  %v877_v13 = vrot.slane %v869_v63, %v16572_v62 }
 0x216   : > { %v831_v0 = vpop.f32.mrb[4].mxu0  ;;  %v884_v14 = vrot.slane %v870_v7, %v16572_v62  ;;  %v885_v18 = vcombine.high %v877_v13, %v877_v13  ;;  %v917_v22 = vrot.slane %v877_v13, %v16564_v41  ;;  %v921_v23 = vrot.slane %v877_v13, %v16567_v43  ;;  %v1089_v13 = vld [vmem:[#allocation7 + $0x78] sm:$0xff] }
 0x217   : > { %v854_v1 = vadd.f32 %v831_v0, %v745_v55  ;;  %v833_v2 = vpop.f32.mrb[5].mxu0 }
 0x218   : > { %v835_v3 = vpop.f32.mrb[6].mxu0  ;;  %v855_v5 = vadd.f32 %v833_v2, %v747_v58  ;;  %v886_v19 = vcombine.high %v884_v14, %v884_v14  ;;  %v925_v24 = vrot.slane %v884_v14, %v16564_v41  ;;  %v929_v30 = vrot.slane %v884_v14, %v16567_v43 }
 0x219   : > { %v856_v4 = vadd.f32 %v854_v1, %v843_v44  ;;  %v836_v6 = vpop.f32.mrb[7].mxu0  ;;  %v933_v35 = vrot.slane %v885_v18, %v16564_v41  ;;  %v937_v38 = vrot.slane %v885_v18, %v16567_v43 }
 0x21a   : > { %v857_v9 = vadd.f32 %v855_v5, %v847_v45  ;;  %v941_v39 = vrot.slane %v886_v19, %v16564_v41  ;;  %v945_v47 = vrot.slane %v886_v19, %v16567_v43  ;;  %v1096_v19 = vld [vmem:[#allocation7 + $0xb0] sm:$0xff] }
 0x21b   : > { %v858_v8 = vmax.f32 %v856_v4, 0.0  ;;  %v13903_v31 = vcombine.low %v1092_v16, %v1096_v19 }
 0x21c   : > { %v859_v12 = vmax.f32 %v857_v9, 0.0 }
 0x21e   : > { %v889_v15 = vcombine.low %v858_v8, %v859_v12  ;;  %v1085_v12 = vld [vmem:[#allocation7 + $0x58] sm:$0xff] }
 0x21f   : > { %v13898_v18 = vcombine.high %v1085_v12, %v1089_v13 }
 0x220   : > { %v896_v17 = vrot.slane %v889_v15, %v16572_v62 }
 0x222   : > { %v897_v20 = vcombine.high %v896_v17, %v896_v17  ;;  %v904_v21 = vrot.slane %v896_v17, %v16572_v62  ;;  %v13896_v17 = vcombine.high %v1084_v10, %v1088_v11 }
 0x224   : > { %v911_v26 = vrot.slane %v897_v20, %v16572_v62  ;;  %v912_v27 = vcombine.high %v904_v21, %v904_v21  ;;  %v957_v28 = vrot.slane %v904_v21, %v16564_v41  ;;  %v961_v29 = vrot.slane %v904_v21, %v16567_v43  ;;  %v1093_v20 = vld [vmem:[#allocation7 + $0x98] sm:$0xff] }
 0x225   : > { %v1097_v21 = vld [vmem:[#allocation7 + $0xb8] sm:$0xff] }
 0x226   : > { %v913_v42 = vcombine.high %v911_v26, %v911_v26  ;;  %v965_v44 = vrot.slane %v911_v26, %v16564_v41  ;;  %v969_v45 = vrot.slane %v911_v26, %v16567_v43  ;;  %v973_v46 = vrot.slane %v912_v27, %v16564_v41 }
 0x227   : > { %v977_v48 = vrot.slane %v912_v27, %v16567_v43  ;;  %v995_v49 = vsel %vm994_vm2, %v917_v22, %v957_v28  ;;  %v996_v50 = vsel %vm994_vm2, %v921_v23, %v961_v29  ;;  %v13895_v22 = vcombine.low %v1084_v10, %v1088_v11  ;;  %v1100_v27 = vld [vmem:[#allocation7 + $0xd0] sm:$0xff]  ;;  %v1101_v29 = vld [vmem:[#allocation7 + $0xd8] sm:$0xff] }
 0x228   : > { %v981_v51 = vrot.slane %v913_v42, %v16564_v41  ;;  %v985_v52 = vrot.slane %v913_v42, %v16567_v43  ;;  %v997_v53 = vsel %vm994_vm2, %v925_v24, %v965_v44  ;;  %v998_v54 = vsel %vm994_vm2, %v929_v30, %v969_v45  ;;  %v1104_v28 = vld [vmem:[#allocation7 + $0xf0] sm:$0xff]  ;;  %v1105_v30 = vld [vmem:[#allocation7 + $0xf8] sm:$0xff] }
 0x229   : > { %v999_v55 = vsel %vm994_vm2, %v933_v35, %v973_v46  ;;  %v1000_v56 = vsel %vm994_vm2, %v937_v38, %v977_v48  ;;  %v1011_v57 = vcombine.low %v995_v49, %v996_v50  ;;  %v1019_v58 = vcombine.low %v997_v53, %v998_v54  ;;  %v1109_v35 = vld [vmem:[#allocation7 + $0x118] sm:$0xff]  ;;  %v1116_v46 = vld [vmem:[#allocation7 + $0x150] sm:$0xff] }
 0x22a   : > { %v1001_v59 = vsel %vm994_vm2, %v941_v39, %v981_v51  ;;  %v1002_v60 = vsel %vm994_vm2, %v945_v47, %v985_v52  ;;  %v1027_v61 = vcombine.low %v999_v55, %v1000_v56  ;;  %v13897_v23 = vcombine.low %v1085_v12, %v1089_v13  ;;  %v1113_v38 = vld [vmem:[#allocation7 + $0x138] sm:$0xff]  ;;  %v1120_v47 = vld [vmem:[#allocation7 + $0x170] sm:$0xff] }
 0x22b   : > { %v1018_v63 = vrot.slane %v1011_v57, %v16583_v25  ;;  %v1026_v0 = vrot.slane %v1019_v58, %v16583_v25  ;;  %v1035_v1 = vcombine.low %v1001_v59, %v1002_v60  ;;  %v13904_v24 = vcombine.high %v1092_v16, %v1096_v19  ;;  %v1117_v48 = vld [vmem:[#allocation7 + $0x158] sm:$0xff]  ;;  %v1124_v54 = vld [vmem:[#allocation7 + $0x190] sm:$0xff] }
 0x22c   : > { %v1034_v2 = vrot.slane %v1027_v61, %v16583_v25  ;;  %v13906_v26 = vcombine.high %v1093_v20, %v1097_v21  ;;  %v13905_v32 = vcombine.low %v1093_v20, %v1097_v21  ;;  %v13912_v33 = vcombine.high %v1100_v27, %v1104_v28  ;;  %v1121_v49 = vld [vmem:[#allocation7 + $0x178] sm:$0xff]  ;;  %v1128_v55 = vld [vmem:[#allocation7 + $0x1b0] sm:$0xff] }
 0x22d   : > { %v1042_v3 = vrot.slane %v1035_v1, %v16583_v25  ;;  %v1043_v4 = vcombine.low %v1018_v63, %v1026_v0  ;;  %v13911_v39 = vcombine.low %v1100_v27, %v1104_v28  ;;  %v13913_v42 = vcombine.low %v1101_v29, %v1105_v30  ;;  %v1125_v56 = vld [vmem:[#allocation7 + $0x198] sm:$0xff]  ;;  %v1132_v63 = vld [vmem:[#allocation7 + $0x1d0] sm:$0xff] }
 0x22e   : > { %v13922_v45 = vcombine.high %v1109_v35, %v1113_v38  ;;  %v13921_v51 = vcombine.low %v1109_v35, %v1113_v38  ;;  %v13928_v52 = vcombine.high %v1116_v46, %v1120_v47  ;;  %v13930_v53 = vcombine.high %v1117_v48, %v1121_v49  ;;  %v1129_v57 = vld [vmem:[#allocation7 + $0x1b8] sm:$0xff]  ;;  %v1136_v0 = vld [vmem:[#allocation7 + $0x1f0] sm:$0xff] }
 0x22f   : > { %v1044_v5 = vcombine.low %v1034_v2, %v1042_v3  ;;  %v1051_v6 = vrot.slane %v1043_v4, %v16583_v25  ;;  %v13927_v58 = vcombine.low %v1116_v46, %v1120_v47  ;;  %v13929_v59 = vcombine.low %v1117_v48, %v1121_v49  ;;  %v1133_v1 = vld [vmem:[#allocation7 + $0x1d8] sm:$0xff]  ;;  %v1144_v10 = vld [vmem:[#allocation7 + $0x230] sm:$0xff] }
 0x230   : > { %v13936_v60 = vcombine.high %v1124_v54, %v1128_v55  ;;  %v13938_v61 = vcombine.high %v1125_v56, %v1129_v57  ;;  %v1137_v2 = vld [vmem:[#allocation7 + $0x1f8] sm:$0xff]  ;;  %v13935_v3 = vcombine.low %v1124_v54, %v1128_v55  ;;  %v13937_v4 = vcombine.low %v1125_v56, %v1129_v57  ;;  %v1152_v19 = vld [vmem:[#allocation7 + $0x270] sm:$0xff] }
 0x231   : > { %v1058_v7 = vrot.slane %v1044_v5, %v16583_v25  ;;  %v13944_v5 = vcombine.high %v1132_v63, %v1136_v0  ;;  %v1141_v11 = vld [vmem:[#allocation7 + $0x218] sm:$0xff]  ;;  %v13943_v13 = vcombine.low %v1132_v63, %v1136_v0  ;;  %v1156_v27 = vld [vmem:[#allocation7 + $0x290] sm:$0xff] }
 0x232   : > { %v1145_v12 = vld [vmem:[#allocation7 + $0x238] sm:$0xff]  ;;  %v1160_v28 = vld [vmem:[#allocation7 + $0x2b0] sm:$0xff] }
 0x233   : > { %v16613_v8 = vcombine.high %v1051_v6, %v1058_v7  ;;  %v16615_v9 = vcombine.low %v1051_v6, %v1058_v7  ;;  %v13946_v6 = vcombine.high %v1133_v1, %v1137_v2  ;;  %v1140_v7 = vld [vmem:[#allocation7 + $0x210] sm:$0xff]  ;;  %v1149_v20 = vld [vmem:[#allocation7 + $0x258] sm:$0xff] }
 0x234   : > { %v13952_v16 = vcombine.high %v1140_v7, %v1144_v10  ;;  %v1153_v21 = vld [vmem:[#allocation7 + $0x278] sm:$0xff]  ;;  %v1172_v46 = vld [vmem:[#allocation7 + $0x310] sm:$0xff] }
 0x235   : > { %v1064_v14 = vpack.c.bf16 %v16613_v8, %v16613_v8  ;;  %v16621_v15 = vpack.c.bf16 %v16615_v9, %v16615_v9  ;;  %v1165_v35 = vld [vmem:[#allocation7 + $0x2d8] sm:$0xff]  ;;  %v1176_v47 = vld [vmem:[#allocation7 + $0x330] sm:$0xff] }
 0x236   : > { %v1169_v38 = vld [vmem:[#allocation7 + $0x2f8] sm:$0xff]  ;;  %v1180_v54 = vld [vmem:[#allocation7 + $0x350] sm:$0xff] }
 0x237   : > { %1874 = vmatprep.mubr.bf16.mxu1 %v1064_v14  ;;  %1915 = vmatprep.mubr.bf16.mxu0 %v1064_v14  ;;  %v1173_v48 = vld [vmem:[#allocation7 + $0x318] sm:$0xff]  ;;  %v1184_v55 = vld [vmem:[#allocation7 + $0x370] sm:$0xff] }
 0x238   : > { %1875 = vmatmul.mubr.bf16.vlgmr.msra.gmra.mrb[4].mxu1 %v16621_v15  ;;  %1916 = vmatmul.mubr.bf16.vlgmr.msra.gmra.mrb[8].mxu0 %v16621_v15  ;;  %v1177_v49 = vld [vmem:[#allocation7 + $0x338] sm:$0xff]  ;;  %v1188_v63 = vld [vmem:[#allocation7 + $0x390] sm:$0xff] }
 0x239   : > { %1925 = vmatpush1.bf16.msra.mxu1 %v13887_v34  ;;  %1966 = vmatpush1.bf16.msra.mxu0 %v13889_v37  ;;  %v13914_v34 = vcombine.high %v1101_v29, %v1105_v30  ;;  %v1112_v37 = vld [vmem:[#allocation7 + $0x130] sm:$0xff]  ;;  %v1157_v29 = vld [vmem:[#allocation7 + $0x298] sm:$0xff] }
 0x23a   : > { %1956 = vmatprep.mubr.bf16.mxu1 %v1064_v14  ;;  %1997 = vmatprep.mubr.bf16.mxu0 %v1064_v14  ;;  %v13920_v44 = vcombine.high %v1108_v36, %v1112_v37  ;;  %v13919_v50 = vcombine.low %v1108_v36, %v1112_v37  ;;  %v13945_v14 = vcombine.low %v1133_v1, %v1137_v2  ;;  %v1161_v30 = vld [vmem:[#allocation7 + $0x2b8] sm:$0xff]  ;;  %v1164_v36 = vld [vmem:[#allocation7 + $0x2d0] sm:$0xff] }
 0x23b   : > { %1926 = vmatprep.subr.bf16.mxu1 %v13896_v17  ;;  %1967 = vmatprep.subr.bf16.mxu0 %v13898_v18  ;;  %v13954_v17 = vcombine.high %v1141_v11, %v1145_v12  ;;  %v1148_v18 = vld [vmem:[#allocation7 + $0x250] sm:$0xff]  ;;  %v1181_v56 = vld [vmem:[#allocation7 + $0x358] sm:$0xff] }
 0x23c   : > { %v1168_v37 = vld [vmem:[#allocation7 + $0x2f0] sm:$0xff]  ;;  %v1185_v57 = vld [vmem:[#allocation7 + $0x378] sm:$0xff] }
 0x23d   : > { %1927 = vmatpush1.bf16.msra.mxu1 %v13895_v22  ;;  %1968 = vmatpush1.bf16.msra.mxu0 %v13897_v23  ;;  %v13951_v22 = vcombine.low %v1140_v7, %v1144_v10  ;;  %v13953_v23 = vcombine.low %v1141_v11, %v1145_v12  ;;  %v1192_v0 = vld [vmem:[#allocation7 + $0x3b0] sm:$0xff]  ;;  %v1189_v1 = vld [vmem:[#allocation7 + $0x398] sm:$0xff] }
 0x23e   : > { %1928 = vmatprep.subr.bf16.mxu1 %v13904_v24  ;;  %1969 = vmatprep.subr.bf16.mxu0 %v13906_v26  ;;  %v13960_v24 = vcombine.high %v1148_v18, %v1152_v19  ;;  %v13962_v26 = vcombine.high %v1149_v20, %v1153_v21  ;;  %v1193_v2 = vld [vmem:[#allocation7 + $0x3b8] sm:$0xff]  ;;  %v1196_v7 = vld [vmem:[#allocation7 + $0x3d0] sm:$0xff] }
 0x23f   : > { %v1200_v10 = vld [vmem:[#allocation7 + $0x3f0] sm:$0xff]  ;;  %v1197_v11 = vld [vmem:[#allocation7 + $0x3d8] sm:$0xff] }
 0x240   : > { %v1201_v12 = vld [vmem:[#allocation7 + $0x3f8] sm:$0xff] }
 0x241   : > { %1929 = vmatpush1.bf16.msra.mxu1 %v13903_v31  ;;  %1970 = vmatpush1.bf16.msra.mxu0 %v13905_v32  ;;  %v13959_v31 = vcombine.low %v1148_v18, %v1152_v19  ;;  %v13961_v32 = vcombine.low %v1149_v20, %v1153_v21  ;;  %v14007_v18 = vcombine.low %v1196_v7, %v1200_v10  ;;  %v15554_v20 = vld [vmem:[#allocation9 + $0x4] ss:$16 sps:$4 sm:$0xff]   ;;  %v15557_v21 = vld [vmem:[#allocation9 + $0xc] ss:$16 sps:$4 sm:$0xff]  }
 0x242   : > { %1930 = vmatprep.subr.bf16.mxu1 %v13912_v33  ;;  %1971 = vmatprep.subr.bf16.mxu0 %v13914_v34  ;;  %v13968_v33 = vcombine.high %v1156_v27, %v1160_v28  ;;  %v13970_v34 = vcombine.high %v1157_v29, %v1161_v30  ;;  %v14009_v19 = vcombine.low %v1197_v11, %v1201_v12 }
 0x245   : > { %1931 = vmatpush1.bf16.msra.mxu1 %v13911_v39  ;;  %1972 = vmatpush1.bf16.msra.mxu0 %v13913_v42  ;;  %v13967_v39 = vcombine.low %v1156_v27, %v1160_v28  ;;  %v13969_v42 = vcombine.low %v1157_v29, %v1161_v30  ;;  %v15560_v28 = vld [vmem:[#allocation9 + $0x24] ss:$16 sps:$4 sm:$0xff]   ;;  %v15563_v29 = vld [vmem:[#allocation9 + $0x2c] ss:$16 sps:$4 sm:$0xff]   ;;  %v15561_v30 = vld [vmem:[#allocation9 + $0x28] ss:$16 sps:$4 sm:$0xff]  }
 0x246   : > { %1932 = vmatprep.subr.bf16.mxu1 %v13920_v44  ;;  %1973 = vmatprep.subr.bf16.mxu0 %v13922_v45  ;;  %v13976_v44 = vcombine.high %v1164_v36, %v1168_v37  ;;  %v13978_v45 = vcombine.high %v1165_v35, %v1169_v38 }
 0x249   : > { %1933 = vmatpush1.bf16.msra.mxu1 %v13919_v50  ;;  %1974 = vmatpush1.bf16.msra.mxu0 %v13921_v51  ;;  %v13975_v50 = vcombine.low %v1164_v36, %v1168_v37  ;;  %v13977_v51 = vcombine.low %v1165_v35, %v1169_v38  ;;  %v15575_v36 = vld [vmem:[#allocation9 + $0x6c] ss:$16 sps:$4 sm:$0xff]   ;;  %v15570_v37 = vld [vmem:[#allocation9 + $0x60] ss:$16 sps:$4 sm:$0xff]   ;;  %v15573_v35 = vld [vmem:[#allocation9 + $0x68] ss:$16 sps:$4 sm:$0xff]  }
 0x24a   : > { %1934 = vmatprep.subr.bf16.mxu1 %v13928_v52  ;;  %1975 = vmatprep.subr.bf16.mxu0 %v13930_v53  ;;  %v13984_v52 = vcombine.high %v1172_v46, %v1176_v47  ;;  %v13986_v53 = vcombine.high %v1173_v48, %v1177_v49  ;;  %v15578_v38 = vld [vmem:[#allocation9 + $0x84] ss:$16 sps:$4 sm:$0xff]  }
 0x24d   : > { %1935 = vmatpush1.bf16.msra.mxu1 %v13927_v58  ;;  %1976 = vmatpush1.bf16.msra.mxu0 %v13929_v59  ;;  %v13983_v58 = vcombine.low %v1172_v46, %v1176_v47  ;;  %v13985_v59 = vcombine.low %v1173_v48, %v1177_v49  ;;  %v15587_v46 = vld [vmem:[#allocation9 + $0xac] ss:$16 sps:$4 sm:$0xff]   ;;  %v15582_v47 = vld [vmem:[#allocation9 + $0xa0] ss:$16 sps:$4 sm:$0xff]   ;;  %v15585_v48 = vld [vmem:[#allocation9 + $0xa8] ss:$16 sps:$4 sm:$0xff]  }
 0x24e   : > { %1936 = vmatprep.subr.bf16.mxu1 %v13936_v60  ;;  %1977 = vmatprep.subr.bf16.mxu0 %v13938_v61  ;;  %v13992_v60 = vcombine.high %v1180_v54, %v1184_v55  ;;  %v13994_v61 = vcombine.high %v1181_v56, %v1185_v57  ;;  %v15590_v49 = vld [vmem:[#allocation9 + $0xc4] ss:$16 sps:$4 sm:$0xff]  }
 0x251   : > { %1937 = vmatpush1.bf16.msra.mxu1 %v13935_v3  ;;  %1978 = vmatpush1.bf16.msra.mxu0 %v13937_v4  ;;  %v13991_v3 = vcombine.low %v1180_v54, %v1184_v55  ;;  %v13993_v4 = vcombine.low %v1181_v56, %v1185_v57  ;;  %v15599_v54 = vld [vmem:[#allocation9 + $0xec] ss:$16 sps:$4 sm:$0xff]   ;;  %v15594_v55 = vld [vmem:[#allocation9 + $0xe0] ss:$16 sps:$4 sm:$0xff]   ;;  %v15597_v56 = vld [vmem:[#allocation9 + $0xe8] ss:$16 sps:$4 sm:$0xff]  }
 0x252   : > { %1938 = vmatprep.subr.bf16.mxu1 %v13944_v5  ;;  %1979 = vmatprep.subr.bf16.mxu0 %v13946_v6  ;;  %v14000_v5 = vcombine.high %v1188_v63, %v1192_v0  ;;  %v14002_v6 = vcombine.high %v1189_v1, %v1193_v2  ;;  %v15602_v57 = vld [vmem:[#allocation9 + $0x104] ss:$16 sps:$4 sm:$0xff]  }
 0x255   : > { %1939 = vmatpush1.bf16.msra.mxu1 %v13943_v13  ;;  %1980 = vmatpush1.bf16.msra.mxu0 %v13945_v14  ;;  %v13999_v13 = vcombine.low %v1188_v63, %v1192_v0  ;;  %v14001_v14 = vcombine.low %v1189_v1, %v1193_v2  ;;  %v15611_v63 = vld [vmem:[#allocation9 + $0x12c] ss:$16 sps:$4 sm:$0xff]   ;;  %v15606_v0 = vld [vmem:[#allocation9 + $0x120] ss:$16 sps:$4 sm:$0xff]   ;;  %v15609_v1 = vld [vmem:[#allocation9 + $0x128] ss:$16 sps:$4 sm:$0xff]  }
 0x256   : > { %1940 = vmatprep.subr.bf16.mxu1 %v13952_v16  ;;  %1981 = vmatprep.subr.bf16.mxu0 %v13954_v17  ;;  %v14008_v16 = vcombine.high %v1196_v7, %v1200_v10  ;;  %v14010_v17 = vcombine.high %v1197_v11, %v1201_v12  ;;  %v15614_v2 = vld [vmem:[#allocation9 + $0x144] ss:$16 sps:$4 sm:$0xff]   ;;  %v15623_v7 = vld [vmem:[#allocation9 + $0x16c] ss:$16 sps:$4 sm:$0xff]   ;;  %v15618_v10 = vld [vmem:[#allocation9 + $0x160] ss:$16 sps:$4 sm:$0xff]  }
 0x257   : > { %v15621_v11 = vld [vmem:[#allocation9 + $0x168] ss:$16 sps:$4 sm:$0xff]   ;;  %v15626_v12 = vld [vmem:[#allocation9 + $0x184] ss:$16 sps:$4 sm:$0xff]  }
 0x259   : > { %1941 = vmatpush1.bf16.msra.mxu1 %v13951_v22  ;;  %1982 = vmatpush1.bf16.msra.mxu0 %v13953_v23  ;;  %v1066_v22 = vrot.slane %v16613_v8, 1  ;;  %v15552_v23 = vld [vmem:[#allocation9] ss:$16 sps:$4 sm:$0xff]  }
 0x25a   : > { %1942 = vmatprep.subr.bf16.mxu1 %v13960_v24  ;;  %1983 = vmatprep.subr.bf16.mxu0 %v13962_v26  ;;  %v15555_v24 = vld [vmem:[#allocation9 + $0x8] ss:$16 sps:$4 sm:$0xff]   ;;  %v15558_v8 = vld [vmem:[#allocation9 + $0x20] ss:$16 sps:$4 sm:$0xff]  }
 0x25b   : > { %v14076_v27 = vpack.c.bf16 %v1066_v22, %v1066_v22  ;;  %v15641_v22 = vld [vmem:[#allocation9 + $0x1cc] ss:$16 sps:$4 sm:$0xff]  }
 0x25c   : > { %v3331_v26 = vld [vmem:[#allocation12 + $0x148] sm:$0xff] }
 0x25d   : > { %1943 = vmatpush1.bf16.msra.mxu1 %v13959_v31  ;;  %1984 = vmatpush1.bf16.msra.mxu0 %v13961_v32  ;;  %v15566_v31 = vld [vmem:[#allocation9 + $0x44] ss:$16 sps:$4 sm:$0xff]   ;;  %v15569_v32 = vld [vmem:[#allocation9 + $0x4c] ss:$16 sps:$4 sm:$0xff]  }
 0x25e   : > { %1944 = vmatprep.subr.bf16.mxu1 %v13968_v33  ;;  %1985 = vmatprep.subr.bf16.mxu0 %v13970_v34  ;;  %v15564_v33 = vld [vmem:[#allocation9 + $0x40] ss:$16 sps:$4 sm:$0xff]   ;;  %v15567_v34 = vld [vmem:[#allocation9 + $0x48] ss:$16 sps:$4 sm:$0xff]  }
 0x261   : > { %1945 = vmatpush1.bf16.msra.mxu1 %v13967_v39  ;;  %1986 = vmatpush1.bf16.msra.mxu0 %v13969_v42  ;;  %v15581_v39 = vld [vmem:[#allocation9 + $0x8c] ss:$16 sps:$4 sm:$0xff]   ;;  %v15576_v42 = vld [vmem:[#allocation9 + $0x80] ss:$16 sps:$4 sm:$0xff]  }
 0x262   : > { %1946 = vmatprep.subr.bf16.mxu1 %v13976_v44  ;;  %1987 = vmatprep.subr.bf16.mxu0 %v13978_v45  ;;  %v15579_v44 = vld [vmem:[#allocation9 + $0x88] ss:$16 sps:$4 sm:$0xff]   ;;  %v15584_v45 = vld [vmem:[#allocation9 + $0xa4] ss:$16 sps:$4 sm:$0xff]  }
 0x265   : > { %1947 = vmatpush1.bf16.msra.mxu1 %v13975_v50  ;;  %1988 = vmatpush1.bf16.msra.mxu0 %v13977_v51  ;;  %v15593_v50 = vld [vmem:[#allocation9 + $0xcc] ss:$16 sps:$4 sm:$0xff]   ;;  %v15588_v51 = vld [vmem:[#allocation9 + $0xc0] ss:$16 sps:$4 sm:$0xff]  }
 0x266   : > { %1948 = vmatprep.subr.bf16.mxu1 %v13984_v52  ;;  %1989 = vmatprep.subr.bf16.mxu0 %v13986_v53  ;;  %v15591_v52 = vld [vmem:[#allocation9 + $0xc8] ss:$16 sps:$4 sm:$0xff]   ;;  %v15596_v53 = vld [vmem:[#allocation9 + $0xe4] ss:$16 sps:$4 sm:$0xff]  }
 0x269   : > { %1949 = vmatpush1.bf16.msra.mxu1 %v13983_v58  ;;  %1990 = vmatpush1.bf16.msra.mxu0 %v13985_v59  ;;  %v15605_v58 = vld [vmem:[#allocation9 + $0x10c] ss:$16 sps:$4 sm:$0xff]   ;;  %v15600_v59 = vld [vmem:[#allocation9 + $0x100] ss:$16 sps:$4 sm:$0xff]  }
 0x26a   : > { %1950 = vmatprep.subr.bf16.mxu1 %v13992_v60  ;;  %1991 = vmatprep.subr.bf16.mxu0 %v13994_v61  ;;  %v15603_v60 = vld [vmem:[#allocation9 + $0x108] ss:$16 sps:$4 sm:$0xff]   ;;  %v15608_v61 = vld [vmem:[#allocation9 + $0x124] ss:$16 sps:$4 sm:$0xff]  }
 0x26d   : > { %1951 = vmatpush1.bf16.msra.mxu1 %v13991_v3  ;;  %1992 = vmatpush1.bf16.msra.mxu0 %v13993_v4  ;;  %v15617_v3 = vld [vmem:[#allocation9 + $0x14c] ss:$16 sps:$4 sm:$0xff]   ;;  %v15612_v4 = vld [vmem:[#allocation9 + $0x140] ss:$16 sps:$4 sm:$0xff]  }
 0x26e   : > { %1952 = vmatprep.subr.bf16.mxu1 %v14000_v5  ;;  %1993 = vmatprep.subr.bf16.mxu0 %v14002_v6  ;;  %v15615_v5 = vld [vmem:[#allocation9 + $0x148] ss:$16 sps:$4 sm:$0xff]   ;;  %v15620_v6 = vld [vmem:[#allocation9 + $0x164] ss:$16 sps:$4 sm:$0xff]  }
 0x271   : > { %1953 = vmatpush1.bf16.msra.mxu1 %v13999_v13  ;;  %1994 = vmatpush1.bf16.msra.mxu0 %v14001_v14  ;;  %v15629_v13 = vld [vmem:[#allocation9 + $0x18c] ss:$16 sps:$4 sm:$0xff]   ;;  %v15624_v14 = vld [vmem:[#allocation9 + $0x180] ss:$16 sps:$4 sm:$0xff]  }
 0x272   : > { %1954 = vmatprep.subr.bf16.mxu1 %v14008_v16  ;;  %1995 = vmatprep.subr.bf16.mxu0 %v14010_v17  ;;  %v15627_v16 = vld [vmem:[#allocation9 + $0x188] ss:$16 sps:$4 sm:$0xff]   ;;  %v15632_v17 = vld [vmem:[#allocation9 + $0x1a4] ss:$16 sps:$4 sm:$0xff]  }
 0x275   : > { %1955 = vmatpush1.bf16.msra.mxu1 %v14007_v18  ;;  %1996 = vmatpush1.bf16.msra.mxu0 %v14009_v19  ;;  %v15635_v18 = vld [vmem:[#allocation9 + $0x1ac] ss:$16 sps:$4 sm:$0xff]   ;;  %v15630_v19 = vld [vmem:[#allocation9 + $0x1a0] ss:$16 sps:$4 sm:$0xff]  }
 0x276   : > { %2390 = vmatprep.subr.bf16.mxu1 %v15554_v20  ;;  %2431 = vmatprep.subr.bf16.mxu0 %v15557_v21  ;;  %v15633_v20 = vld [vmem:[#allocation9 + $0x1a8] ss:$16 sps:$4 sm:$0xff]   ;;  %v15638_v21 = vld [vmem:[#allocation9 + $0x1c4] ss:$16 sps:$4 sm:$0xff]  }
 0x278   : > { %1957 = vmatmul.mubr.bf16.vlgmr.msra.gmra.mrb[8].mxu1 %v16621_v15  ;;  %1998 = vmatmul.mubr.bf16.vlgmr.msra.gmra.mrb[12].mxu0 %v16621_v15  ;;  %v15572_v15 = vld [vmem:[#allocation9 + $0x64] ss:$16 sps:$4 sm:$0xff]  }
 0x279   : > { %2391 = vmatpush1.bf16.msra.mxu1 %v15552_v23  ;;  %14077 = vmatprep.mubr.msk.bf16.mxu1 %vm16634_vm4, %v14076_v27  ;;  %v15636_v23 = vld [vmem:[#allocation9 + $0x1c0] ss:$16 sps:$4 sm:$0xff]  }
 0x27a   : > { %2432 = vmatpush1.bf16.msra.mxu0 %v15555_v24  ;;  %14083 = vmatprep.mubr.msk.bf16.mxu0 %vm16634_vm4, %v14076_v27  ;;  %v15639_v24 = vld [vmem:[#allocation9 + $0x1c8] ss:$16 sps:$4 sm:$0xff]   ;;  %v15644_v27 = vld [vmem:[#allocation9 + $0x1e4] ss:$16 sps:$4 sm:$0xff]  }
 0x27b   : > { %2392 = vmatprep.subr.bf16.mxu1 %v15560_v28  ;;  %2433 = vmatprep.subr.bf16.mxu0 %v15563_v29  ;;  %v15647_v28 = vld [vmem:[#allocation9 + $0x1ec] ss:$16 sps:$4 sm:$0xff]   ;;  %v15642_v29 = vld [vmem:[#allocation9 + $0x1e0] ss:$16 sps:$4 sm:$0xff]  }
 0x27d   : > { %2393 = vmatpush1.bf16.msra.mxu1 %v15558_v8  ;;  %v1065_v8 = vrot.slane %v16615_v9, 1  ;;  %v3306_v9 = vld [vmem:[#allocation12 + $0x80] sm:$0xff] }
 0x27e   : > { %2434 = vmatpush1.bf16.msra.mxu0 %v15561_v30  ;;  %2394 = vmatprep.subr.bf16.mxu1 %v15566_v31  ;;  %v15645_v30 = vld [vmem:[#allocation9 + $0x1e8] ss:$16 sps:$4 sm:$0xff]  }
 0x27f   : > { %2435 = vmatprep.subr.bf16.mxu0 %v15569_v32  ;;  %v14079_v31 = vpack.c.bf16 %v1065_v8, %v1065_v8  ;;  %v3290_v32 = vld [vmem:[#allocation12] sm:$0xff]  ;;  %v3403_v8 = vld [vmem:[#allocation12 + $0x388] sm:$0xff] }
 0x281   : > { %2395 = vmatpush1.bf16.msra.mxu1 %v15564_v33  ;;  %v3298_v33 = vld [vmem:[#allocation12 + $0x40] sm:$0xff] }
 0x282   : > { %2436 = vmatpush1.bf16.msra.mxu0 %v15567_v34  ;;  %2396 = vmatprep.subr.bf16.mxu1 %v15572_v15  ;;  %v3291_v34 = vld [vmem:[#allocation12 + $0x8] sm:$0xff]  ;;  %v14095_v15 = vcombine.low %v3290_v32, %v3298_v33 }
 0x283   : > { %2437 = vmatprep.subr.bf16.mxu0 %v15575_v36  ;;  %v14096_v36 = vcombine.high %v3290_v32, %v3298_v33 }
 0x285   : > { %2397 = vmatpush1.bf16.msra.mxu1 %v15570_v37  ;;  %v3299_v37 = vld [vmem:[#allocation12 + $0x48] sm:$0xff] }
 0x286   : > { %2438 = vmatpush1.bf16.msra.mxu0 %v15573_v35  ;;  %2398 = vmatprep.subr.bf16.mxu1 %v15578_v38  ;;  %v3314_v35 = vld [vmem:[#allocation12 + $0xc0] sm:$0xff]  ;;  %v14097_v38 = vcombine.low %v3291_v34, %v3299_v37 }
 0x287   : > { %2439 = vmatprep.subr.bf16.mxu0 %v15581_v39  ;;  %v14098_v39 = vcombine.high %v3291_v34, %v3299_v37  ;;  %v16650_v37 = vsub.s32 2, %v16561_v40 }
 0x289   : > { %2399 = vmatpush1.bf16.msra.mxu1 %v15576_v42  ;;  %v14112_v42 = vcombine.high %v3306_v9, %v3314_v35 }
 0x28a   : > { %2440 = vmatpush1.bf16.msra.mxu0 %v15579_v44  ;;  %2400 = vmatprep.subr.bf16.mxu1 %v15584_v45  ;;  %v3307_v44 = vld [vmem:[#allocation12 + $0x88] sm:$0xff] }
 0x28b   : > { %2441 = vmatprep.subr.bf16.mxu0 %v15587_v46  ;;  %v3315_v45 = vld [vmem:[#allocation12 + $0xc8] sm:$0xff]  ;;  %v3322_v46 = vld [vmem:[#allocation12 + $0x100] sm:$0xff] }
 0x28d   : > { %2401 = vmatpush1.bf16.msra.mxu1 %v15582_v47  ;;  %v14114_v47 = vcombine.high %v3307_v44, %v3315_v45 }
 0x28e   : > { %2442 = vmatpush1.bf16.msra.mxu0 %v15585_v48  ;;  %2402 = vmatprep.subr.bf16.mxu1 %v15590_v49  ;;  %v3330_v48 = vld [vmem:[#allocation12 + $0x140] sm:$0xff]  ;;  %v3323_v49 = vld [vmem:[#allocation12 + $0x108] sm:$0xff] }
 0x28f   : > { %2443 = vmatprep.subr.bf16.mxu0 %v15593_v50  ;;  %v14111_v50 = vcombine.low %v3306_v9, %v3314_v35  ;;  %v2472_v9 = vld [vmem:[#allocation10] sm:$0xf]  ;;  %v16653_v35 = vsub.s32 3, %v16561_v40 }
 0x291   : > { %2403 = vmatpush1.bf16.msra.mxu1 %v15588_v51  ;;  %v14113_v51 = vcombine.low %v3307_v44, %v3315_v45  ;;  %v16665_v44 = vrot.slane %v2472_v9, %v16653_v35 }
 0x292   : > { %2444 = vmatpush1.bf16.msra.mxu0 %v15591_v52  ;;  %2404 = vmatprep.subr.bf16.mxu1 %v15596_v53  ;;  %v14128_v52 = vcombine.high %v3322_v46, %v3330_v48  ;;  %v14130_v53 = vcombine.high %v3323_v49, %v3331_v26 }
 0x293   : > { %2445 = vmatprep.subr.bf16.mxu0 %v15599_v54  ;;  %v3338_v54 = vld [vmem:[#allocation12 + $0x180] sm:$0xff] }
 0x295   : > { %2405 = vmatpush1.bf16.msra.mxu1 %v15594_v55  ;;  %v3346_v55 = vld [vmem:[#allocation12 + $0x1c0] sm:$0xff] }
 0x296   : > { %2446 = vmatpush1.bf16.msra.mxu0 %v15597_v56  ;;  %2406 = vmatprep.subr.bf16.mxu1 %v15602_v57  ;;  %v3339_v56 = vld [vmem:[#allocation12 + $0x188] sm:$0xff] }
 0x297   : > { %2447 = vmatprep.subr.bf16.mxu0 %v15605_v58  ;;  %v3347_v57 = vld [vmem:[#allocation12 + $0x1c8] sm:$0xff]  ;;  %v14127_v58 = vcombine.low %v3322_v46, %v3330_v48 }
 0x299   : > { %2407 = vmatpush1.bf16.msra.mxu1 %v15600_v59  ;;  %v14129_v59 = vcombine.low %v3323_v49, %v3331_v26 }
 0x29a   : > { %2448 = vmatpush1.bf16.msra.mxu0 %v15603_v60  ;;  %2408 = vmatprep.subr.bf16.mxu1 %v15608_v61  ;;  %v14144_v60 = vcombine.high %v3338_v54, %v3346_v55  ;;  %v14146_v61 = vcombine.high %v3339_v56, %v3347_v57 }
 0x29b   : > { %2449 = vmatprep.subr.bf16.mxu0 %v15611_v63  ;;  %v3354_v63 = vld [vmem:[#allocation12 + $0x200] sm:$0xff] }
 0x29d   : > { %2409 = vmatpush1.bf16.msra.mxu1 %v15606_v0  ;;  %v3362_v0 = vld [vmem:[#allocation12 + $0x240] sm:$0xff] }
 0x29e   : > { %2450 = vmatpush1.bf16.msra.mxu0 %v15609_v1  ;;  %2410 = vmatprep.subr.bf16.mxu1 %v15614_v2  ;;  %v3355_v1 = vld [vmem:[#allocation12 + $0x208] sm:$0xff] }
 0x29f   : > { %2451 = vmatprep.subr.bf16.mxu0 %v15617_v3  ;;  %v3363_v2 = vld [vmem:[#allocation12 + $0x248] sm:$0xff]  ;;  %v14143_v3 = vcombine.low %v3338_v54, %v3346_v55 }
 0x2a1   : > { %2411 = vmatpush1.bf16.msra.mxu1 %v15612_v4  ;;  %v14145_v4 = vcombine.low %v3339_v56, %v3347_v57 }
 0x2a2   : > { %2452 = vmatpush1.bf16.msra.mxu0 %v15615_v5  ;;  %2412 = vmatprep.subr.bf16.mxu1 %v15620_v6  ;;  %v14160_v5 = vcombine.high %v3354_v63, %v3362_v0  ;;  %v14162_v6 = vcombine.high %v3355_v1, %v3363_v2 }
 0x2a3   : > { %2453 = vmatprep.subr.bf16.mxu0 %v15623_v7  ;;  %v3370_v7 = vld [vmem:[#allocation12 + $0x280] sm:$0xff] }
 0x2a5   : > { %2413 = vmatpush1.bf16.msra.mxu1 %v15618_v10  ;;  %v3378_v10 = vld [vmem:[#allocation12 + $0x2c0] sm:$0xff] }
 0x2a6   : > { %2454 = vmatpush1.bf16.msra.mxu0 %v15621_v11  ;;  %2414 = vmatprep.subr.bf16.mxu1 %v15626_v12  ;;  %v3371_v11 = vld [vmem:[#allocation12 + $0x288] sm:$0xff] }
 0x2a7   : > { %2455 = vmatprep.subr.bf16.mxu0 %v15629_v13  ;;  %v3379_v12 = vld [vmem:[#allocation12 + $0x2c8] sm:$0xff]  ;;  %v14159_v13 = vcombine.low %v3354_v63, %v3362_v0 }
 0x2a9   : > { %2415 = vmatpush1.bf16.msra.mxu1 %v15624_v14  ;;  %v14161_v14 = vcombine.low %v3355_v1, %v3363_v2 }
 0x2aa   : > { %2456 = vmatpush1.bf16.msra.mxu0 %v15627_v16  ;;  %2416 = vmatprep.subr.bf16.mxu1 %v15632_v17  ;;  %v14176_v16 = vcombine.high %v3370_v7, %v3378_v10  ;;  %v14178_v17 = vcombine.high %v3371_v11, %v3379_v12 }
 0x2ab   : > { %2457 = vmatprep.subr.bf16.mxu0 %v15635_v18  ;;  %v3386_v18 = vld [vmem:[#allocation12 + $0x300] sm:$0xff] }
 0x2ad   : > { %2417 = vmatpush1.bf16.msra.mxu1 %v15630_v19  ;;  %v3394_v19 = vld [vmem:[#allocation12 + $0x340] sm:$0xff] }
 0x2ae   : > { %2458 = vmatpush1.bf16.msra.mxu0 %v15633_v20  ;;  %2418 = vmatprep.subr.bf16.mxu1 %v15638_v21  ;;  %v3387_v20 = vld [vmem:[#allocation12 + $0x308] sm:$0xff] }
 0x2af   : > { %2459 = vmatprep.subr.bf16.mxu0 %v15641_v22  ;;  %v3395_v21 = vld [vmem:[#allocation12 + $0x348] sm:$0xff]  ;;  %v14175_v22 = vcombine.low %v3370_v7, %v3378_v10 }
 0x2b0   : > { %v14193_v32 = vcombine.low %v3387_v20, %v3395_v21 }
 0x2b1   : > { %2419 = vmatpush1.bf16.msra.mxu1 %v15636_v23  ;;  %v14177_v23 = vcombine.low %v3371_v11, %v3379_v12  ;;  %v3418_v11 = vld [vmem:[#allocation12 + $0x400] sm:$0xff] }
 0x2b2   : > { %2460 = vmatpush1.bf16.msra.mxu0 %v15639_v24  ;;  %2420 = vmatprep.subr.bf16.mxu1 %v15644_v27  ;;  %v14192_v24 = vcombine.high %v3386_v18, %v3394_v19  ;;  %v14194_v27 = vcombine.high %v3387_v20, %v3395_v21  ;;  %v3426_v12 = vld [vmem:[#allocation12 + $0x440] sm:$0xff] }
 0x2b3   : > { %2461 = vmatprep.subr.bf16.mxu0 %v15647_v28  ;;  %v3402_v28 = vld [vmem:[#allocation12 + $0x380] sm:$0xff]  ;;  %v14223_v20 = vcombine.low %v3418_v11, %v3426_v12  ;;  %v14224_v21 = vcombine.high %v3418_v11, %v3426_v12 }
 0x2b4   : > { %v3514_v12 = vld [vmem:[#allocation12 + $0x700] sm:$0xff] }
 0x2b5   : > { %2421 = vmatpush1.bf16.msra.mxu1 %v15642_v29  ;;  %v3410_v29 = vld [vmem:[#allocation12 + $0x3c0] sm:$0xff] }
 0x2b6   : > { %2462 = vmatpush1.bf16.msra.mxu0 %v15645_v30  ;;  %6362 = vmatprep.subr.bf16.mxu1 %v14096_v36  ;;  %v3411_v30 = vld [vmem:[#allocation12 + $0x3c8] sm:$0xff]  ;;  %v14208_v33 = vcombine.high %v3402_v28, %v3410_v29 }
 0x2b7   : > { %6448 = vmatprep.subr.bf16.mxu0 %v14098_v39  ;;  %v14210_v34 = vcombine.high %v3403_v8, %v3411_v30  ;;  %v14209_v36 = vcombine.low %v3403_v8, %v3411_v30  ;;  %v16659_v39 = vrot.slane %v2472_v9, %v16650_v37  ;;  %v3451_v8 = vld [vmem:[#allocation12 + $0x508] sm:$0xff] }
 0x2b8   : > { %14080 = vmatmul.mubr.msk.bf16.vlgmr.msra.gmra.mrb[12].mxu1 %vm16634_vm4, %v14079_v31 }
 0x2b9   : > { %14086 = vmatmul.mubr.msk.bf16.vlgmr.msra.gmra.mrb[16].mxu0 %vm16634_vm4, %v14079_v31  ;;  %6363 = vmatpush1.bf16.msra.mxu1 %v14095_v15  ;;  %v14191_v31 = vcombine.low %v3386_v18, %v3394_v19  ;;  %v14207_v15 = vcombine.low %v3402_v28, %v3410_v29  ;;  %v3435_v18 = vld [vmem:[#allocation12 + $0x488] sm:$0xff]  ;;  %v3450_v28 = vld [vmem:[#allocation12 + $0x500] sm:$0xff] }
 0x2ba   : > { %6449 = vmatpush1.bf16.msra.mxu0 %v14097_v38  ;;  %6364 = vmatprep.subr.bf16.mxu1 %v14112_v42  ;;  %v16656_v38 = vrot.slane %v2472_v9, %v16564_v41  ;;  %v16662_v42 = vrot.slane %v2472_v9, %v16567_v43  ;;  %v3443_v19 = vld [vmem:[#allocation12 + $0x4c8] sm:$0xff]  ;;  %v3458_v29 = vld [vmem:[#allocation12 + $0x540] sm:$0xff] }
 0x2bb   : > { %6450 = vmatprep.subr.bf16.mxu0 %v14114_v47  ;;  %v3467_v9 = vld [vmem:[#allocation12 + $0x588] sm:$0xff] }
 0x2bd   : > { %6365 = vmatpush1.bf16.msra.mxu1 %v14111_v50 }
 0x2be   : > { %6451 = vmatpush1.bf16.msra.mxu0 %v14113_v51  ;;  %6366 = vmatprep.subr.bf16.mxu1 %v14128_v52 }
 0x2bf   : > { %6452 = vmatprep.subr.bf16.mxu0 %v14130_v53 }
 0x2c1   : > { %6367 = vmatpush1.bf16.msra.mxu1 %v14127_v58 }
 0x2c2   : > { %6453 = vmatpush1.bf16.msra.mxu0 %v14129_v59  ;;  %6368 = vmatprep.subr.bf16.mxu1 %v14144_v60 }
 0x2c3   : > { %6454 = vmatprep.subr.bf16.mxu0 %v14146_v61 }
 0x2c5   : > { %6369 = vmatpush1.bf16.msra.mxu1 %v14143_v3 }
 0x2c6   : > { %6455 = vmatpush1.bf16.msra.mxu0 %v14145_v4  ;;  %6370 = vmatprep.subr.bf16.mxu1 %v14160_v5 }
 0x2c7   : > { %6456 = vmatprep.subr.bf16.mxu0 %v14162_v6 }
 0x2c9   : > { %6371 = vmatpush1.bf16.msra.mxu1 %v14159_v13  ;;  %v3419_v13 = vld [vmem:[#allocation12 + $0x408] sm:$0xff] }
 0x2ca   : > { %6457 = vmatpush1.bf16.msra.mxu0 %v14161_v14  ;;  %6372 = vmatprep.subr.bf16.mxu1 %v14176_v16  ;;  %v3427_v14 = vld [vmem:[#allocation12 + $0x448] sm:$0xff]  ;;  %v3434_v16 = vld [vmem:[#allocation12 + $0x480] sm:$0xff] }
 0x2cb   : > { %6458 = vmatprep.subr.bf16.mxu0 %v14178_v17  ;;  %v3442_v17 = vld [vmem:[#allocation12 + $0x4c0] sm:$0xff] }
 0x2cc   : > { %v14239_v30 = vcombine.low %v3434_v16, %v3442_v17 }
 0x2cd   : > { %6373 = vmatpush1.bf16.msra.mxu1 %v14175_v22  ;;  %v14225_v22 = vcombine.low %v3419_v13, %v3427_v14 }
 0x2ce   : > { %6459 = vmatpush1.bf16.msra.mxu0 %v14177_v23  ;;  %6374 = vmatprep.subr.bf16.mxu1 %v14192_v24  ;;  %v14226_v23 = vcombine.high %v3419_v13, %v3427_v14  ;;  %v14240_v24 = vcombine.high %v3434_v16, %v3442_v17  ;;  %v3522_v13 = vld [vmem:[#allocation12 + $0x740] sm:$0xff]  ;;  %v3515_v14 = vld [vmem:[#allocation12 + $0x708] sm:$0xff] }
 0x2cf   : > { %6460 = vmatprep.subr.bf16.mxu0 %v14194_v27  ;;  %v14242_v27 = vcombine.high %v3435_v18, %v3443_v19 }
 0x2d1   : > { %6375 = vmatpush1.bf16.msra.mxu1 %v14191_v31  ;;  %v14241_v31 = vcombine.low %v3435_v18, %v3443_v19  ;;  %v3523_v18 = vld [vmem:[#allocation12 + $0x748] sm:$0xff]  ;;  %v14320_v19 = vcombine.high %v3514_v12, %v3522_v13 }
 0x2d2   : > { %6461 = vmatpush1.bf16.msra.mxu0 %v14193_v32  ;;  %6376 = vmatprep.subr.bf16.mxu1 %v14208_v33  ;;  %v3459_v32 = vld [vmem:[#allocation12 + $0x548] sm:$0xff]  ;;  %v14256_v33 = vcombine.high %v3450_v28, %v3458_v29 }
 0x2d3   : > { %6462 = vmatprep.subr.bf16.mxu0 %v14210_v34  ;;  %v14258_v34 = vcombine.high %v3451_v8, %v3459_v32 }
 0x2d5   : > { %6377 = vmatpush1.bf16.msra.mxu1 %v14207_v15  ;;  %v3466_v15 = vld [vmem:[#allocation12 + $0x580] sm:$0xff] }
 0x2d6   : > { %6463 = vmatpush1.bf16.msra.mxu0 %v14209_v36  ;;  %6378 = vmatprep.subr.bf16.mxu1 %v14224_v21  ;;  %v3474_v36 = vld [vmem:[#allocation12 + $0x5c0] sm:$0xff] }
 0x2d7   : > { %6464 = vmatprep.subr.bf16.mxu0 %v14226_v23  ;;  %v3530_v21 = vld [vmem:[#allocation12 + $0x780] sm:$0xff]  ;;  %v3531_v23 = vld [vmem:[#allocation12 + $0x788] sm:$0xff] }
 0x2d9   : > { %6379 = vmatpush1.bf16.msra.mxu1 %v14223_v20  ;;  %v14322_v20 = vcombine.high %v3515_v14, %v3523_v18 }
 0x2da   : > { %6465 = vmatpush1.bf16.msra.mxu0 %v14225_v22  ;;  %6380 = vmatprep.subr.bf16.mxu1 %v14240_v24  ;;  %v3538_v22 = vld [vmem:[#allocation12 + $0x7c0] sm:$0xff]  ;;  %v3539_v24 = vld [vmem:[#allocation12 + $0x7c8] sm:$0xff] }
 0x2db   : > { %6466 = vmatprep.subr.bf16.mxu0 %v14242_v27  ;;  %v14319_v27 = vcombine.low %v3514_v12, %v3522_v13 }
 0x2dd   : > { %6381 = vmatpush1.bf16.msra.mxu1 %v14239_v30  ;;  %v16691_v30 = vld [vmem:[#allocation12 + $0x800] sm:$0xff] }
 0x2de   : > { %6467 = vmatpush1.bf16.msra.mxu0 %v14241_v31  ;;  %6382 = vmatprep.subr.bf16.mxu1 %v14256_v33  ;;  %v16693_v31 = vld [vmem:[#allocation12 + $0x840] sm:$0xff]  ;;  %v14335_v33 = vcombine.low %v3530_v21, %v3538_v22 }
 0x2df   : > { %6468 = vmatprep.subr.bf16.mxu0 %v14258_v34  ;;  %v14337_v34 = vcombine.low %v3531_v23, %v3539_v24 }
 0x30b   : > { %v1876_v45 = vpop.f32.mrb[4].mxu1  ;;  %v1917_v46 = vpop.f32.mrb[8].mxu0 }
 0x30c   : > { %v2494_v47 = vadd.f32 %v16656_v38, %v1876_v45  ;;  %v2496_v48 = vadd.f32 %v16659_v39, %v1917_v46  ;;  %v1878_v49 = vpop.f32.mrb[5].mxu1  ;;  %v1919_v26 = vpop.f32.mrb[9].mxu0  ;;  %v14255_v45 = vcombine.low %v3450_v28, %v3458_v29  ;;  %v14257_v46 = vcombine.low %v3451_v8, %v3459_v32  ;;  %v16695_v32 = vld [vmem:[#allocation12 + $0x808] sm:$0xff] }
 0x30d   : > { %v2495_v50 = vadd.f32 %v16662_v42, %v1878_v49  ;;  %v2497_v51 = vadd.f32 %v16665_v44, %v1919_v26  ;;  %v1880_v52 = vpop.f32.mrb[6].mxu1  ;;  %v1921_v53 = vpop.f32.mrb[10].mxu0  ;;  %v3482_v26 = vld [vmem:[#allocation12 + $0x600] sm:$0xff]  ;;  %v14321_v28 = vcombine.low %v3515_v14, %v3523_v18  ;;  %v14336_v29 = vcombine.high %v3530_v21, %v3538_v22 }
 0x30e   : > { %v2498_v54 = vmax.f32 %v2494_v47, 0.0  ;;  %v2500_v55 = vmax.f32 %v2496_v48, 0.0  ;;  %v1881_v56 = vpop.f32.mrb[7].mxu1  ;;  %v1922_v57 = vpop.f32.mrb[11].mxu0  ;;  %v3475_v47 = vld [vmem:[#allocation12 + $0x5c8] sm:$0xff]  ;;  %v14272_v48 = vcombine.high %v3466_v15, %v3474_v36  ;;  %6383 = vmatpush1.bf16.msra.mxu1 %v14255_v45  ;;  %6469 = vmatpush1.bf16.msra.mxu0 %v14257_v46  ;;  %v14271_v52 = vcombine.low %v3466_v15, %v3474_v36 }
 0x30f   : > { %v2499_v58 = vmax.f32 %v2495_v50, 0.0  ;;  %v2501_v59 = vmax.f32 %v2497_v51, 0.0  ;;  %v14274_v49 = vcombine.high %v3467_v9, %v3475_v47  ;;  %v3490_v50 = vld [vmem:[#allocation12 + $0x640] sm:$0xff]  ;;  %v3483_v51 = vld [vmem:[#allocation12 + $0x608] sm:$0xff]  ;;  %v14273_v53 = vcombine.low %v3467_v9, %v3475_v47 }
 0x310   : > { %6384 = vmatprep.subr.bf16.mxu1 %v14272_v48  ;;  %v3498_v57 = vld [vmem:[#allocation12 + $0x680] sm:$0xff]  ;;  %v14338_v8 = vcombine.high %v3531_v23, %v3539_v24  ;;  %v14352_v15 = vcombine.high %v16691_v30, %v16693_v31  ;;  %v16699_v36 = vld [vmem:[#allocation12 + $0x848] sm:$0xff] }
 0x311   : > { %v2518_v60 = vcombine.low %v2498_v54, %v2499_v58  ;;  %v2519_v61 = vcombine.high %v2498_v54, %v2499_v58  ;;  %v2520_v63 = vcombine.low %v2500_v55, %v2501_v59  ;;  %v2521_v0 = vcombine.high %v2500_v55, %v2501_v59  ;;  %v3491_v54 = vld [vmem:[#allocation12 + $0x648] sm:$0xff]  ;;  %6470 = vmatprep.subr.bf16.mxu0 %v14274_v49  ;;  %v3506_v58 = vld [vmem:[#allocation12 + $0x6c0] sm:$0xff] }
 0x312   : > { %v14288_v55 = vcombine.high %v3482_v26, %v3490_v50  ;;  %v14290_v56 = vcombine.high %v3483_v51, %v3491_v54  ;;  %v3499_v59 = vld [vmem:[#allocation12 + $0x688] sm:$0xff]  ;;  %6385 = vmatpush1.bf16.msra.mxu1 %v14271_v52  ;;  %6471 = vmatpush1.bf16.msra.mxu0 %v14273_v53  ;;  %v14303_v16 = vcombine.low %v3498_v57, %v3506_v58 }
 0x313   : > { %v16672_v1 = vrot.slane %v2518_v60, %v16572_v62  ;;  %v16675_v2 = vrot.slane %v2519_v61, %v16572_v62  ;;  %v16678_v3 = vrot.slane %v2520_v63, %v16572_v62  ;;  %v16681_v4 = vrot.slane %v2521_v0, %v16572_v62  ;;  %v3507_v63 = vld [vmem:[#allocation12 + $0x6c8] sm:$0xff] }
 0x314   : > { %v14287_v60 = vcombine.low %v3482_v26, %v3490_v50  ;;  %v14289_v61 = vcombine.low %v3483_v51, %v3491_v54  ;;  %6386 = vmatprep.subr.bf16.mxu1 %v14288_v55  ;;  %6472 = vmatprep.subr.bf16.mxu0 %v14290_v56  ;;  %v14304_v0 = vcombine.high %v3498_v57, %v3506_v58 }
 0x315   : > { %v2550_v5 = vcombine.low %v16672_v1, %v16678_v3  ;;  %v2551_v6 = vcombine.high %v16672_v1, %v16678_v3  ;;  %v2552_v7 = vcombine.low %v16675_v2, %v16681_v4  ;;  %v2553_v10 = vcombine.high %v16675_v2, %v16681_v4 }
 0x316   : > { %v14306_v11 = vcombine.high %v3499_v59, %v3507_v63  ;;  %6387 = vmatpush1.bf16.msra.mxu1 %v14287_v60  ;;  %6473 = vmatpush1.bf16.msra.mxu0 %v14289_v61  ;;  %v14305_v17 = vcombine.low %v3499_v59, %v3507_v63  ;;  %v14354_v46 = vcombine.high %v16695_v32, %v16699_v36 }
 0x317   : > { %6388 = vmatprep.subr.bf16.mxu1 %v14304_v0  ;;  %v16711_v54 = vrot.slane %v2550_v5, %v16572_v62  ;;  %v16717_v55 = vrot.slane %v2552_v7, %v16572_v62  ;;  %v16723_v56 = vrot.slane %v2551_v6, %v16572_v62  ;;  %v16729_v57 = vrot.slane %v2553_v10, %v16572_v62 }
 0x318   : > { %6474 = vmatprep.subr.bf16.mxu0 %v14306_v11 }
 0x319   : > { %v16733_v58 = vcombine.high %v16711_v54, %v16711_v54  ;;  %v16737_v7 = vcombine.high %v16717_v55, %v16717_v55  ;;  %v16741_v1 = vcombine.high %v16723_v56, %v16723_v56  ;;  %v16745_v2 = vcombine.high %v16729_v57, %v16729_v57 }
 0x31a   : > { %6389 = vmatpush1.bf16.msra.mxu1 %v14303_v16  ;;  %6475 = vmatpush1.bf16.msra.mxu0 %v14305_v17  ;;  %v2661_v4 = vrot.slane %v16711_v54, %v16564_v41  ;;  %v2665_v0 = vrot.slane %v16711_v54, %v16567_v43  ;;  %v2669_v11 = vrot.slane %v16711_v54, %v16650_v37 }
 0x31b   : > { %6390 = vmatprep.subr.bf16.mxu1 %v14320_v19  ;;  %6476 = vmatprep.subr.bf16.mxu0 %v14322_v20  ;;  %v2673_v17 = vrot.slane %v16711_v54, %v16653_v35  ;;  %v2677_v18 = vrot.slane %v16723_v56, %v16564_v41  ;;  %v2681_v22 = vrot.slane %v16723_v56, %v16567_v43 }
 0x31c   : > { %v19428_v54 = vrot.slane %v16733_v58, %v16567_v43 }
 0x31e   : > { %6391 = vmatpush1.bf16.msra.mxu1 %v14319_v27  ;;  %6477 = vmatpush1.bf16.msra.mxu0 %v14321_v28  ;;  %v2689_v27 = vrot.slane %v16723_v56, %v16653_v35  ;;  %v2693_v28 = vrot.slane %v16733_v58, %v16564_v41 }
 0x31f   : > { %6392 = vmatprep.subr.bf16.mxu1 %v14336_v29  ;;  %6478 = vmatprep.subr.bf16.mxu0 %v14338_v8 }
 0x322   : > { %6393 = vmatpush1.bf16.msra.mxu1 %v14335_v33  ;;  %6479 = vmatpush1.bf16.msra.mxu0 %v14337_v34 }
 0x323   : > { %6405 = vmatprep.subr.bf16.mxu1 %v14352_v15  ;;  %6491 = vmatprep.subr.bf16.mxu0 %v14354_v46 }
 0x34b   : > { %v1958_v47 = vpop.f32.mrb[8].mxu1  ;;  %v1999_v48 = vpop.f32.mrb[12].mxu0 }
 0x34c   : > { %v1960_v49 = vpop.f32.mrb[9].mxu1  ;;  %v2001_v26 = vpop.f32.mrb[13].mxu0 }
 0x34d   : > { %v1962_v50 = vpop.f32.mrb[10].mxu1  ;;  %v2003_v51 = vpop.f32.mrb[14].mxu0 }
 0x34e   : > { %v1963_v52 = vpop.f32.mrb[11].mxu1  ;;  %v2004_v53 = vpop.f32.mrb[15].mxu0 }
 0x38b   : > { %v2424_v5 = vpop.f32.mrb[12].mxu1 }
 0x38c   : > { %v2502_v3 = vadd.f32 %v2424_v5, %v1958_v47  ;;  %v2465_v6 = vpop.f32.mrb[16].mxu0  ;;  %v2426_v59 = vpop.f32.mrb[13].mxu1 }
 0x38d   : > { %v2504_v10 = vadd.f32 %v2465_v6, %v1999_v48  ;;  %v2503_v60 = vadd.f32 %v2426_v59, %v1960_v49  ;;  %v2467_v61 = vpop.f32.mrb[17].mxu0  ;;  %v2428_v63 = vpop.f32.mrb[14].mxu1 }
 0x38e   : > { %v2506_v12 = vadd.f32 %v2502_v3, %v16656_v38  ;;  %v2505_v13 = vadd.f32 %v2467_v61, %v2001_v26  ;;  %v2469_v14 = vpop.f32.mrb[18].mxu0  ;;  %v2429_v16 = vpop.f32.mrb[15].mxu1  ;;  %v2685_v38 = vrot.slane %v16723_v56, %v16650_v37  ;;  %v19430_v56 = vrot.slane %v16733_v58, %v16653_v35 }
 0x38f   : > { %v2508_v19 = vadd.f32 %v2504_v10, %v16659_v39  ;;  %v2507_v20 = vadd.f32 %v2503_v60, %v16662_v42  ;;  %v2470_v21 = vpop.f32.mrb[19].mxu0 }
 0x390   : > { %v2510_v23 = vmax.f32 %v2506_v12, 0.0  ;;  %v2509_v24 = vadd.f32 %v2505_v13, %v16665_v44 }
 0x391   : > { %v2512_v29 = vmax.f32 %v2508_v19, 0.0  ;;  %v2511_v39 = vmax.f32 %v2507_v20, 0.0 }
 0x392   : > { %v2513_v34 = vmax.f32 %v2509_v24, 0.0 }
 0x393   : > { %v2590_v46 = vcombine.low %v2510_v23, %v2511_v39  ;;  %v2591_v47 = vcombine.high %v2510_v23, %v2511_v39 }
 0x394   : > { %v2592_v26 = vcombine.low %v2512_v29, %v2513_v34  ;;  %v2593_v50 = vcombine.high %v2512_v29, %v2513_v34 }
 0x395   : > { %v2600_v53 = vrot.slane %v2590_v46, %v16572_v62  ;;  %v2607_v5 = vrot.slane %v2591_v47, %v16572_v62 }
 0x396   : > { %v2614_v59 = vrot.slane %v2592_v26, %v16572_v62  ;;  %v2621_v10 = vrot.slane %v2593_v50, %v16572_v62 }
 0x398   : > { %v2622_v13 = vcombine.low %v2600_v53, %v2614_v59  ;;  %v2623_v14 = vcombine.high %v2600_v53, %v2614_v59  ;;  %v2624_v16 = vcombine.low %v2607_v5, %v2621_v10  ;;  %v2625_v19 = vcombine.high %v2607_v5, %v2621_v10 }
 0x39a   : > { %v2632_v29 = vrot.slane %v2622_v13, %v16572_v62  ;;  %v16813_v39 = vrot.slane %v2624_v16, %v16572_v62  ;;  %v2646_v34 = vrot.slane %v2623_v14, %v16572_v62  ;;  %v16817_v46 = vrot.slane %v2625_v19, %v16572_v62 }
 0x39c   : > { %v2654_v5 = vcombine.high %v2632_v29, %v2632_v29  ;;  %v16829_v59 = vcombine.high %v16813_v39, %v16813_v39  ;;  %v2656_v10 = vcombine.high %v2646_v34, %v2646_v34  ;;  %v16833_v13 = vcombine.high %v16817_v46, %v16817_v46 }
 0x39d   : > { %v2821_v14 = vrot.slane %v2632_v29, %v16564_v41  ;;  %v2825_v16 = vrot.slane %v2632_v29, %v16567_v43  ;;  %v2829_v19 = vrot.slane %v2632_v29, %v16650_v37  ;;  %v2833_v45 = vrot.slane %v2632_v29, %v16653_v35 }
 0x39e   : > { %v2837_v9 = vrot.slane %v2646_v34, %v16564_v41  ;;  %v2841_v53 = vrot.slane %v2646_v34, %v16567_v43  ;;  %v2845_v50 = vrot.slane %v2646_v34, %v16650_v37  ;;  %v2849_v26 = vrot.slane %v2646_v34, %v16653_v35 }
 0x39f   : > { %v2853_v47 = vrot.slane %v2654_v5, %v16564_v41  ;;  %v2857_v24 = vrot.slane %v2654_v5, %v16567_v43  ;;  %v2861_v23 = vrot.slane %v2654_v5, %v16650_v37  ;;  %v2865_v21 = vrot.slane %v2654_v5, %v16653_v35 }
 0x3a0   : > { %v2869_v20 = vrot.slane %v2656_v10, %v16564_v41  ;;  %v2873_v29 = vrot.slane %v2656_v10, %v16567_v43  ;;  %v2877_v12 = vrot.slane %v2656_v10, %v16650_v37  ;;  %v2881_v63 = vrot.slane %v2656_v10, %v16653_v35 }
 0x3a1   : > { %v2885_v61 = vrot.slane %v16813_v39, %v16564_v41  ;;  %v2889_v34 = vrot.slane %v16813_v39, %v16567_v43  ;;  %v2893_v60 = vrot.slane %v16813_v39, %v16650_v37  ;;  %v2897_v5 = vrot.slane %v16813_v39, %v16653_v35 }
 0x3a2   : > { %v2901_v6 = vrot.slane %v16817_v46, %v16564_v41  ;;  %v2905_v3 = vrot.slane %v16817_v46, %v16567_v43  ;;  %v2909_v10 = vrot.slane %v16817_v46, %v16650_v37  ;;  %v2913_v52 = vrot.slane %v16817_v46, %v16653_v35 }
 0x3a3   : > { %v2917_v51 = vrot.slane %v16829_v59, %v16564_v41  ;;  %v2921_v49 = vrot.slane %v16829_v59, %v16567_v43  ;;  %v2925_v39 = vrot.slane %v16829_v59, %v16650_v37  ;;  %v2929_v48 = vrot.slane %v16829_v59, %v16653_v35 }
 0x3a4   : > { %v2933_v15 = vrot.slane %v16833_v13, %v16564_v41  ;;  %v2937_v44 = vrot.slane %v16833_v13, %v16567_v43  ;;  %v2941_v46 = vrot.slane %v16833_v13, %v16650_v37  ;;  %v2945_v33 = vrot.slane %v16833_v13, %v16653_v35 }
 0x3a5   : > { %v2978_v8 = vsel %vm994_vm2, %v2661_v4, %v2821_v14  ;;  %v2979_v59 = vsel %vm994_vm2, %v2665_v0, %v2825_v16  ;;  %v2980_v42 = vsel %vm994_vm2, %v2669_v11, %v2829_v19  ;;  %v2981_v13 = vsel %vm994_vm2, %v2673_v17, %v2833_v45 }
 0x3a6   : > { %v2982_v4 = vsel %vm994_vm2, %v2677_v18, %v2837_v9  ;;  %v2983_v0 = vsel %vm994_vm2, %v2681_v22, %v2841_v53  ;;  %v2984_v11 = vsel %vm994_vm2, %v2685_v38, %v2845_v50  ;;  %v2985_v45 = vsel %vm994_vm2, %v2689_v27, %v2849_v26 }
 0x3a7   : > { %v2986_v9 = vsel %vm994_vm2, %v2693_v28, %v2853_v47  ;;  %v2987_v17 = vsel %vm994_vm2, %v19428_v54, %v2857_v24  ;;  %v19429_v18 = vrot.slane %v16733_v58, %v16650_v37  ;;  %v2989_v38 = vsel %vm994_vm2, %v19430_v56, %v2865_v21 }
 0x3a8   : > { %v19431_v27 = vrot.slane %v16741_v1, %v16564_v41  ;;  %v19432_v47 = vrot.slane %v16741_v1, %v16567_v43  ;;  %v19433_v26 = vrot.slane %v16741_v1, %v16650_v37  ;;  %v19434_v58 = vrot.slane %v16741_v1, %v16653_v35 }
 0x3a9   : > { %v2988_v22 = vsel %vm994_vm2, %v19429_v18, %v2861_v23  ;;  %v19435_v50 = vrot.slane %v16717_v55, %v16564_v41  ;;  %v19436_v53 = vrot.slane %v16717_v55, %v16567_v43  ;;  %v19437_v16 = vrot.slane %v16717_v55, %v16650_v37 }
 0x3aa   : > { %v2990_v28 = vsel %vm994_vm2, %v19431_v27, %v2869_v20  ;;  %v2991_v24 = vsel %vm994_vm2, %v19432_v47, %v2873_v29  ;;  %v2992_v23 = vsel %vm994_vm2, %v19433_v26, %v2877_v12  ;;  %v2993_v21 = vsel %vm994_vm2, %v19434_v58, %v2881_v63 }
 0x3ab   : > { %v2994_v20 = vsel %vm994_vm2, %v19435_v50, %v2885_v61  ;;  %v2995_v14 = vsel %vm994_vm2, %v19436_v53, %v2889_v34  ;;  %v2996_v12 = vsel %vm994_vm2, %v19437_v16, %v2893_v60  ;;  %v19438_v1 = vrot.slane %v16717_v55, %v16653_v35 }
 0x3ac   : > { %v19439_v19 = vrot.slane %v16729_v57, %v16564_v41  ;;  %v19440_v29 = vrot.slane %v16729_v57, %v16567_v43  ;;  %v19441_v54 = vrot.slane %v16729_v57, %v16650_v37  ;;  %v19442_v55 = vrot.slane %v16729_v57, %v16653_v35 }
 0x3ad   : > { %v2997_v63 = vsel %vm994_vm2, %v19438_v1, %v2897_v5  ;;  %v19443_v18 = vrot.slane %v16737_v7, %v16564_v41  ;;  %v19444_v56 = vrot.slane %v16737_v7, %v16567_v43  ;;  %v19445_v27 = vrot.slane %v16737_v7, %v16650_v37 }
 0x3ae   : > { %v2998_v61 = vsel %vm994_vm2, %v19439_v19, %v2901_v6  ;;  %v2999_v34 = vsel %vm994_vm2, %v19440_v29, %v2905_v3  ;;  %v3000_v60 = vsel %vm994_vm2, %v19441_v54, %v2909_v10  ;;  %v3001_v5 = vsel %vm994_vm2, %v19442_v55, %v2913_v52 }
 0x3af   : > { %v3002_v6 = vsel %vm994_vm2, %v19443_v18, %v2917_v51  ;;  %v3003_v3 = vsel %vm994_vm2, %v19444_v56, %v2921_v49  ;;  %v3004_v10 = vsel %vm994_vm2, %v19445_v27, %v2925_v39  ;;  %v19446_v57 = vrot.slane %v16737_v7, %v16653_v35 }
 0x3b0   : > { %v19447_v47 = vrot.slane %v16745_v2, %v16564_v41  ;;  %v19448_v26 = vrot.slane %v16745_v2, %v16567_v43  ;;  %v19449_v58 = vrot.slane %v16745_v2, %v16650_v37  ;;  %v19450_v7 = vrot.slane %v16745_v2, %v16653_v35 }
 0x3b1   : > { %v3005_v52 = vsel %vm994_vm2, %v19446_v57, %v2929_v48  ;;  %v3042_v50 = vcombine.low %v2978_v8, %v2979_v59  ;;  %v3043_v53 = vcombine.low %v2980_v42, %v2981_v13  ;;  %v3059_v16 = vcombine.low %v2982_v4, %v2983_v0 }
 0x3b2   : > { %v3006_v51 = vsel %vm994_vm2, %v19447_v47, %v2933_v15  ;;  %v3007_v49 = vsel %vm994_vm2, %v19448_v26, %v2937_v44  ;;  %v3008_v39 = vsel %vm994_vm2, %v19449_v58, %v2941_v46  ;;  %v3009_v48 = vsel %vm994_vm2, %v19450_v7, %v2945_v33 }
 0x3b3   : > { %v3060_v1 = vcombine.low %v2984_v11, %v2985_v45  ;;  %v3076_v15 = vcombine.low %v2986_v9, %v2987_v17  ;;  %v3077_v19 = vcombine.low %v2988_v22, %v2989_v38  ;;  %v3093_v29 = vcombine.low %v2990_v28, %v2991_v24 }
 0x3b4   : > { %v3094_v54 = vcombine.low %v2992_v23, %v2993_v21  ;;  %v3050_v44 = vrot.slane %v3042_v50, %v16583_v25  ;;  %v3057_v55 = vrot.slane %v3043_v53, %v16583_v25  ;;  %v3067_v18 = vrot.slane %v3059_v16, %v16583_v25  ;;  %v3570_v16 = vld [vmem:[#allocation12 + $0x8c0] sm:$0xff] }
 0x3b5   : > { %v3074_v46 = vrot.slane %v3060_v1, %v16583_v25  ;;  %v3084_v2 = vrot.slane %v3076_v15, %v16583_v25  ;;  %v3091_v33 = vrot.slane %v3077_v19, %v16583_v25  ;;  %v3101_v42 = vrot.slane %v3093_v29, %v16583_v25  ;;  %v3563_v1 = vld [vmem:[#allocation12 + $0x888] sm:$0xff] }
 0x3b6   : > { %v3108_v8 = vrot.slane %v3094_v54, %v16583_v25  ;;  %v3110_v59 = vcombine.low %v2994_v20, %v2995_v14  ;;  %v3111_v13 = vcombine.low %v2996_v12, %v2997_v63  ;;  %v3127_v4 = vcombine.low %v2998_v61, %v2999_v34  ;;  %v3571_v15 = vld [vmem:[#allocation12 + $0x8c8] sm:$0xff] }
 0x3b7   : > { %v3128_v0 = vcombine.low %v3000_v60, %v3001_v5  ;;  %v3144_v11 = vcombine.low %v3002_v6, %v3003_v3  ;;  %v3145_v45 = vcombine.low %v3004_v10, %v3005_v52  ;;  %v3161_v9 = vcombine.low %v3006_v51, %v3007_v49 }
 0x3b8   : > { %v3162_v17 = vcombine.low %v3008_v39, %v3009_v48  ;;  %v3118_v22 = vrot.slane %v3110_v59, %v16583_v25  ;;  %v3125_v38 = vrot.slane %v3111_v13, %v16583_v25  ;;  %v3135_v28 = vrot.slane %v3127_v4, %v16583_v25  ;;  %v3562_v48 = vld [vmem:[#allocation12 + $0x880] sm:$0xff]  ;;  %v3587_v59 = vld [vmem:[#allocation12 + $0x948] sm:$0xff] }
 0x3b9   : > { %v3142_v24 = vrot.slane %v3128_v0, %v16583_v25  ;;  %v3152_v23 = vrot.slane %v3144_v11, %v16583_v25  ;;  %v3159_v21 = vrot.slane %v3145_v45, %v16583_v25  ;;  %v3169_v20 = vrot.slane %v3161_v9, %v16583_v25  ;;  %v3594_v45 = vld [vmem:[#allocation12 + $0x980] sm:$0xff] }
 0x3ba   : > { %v3176_v14 = vrot.slane %v3162_v17, %v16583_v25  ;;  %v14087_v12 = vcombine.low %v3050_v44, %v3067_v18  ;;  %v14088_v63 = vcombine.low %v3057_v55, %v3074_v46  ;;  %v14091_v61 = vcombine.low %v3118_v22, %v3135_v28  ;;  %v3578_v18 = vld [vmem:[#allocation12 + $0x900] sm:$0xff]  ;;  %v3603_v28 = vld [vmem:[#allocation12 + $0x9c8] sm:$0xff] }
 0x3bb   : > { %v14092_v34 = vcombine.low %v3125_v38, %v3142_v24  ;;  %v14089_v60 = vcombine.low %v3084_v2, %v3101_v42  ;;  %v14093_v5 = vcombine.low %v3152_v23, %v3169_v20  ;;  %v14090_v6 = vcombine.low %v3091_v33, %v3108_v8  ;;  %v3586_v42 = vld [vmem:[#allocation12 + $0x940] sm:$0xff]  ;;  %v3579_v8 = vld [vmem:[#allocation12 + $0x908] sm:$0xff] }
 0x3bc   : > { %v14094_v56 = vcombine.low %v3159_v21, %v3176_v14  ;;  %v3188_v3 = vrot.slane %v14087_v12, %v16583_v25  ;;  %v3224_v27 = vrot.slane %v14091_v61, %v16583_v25  ;;  %v3195_v51 = vrot.slane %v14088_v63, %v16583_v25  ;;  %v3602_v22 = vld [vmem:[#allocation12 + $0x9c0] sm:$0xff]  ;;  %v3595_v38 = vld [vmem:[#allocation12 + $0x988] sm:$0xff] }
 0x3bd   : > { %v3202_v10 = vrot.slane %v14089_v60, %v16583_v25  ;;  %v3238_v57 = vrot.slane %v14093_v5, %v16583_v25  ;;  %v3209_v52 = vrot.slane %v14090_v6, %v16583_v25  ;;  %v3231_v26 = vrot.slane %v14092_v34, %v16583_v25  ;;  %v3610_v24 = vld [vmem:[#allocation12 + $0xa00] sm:$0xff]  ;;  %v3611_v14 = vld [vmem:[#allocation12 + $0xa08] sm:$0xff] }
 0x3be   : > { %v3245_v47 = vrot.slane %v14094_v56, %v16583_v25  ;;  %v14368_v2 = vcombine.high %v3562_v48, %v3570_v16  ;;  %v14370_v33 = vcombine.high %v3563_v1, %v3571_v15  ;;  %v19451_v13 = vcombine.low %v16691_v30, %v16693_v31  ;;  %v3618_v23 = vld [vmem:[#allocation12 + $0xa40] sm:$0xff]  ;;  %v3619_v12 = vld [vmem:[#allocation12 + $0xa48] sm:$0xff] }
 0x3bf   : > { %v17035_v49 = vcombine.high %v3188_v3, %v3202_v10  ;;  %v17037_v58 = vcombine.high %v3224_v27, %v3238_v57  ;;  %v17039_v39 = vcombine.low %v3188_v3, %v3202_v10  ;;  %v17041_v7 = vcombine.low %v3224_v27, %v3238_v57  ;;  %v3626_v57 = vld [vmem:[#allocation12 + $0xa80] sm:$0xff] }
 0x3c0   : > { %v17043_v50 = vcombine.high %v3195_v51, %v3209_v52  ;;  %v17045_v53 = vcombine.high %v3231_v26, %v3245_v47  ;;  %v17047_v19 = vcombine.low %v3195_v51, %v3209_v52  ;;  %v17049_v29 = vcombine.low %v3231_v26, %v3245_v47  ;;  %v3634_v26 = vld [vmem:[#allocation12 + $0xac0] sm:$0xff] }
 0x3c1   : > { %v17053_v54 = vpack.c.bf16 %v17037_v58, %v17035_v49  ;;  %v17057_v44 = vpack.c.bf16 %v17041_v7, %v17039_v39  ;;  %v19452_v4 = vcombine.low %v16695_v32, %v16699_v36  ;;  %v14367_v0 = vcombine.low %v3562_v48, %v3570_v16 }
 0x3c2   : > { %v17061_v55 = vpack.c.bf16 %v17045_v53, %v17043_v50  ;;  %v17065_v46 = vpack.c.bf16 %v17049_v29, %v17047_v19  ;;  %v14369_v11 = vcombine.low %v3563_v1, %v3571_v15  ;;  %v14384_v9 = vcombine.high %v3578_v18, %v3586_v42 }
 0x3c3   : > { %6394 = vmatprep.mubr.bf16.mxu1 %v17053_v54  ;;  %6480 = vmatprep.mubr.bf16.mxu0 %v17053_v54  ;;  %v14386_v17 = vcombine.high %v3579_v8, %v3587_v59  ;;  %v14383_v30 = vcombine.low %v3578_v18, %v3586_v42  ;;  %v14385_v31 = vcombine.low %v3579_v8, %v3587_v59  ;;  %v3265_v21 = vrot.slane %v17035_v49, 1  ;;  %v3627_v49 = vld [vmem:[#allocation12 + $0xa88] sm:$0xff]  ;;  %v3650_v18 = vld [vmem:[#allocation12 + $0xb40] sm:$0xff] }
 0x3c4   : > { %6395 = vmatmul.mubr.bf16.vlgmr.msra.gmra.mrb[16].mxu1 %v17057_v44  ;;  %6481 = vmatmul.mubr.bf16.vlgmr.msra.gmra.mrb[20].mxu0 %v17057_v44  ;;  %v14400_v32 = vcombine.high %v3594_v45, %v3602_v22  ;;  %v14402_v36 = vcombine.high %v3595_v38, %v3603_v28  ;;  %v3266_v20 = vrot.slane %v17037_v58, 1  ;;  %v3262_v63 = vrot.slane %v17039_v39, 1  ;;  %v3635_v58 = vld [vmem:[#allocation12 + $0xac8] sm:$0xff] }
 0x3c5   : > { %6406 = vmatpush1.bf16.msra.mxu1 %v19451_v13  ;;  %6492 = vmatpush1.bf16.msra.mxu0 %v19452_v4  ;;  %v3263_v61 = vrot.slane %v17041_v7, 1  ;;  %v3271_v34 = vrot.slane %v17043_v50, 1  ;;  %v3272_v60 = vrot.slane %v17045_v53, 1  ;;  %v14399_v5 = vcombine.low %v3594_v45, %v3602_v22  ;;  %v3658_v4 = vld [vmem:[#allocation12 + $0xb80] sm:$0xff]  ;;  %v3667_v45 = vld [vmem:[#allocation12 + $0xbc8] sm:$0xff] }
 0x3c6   : > { %6437 = vmatprep.mubr.bf16.mxu1 %v17061_v55  ;;  %6523 = vmatprep.mubr.bf16.mxu0 %v17061_v55  ;;  %v3268_v6 = vrot.slane %v17047_v19, 1  ;;  %v14401_v56 = vcombine.low %v3595_v38, %v3603_v28  ;;  %v14416_v3 = vcombine.high %v3610_v24, %v3618_v23  ;;  %v14418_v27 = vcombine.high %v3611_v14, %v3619_v12  ;;  %v3674_v28 = vld [vmem:[#allocation12 + $0xc00] sm:$0xff] }
 0x3c7   : > { %6407 = vmatprep.subr.bf16.mxu1 %v14368_v2  ;;  %6493 = vmatprep.subr.bf16.mxu0 %v14370_v33  ;;  %v3269_v10 = vrot.slane %v17049_v29, 1  ;;  %v3267_v52 = vsel %vm1069_vm3, %v3265_v21, %v3266_v20  ;;  %v3264_v47 = vsel %vm1069_vm3, %v3262_v63, %v3263_v61  ;;  %v3273_v51 = vsel %vm1069_vm3, %v3271_v34, %v3272_v60  ;;  %v3642_v29 = vld [vmem:[#allocation12 + $0xb00] sm:$0xff]  ;;  %v3643_v2 = vld [vmem:[#allocation12 + $0xb08] sm:$0xff] }
 0x3c8   : > { %v17090_v39 = vpack.c.bf16 %v3266_v20, %v3267_v52  ;;  %v17092_v7 = vpack.c.bf16 %v3263_v61, %v3264_v47  ;;  %v17094_v48 = vpack.c.bf16 %v3272_v60, %v3273_v51  ;;  %v14415_v53 = vcombine.low %v3610_v24, %v3618_v23  ;;  %v3651_v33 = vld [vmem:[#allocation12 + $0xb48] sm:$0xff]  ;;  %v3690_v20 = vld [vmem:[#allocation12 + $0xc80] sm:$0xff] }
 0x3c9   : > { %6408 = vmatpush1.bf16.msra.mxu1 %v14367_v0  ;;  %6494 = vmatpush1.bf16.msra.mxu0 %v14369_v11  ;;  %v3270_v50 = vsel %vm1069_vm3, %v3268_v6, %v3269_v10  ;;  %v14417_v16 = vcombine.low %v3611_v14, %v3619_v12  ;;  %v14432_v15 = vcombine.high %v3626_v57, %v3634_v26  ;;  %v3666_v0 = vld [vmem:[#allocation12 + $0xbc0] sm:$0xff]  ;;  %v3659_v11 = vld [vmem:[#allocation12 + $0xb88] sm:$0xff] }
 0x3ca   : > { %6409 = vmatprep.subr.bf16.mxu1 %v14384_v9  ;;  %6495 = vmatprep.subr.bf16.mxu0 %v14386_v17  ;;  %v17097_v1 = vpack.c.bf16 %v3269_v10, %v3270_v50  ;;  %v14434_v19 = vcombine.high %v3627_v49, %v3635_v58  ;;  %v14431_v42 = vcombine.low %v3626_v57, %v3634_v26  ;;  %v3698_v14 = vld [vmem:[#allocation12 + $0xcc0] sm:$0xff]  ;;  %v3691_v12 = vld [vmem:[#allocation12 + $0xc88] sm:$0xff] }
 0x3cb   : > { %v14433_v8 = vcombine.low %v3627_v49, %v3635_v58  ;;  %v14448_v59 = vcombine.high %v3642_v29, %v3650_v18  ;;  %v14450_v13 = vcombine.high %v3643_v2, %v3651_v33  ;;  %v14447_v9 = vcombine.low %v3642_v29, %v3650_v18  ;;  %v3699_v63 = vld [vmem:[#allocation12 + $0xcc8] sm:$0xff]  ;;  %v3706_v6 = vld [vmem:[#allocation12 + $0xd00] sm:$0xff] }
 0x3cc   : > { %v14449_v17 = vcombine.low %v3643_v2, %v3651_v33  ;;  %v14464_v22 = vcombine.high %v3658_v4, %v3666_v0  ;;  %v14466_v38 = vcombine.high %v3659_v11, %v3667_v45  ;;  %v14465_v24 = vcombine.low %v3659_v11, %v3667_v45  ;;  %v3722_v51 = vld [vmem:[#allocation12 + $0xd80] sm:$0xff]  ;;  %v3723_v49 = vld [vmem:[#allocation12 + $0xd88] sm:$0xff] }
 0x3cd   : > { %6410 = vmatpush1.bf16.msra.mxu1 %v14383_v30  ;;  %6496 = vmatpush1.bf16.msra.mxu0 %v14385_v31  ;;  %v3682_v30 = vld [vmem:[#allocation12 + $0xc40] sm:$0xff]  ;;  %v3675_v31 = vld [vmem:[#allocation12 + $0xc08] sm:$0xff]  ;;  %v14496_v60 = vcombine.high %v3690_v20, %v3698_v14  ;;  %v14495_v10 = vcombine.low %v3690_v20, %v3698_v14  ;;  %v14497_v57 = vcombine.low %v3691_v12, %v3699_v63 }
 0x3ce   : > { %6411 = vmatprep.subr.bf16.mxu1 %v14400_v32  ;;  %6497 = vmatprep.subr.bf16.mxu0 %v14402_v36  ;;  %v3683_v32 = vld [vmem:[#allocation12 + $0xc48] sm:$0xff]  ;;  %v14463_v36 = vcombine.low %v3658_v4, %v3666_v0  ;;  %v14480_v23 = vcombine.high %v3674_v28, %v3682_v30  ;;  %v14479_v61 = vcombine.low %v3674_v28, %v3682_v30  ;;  %v3730_v26 = vld [vmem:[#allocation12 + $0xdc0] sm:$0xff] }
 0x3cf   : > { %v14482_v21 = vcombine.high %v3675_v31, %v3683_v32  ;;  %v14481_v34 = vcombine.low %v3675_v31, %v3683_v32  ;;  %v3731_v58 = vld [vmem:[#allocation12 + $0xdc8] sm:$0xff]  ;;  %v3746_v29 = vld [vmem:[#allocation12 + $0xe40] sm:$0xff]  ;;  %v14527_v33 = vcombine.low %v3722_v51, %v3730_v26 }
 0x3d0   : > { %v3739_v18 = vld [vmem:[#allocation12 + $0xe08] sm:$0xff]  ;;  %v3762_v4 = vld [vmem:[#allocation12 + $0xec0] sm:$0xff] }
 0x3d1   : > { %6412 = vmatpush1.bf16.msra.mxu1 %v14399_v5  ;;  %6498 = vmatpush1.bf16.msra.mxu0 %v14401_v56  ;;  %v14498_v5 = vcombine.high %v3691_v12, %v3699_v63  ;;  %v3714_v56 = vld [vmem:[#allocation12 + $0xd40] sm:$0xff]  ;;  %v3747_v2 = vld [vmem:[#allocation12 + $0xe48] sm:$0xff] }
 0x3d2   : > { %6413 = vmatprep.subr.bf16.mxu1 %v14416_v3  ;;  %6499 = vmatprep.subr.bf16.mxu0 %v14418_v27  ;;  %v3707_v3 = vld [vmem:[#allocation12 + $0xd08] sm:$0xff]  ;;  %v14512_v52 = vcombine.high %v3706_v6, %v3714_v56  ;;  %v14511_v50 = vcombine.low %v3706_v6, %v3714_v56  ;;  %v3778_v28 = vld [vmem:[#allocation12 + $0xf40] sm:$0xff]  ;;  %v3300_v6 = vld [vmem:[#allocation12 + $0x50] sm:$0xff] }
 0x3d3   : > { %v3715_v27 = vld [vmem:[#allocation12 + $0xd48] sm:$0xff]  ;;  %v3794_v20 = vld [vmem:[#allocation12 + $0xfc0] sm:$0xff]  ;;  %v3293_v56 = vld [vmem:[#allocation12 + $0x18] sm:$0xff] }
 0x3d4   : > { %v14514_v47 = vcombine.high %v3707_v3, %v3715_v27  ;;  %v3755_v0 = vld [vmem:[#allocation12 + $0xe88] sm:$0xff] }
 0x3d5   : > { %6414 = vmatpush1.bf16.msra.mxu1 %v14415_v53  ;;  %6500 = vmatpush1.bf16.msra.mxu0 %v14417_v16  ;;  %v14513_v53 = vcombine.low %v3707_v3, %v3715_v27  ;;  %v14528_v16 = vcombine.high %v3722_v51, %v3730_v26  ;;  %v3763_v11 = vld [vmem:[#allocation12 + $0xec8] sm:$0xff]  ;;  %v3301_v3 = vld [vmem:[#allocation12 + $0x58] sm:$0xff]  ;;  %v3316_v51 = vld [vmem:[#allocation12 + $0xd0] sm:$0xff] }
 0x3d6   : > { %6415 = vmatprep.subr.bf16.mxu1 %v14432_v15  ;;  %6501 = vmatprep.subr.bf16.mxu0 %v14434_v19  ;;  %v14530_v15 = vcombine.high %v3723_v49, %v3731_v58  ;;  %v3738_v19 = vld [vmem:[#allocation12 + $0xe00] sm:$0xff]  ;;  %v3771_v30 = vld [vmem:[#allocation12 + $0xf08] sm:$0xff]  ;;  %v3309_v26 = vld [vmem:[#allocation12 + $0x98] sm:$0xff] }
 0x3d7   : > { %v14543_v45 = vcombine.low %v3738_v19, %v3746_v29  ;;  %v3779_v31 = vld [vmem:[#allocation12 + $0xf48] sm:$0xff] }
 0x3d8   : > { %v3787_v14 = vld [vmem:[#allocation12 + $0xf88] sm:$0xff] }
 0x3d9   : > { %6416 = vmatpush1.bf16.msra.mxu1 %v14431_v42  ;;  %6502 = vmatpush1.bf16.msra.mxu0 %v14433_v8  ;;  %v14529_v42 = vcombine.low %v3723_v49, %v3731_v58  ;;  %v14544_v8 = vcombine.high %v3738_v19, %v3746_v29  ;;  %v3795_v12 = vld [vmem:[#allocation12 + $0xfc8] sm:$0xff]  ;;  %v3317_v49 = vld [vmem:[#allocation12 + $0xd8] sm:$0xff]  ;;  %v3332_v19 = vld [vmem:[#allocation12 + $0x150] sm:$0xff] }
 0x3da   : > { %6417 = vmatprep.subr.bf16.mxu1 %v14448_v59  ;;  %6503 = vmatprep.subr.bf16.mxu0 %v14450_v13  ;;  %v14546_v59 = vcombine.high %v3739_v18, %v3747_v2  ;;  %v3754_v13 = vld [vmem:[#allocation12 + $0xe80] sm:$0xff]  ;;  %v3325_v29 = vld [vmem:[#allocation12 + $0x118] sm:$0xff] }
 0x3db   : > { %v14559_v32 = vcombine.low %v3754_v13, %v3762_v4 }
 0x3dd   : > { %6418 = vmatpush1.bf16.msra.mxu1 %v14447_v9  ;;  %6504 = vmatpush1.bf16.msra.mxu0 %v14449_v17  ;;  %v14545_v9 = vcombine.low %v3739_v18, %v3747_v2  ;;  %v14560_v17 = vcombine.high %v3754_v13, %v3762_v4  ;;  %v3333_v18 = vld [vmem:[#allocation12 + $0x158] sm:$0xff]  ;;  %v3348_v13 = vld [vmem:[#allocation12 + $0x1d0] sm:$0xff] }
 0x3de   : > { %6419 = vmatprep.subr.bf16.mxu1 %v14464_v22  ;;  %6505 = vmatprep.subr.bf16.mxu0 %v14466_v38  ;;  %v14562_v22 = vcombine.high %v3755_v0, %v3763_v11  ;;  %v3770_v38 = vld [vmem:[#allocation12 + $0xf00] sm:$0xff]  ;;  %v3341_v4 = vld [vmem:[#allocation12 + $0x198] sm:$0xff] }
 0x3df   : > { %v14575_v63 = vcombine.low %v3770_v38, %v3778_v28 }
 0x3e1   : > { %6420 = vmatpush1.bf16.msra.mxu1 %v14463_v36  ;;  %6506 = vmatpush1.bf16.msra.mxu0 %v14465_v24  ;;  %v14561_v36 = vcombine.low %v3755_v0, %v3763_v11  ;;  %v14576_v24 = vcombine.high %v3770_v38, %v3778_v28  ;;  %v3349_v0 = vld [vmem:[#allocation12 + $0x1d8] sm:$0xff]  ;;  %v3364_v38 = vld [vmem:[#allocation12 + $0x250] sm:$0xff] }
 0x3e2   : > { %6421 = vmatprep.subr.bf16.mxu1 %v14480_v23  ;;  %6507 = vmatprep.subr.bf16.mxu0 %v14482_v21  ;;  %v14578_v23 = vcombine.high %v3771_v30, %v3779_v31  ;;  %v3786_v21 = vld [vmem:[#allocation12 + $0xf80] sm:$0xff]  ;;  %v3357_v28 = vld [vmem:[#allocation12 + $0x218] sm:$0xff] }
 0x3e3   : > { %v14591_v27 = vcombine.low %v3786_v21, %v3794_v20 }
 0x3e5   : > { %6422 = vmatpush1.bf16.msra.mxu1 %v14479_v61  ;;  %6508 = vmatpush1.bf16.msra.mxu0 %v14481_v34  ;;  %v14577_v61 = vcombine.low %v3771_v30, %v3779_v31  ;;  %v14592_v34 = vcombine.high %v3786_v21, %v3794_v20  ;;  %v3365_v30 = vld [vmem:[#allocation12 + $0x258] sm:$0xff]  ;;  %v3380_v21 = vld [vmem:[#allocation12 + $0x2d0] sm:$0xff] }
 0x3e6   : > { %6423 = vmatprep.subr.bf16.mxu1 %v14496_v60  ;;  %6509 = vmatprep.subr.bf16.mxu0 %v14498_v5  ;;  %v14594_v60 = vcombine.high %v3787_v14, %v3795_v12  ;;  %v3292_v5 = vld [vmem:[#allocation12 + $0x10] sm:$0xff]  ;;  %v3373_v20 = vld [vmem:[#allocation12 + $0x298] sm:$0xff] }
 0x3e7   : > { %v14099_v58 = vcombine.low %v3292_v5, %v3300_v6 }
 0x3e9   : > { %6424 = vmatpush1.bf16.msra.mxu1 %v14495_v10  ;;  %6510 = vmatpush1.bf16.msra.mxu0 %v14497_v57  ;;  %v14593_v10 = vcombine.low %v3787_v14, %v3795_v12  ;;  %v14100_v57 = vcombine.high %v3292_v5, %v3300_v6  ;;  %v3381_v14 = vld [vmem:[#allocation12 + $0x2d8] sm:$0xff]  ;;  %v3396_v5 = vld [vmem:[#allocation12 + $0x350] sm:$0xff] }
 0x3ea   : > { %6425 = vmatprep.subr.bf16.mxu1 %v14512_v52  ;;  %6511 = vmatprep.subr.bf16.mxu0 %v14514_v47  ;;  %v14102_v52 = vcombine.high %v3293_v56, %v3301_v3  ;;  %v3308_v47 = vld [vmem:[#allocation12 + $0x90] sm:$0xff]  ;;  %v3389_v6 = vld [vmem:[#allocation12 + $0x318] sm:$0xff] }
 0x3eb   : > { %v14115_v2 = vcombine.low %v3308_v47, %v3316_v51 }
 0x3ed   : > { %6426 = vmatpush1.bf16.msra.mxu1 %v14511_v50  ;;  %6512 = vmatpush1.bf16.msra.mxu0 %v14513_v53  ;;  %v14101_v50 = vcombine.low %v3293_v56, %v3301_v3  ;;  %v14116_v53 = vcombine.high %v3308_v47, %v3316_v51  ;;  %v3397_v56 = vld [vmem:[#allocation12 + $0x358] sm:$0xff]  ;;  %v3412_v47 = vld [vmem:[#allocation12 + $0x3d0] sm:$0xff] }
 0x3ee   : > { %6427 = vmatprep.subr.bf16.mxu1 %v14528_v16  ;;  %6513 = vmatprep.subr.bf16.mxu0 %v14530_v15  ;;  %v14118_v16 = vcombine.high %v3309_v26, %v3317_v49  ;;  %v3324_v15 = vld [vmem:[#allocation12 + $0x110] sm:$0xff]  ;;  %v3405_v51 = vld [vmem:[#allocation12 + $0x398] sm:$0xff] }
 0x3ef   : > { %v14131_v11 = vcombine.low %v3324_v15, %v3332_v19 }
 0x3f1   : > { %6428 = vmatpush1.bf16.msra.mxu1 %v14527_v33  ;;  %6514 = vmatpush1.bf16.msra.mxu0 %v14529_v42  ;;  %v14117_v33 = vcombine.low %v3309_v26, %v3317_v49  ;;  %v14132_v42 = vcombine.high %v3324_v15, %v3332_v19  ;;  %v3413_v26 = vld [vmem:[#allocation12 + $0x3d8] sm:$0xff]  ;;  %v3428_v15 = vld [vmem:[#allocation12 + $0x450] sm:$0xff] }
 0x3f2   : > { %6429 = vmatprep.subr.bf16.mxu1 %v14544_v8  ;;  %6515 = vmatprep.subr.bf16.mxu0 %v14546_v59  ;;  %v14134_v8 = vcombine.high %v3325_v29, %v3333_v18  ;;  %v3340_v59 = vld [vmem:[#allocation12 + $0x190] sm:$0xff]  ;;  %v3421_v19 = vld [vmem:[#allocation12 + $0x418] sm:$0xff] }
 0x3f3   : > { %v14147_v31 = vcombine.low %v3340_v59, %v3348_v13 }
 0x3f5   : > { %6430 = vmatpush1.bf16.msra.mxu1 %v14543_v45  ;;  %6516 = vmatpush1.bf16.msra.mxu0 %v14545_v9  ;;  %v14133_v45 = vcombine.low %v3325_v29, %v3333_v18  ;;  %v14148_v9 = vcombine.high %v3340_v59, %v3348_v13  ;;  %v3429_v29 = vld [vmem:[#allocation12 + $0x458] sm:$0xff]  ;;  %v3444_v59 = vld [vmem:[#allocation12 + $0x4d0] sm:$0xff] }
 0x3f6   : > { %6431 = vmatprep.subr.bf16.mxu1 %v14560_v17  ;;  %6517 = vmatprep.subr.bf16.mxu0 %v14562_v22  ;;  %v14150_v17 = vcombine.high %v3341_v4, %v3349_v0  ;;  %v3356_v22 = vld [vmem:[#allocation12 + $0x210] sm:$0xff]  ;;  %v3437_v13 = vld [vmem:[#allocation12 + $0x498] sm:$0xff] }
 0x3f7   : > { %v14163_v12 = vcombine.low %v3356_v22, %v3364_v38 }
 0x3f9   : > { %6432 = vmatpush1.bf16.msra.mxu1 %v14559_v32  ;;  %6518 = vmatpush1.bf16.msra.mxu0 %v14561_v36  ;;  %v14149_v32 = vcombine.low %v3341_v4, %v3349_v0  ;;  %v14164_v36 = vcombine.high %v3356_v22, %v3364_v38  ;;  %v3445_v4 = vld [vmem:[#allocation12 + $0x4d8] sm:$0xff]  ;;  %v3460_v22 = vld [vmem:[#allocation12 + $0x550] sm:$0xff] }
 0x3fa   : > { %6433 = vmatprep.subr.bf16.mxu1 %v14576_v24  ;;  %6519 = vmatprep.subr.bf16.mxu0 %v14578_v23  ;;  %v14166_v24 = vcombine.high %v3357_v28, %v3365_v30  ;;  %v3372_v23 = vld [vmem:[#allocation12 + $0x290] sm:$0xff]  ;;  %v3453_v38 = vld [vmem:[#allocation12 + $0x518] sm:$0xff] }
 0x3fb   : > { %v14179_v3 = vcombine.low %v3372_v23, %v3380_v21 }
 0x3fd   : > { %6434 = vmatpush1.bf16.msra.mxu1 %v14575_v63  ;;  %6520 = vmatpush1.bf16.msra.mxu0 %v14577_v61  ;;  %v14165_v63 = vcombine.low %v3357_v28, %v3365_v30  ;;  %v14180_v61 = vcombine.high %v3372_v23, %v3380_v21  ;;  %v3461_v28 = vld [vmem:[#allocation12 + $0x558] sm:$0xff]  ;;  %v3476_v23 = vld [vmem:[#allocation12 + $0x5d0] sm:$0xff] }
 0x3fe   : > { %6435 = vmatprep.subr.bf16.mxu1 %v14592_v34  ;;  %6521 = vmatprep.subr.bf16.mxu0 %v14594_v60  ;;  %v14182_v34 = vcombine.high %v3373_v20, %v3381_v14  ;;  %v3388_v60 = vld [vmem:[#allocation12 + $0x310] sm:$0xff]  ;;  %v3469_v21 = vld [vmem:[#allocation12 + $0x598] sm:$0xff] }
 0x3ff   : > { %v14195_v49 = vcombine.low %v3388_v60, %v3396_v5 }
 0x401   : > { %6436 = vmatpush1.bf16.msra.mxu1 %v14591_v27  ;;  %6522 = vmatpush1.bf16.msra.mxu0 %v14593_v10  ;;  %v14181_v27 = vcombine.low %v3373_v20, %v3381_v14  ;;  %v14196_v10 = vcombine.high %v3388_v60, %v3396_v5  ;;  %v3477_v20 = vld [vmem:[#allocation12 + $0x5d8] sm:$0xff]  ;;  %v3492_v60 = vld [vmem:[#allocation12 + $0x650] sm:$0xff] }
 0x402   : > { %6534 = vmatprep.subr.bf16.mxu1 %v14100_v57  ;;  %6620 = vmatprep.subr.bf16.mxu0 %v14102_v52  ;;  %v14198_v57 = vcombine.high %v3389_v6, %v3397_v56  ;;  %v3404_v52 = vld [vmem:[#allocation12 + $0x390] sm:$0xff]  ;;  %v3485_v5 = vld [vmem:[#allocation12 + $0x618] sm:$0xff] }
 0x403   : > { %v14211_v18 = vcombine.low %v3404_v52, %v3412_v47 }
 0x404   : > { %6438 = vmatmul.mubr.bf16.vlgmr.msra.gmra.mrb[16].mxu1 %v17065_v46  ;;  %6524 = vmatmul.mubr.bf16.vlgmr.msra.gmra.mrb[20].mxu0 %v17065_v46 }
 0x405   : > { %6535 = vmatpush1.bf16.msra.mxu1 %v14099_v58  ;;  %6566 = vmatprep.mubr.bf16.mxu1 %v17053_v54  ;;  %v14197_v58 = vcombine.low %v3389_v6, %v3397_v56  ;;  %v3493_v6 = vld [vmem:[#allocation12 + $0x658] sm:$0xff] }
 0x406   : > { %6621 = vmatpush1.bf16.msra.mxu0 %v14101_v50  ;;  %6652 = vmatprep.mubr.bf16.mxu0 %v17053_v54  ;;  %v14212_v50 = vcombine.high %v3404_v52, %v3412_v47  ;;  %v3508_v52 = vld [vmem:[#allocation12 + $0x6d0] sm:$0xff]  ;;  %v3501_v47 = vld [vmem:[#allocation12 + $0x698] sm:$0xff] }
 0x407   : > { %6536 = vmatprep.subr.bf16.mxu1 %v14116_v53  ;;  %6622 = vmatprep.subr.bf16.mxu0 %v14118_v16  ;;  %v14214_v53 = vcombine.high %v3405_v51, %v3413_v26  ;;  %v3420_v16 = vld [vmem:[#allocation12 + $0x410] sm:$0xff] }
 0x408   : > { %v14227_v0 = vcombine.low %v3420_v16, %v3428_v15 }
 0x409   : > { %6537 = vmatpush1.bf16.msra.mxu1 %v14115_v2  ;;  %v14213_v2 = vcombine.low %v3405_v51, %v3413_v26  ;;  %v3509_v51 = vld [vmem:[#allocation12 + $0x6d8] sm:$0xff] }
 0x40a   : > { %6623 = vmatpush1.bf16.msra.mxu0 %v14117_v33  ;;  %6538 = vmatprep.subr.bf16.mxu1 %v14132_v42  ;;  %v14228_v33 = vcombine.high %v3420_v16, %v3428_v15  ;;  %v14230_v42 = vcombine.high %v3421_v19, %v3429_v29  ;;  %v3524_v16 = vld [vmem:[#allocation12 + $0x750] sm:$0xff]  ;;  %v3517_v15 = vld [vmem:[#allocation12 + $0x718] sm:$0xff] }
 0x40b   : > { %6624 = vmatprep.subr.bf16.mxu0 %v14134_v8  ;;  %v3436_v8 = vld [vmem:[#allocation12 + $0x490] sm:$0xff] }
 0x40c   : > { %v14243_v30 = vcombine.low %v3436_v8, %v3444_v59 }
 0x40d   : > { %6539 = vmatpush1.bf16.msra.mxu1 %v14131_v11  ;;  %v14229_v11 = vcombine.low %v3421_v19, %v3429_v29  ;;  %v3525_v19 = vld [vmem:[#allocation12 + $0x758] sm:$0xff] }
 0x40e   : > { %6625 = vmatpush1.bf16.msra.mxu0 %v14133_v45  ;;  %6540 = vmatprep.subr.bf16.mxu1 %v14148_v9  ;;  %v14244_v45 = vcombine.high %v3436_v8, %v3444_v59  ;;  %v14246_v9 = vcombine.high %v3437_v13, %v3445_v4  ;;  %v3540_v8 = vld [vmem:[#allocation12 + $0x7d0] sm:$0xff]  ;;  %v3533_v59 = vld [vmem:[#allocation12 + $0x798] sm:$0xff] }
 0x40f   : > { %6626 = vmatprep.subr.bf16.mxu0 %v14150_v17  ;;  %v3452_v17 = vld [vmem:[#allocation12 + $0x510] sm:$0xff] }
 0x410   : > { %v14259_v14 = vcombine.low %v3452_v17, %v3460_v22 }
 0x411   : > { %6541 = vmatpush1.bf16.msra.mxu1 %v14147_v31  ;;  %v14245_v31 = vcombine.low %v3437_v13, %v3445_v4  ;;  %v3541_v13 = vld [vmem:[#allocation12 + $0x7d8] sm:$0xff] }
 0x412   : > { %6627 = vmatpush1.bf16.msra.mxu0 %v14149_v32  ;;  %6542 = vmatprep.subr.bf16.mxu1 %v14164_v36  ;;  %v14260_v32 = vcombine.high %v3452_v17, %v3460_v22  ;;  %v14262_v36 = vcombine.high %v3453_v38, %v3461_v28  ;;  %v3556_v17 = vld [vmem:[#allocation12 + $0x850] sm:$0xff]  ;;  %v3549_v22 = vld [vmem:[#allocation12 + $0x818] sm:$0xff] }
 0x413   : > { %6628 = vmatprep.subr.bf16.mxu0 %v14166_v24  ;;  %v3468_v24 = vld [vmem:[#allocation12 + $0x590] sm:$0xff] }
 0x414   : > { %v14275_v56 = vcombine.low %v3468_v24, %v3476_v23 }
 0x415   : > { %6543 = vmatpush1.bf16.msra.mxu1 %v14163_v12  ;;  %v14261_v12 = vcombine.low %v3453_v38, %v3461_v28  ;;  %v3557_v38 = vld [vmem:[#allocation12 + $0x858] sm:$0xff] }
 0x416   : > { %6629 = vmatpush1.bf16.msra.mxu0 %v14165_v63  ;;  %6544 = vmatprep.subr.bf16.mxu1 %v14180_v61  ;;  %v14276_v63 = vcombine.high %v3468_v24, %v3476_v23  ;;  %v14278_v61 = vcombine.high %v3469_v21, %v3477_v20  ;;  %v3572_v24 = vld [vmem:[#allocation12 + $0x8d0] sm:$0xff] }
 0x417   : > { %6630 = vmatprep.subr.bf16.mxu0 %v14182_v34  ;;  %v3484_v34 = vld [vmem:[#allocation12 + $0x610] sm:$0xff] }
 0x418   : > { %v14291_v26 = vcombine.low %v3484_v34, %v3492_v60 }
 0x419   : > { %6545 = vmatpush1.bf16.msra.mxu1 %v14179_v3  ;;  %v14277_v3 = vcombine.low %v3469_v21, %v3477_v20  ;;  %v3565_v21 = vld [vmem:[#allocation12 + $0x898] sm:$0xff] }
 0x41a   : > { %6631 = vmatpush1.bf16.msra.mxu0 %v14181_v27  ;;  %6546 = vmatprep.subr.bf16.mxu1 %v14196_v10  ;;  %v14292_v27 = vcombine.high %v3484_v34, %v3492_v60  ;;  %v14294_v10 = vcombine.high %v3485_v5, %v3493_v6  ;;  %v3573_v20 = vld [vmem:[#allocation12 + $0x8d8] sm:$0xff] }
 0x41b   : > { %6632 = vmatprep.subr.bf16.mxu0 %v14198_v57  ;;  %v3500_v57 = vld [vmem:[#allocation12 + $0x690] sm:$0xff]  ;;  %v14374_v34 = vcombine.high %v3565_v21, %v3573_v20  ;;  %v3581_v60 = vld [vmem:[#allocation12 + $0x918] sm:$0xff] }
 0x41c   : > { %v14307_v29 = vcombine.low %v3500_v57, %v3508_v52 }
 0x41d   : > { %6547 = vmatpush1.bf16.msra.mxu1 %v14195_v49  ;;  %v14293_v49 = vcombine.low %v3485_v5, %v3493_v6  ;;  %v3589_v5 = vld [vmem:[#allocation12 + $0x958] sm:$0xff] }
 0x41e   : > { %6633 = vmatpush1.bf16.msra.mxu0 %v14197_v58  ;;  %6548 = vmatprep.subr.bf16.mxu1 %v14212_v50  ;;  %v14308_v58 = vcombine.high %v3500_v57, %v3508_v52  ;;  %v14310_v50 = vcombine.high %v3501_v47, %v3509_v51  ;;  %v3604_v57 = vld [vmem:[#allocation12 + $0x9d0] sm:$0xff]  ;;  %v3597_v52 = vld [vmem:[#allocation12 + $0x998] sm:$0xff] }
 0x41f   : > { %6634 = vmatprep.subr.bf16.mxu0 %v14214_v53  ;;  %v3516_v53 = vld [vmem:[#allocation12 + $0x710] sm:$0xff] }
 0x420   : > { %v14323_v4 = vcombine.low %v3516_v53, %v3524_v16 }
 0x421   : > { %6549 = vmatpush1.bf16.msra.mxu1 %v14211_v18  ;;  %v14309_v18 = vcombine.low %v3501_v47, %v3509_v51  ;;  %v3605_v47 = vld [vmem:[#allocation12 + $0x9d8] sm:$0xff] }
 0x422   : > { %6635 = vmatpush1.bf16.msra.mxu0 %v14213_v2  ;;  %6550 = vmatprep.subr.bf16.mxu1 %v14228_v33  ;;  %v14324_v2 = vcombine.high %v3516_v53, %v3524_v16  ;;  %v14326_v33 = vcombine.high %v3517_v15, %v3525_v19  ;;  %v3620_v53 = vld [vmem:[#allocation12 + $0xa50] sm:$0xff]  ;;  %v3613_v16 = vld [vmem:[#allocation12 + $0xa18] sm:$0xff] }
 0x423   : > { %6636 = vmatprep.subr.bf16.mxu0 %v14230_v42  ;;  %v3532_v42 = vld [vmem:[#allocation12 + $0x790] sm:$0xff] }
 0x424   : > { %v14339_v28 = vcombine.low %v3532_v42, %v3540_v8 }
 0x425   : > { %6551 = vmatpush1.bf16.msra.mxu1 %v14227_v0  ;;  %v14325_v0 = vcombine.low %v3517_v15, %v3525_v19  ;;  %v3621_v15 = vld [vmem:[#allocation12 + $0xa58] sm:$0xff] }
 0x426   : > { %6637 = vmatpush1.bf16.msra.mxu0 %v14229_v11  ;;  %6552 = vmatprep.subr.bf16.mxu1 %v14244_v45  ;;  %v14340_v11 = vcombine.high %v3532_v42, %v3540_v8  ;;  %v14342_v45 = vcombine.high %v3533_v59, %v3541_v13  ;;  %v3636_v42 = vld [vmem:[#allocation12 + $0xad0] sm:$0xff]  ;;  %v3629_v8 = vld [vmem:[#allocation12 + $0xa98] sm:$0xff] }
 0x427   : > { %6638 = vmatprep.subr.bf16.mxu0 %v14246_v9  ;;  %v3548_v9 = vld [vmem:[#allocation12 + $0x810] sm:$0xff] }
 0x428   : > { %v14355_v23 = vcombine.low %v3548_v9, %v3556_v17 }
 0x429   : > { %6553 = vmatpush1.bf16.msra.mxu1 %v14243_v30  ;;  %v14341_v30 = vcombine.low %v3533_v59, %v3541_v13  ;;  %v3637_v59 = vld [vmem:[#allocation12 + $0xad8] sm:$0xff] }
 0x42a   : > { %6639 = vmatpush1.bf16.msra.mxu0 %v14245_v31  ;;  %6554 = vmatprep.subr.bf16.mxu1 %v14260_v32  ;;  %v14356_v31 = vcombine.high %v3548_v9, %v3556_v17  ;;  %v14358_v32 = vcombine.high %v3549_v22, %v3557_v38  ;;  %v3652_v9 = vld [vmem:[#allocation12 + $0xb50] sm:$0xff]  ;;  %v3645_v17 = vld [vmem:[#allocation12 + $0xb18] sm:$0xff] }
 0x42b   : > { %6640 = vmatprep.subr.bf16.mxu0 %v14262_v36  ;;  %v3564_v36 = vld [vmem:[#allocation12 + $0x890] sm:$0xff] }
 0x42c   : > { %v14371_v6 = vcombine.low %v3564_v36, %v3572_v24 }
 0x42d   : > { %6555 = vmatpush1.bf16.msra.mxu1 %v14259_v14  ;;  %v14357_v14 = vcombine.low %v3549_v22, %v3557_v38  ;;  %v3653_v22 = vld [vmem:[#allocation12 + $0xb58] sm:$0xff] }
 0x42e   : > { %6641 = vmatpush1.bf16.msra.mxu0 %v14261_v12  ;;  %6556 = vmatprep.subr.bf16.mxu1 %v14276_v63  ;;  %v14372_v12 = vcombine.high %v3564_v36, %v3572_v24  ;;  %v3580_v63 = vld [vmem:[#allocation12 + $0x910] sm:$0xff]  ;;  %v3661_v24 = vld [vmem:[#allocation12 + $0xb98] sm:$0xff] }
 0x42f   : > { %6642 = vmatprep.subr.bf16.mxu0 %v14278_v61  ;;  %v3588_v61 = vld [vmem:[#allocation12 + $0x950] sm:$0xff] }
 0x430   : > { %v14387_v51 = vcombine.low %v3580_v63, %v3588_v61  ;;  %v3668_v36 = vld [vmem:[#allocation12 + $0xbd0] sm:$0xff] }
 0x431   : > { %6557 = vmatpush1.bf16.msra.mxu1 %v14275_v56  ;;  %v14373_v56 = vcombine.low %v3565_v21, %v3573_v20  ;;  %v14453_v20 = vcombine.low %v3645_v17, %v3653_v22 }
 0x432   : > { %6643 = vmatpush1.bf16.msra.mxu0 %v14277_v3  ;;  %6558 = vmatprep.subr.bf16.mxu1 %v14292_v27  ;;  %v14388_v3 = vcombine.high %v3580_v63, %v3588_v61  ;;  %v14390_v27 = vcombine.high %v3581_v60, %v3589_v5  ;;  %v3676_v63 = vld [vmem:[#allocation12 + $0xc10] sm:$0xff] }
 0x433   : > { %6644 = vmatprep.subr.bf16.mxu0 %v14294_v10  ;;  %v3596_v10 = vld [vmem:[#allocation12 + $0x990] sm:$0xff] }
 0x434   : > { %v14403_v19 = vcombine.low %v3596_v10, %v3604_v57  ;;  %v3684_v61 = vld [vmem:[#allocation12 + $0xc50] sm:$0xff] }
 0x435   : > { %6559 = vmatpush1.bf16.msra.mxu1 %v14291_v26  ;;  %v14389_v26 = vcombine.low %v3581_v60, %v3589_v5  ;;  %v3685_v60 = vld [vmem:[#allocation12 + $0xc58] sm:$0xff] }
 0x436   : > { %6645 = vmatpush1.bf16.msra.mxu0 %v14293_v49  ;;  %6560 = vmatprep.subr.bf16.mxu1 %v14308_v58  ;;  %v14404_v49 = vcombine.high %v3596_v10, %v3604_v57  ;;  %v14406_v58 = vcombine.high %v3597_v52, %v3605_v47  ;;  %v3700_v10 = vld [vmem:[#allocation12 + $0xcd0] sm:$0xff]  ;;  %v3693_v57 = vld [vmem:[#allocation12 + $0xc98] sm:$0xff] }
 0x437   : > { %6646 = vmatprep.subr.bf16.mxu0 %v14310_v50  ;;  %v3612_v50 = vld [vmem:[#allocation12 + $0xa10] sm:$0xff] }
 0x438   : > { %v14419_v13 = vcombine.low %v3612_v50, %v3620_v53 }
 0x439   : > { %6561 = vmatpush1.bf16.msra.mxu1 %v14307_v29  ;;  %v14405_v29 = vcombine.low %v3597_v52, %v3605_v47  ;;  %v3701_v52 = vld [vmem:[#allocation12 + $0xcd8] sm:$0xff]  ;;  %v14483_v47 = vcombine.low %v3676_v63, %v3684_v61 }
 0x43a   : > { %6647 = vmatpush1.bf16.msra.mxu0 %v14309_v18  ;;  %6562 = vmatprep.subr.bf16.mxu1 %v14324_v2  ;;  %v14420_v18 = vcombine.high %v3612_v50, %v3620_v53  ;;  %v14422_v2 = vcombine.high %v3613_v16, %v3621_v15  ;;  %v3716_v50 = vld [vmem:[#allocation12 + $0xd50] sm:$0xff]  ;;  %v3709_v53 = vld [vmem:[#allocation12 + $0xd18] sm:$0xff] }
 0x43b   : > { %6648 = vmatprep.subr.bf16.mxu0 %v14326_v33  ;;  %v3628_v33 = vld [vmem:[#allocation12 + $0xa90] sm:$0xff] }
 0x43c   : > { %v14435_v38 = vcombine.low %v3628_v33, %v3636_v42 }
 0x43d   : > { %6563 = vmatpush1.bf16.msra.mxu1 %v14323_v4  ;;  %v14421_v4 = vcombine.low %v3613_v16, %v3621_v15  ;;  %v3717_v16 = vld [vmem:[#allocation12 + $0xd58] sm:$0xff] }
 0x43e   : > { %6649 = vmatpush1.bf16.msra.mxu0 %v14325_v0  ;;  %6564 = vmatprep.subr.bf16.mxu1 %v14340_v11  ;;  %v14436_v0 = vcombine.high %v3628_v33, %v3636_v42  ;;  %v14438_v11 = vcombine.high %v3629_v8, %v3637_v59  ;;  %v3732_v33 = vld [vmem:[#allocation12 + $0xdd0] sm:$0xff]  ;;  %v3725_v42 = vld [vmem:[#allocation12 + $0xd98] sm:$0xff] }
 0x43f   : > { %6650 = vmatprep.subr.bf16.mxu0 %v14342_v45  ;;  %v3644_v45 = vld [vmem:[#allocation12 + $0xb10] sm:$0xff] }
 0x440   : > { %v14451_v21 = vcombine.low %v3644_v45, %v3652_v9 }
 0x441   : > { %6565 = vmatpush1.bf16.msra.mxu1 %v14339_v28  ;;  %v14437_v28 = vcombine.low %v3629_v8, %v3637_v59  ;;  %v3733_v8 = vld [vmem:[#allocation12 + $0xdd8] sm:$0xff] }
 0x442   : > { %6651 = vmatpush1.bf16.msra.mxu0 %v14341_v30  ;;  %6577 = vmatprep.subr.bf16.mxu1 %v14356_v31  ;;  %v14452_v30 = vcombine.high %v3644_v45, %v3652_v9  ;;  %v14454_v31 = vcombine.high %v3645_v17, %v3653_v22  ;;  %v3748_v45 = vld [vmem:[#allocation12 + $0xe50] sm:$0xff]  ;;  %v3741_v9 = vld [vmem:[#allocation12 + $0xe18] sm:$0xff] }
 0x443   : > { %6663 = vmatprep.subr.bf16.mxu0 %v14358_v32  ;;  %v3660_v32 = vld [vmem:[#allocation12 + $0xb90] sm:$0xff]  ;;  %v3749_v17 = vld [vmem:[#allocation12 + $0xe58] sm:$0xff] }
 0x444   : > { %6567 = vmatmul.mubr.bf16.vlgmr.msra.gmra.mrb[20].mxu1 %v17057_v44  ;;  %v14467_v5 = vcombine.low %v3660_v32, %v3668_v36 }
 0x445   : > { %6653 = vmatmul.mubr.bf16.vlgmr.msra.gmra.mrb[24].mxu0 %v17057_v44  ;;  %6578 = vmatpush1.bf16.msra.mxu1 %v14355_v23  ;;  %v3669_v23 = vld [vmem:[#allocation12 + $0xbd8] sm:$0xff] }
 0x446   : > { %6609 = vmatprep.mubr.bf16.mxu1 %v17061_v55  ;;  %6664 = vmatpush1.bf16.msra.mxu0 %v14357_v14  ;;  %v14468_v14 = vcombine.high %v3660_v32, %v3668_v36  ;;  %v3764_v32 = vld [vmem:[#allocation12 + $0xed0] sm:$0xff]  ;;  %v3757_v36 = vld [vmem:[#allocation12 + $0xe98] sm:$0xff] }
 0x447   : > { %6695 = vmatprep.mubr.bf16.mxu0 %v17061_v55  ;;  %6579 = vmatprep.subr.bf16.mxu1 %v14372_v12  ;;  %v14470_v12 = vcombine.high %v3661_v24, %v3669_v23 }
 0x448   : > { %6665 = vmatprep.subr.bf16.mxu0 %v14374_v34  ;;  %v3677_v34 = vld [vmem:[#allocation12 + $0xc18] sm:$0xff] }
 0x449   : > { %6580 = vmatpush1.bf16.msra.mxu1 %v14371_v6  ;;  %v14469_v6 = vcombine.low %v3661_v24, %v3669_v23  ;;  %v3765_v24 = vld [vmem:[#allocation12 + $0xed8] sm:$0xff] }
 0x44a   : > { %6666 = vmatpush1.bf16.msra.mxu0 %v14373_v56  ;;  %6581 = vmatprep.subr.bf16.mxu1 %v14388_v3  ;;  %v14484_v56 = vcombine.high %v3676_v63, %v3684_v61  ;;  %v14486_v3 = vcombine.high %v3677_v34, %v3685_v60  ;;  %v3780_v63 = vld [vmem:[#allocation12 + $0xf50] sm:$0xff]  ;;  %v3773_v61 = vld [vmem:[#allocation12 + $0xf18] sm:$0xff] }
 0x44b   : > { %6667 = vmatprep.subr.bf16.mxu0 %v14390_v27  ;;  %v3692_v27 = vld [vmem:[#allocation12 + $0xc90] sm:$0xff] }
 0x44c   : > { %v14499_v15 = vcombine.low %v3692_v27, %v3700_v10 }
 0x44d   : > { %6582 = vmatpush1.bf16.msra.mxu1 %v14387_v51  ;;  %v14485_v51 = vcombine.low %v3677_v34, %v3685_v60  ;;  %v3781_v34 = vld [vmem:[#allocation12 + $0xf58] sm:$0xff] }
 0x44e   : > { %6668 = vmatpush1.bf16.msra.mxu0 %v14389_v26  ;;  %6583 = vmatprep.subr.bf16.mxu1 %v14404_v49  ;;  %v14500_v26 = vcombine.high %v3692_v27, %v3700_v10  ;;  %v14502_v49 = vcombine.high %v3693_v57, %v3701_v52  ;;  %v3796_v27 = vld [vmem:[#allocation12 + $0xfd0] sm:$0xff]  ;;  %v3789_v10 = vld [vmem:[#allocation12 + $0xf98] sm:$0xff] }
 0x44f   : > { %6669 = vmatprep.subr.bf16.mxu0 %v14406_v58  ;;  %v3708_v58 = vld [vmem:[#allocation12 + $0xd10] sm:$0xff] }
 0x450   : > { %v14515_v59 = vcombine.low %v3708_v58, %v3716_v50 }
 0x451   : > { %6584 = vmatpush1.bf16.msra.mxu1 %v14403_v19  ;;  %v14501_v19 = vcombine.low %v3693_v57, %v3701_v52  ;;  %v3797_v57 = vld [vmem:[#allocation12 + $0xfd8] sm:$0xff] }
 0x452   : > { %6670 = vmatpush1.bf16.msra.mxu0 %v14405_v29  ;;  %6585 = vmatprep.subr.bf16.mxu1 %v14420_v18  ;;  %v14516_v29 = vcombine.high %v3708_v58, %v3716_v50  ;;  %v14518_v18 = vcombine.high %v3709_v53, %v3717_v16  ;;  %v3302_v58 = vld [vmem:[#allocation12 + $0x60] sm:$0xff]  ;;  %v3295_v50 = vld [vmem:[#allocation12 + $0x28] sm:$0xff] }
 0x453   : > { %6671 = vmatprep.subr.bf16.mxu0 %v14422_v2  ;;  %v3724_v2 = vld [vmem:[#allocation12 + $0xd90] sm:$0xff] }
 0x454   : > { %v14531_v22 = vcombine.low %v3724_v2, %v3732_v33 }
 0x455   : > { %6586 = vmatpush1.bf16.msra.mxu1 %v14419_v13  ;;  %v14517_v13 = vcombine.low %v3709_v53, %v3717_v16  ;;  %v3303_v53 = vld [vmem:[#allocation12 + $0x68] sm:$0xff] }
 0x456   : > { %6672 = vmatpush1.bf16.msra.mxu0 %v14421_v4  ;;  %6587 = vmatprep.subr.bf16.mxu1 %v14436_v0  ;;  %v14532_v4 = vcombine.high %v3724_v2, %v3732_v33  ;;  %v14534_v0 = vcombine.high %v3725_v42, %v3733_v8  ;;  %v3318_v2 = vld [vmem:[#allocation12 + $0xe0] sm:$0xff] }
 0x457   : > { %6673 = vmatprep.subr.bf16.mxu0 %v14438_v11  ;;  %v3740_v11 = vld [vmem:[#allocation12 + $0xe10] sm:$0xff] }
 0x458   : > { %v14547_v23 = vcombine.low %v3740_v11, %v3748_v45 }
 0x459   : > { %6588 = vmatpush1.bf16.msra.mxu1 %v14435_v38  ;;  %v14533_v38 = vcombine.low %v3725_v42, %v3733_v8  ;;  %v3311_v42 = vld [vmem:[#allocation12 + $0xa8] sm:$0xff] }
 0x45a   : > { %6674 = vmatpush1.bf16.msra.mxu0 %v14437_v28  ;;  %6589 = vmatprep.subr.bf16.mxu1 %v14452_v30  ;;  %v14548_v28 = vcombine.high %v3740_v11, %v3748_v45  ;;  %v14550_v30 = vcombine.high %v3741_v9, %v3749_v17  ;;  %v3319_v8 = vld [vmem:[#allocation12 + $0xe8] sm:$0xff] }
 0x45b   : > { %6675 = vmatprep.subr.bf16.mxu0 %v14454_v31  ;;  %v3756_v31 = vld [vmem:[#allocation12 + $0xe90] sm:$0xff]  ;;  %v14122_v11 = vcombine.high %v3311_v42, %v3319_v8  ;;  %v3327_v45 = vld [vmem:[#allocation12 + $0x128] sm:$0xff] }
 0x45c   : > { %v14563_v60 = vcombine.low %v3756_v31, %v3764_v32 }
 0x45d   : > { %6590 = vmatpush1.bf16.msra.mxu1 %v14451_v21  ;;  %v14549_v21 = vcombine.low %v3741_v9, %v3749_v17  ;;  %v3335_v9 = vld [vmem:[#allocation12 + $0x168] sm:$0xff] }
 0x45e   : > { %6676 = vmatpush1.bf16.msra.mxu0 %v14453_v20  ;;  %6591 = vmatprep.subr.bf16.mxu1 %v14468_v14  ;;  %v14564_v20 = vcombine.high %v3756_v31, %v3764_v32  ;;  %v14566_v14 = vcombine.high %v3757_v36, %v3765_v24  ;;  %v3350_v31 = vld [vmem:[#allocation12 + $0x1e0] sm:$0xff]  ;;  %v3343_v32 = vld [vmem:[#allocation12 + $0x1a8] sm:$0xff] }
 0x45f   : > { %6677 = vmatprep.subr.bf16.mxu0 %v14470_v12  ;;  %v3772_v12 = vld [vmem:[#allocation12 + $0xf10] sm:$0xff] }
 0x460   : > { %v14579_v52 = vcombine.low %v3772_v12, %v3780_v63 }
 0x461   : > { %6592 = vmatpush1.bf16.msra.mxu1 %v14467_v5  ;;  %v14565_v5 = vcombine.low %v3757_v36, %v3765_v24  ;;  %v3351_v36 = vld [vmem:[#allocation12 + $0x1e8] sm:$0xff] }
 0x462   : > { %6678 = vmatpush1.bf16.msra.mxu0 %v14469_v6  ;;  %6593 = vmatprep.subr.bf16.mxu1 %v14484_v56  ;;  %v14580_v6 = vcombine.high %v3772_v12, %v3780_v63  ;;  %v14582_v56 = vcombine.high %v3773_v61, %v3781_v34  ;;  %v3366_v12 = vld [vmem:[#allocation12 + $0x260] sm:$0xff]  ;;  %v3359_v63 = vld [vmem:[#allocation12 + $0x228] sm:$0xff] }
 0x463   : > { %6679 = vmatprep.subr.bf16.mxu0 %v14486_v3  ;;  %v3788_v3 = vld [vmem:[#allocation12 + $0xf90] sm:$0xff] }
 0x464   : > { %v14595_v16 = vcombine.low %v3788_v3, %v3796_v27 }
 0x465   : > { %6594 = vmatpush1.bf16.msra.mxu1 %v14483_v47  ;;  %v14581_v47 = vcombine.low %v3773_v61, %v3781_v34  ;;  %v3367_v61 = vld [vmem:[#allocation12 + $0x268] sm:$0xff] }
 0x466   : > { %6680 = vmatpush1.bf16.msra.mxu0 %v14485_v51  ;;  %6595 = vmatprep.subr.bf16.mxu1 %v14500_v26  ;;  %v14596_v51 = vcombine.high %v3788_v3, %v3796_v27  ;;  %v14598_v26 = vcombine.high %v3789_v10, %v3797_v57  ;;  %v3382_v3 = vld [vmem:[#allocation12 + $0x2e0] sm:$0xff]  ;;  %v3375_v27 = vld [vmem:[#allocation12 + $0x2a8] sm:$0xff] }
 0x467   : > { %6681 = vmatprep.subr.bf16.mxu0 %v14502_v49  ;;  %v3294_v49 = vld [vmem:[#allocation12 + $0x20] sm:$0xff] }
 0x468   : > { %v14103_v33 = vcombine.low %v3294_v49, %v3302_v58 }
 0x469   : > { %6596 = vmatpush1.bf16.msra.mxu1 %v14499_v15  ;;  %v14597_v15 = vcombine.low %v3789_v10, %v3797_v57  ;;  %v3383_v10 = vld [vmem:[#allocation12 + $0x2e8] sm:$0xff] }
 0x46a   : > { %6682 = vmatpush1.bf16.msra.mxu0 %v14501_v19  ;;  %6597 = vmatprep.subr.bf16.mxu1 %v14516_v29  ;;  %v14104_v19 = vcombine.high %v3294_v49, %v3302_v58  ;;  %v14106_v29 = vcombine.high %v3295_v50, %v3303_v53  ;;  %v3398_v49 = vld [vmem:[#allocation12 + $0x360] sm:$0xff]  ;;  %v3391_v58 = vld [vmem:[#allocation12 + $0x328] sm:$0xff] }
 0x46b   : > { %6683 = vmatprep.subr.bf16.mxu0 %v14518_v18  ;;  %v3310_v18 = vld [vmem:[#allocation12 + $0xa0] sm:$0xff] }
 0x46c   : > { %v14119_v17 = vcombine.low %v3310_v18, %v3318_v2 }
 0x46d   : > { %6598 = vmatpush1.bf16.msra.mxu1 %v14515_v59  ;;  %v14105_v59 = vcombine.low %v3295_v50, %v3303_v53  ;;  %v3399_v50 = vld [vmem:[#allocation12 + $0x368] sm:$0xff] }
 0x46e   : > { %6684 = vmatpush1.bf16.msra.mxu0 %v14517_v13  ;;  %6599 = vmatprep.subr.bf16.mxu1 %v14532_v4  ;;  %v14120_v13 = vcombine.high %v3310_v18, %v3318_v2  ;;  %v3326_v4 = vld [vmem:[#allocation12 + $0x120] sm:$0xff]  ;;  %v3407_v2 = vld [vmem:[#allocation12 + $0x3a8] sm:$0xff] }
 0x46f   : > { %6685 = vmatprep.subr.bf16.mxu0 %v14534_v0  ;;  %v3334_v0 = vld [vmem:[#allocation12 + $0x160] sm:$0xff] }
 0x470   : > { %v14135_v24 = vcombine.low %v3326_v4, %v3334_v0  ;;  %v3414_v18 = vld [vmem:[#allocation12 + $0x3e0] sm:$0xff] }
 0x471   : > { %6600 = vmatpush1.bf16.msra.mxu1 %v14531_v22  ;;  %v14121_v22 = vcombine.low %v3311_v42, %v3319_v8  ;;  %v14201_v8 = vcombine.low %v3391_v58, %v3399_v50 }
 0x472   : > { %6686 = vmatpush1.bf16.msra.mxu0 %v14533_v38  ;;  %6601 = vmatprep.subr.bf16.mxu1 %v14548_v28  ;;  %v14136_v38 = vcombine.high %v3326_v4, %v3334_v0  ;;  %v14138_v28 = vcombine.high %v3327_v45, %v3335_v9  ;;  %v3422_v4 = vld [vmem:[#allocation12 + $0x420] sm:$0xff] }
 0x473   : > { %6687 = vmatprep.subr.bf16.mxu0 %v14550_v30  ;;  %v3342_v30 = vld [vmem:[#allocation12 + $0x1a0] sm:$0xff] }
 0x474   : > { %v14151_v34 = vcombine.low %v3342_v30, %v3350_v31  ;;  %v3430_v0 = vld [vmem:[#allocation12 + $0x460] sm:$0xff] }
 0x475   : > { %6602 = vmatpush1.bf16.msra.mxu1 %v14547_v23  ;;  %v14137_v23 = vcombine.low %v3327_v45, %v3335_v9  ;;  %v3431_v45 = vld [vmem:[#allocation12 + $0x468] sm:$0xff] }
 0x476   : > { %6688 = vmatpush1.bf16.msra.mxu0 %v14549_v21  ;;  %6603 = vmatprep.subr.bf16.mxu1 %v14564_v20  ;;  %v14152_v21 = vcombine.high %v3342_v30, %v3350_v31  ;;  %v14154_v20 = vcombine.high %v3343_v32, %v3351_v36  ;;  %v3446_v30 = vld [vmem:[#allocation12 + $0x4e0] sm:$0xff]  ;;  %v3439_v31 = vld [vmem:[#allocation12 + $0x4a8] sm:$0xff] }
 0x477   : > { %6689 = vmatprep.subr.bf16.mxu0 %v14566_v14  ;;  %v3358_v14 = vld [vmem:[#allocation12 + $0x220] sm:$0xff] }
 0x478   : > { %v14167_v57 = vcombine.low %v3358_v14, %v3366_v12 }
 0x479   : > { %6604 = vmatpush1.bf16.msra.mxu1 %v14563_v60  ;;  %v14153_v60 = vcombine.low %v3343_v32, %v3351_v36  ;;  %v3447_v32 = vld [vmem:[#allocation12 + $0x4e8] sm:$0xff]  ;;  %v14231_v36 = vcombine.low %v3422_v4, %v3430_v0 }
 0x47a   : > { %6690 = vmatpush1.bf16.msra.mxu0 %v14565_v5  ;;  %6605 = vmatprep.subr.bf16.mxu1 %v14580_v6  ;;  %v14168_v5 = vcombine.high %v3358_v14, %v3366_v12  ;;  %v14170_v6 = vcombine.high %v3359_v63, %v3367_v61  ;;  %v3462_v14 = vld [vmem:[#allocation12 + $0x560] sm:$0xff]  ;;  %v3455_v12 = vld [vmem:[#allocation12 + $0x528] sm:$0xff] }
 0x47b   : > { %6691 = vmatprep.subr.bf16.mxu0 %v14582_v56  ;;  %v3374_v56 = vld [vmem:[#allocation12 + $0x2a0] sm:$0xff] }
 0x47c   : > { %v14183_v53 = vcombine.low %v3374_v56, %v3382_v3 }
 0x47d   : > { %6606 = vmatpush1.bf16.msra.mxu1 %v14579_v52  ;;  %v14169_v52 = vcombine.low %v3359_v63, %v3367_v61  ;;  %v3463_v63 = vld [vmem:[#allocation12 + $0x568] sm:$0xff] }
 0x47e   : > { %6692 = vmatpush1.bf16.msra.mxu0 %v14581_v47  ;;  %6607 = vmatprep.subr.bf16.mxu1 %v14596_v51  ;;  %v14184_v47 = vcombine.high %v3374_v56, %v3382_v3  ;;  %v14186_v51 = vcombine.high %v3375_v27, %v3383_v10  ;;  %v3478_v56 = vld [vmem:[#allocation12 + $0x5e0] sm:$0xff]  ;;  %v3471_v3 = vld [vmem:[#allocation12 + $0x5a8] sm:$0xff] }
 0x47f   : > { %6693 = vmatprep.subr.bf16.mxu0 %v14598_v26  ;;  %v3390_v26 = vld [vmem:[#allocation12 + $0x320] sm:$0xff] }
 0x480   : > { %v14199_v42 = vcombine.low %v3390_v26, %v3398_v49 }
 0x481   : > { %6608 = vmatpush1.bf16.msra.mxu1 %v14595_v16  ;;  %v14185_v16 = vcombine.low %v3375_v27, %v3383_v10  ;;  %v3479_v27 = vld [vmem:[#allocation12 + $0x5e8] sm:$0xff] }
 0x482   : > { %6694 = vmatpush1.bf16.msra.mxu0 %v14597_v15  ;;  %6706 = vmatprep.subr.bf16.mxu1 %v14104_v19  ;;  %v14200_v15 = vcombine.high %v3390_v26, %v3398_v49  ;;  %v14202_v19 = vcombine.high %v3391_v58, %v3399_v50  ;;  %v3494_v26 = vld [vmem:[#allocation12 + $0x660] sm:$0xff]  ;;  %v3487_v49 = vld [vmem:[#allocation12 + $0x628] sm:$0xff] }
 0x483   : > { %6792 = vmatprep.subr.bf16.mxu0 %v14106_v29  ;;  %v3406_v29 = vld [vmem:[#allocation12 + $0x3a0] sm:$0xff]  ;;  %v3495_v58 = vld [vmem:[#allocation12 + $0x668] sm:$0xff] }
 0x484   : > { %6610 = vmatmul.mubr.bf16.vlgmr.msra.gmra.mrb[20].mxu1 %v17065_v46  ;;  %v14215_v9 = vcombine.low %v3406_v29, %v3414_v18 }
 0x485   : > { %6696 = vmatmul.mubr.bf16.vlgmr.msra.gmra.mrb[24].mxu0 %v17065_v46  ;;  %6707 = vmatpush1.bf16.msra.mxu1 %v14103_v33  ;;  %v3415_v33 = vld [vmem:[#allocation12 + $0x3e8] sm:$0xff] }
 0x486   : > { %6738 = vmatprep.mubr.bf16.mxu1 %v17053_v54  ;;  %6793 = vmatpush1.bf16.msra.mxu0 %v14105_v59  ;;  %v14216_v59 = vcombine.high %v3406_v29, %v3414_v18  ;;  %v3510_v29 = vld [vmem:[#allocation12 + $0x6e0] sm:$0xff]  ;;  %v3503_v18 = vld [vmem:[#allocation12 + $0x6a8] sm:$0xff] }
 0x487   : > { %6824 = vmatprep.mubr.bf16.mxu0 %v17053_v54  ;;  %6708 = vmatprep.subr.bf16.mxu1 %v14120_v13  ;;  %v14218_v13 = vcombine.high %v3407_v2, %v3415_v33 }
 0x488   : > { %6794 = vmatprep.subr.bf16.mxu0 %v14122_v11  ;;  %v3423_v11 = vld [vmem:[#allocation12 + $0x428] sm:$0xff] }
 0x489   : > { %6709 = vmatpush1.bf16.msra.mxu1 %v14119_v17  ;;  %v14217_v17 = vcombine.low %v3407_v2, %v3415_v33  ;;  %v3511_v2 = vld [vmem:[#allocation12 + $0x6e8] sm:$0xff] }
 0x48a   : > { %6795 = vmatpush1.bf16.msra.mxu0 %v14121_v22  ;;  %6710 = vmatprep.subr.bf16.mxu1 %v14136_v38  ;;  %v14232_v22 = vcombine.high %v3422_v4, %v3430_v0  ;;  %v14234_v38 = vcombine.high %v3423_v11, %v3431_v45  ;;  %v3526_v4 = vld [vmem:[#allocation12 + $0x760] sm:$0xff]  ;;  %v3519_v0 = vld [vmem:[#allocation12 + $0x728] sm:$0xff] }
 0x48b   : > { %6796 = vmatprep.subr.bf16.mxu0 %v14138_v28  ;;  %v3438_v28 = vld [vmem:[#allocation12 + $0x4a0] sm:$0xff] }
 0x48c   : > { %v14247_v61 = vcombine.low %v3438_v28, %v3446_v30 }
 0x48d   : > { %6711 = vmatpush1.bf16.msra.mxu1 %v14135_v24  ;;  %v14233_v24 = vcombine.low %v3423_v11, %v3431_v45  ;;  %v3527_v11 = vld [vmem:[#allocation12 + $0x768] sm:$0xff] }
 0x48e   : > { %6797 = vmatpush1.bf16.msra.mxu0 %v14137_v23  ;;  %6712 = vmatprep.subr.bf16.mxu1 %v14152_v21  ;;  %v14248_v23 = vcombine.high %v3438_v28, %v3446_v30  ;;  %v14250_v21 = vcombine.high %v3439_v31, %v3447_v32  ;;  %v3542_v28 = vld [vmem:[#allocation12 + $0x7e0] sm:$0xff]  ;;  %v3535_v30 = vld [vmem:[#allocation12 + $0x7a8] sm:$0xff] }
 0x48f   : > { %6798 = vmatprep.subr.bf16.mxu0 %v14154_v20  ;;  %v3454_v20 = vld [vmem:[#allocation12 + $0x520] sm:$0xff] }
 0x490   : > { %v14263_v10 = vcombine.low %v3454_v20, %v3462_v14 }
 0x491   : > { %6713 = vmatpush1.bf16.msra.mxu1 %v14151_v34  ;;  %v14249_v34 = vcombine.low %v3439_v31, %v3447_v32  ;;  %v3543_v31 = vld [vmem:[#allocation12 + $0x7e8] sm:$0xff] }
 0x492   : > { %6799 = vmatpush1.bf16.msra.mxu0 %v14153_v60  ;;  %6714 = vmatprep.subr.bf16.mxu1 %v14168_v5  ;;  %v14264_v60 = vcombine.high %v3454_v20, %v3462_v14  ;;  %v14266_v5 = vcombine.high %v3455_v12, %v3463_v63  ;;  %v3558_v20 = vld [vmem:[#allocation12 + $0x860] sm:$0xff]  ;;  %v3551_v14 = vld [vmem:[#allocation12 + $0x828] sm:$0xff] }
 0x493   : > { %6800 = vmatprep.subr.bf16.mxu0 %v14170_v6  ;;  %v3470_v6 = vld [vmem:[#allocation12 + $0x5a0] sm:$0xff] }
 0x494   : > { %v14279_v50 = vcombine.low %v3470_v6, %v3478_v56 }
 0x495   : > { %6715 = vmatpush1.bf16.msra.mxu1 %v14167_v57  ;;  %v14265_v57 = vcombine.low %v3455_v12, %v3463_v63  ;;  %v3559_v12 = vld [vmem:[#allocation12 + $0x868] sm:$0xff] }
 0x496   : > { %6801 = vmatpush1.bf16.msra.mxu0 %v14169_v52  ;;  %6716 = vmatprep.subr.bf16.mxu1 %v14184_v47  ;;  %v14280_v52 = vcombine.high %v3470_v6, %v3478_v56  ;;  %v14282_v47 = vcombine.high %v3471_v3, %v3479_v27  ;;  %v3574_v6 = vld [vmem:[#allocation12 + $0x8e0] sm:$0xff] }
 0x497   : > { %6802 = vmatprep.subr.bf16.mxu0 %v14186_v51  ;;  %v3486_v51 = vld [vmem:[#allocation12 + $0x620] sm:$0xff] }
 0x498   : > { %v14295_v33 = vcombine.low %v3486_v51, %v3494_v26 }
 0x499   : > { %6717 = vmatpush1.bf16.msra.mxu1 %v14183_v53  ;;  %v14281_v53 = vcombine.low %v3471_v3, %v3479_v27  ;;  %v3567_v3 = vld [vmem:[#allocation12 + $0x8a8] sm:$0xff] }
 0x49a   : > { %6803 = vmatpush1.bf16.msra.mxu0 %v14185_v16  ;;  %6718 = vmatprep.subr.bf16.mxu1 %v14200_v15  ;;  %v14296_v16 = vcombine.high %v3486_v51, %v3494_v26  ;;  %v14298_v15 = vcombine.high %v3487_v49, %v3495_v58  ;;  %v3575_v27 = vld [vmem:[#allocation12 + $0x8e8] sm:$0xff] }
 0x49b   : > { %6804 = vmatprep.subr.bf16.mxu0 %v14202_v19  ;;  %v3502_v19 = vld [vmem:[#allocation12 + $0x6a0] sm:$0xff]  ;;  %v14378_v51 = vcombine.high %v3567_v3, %v3575_v27  ;;  %v3583_v26 = vld [vmem:[#allocation12 + $0x928] sm:$0xff] }
 0x49c   : > { %v14311_v45 = vcombine.low %v3502_v19, %v3510_v29 }
 0x49d   : > { %6719 = vmatpush1.bf16.msra.mxu1 %v14199_v42  ;;  %v14297_v42 = vcombine.low %v3487_v49, %v3495_v58  ;;  %v3591_v49 = vld [vmem:[#allocation12 + $0x968] sm:$0xff] }
 0x49e   : > { %6805 = vmatpush1.bf16.msra.mxu0 %v14201_v8  ;;  %6720 = vmatprep.subr.bf16.mxu1 %v14216_v59  ;;  %v14312_v8 = vcombine.high %v3502_v19, %v3510_v29  ;;  %v14314_v59 = vcombine.high %v3503_v18, %v3511_v2  ;;  %v3606_v19 = vld [vmem:[#allocation12 + $0x9e0] sm:$0xff]  ;;  %v3599_v29 = vld [vmem:[#allocation12 + $0x9a8] sm:$0xff] }
 0x49f   : > { %6806 = vmatprep.subr.bf16.mxu0 %v14218_v13  ;;  %v3518_v13 = vld [vmem:[#allocation12 + $0x720] sm:$0xff] }
 0x4a0   : > { %v14327_v32 = vcombine.low %v3518_v13, %v3526_v4 }
 0x4a1   : > { %6721 = vmatpush1.bf16.msra.mxu1 %v14215_v9  ;;  %v14313_v9 = vcombine.low %v3503_v18, %v3511_v2  ;;  %v3607_v18 = vld [vmem:[#allocation12 + $0x9e8] sm:$0xff] }
 0x4a2   : > { %6807 = vmatpush1.bf16.msra.mxu0 %v14217_v17  ;;  %6722 = vmatprep.subr.bf16.mxu1 %v14232_v22  ;;  %v14328_v17 = vcombine.high %v3518_v13, %v3526_v4  ;;  %v14330_v22 = vcombine.high %v3519_v0, %v3527_v11  ;;  %v3622_v13 = vld [vmem:[#allocation12 + $0xa60] sm:$0xff]  ;;  %v3615_v4 = vld [vmem:[#allocation12 + $0xa28] sm:$0xff] }
 0x4a3   : > { %6808 = vmatprep.subr.bf16.mxu0 %v14234_v38  ;;  %v3534_v38 = vld [vmem:[#allocation12 + $0x7a0] sm:$0xff] }
 0x4a4   : > { %v14343_v63 = vcombine.low %v3534_v38, %v3542_v28 }
 0x4a5   : > { %6723 = vmatpush1.bf16.msra.mxu1 %v14231_v36  ;;  %v14329_v36 = vcombine.low %v3519_v0, %v3527_v11  ;;  %v3623_v0 = vld [vmem:[#allocation12 + $0xa68] sm:$0xff] }
 0x4a6   : > { %6809 = vmatpush1.bf16.msra.mxu0 %v14233_v24  ;;  %6724 = vmatprep.subr.bf16.mxu1 %v14248_v23  ;;  %v14344_v24 = vcombine.high %v3534_v38, %v3542_v28  ;;  %v14346_v23 = vcombine.high %v3535_v30, %v3543_v31  ;;  %v3638_v38 = vld [vmem:[#allocation12 + $0xae0] sm:$0xff]  ;;  %v3631_v28 = vld [vmem:[#allocation12 + $0xaa8] sm:$0xff] }
 0x4a7   : > { %6810 = vmatprep.subr.bf16.mxu0 %v14250_v21  ;;  %v3550_v21 = vld [vmem:[#allocation12 + $0x820] sm:$0xff] }
 0x4a8   : > { %v14359_v56 = vcombine.low %v3550_v21, %v3558_v20 }
 0x4a9   : > { %6725 = vmatpush1.bf16.msra.mxu1 %v14247_v61  ;;  %v14345_v61 = vcombine.low %v3535_v30, %v3543_v31  ;;  %v3639_v30 = vld [vmem:[#allocation12 + $0xae8] sm:$0xff] }
 0x4aa   : > { %6811 = vmatpush1.bf16.msra.mxu0 %v14249_v34  ;;  %6726 = vmatprep.subr.bf16.mxu1 %v14264_v60  ;;  %v14360_v34 = vcombine.high %v3550_v21, %v3558_v20  ;;  %v14362_v60 = vcombine.high %v3551_v14, %v3559_v12  ;;  %v3646_v21 = vld [vmem:[#allocation12 + $0xb20] sm:$0xff] }
 0x4ab   : > { %6812 = vmatprep.subr.bf16.mxu0 %v14266_v5  ;;  %v3566_v5 = vld [vmem:[#allocation12 + $0x8a0] sm:$0xff] }
 0x4ac   : > { %v14375_v58 = vcombine.low %v3566_v5, %v3574_v6  ;;  %v3654_v20 = vld [vmem:[#allocation12 + $0xb60] sm:$0xff] }
 0x4ad   : > { %6727 = vmatpush1.bf16.msra.mxu1 %v14263_v10  ;;  %v14361_v10 = vcombine.low %v3551_v14, %v3559_v12 }
 0x4ae   : > { %6813 = vmatpush1.bf16.msra.mxu0 %v14265_v57  ;;  %6728 = vmatprep.subr.bf16.mxu1 %v14280_v52  ;;  %v14376_v57 = vcombine.high %v3566_v5, %v3574_v6  ;;  %v3582_v52 = vld [vmem:[#allocation12 + $0x920] sm:$0xff] }
 0x4af   : > { %6814 = vmatprep.subr.bf16.mxu0 %v14282_v47  ;;  %v3590_v47 = vld [vmem:[#allocation12 + $0x960] sm:$0xff] }
 0x4b0   : > { %v14391_v2 = vcombine.low %v3582_v52, %v3590_v47  ;;  %v17133_v6 = vld [vmem:[#allocation12 + $0xba0] sm:$0xff] }
 0x4b1   : > { %6729 = vmatpush1.bf16.msra.mxu1 %v14279_v50  ;;  %v14377_v50 = vcombine.low %v3567_v3, %v3575_v27  ;;  %v14441_v3 = vcombine.low %v3631_v28, %v3639_v30  ;;  %v14456_v27 = vcombine.high %v3646_v21, %v3654_v20 }
 0x4b2   : > { %6815 = vmatpush1.bf16.msra.mxu0 %v14281_v53  ;;  %6730 = vmatprep.subr.bf16.mxu1 %v14296_v16  ;;  %v14392_v53 = vcombine.high %v3582_v52, %v3590_v47  ;;  %v14394_v16 = vcombine.high %v3583_v26, %v3591_v49 }
 0x4b3   : > { %6816 = vmatprep.subr.bf16.mxu0 %v14298_v15  ;;  %v3598_v15 = vld [vmem:[#allocation12 + $0x9a0] sm:$0xff] }
 0x4b4   : > { %v14407_v11 = vcombine.low %v3598_v15, %v3606_v19 }
 0x4b5   : > { %6731 = vmatpush1.bf16.msra.mxu1 %v14295_v33  ;;  %v14393_v33 = vcombine.low %v3583_v26, %v3591_v49 }
 0x4b6   : > { %6817 = vmatpush1.bf16.msra.mxu0 %v14297_v42  ;;  %6732 = vmatprep.subr.bf16.mxu1 %v14312_v8  ;;  %v14408_v42 = vcombine.high %v3598_v15, %v3606_v19  ;;  %v14410_v8 = vcombine.high %v3599_v29, %v3607_v18 }
 0x4b7   : > { %6818 = vmatprep.subr.bf16.mxu0 %v14314_v59  ;;  %v3614_v59 = vld [vmem:[#allocation12 + $0xa20] sm:$0xff] }
 0x4b8   : > { %v14423_v31 = vcombine.low %v3614_v59, %v3622_v13 }
 0x4b9   : > { %6733 = vmatpush1.bf16.msra.mxu1 %v14311_v45  ;;  %v14409_v45 = vcombine.low %v3599_v29, %v3607_v18 }
 0x4ba   : > { %6819 = vmatpush1.bf16.msra.mxu0 %v14313_v9  ;;  %6734 = vmatprep.subr.bf16.mxu1 %v14328_v17  ;;  %v14424_v9 = vcombine.high %v3614_v59, %v3622_v13  ;;  %v14426_v17 = vcombine.high %v3615_v4, %v3623_v0  ;;  %v17153_v59 = vld [vmem:[#allocation12 + $0xc20] sm:$0xff] }
 0x4bb   : > { %6820 = vmatprep.subr.bf16.mxu0 %v14330_v22  ;;  %v3630_v22 = vld [vmem:[#allocation12 + $0xaa0] sm:$0xff] }
 0x4bc   : > { %v14439_v5 = vcombine.low %v3630_v22, %v3638_v38  ;;  %v17155_v13 = vld [vmem:[#allocation12 + $0xc60] sm:$0xff] }
 0x4bd   : > { %6735 = vmatpush1.bf16.msra.mxu1 %v14327_v32  ;;  %v17115_v32 = vld [vmem:[#allocation15] sm:$0xff] }
 0x4be   : > { %6821 = vmatpush1.bf16.msra.mxu0 %v14329_v36  ;;  %6736 = vmatprep.subr.bf16.mxu1 %v14344_v24  ;;  %v14425_v36 = vcombine.low %v3615_v4, %v3623_v0  ;;  %v14440_v24 = vcombine.high %v3630_v22, %v3638_v38  ;;  %v17119_v14 = vrot.slane %v17115_v32, %v16564_v41 }
 0x4bf   : > { %6822 = vmatprep.subr.bf16.mxu0 %v14346_v23  ;;  %v14442_v23 = vcombine.high %v3631_v28, %v3639_v30  ;;  %v17123_v12 = vrot.slane %v17115_v32, %v16650_v37 }
 0x4c1   : > { %6737 = vmatpush1.bf16.msra.mxu1 %v14343_v63  ;;  %v3647_v63 = vld [vmem:[#allocation12 + $0xb28] sm:$0xff] }
 0x4c2   : > { %6823 = vmatpush1.bf16.msra.mxu0 %v14345_v61  ;;  %6749 = vmatprep.subr.bf16.mxu1 %v14360_v34  ;;  %v3655_v61 = vld [vmem:[#allocation12 + $0xb68] sm:$0xff]  ;;  %v17127_v34 = vrot.slane %v17115_v32, %v16567_v43 }
 0x4c3   : > { %6835 = vmatprep.subr.bf16.mxu0 %v14362_v60  ;;  %v17131_v60 = vrot.slane %v17115_v32, %v16653_v35  ;;  %v14457_v26 = vcombine.low %v3647_v63, %v3655_v61  ;;  %v14458_v49 = vcombine.high %v3647_v63, %v3655_v61 }
 0x4c4   : > { %6739 = vmatmul.mubr.bf16.vlgmr.msra.gmra.mrb[24].mxu1 %v17057_v44 }
 0x4c5   : > { %6825 = vmatmul.mubr.bf16.vlgmr.msra.gmra.mrb[28].mxu0 %v17057_v44  ;;  %6750 = vmatpush1.bf16.msra.mxu1 %v14359_v56  ;;  %v17135_v56 = vld [vmem:[#allocation12 + $0xbe0] sm:$0xff] }
 0x4c6   : > { %6781 = vmatprep.mubr.bf16.mxu1 %v17061_v55  ;;  %6836 = vmatpush1.bf16.msra.mxu0 %v14361_v10  ;;  %v17137_v10 = vld [vmem:[#allocation12 + $0xba8] sm:$0xff]  ;;  %v14471_v15 = vcombine.low %v17133_v6, %v17135_v56  ;;  %v14472_v19 = vcombine.high %v17133_v6, %v17135_v56 }
 0x4c7   : > { %6867 = vmatprep.mubr.bf16.mxu0 %v17061_v55  ;;  %6751 = vmatprep.subr.bf16.mxu1 %v14376_v57  ;;  %v17139_v57 = vld [vmem:[#allocation12 + $0xbe8] sm:$0xff] }
 0x4c8   : > { %6837 = vmatprep.subr.bf16.mxu0 %v14378_v51  ;;  %v14455_v51 = vcombine.low %v3646_v21, %v3654_v20  ;;  %v14487_v21 = vcombine.low %v17153_v59, %v17155_v13  ;;  %v14488_v20 = vcombine.high %v17153_v59, %v17155_v13 }
 0x4c9   : > { %6752 = vmatpush1.bf16.msra.mxu1 %v14375_v58 }
 0x4ca   : > { %6838 = vmatpush1.bf16.msra.mxu0 %v14377_v50  ;;  %6753 = vmatprep.subr.bf16.mxu1 %v14392_v53 }
 0x4cb   : > { %6839 = vmatprep.subr.bf16.mxu0 %v14394_v16 }
 0x4cd   : > { %6754 = vmatpush1.bf16.msra.mxu1 %v14391_v2 }
 0x4ce   : > { %6840 = vmatpush1.bf16.msra.mxu0 %v14393_v33  ;;  %6755 = vmatprep.subr.bf16.mxu1 %v14408_v42  ;;  %v14473_v42 = vcombine.low %v17137_v10, %v17139_v57 }
 0x4cf   : > { %6841 = vmatprep.subr.bf16.mxu0 %v14410_v8  ;;  %v14474_v8 = vcombine.high %v17137_v10, %v17139_v57 }
 0x4d1   : > { %6756 = vmatpush1.bf16.msra.mxu1 %v14407_v11 }
 0x4d2   : > { %6842 = vmatpush1.bf16.msra.mxu0 %v14409_v45  ;;  %6757 = vmatprep.subr.bf16.mxu1 %v14424_v9 }
 0x4d3   : > { %6843 = vmatprep.subr.bf16.mxu0 %v14426_v17 }
 0x4d5   : > { %6758 = vmatpush1.bf16.msra.mxu1 %v14423_v31  ;;  %v3679_v31 = vld [vmem:[#allocation12 + $0xc28] sm:$0xff] }
 0x4d6   : > { %6844 = vmatpush1.bf16.msra.mxu0 %v14425_v36  ;;  %6759 = vmatprep.subr.bf16.mxu1 %v14440_v24  ;;  %v3687_v36 = vld [vmem:[#allocation12 + $0xc68] sm:$0xff] }
 0x4d7   : > { %v6439_v52 = vpop.f32.mrb[16].mxu1  ;;  %v6525_v47 = vpop.f32.mrb[20].mxu0  ;;  %6845 = vmatprep.subr.bf16.mxu0 %v14442_v23  ;;  %v14490_v10 = vcombine.high %v3679_v31, %v3687_v36 }
 0x4d8   : > { %v8972_v58 = vadd.f32 %v17119_v14, %v6439_v52  ;;  %v8974_v50 = vadd.f32 %v17123_v12, %v6525_v47  ;;  %v6441_v53 = vpop.f32.mrb[17].mxu1  ;;  %v6527_v16 = vpop.f32.mrb[21].mxu0 }
 0x4d9   : > { %v8973_v29 = vadd.f32 %v17127_v34, %v6441_v53  ;;  %v8975_v18 = vadd.f32 %v17131_v60, %v6527_v16  ;;  %v6443_v2 = vpop.f32.mrb[18].mxu1  ;;  %v6529_v33 = vpop.f32.mrb[22].mxu0  ;;  %6760 = vmatpush1.bf16.msra.mxu1 %v14439_v5  ;;  %v3702_v16 = vld [vmem:[#allocation12 + $0xce0] sm:$0xff] }
 0x4da   : > { %v8988_v4 = vmax.f32 %v8972_v58, 0.0  ;;  %v8990_v0 = vmax.f32 %v8974_v50, 0.0  ;;  %v8980_v11 = vadd.f32 %v17119_v14, %v6443_v2  ;;  %v8982_v45 = vadd.f32 %v17123_v12, %v6529_v33  ;;  %6846 = vmatpush1.bf16.msra.mxu0 %v14441_v3  ;;  %v6445_v9 = vpop.f32.mrb[19].mxu1  ;;  %v6531_v17 = vpop.f32.mrb[23].mxu0  ;;  %6761 = vmatprep.subr.bf16.mxu1 %v14456_v27 }
 0x4db   : > { %v8989_v22 = vmax.f32 %v8973_v29, 0.0  ;;  %v8991_v38 = vmax.f32 %v8975_v18, 0.0  ;;  %v8981_v28 = vadd.f32 %v17127_v34, %v6445_v9  ;;  %v8983_v30 = vadd.f32 %v17131_v60, %v6531_v17  ;;  %6847 = vmatprep.subr.bf16.mxu0 %v14458_v49  ;;  %v3703_v29 = vld [vmem:[#allocation12 + $0xce8] sm:$0xff]  ;;  %v3710_v9 = vld [vmem:[#allocation12 + $0xd20] sm:$0xff] }
 0x4dc   : > { %v8996_v24 = vmax.f32 %v8980_v11, 0.0  ;;  %v8998_v23 = vmax.f32 %v8982_v45, 0.0  ;;  %v14489_v27 = vcombine.low %v3679_v31, %v3687_v36  ;;  %v3718_v17 = vld [vmem:[#allocation12 + $0xd60] sm:$0xff] }
 0x4dd   : > { %v9068_v63 = vcombine.low %v8988_v4, %v8989_v22  ;;  %v9069_v61 = vcombine.high %v8988_v4, %v8989_v22  ;;  %v9070_v5 = vcombine.low %v8990_v0, %v8991_v38  ;;  %v9071_v6 = vcombine.high %v8990_v0, %v8991_v38  ;;  %6762 = vmatpush1.bf16.msra.mxu1 %v14455_v51  ;;  %v3694_v51 = vld [vmem:[#allocation12 + $0xca0] sm:$0xff] }
 0x4de   : > { %v8997_v56 = vmax.f32 %v8981_v28, 0.0  ;;  %v8999_v3 = vmax.f32 %v8983_v30, 0.0  ;;  %6848 = vmatpush1.bf16.msra.mxu0 %v14457_v26  ;;  %6763 = vmatprep.subr.bf16.mxu1 %v14472_v19  ;;  %v3695_v19 = vld [vmem:[#allocation12 + $0xca8] sm:$0xff]  ;;  %v14504_v11 = vcombine.high %v3694_v51, %v3702_v16  ;;  %v14503_v31 = vcombine.low %v3694_v51, %v3702_v16  ;;  %v3750_v51 = vld [vmem:[#allocation12 + $0xe60] sm:$0xff] }
 0x4df   : > { %v17166_v57 = vrot.slane %v9068_v63, %v16572_v62  ;;  %v17169_v52 = vrot.slane %v9069_v61, %v16572_v62  ;;  %v17172_v47 = vrot.slane %v9070_v5, %v16572_v62  ;;  %v17175_v49 = vrot.slane %v9071_v6, %v16572_v62  ;;  %6849 = vmatprep.subr.bf16.mxu0 %v14474_v8  ;;  %v3711_v30 = vld [vmem:[#allocation12 + $0xd28] sm:$0xff]  ;;  %v3734_v63 = vld [vmem:[#allocation12 + $0xde0] sm:$0xff] }
 0x4e0   : > { %v9204_v58 = vcombine.low %v8996_v24, %v8997_v56  ;;  %v9205_v50 = vcombine.high %v8996_v24, %v8997_v56  ;;  %v9206_v26 = vcombine.low %v8998_v23, %v8999_v3  ;;  %v9207_v53 = vcombine.high %v8998_v23, %v8999_v3  ;;  %v3727_v61 = vld [vmem:[#allocation12 + $0xda8] sm:$0xff] }
 0x4e1   : > { %v9132_v18 = vcombine.low %v17166_v57, %v17172_v47  ;;  %v9133_v2 = vcombine.high %v17166_v57, %v17172_v47  ;;  %v9134_v33 = vcombine.low %v17169_v52, %v17175_v49  ;;  %v9135_v8 = vcombine.high %v17169_v52, %v17175_v49  ;;  %6764 = vmatpush1.bf16.msra.mxu1 %v14471_v15  ;;  %v3735_v5 = vld [vmem:[#allocation12 + $0xde8] sm:$0xff]  ;;  %v17297_v49 = vld [vmem:[#allocation12 + $0xc30] sm:$0xff] }
 0x4e2   : > { %v17186_v59 = vrot.slane %v9204_v58, %v16572_v62  ;;  %v17189_v13 = vrot.slane %v9205_v50, %v16572_v62  ;;  %v17192_v4 = vrot.slane %v9206_v26, %v16572_v62  ;;  %v17195_v0 = vrot.slane %v9207_v53, %v16572_v62  ;;  %6850 = vmatpush1.bf16.msra.mxu0 %v14473_v42  ;;  %v3719_v42 = vld [vmem:[#allocation12 + $0xd68] sm:$0xff] }
 0x4e3   : > { %6765 = vmatprep.subr.bf16.mxu1 %v14488_v20  ;;  %v14506_v45 = vcombine.high %v3695_v19, %v3703_v29  ;;  %6851 = vmatprep.subr.bf16.mxu0 %v14490_v10  ;;  %v14505_v36 = vcombine.low %v3695_v19, %v3703_v29  ;;  %v14520_v24 = vcombine.high %v3710_v9, %v3718_v17  ;;  %v3726_v20 = vld [vmem:[#allocation12 + $0xda0] sm:$0xff]  ;;  %v3751_v58 = vld [vmem:[#allocation12 + $0xe68] sm:$0xff] }
 0x4e4   : > { %v9268_v15 = vcombine.low %v17186_v59, %v17192_v4  ;;  %v9269_v22 = vcombine.high %v17186_v59, %v17192_v4  ;;  %v9270_v38 = vcombine.low %v17189_v13, %v17195_v0  ;;  %v9271_v28 = vcombine.high %v17189_v13, %v17195_v0  ;;  %v3758_v19 = vld [vmem:[#allocation12 + $0xea0] sm:$0xff] }
 0x4e5   : > { %6766 = vmatpush1.bf16.msra.mxu1 %v14487_v21  ;;  %v14522_v23 = vcombine.high %v3711_v30, %v3719_v42  ;;  %v14519_v6 = vcombine.low %v3710_v9, %v3718_v17  ;;  %v14521_v56 = vcombine.low %v3711_v30, %v3719_v42  ;;  %v14536_v3 = vcombine.high %v3726_v20, %v3734_v63  ;;  %v3742_v21 = vld [vmem:[#allocation12 + $0xe20] sm:$0xff] }
 0x4e6   : > { %6852 = vmatpush1.bf16.msra.mxu0 %v14489_v27  ;;  %6767 = vmatprep.subr.bf16.mxu1 %v14504_v11  ;;  %v14538_v10 = vcombine.high %v3727_v61, %v3735_v5  ;;  %v3743_v27 = vld [vmem:[#allocation12 + $0xe28] sm:$0xff]  ;;  %v14535_v50 = vcombine.low %v3726_v20, %v3734_v63  ;;  %v14537_v26 = vcombine.low %v3727_v61, %v3735_v5  ;;  %v3766_v29 = vld [vmem:[#allocation12 + $0xee0] sm:$0xff] }
 0x4e7   : > { %6853 = vmatprep.subr.bf16.mxu0 %v14506_v45  ;;  %v14552_v53 = vcombine.high %v3742_v21, %v3750_v51  ;;  %v14554_v16 = vcombine.high %v3743_v27, %v3751_v58  ;;  %v3759_v11 = vld [vmem:[#allocation12 + $0xea8] sm:$0xff]  ;;  %v14551_v9 = vcombine.low %v3742_v21, %v3750_v51  ;;  %v14553_v17 = vcombine.low %v3743_v27, %v3751_v58 }
 0x4e8   : > { %v3767_v45 = vld [vmem:[#allocation12 + $0xee8] sm:$0xff]  ;;  %v14568_v30 = vcombine.high %v3758_v19, %v3766_v29  ;;  %v14567_v20 = vcombine.low %v3758_v19, %v3766_v29 }
 0x4e9   : > { %6768 = vmatpush1.bf16.msra.mxu1 %v14503_v31  ;;  %v14570_v42 = vcombine.high %v3759_v11, %v3767_v45  ;;  %v3774_v31 = vld [vmem:[#allocation12 + $0xf20] sm:$0xff]  ;;  %v14569_v63 = vcombine.low %v3759_v11, %v3767_v45 }
 0x4ea   : > { %6854 = vmatpush1.bf16.msra.mxu0 %v14505_v36  ;;  %6769 = vmatprep.subr.bf16.mxu1 %v14520_v24  ;;  %v3782_v36 = vld [vmem:[#allocation12 + $0xf60] sm:$0xff]  ;;  %v3775_v24 = vld [vmem:[#allocation12 + $0xf28] sm:$0xff] }
 0x4eb   : > { %6855 = vmatprep.subr.bf16.mxu0 %v14522_v23  ;;  %v3783_v23 = vld [vmem:[#allocation12 + $0xf68] sm:$0xff]  ;;  %v14584_v61 = vcombine.high %v3774_v31, %v3782_v36  ;;  %v14583_v21 = vcombine.low %v3774_v31, %v3782_v36  ;;  %v3321_v31 = vld [vmem:[#allocation12 + $0xf8] sm:$0xff] }
 0x4ec   : > { %v14586_v5 = vcombine.high %v3775_v24, %v3783_v23  ;;  %v14585_v51 = vcombine.low %v3775_v24, %v3783_v23  ;;  %v3328_v23 = vld [vmem:[#allocation12 + $0x130] sm:$0xff] }
 0x4ed   : > { %6770 = vmatpush1.bf16.msra.mxu1 %v14519_v6  ;;  %v3790_v6 = vld [vmem:[#allocation12 + $0xfa0] sm:$0xff] }
 0x4ee   : > { %6856 = vmatpush1.bf16.msra.mxu0 %v14521_v56  ;;  %6771 = vmatprep.subr.bf16.mxu1 %v14536_v3  ;;  %v3798_v56 = vld [vmem:[#allocation12 + $0xfe0] sm:$0xff]  ;;  %v3791_v3 = vld [vmem:[#allocation12 + $0xfa8] sm:$0xff] }
 0x4ef   : > { %6857 = vmatprep.subr.bf16.mxu0 %v14538_v10  ;;  %v3799_v10 = vld [vmem:[#allocation12 + $0xfe8] sm:$0xff]  ;;  %v14600_v27 = vcombine.high %v3790_v6, %v3798_v56  ;;  %v14599_v19 = vcombine.low %v3790_v6, %v3798_v56 }
 0x4f0   : > { %v14602_v58 = vcombine.high %v3791_v3, %v3799_v10  ;;  %v14601_v29 = vcombine.low %v3791_v3, %v3799_v10 }
 0x4f1   : > { %6772 = vmatpush1.bf16.msra.mxu1 %v14535_v50  ;;  %v3296_v50 = vld [vmem:[#allocation12 + $0x30] sm:$0xff] }
 0x4f2   : > { %6858 = vmatpush1.bf16.msra.mxu0 %v14537_v26  ;;  %6773 = vmatprep.subr.bf16.mxu1 %v14552_v53  ;;  %v3304_v26 = vld [vmem:[#allocation12 + $0x70] sm:$0xff]  ;;  %v3297_v53 = vld [vmem:[#allocation12 + $0x38] sm:$0xff] }
 0x4f3   : > { %6859 = vmatprep.subr.bf16.mxu0 %v14554_v16  ;;  %v3305_v16 = vld [vmem:[#allocation12 + $0x78] sm:$0xff]  ;;  %v14108_v11 = vcombine.high %v3296_v50, %v3304_v26 }
 0x4f4   : > { %v14110_v45 = vcombine.high %v3297_v53, %v3305_v16  ;;  %v14109_v36 = vcombine.low %v3297_v53, %v3305_v16 }
 0x4f5   : > { %6774 = vmatpush1.bf16.msra.mxu1 %v14551_v9  ;;  %v3312_v9 = vld [vmem:[#allocation12 + $0xb0] sm:$0xff] }
 0x4f6   : > { %6860 = vmatpush1.bf16.msra.mxu0 %v14553_v17  ;;  %6775 = vmatprep.subr.bf16.mxu1 %v14568_v30  ;;  %v3320_v17 = vld [vmem:[#allocation12 + $0xf0] sm:$0xff]  ;;  %v14107_v30 = vcombine.low %v3296_v50, %v3304_v26 }
 0x4f7   : > { %6861 = vmatprep.subr.bf16.mxu0 %v14570_v42  ;;  %v3313_v42 = vld [vmem:[#allocation12 + $0xb8] sm:$0xff]  ;;  %v14124_v24 = vcombine.high %v3312_v9, %v3320_v17  ;;  %v14123_v6 = vcombine.low %v3312_v9, %v3320_v17 }
 0x4f8   : > { %v14125_v56 = vcombine.low %v3313_v42, %v3321_v31 }
 0x4f9   : > { %6776 = vmatpush1.bf16.msra.mxu1 %v14567_v20  ;;  %v3336_v20 = vld [vmem:[#allocation12 + $0x170] sm:$0xff] }
 0x4fa   : > { %6862 = vmatpush1.bf16.msra.mxu0 %v14569_v63  ;;  %6777 = vmatprep.subr.bf16.mxu1 %v14584_v61  ;;  %v14126_v63 = vcombine.high %v3313_v42, %v3321_v31  ;;  %v3329_v61 = vld [vmem:[#allocation12 + $0x138] sm:$0xff]  ;;  %v14140_v3 = vcombine.high %v3328_v23, %v3336_v20  ;;  %v14139_v50 = vcombine.low %v3328_v23, %v3336_v20  ;;  %v3376_v42 = vld [vmem:[#allocation12 + $0x2b0] sm:$0xff] }
 0x4fb   : > { %6863 = vmatprep.subr.bf16.mxu0 %v14586_v5  ;;  %v3337_v5 = vld [vmem:[#allocation12 + $0x178] sm:$0xff]  ;;  %v3384_v31 = vld [vmem:[#allocation12 + $0x2f0] sm:$0xff] }
 0x4fc   : > { %v14142_v10 = vcombine.high %v3329_v61, %v3337_v5  ;;  %v14141_v26 = vcombine.low %v3329_v61, %v3337_v5  ;;  %v3392_v5 = vld [vmem:[#allocation12 + $0x330] sm:$0xff] }
 0x4fd   : > { %6778 = vmatpush1.bf16.msra.mxu1 %v14583_v21  ;;  %v3344_v21 = vld [vmem:[#allocation12 + $0x1b0] sm:$0xff] }
 0x4fe   : > { %6864 = vmatpush1.bf16.msra.mxu0 %v14585_v51  ;;  %6779 = vmatprep.subr.bf16.mxu1 %v14600_v27  ;;  %v3352_v51 = vld [vmem:[#allocation12 + $0x1f0] sm:$0xff]  ;;  %v3345_v27 = vld [vmem:[#allocation12 + $0x1b8] sm:$0xff] }
 0x4ff   : > { %6865 = vmatprep.subr.bf16.mxu0 %v14602_v58  ;;  %v3353_v58 = vld [vmem:[#allocation12 + $0x1f8] sm:$0xff]  ;;  %v14156_v53 = vcombine.high %v3344_v21, %v3352_v51 }
 0x500   : > { %v14158_v16 = vcombine.high %v3345_v27, %v3353_v58  ;;  %v14157_v9 = vcombine.low %v3345_v27, %v3353_v58  ;;  %v3408_v58 = vld [vmem:[#allocation12 + $0x3b0] sm:$0xff] }
 0x501   : > { %6780 = vmatpush1.bf16.msra.mxu1 %v14599_v19  ;;  %v3360_v19 = vld [vmem:[#allocation12 + $0x230] sm:$0xff] }
 0x502   : > { %6866 = vmatpush1.bf16.msra.mxu0 %v14601_v29  ;;  %6878 = vmatprep.subr.bf16.mxu1 %v14108_v11  ;;  %v3368_v29 = vld [vmem:[#allocation12 + $0x270] sm:$0xff]  ;;  %v3361_v11 = vld [vmem:[#allocation12 + $0x238] sm:$0xff] }
 0x503   : > { %6964 = vmatprep.subr.bf16.mxu0 %v14110_v45  ;;  %v3369_v45 = vld [vmem:[#allocation12 + $0x278] sm:$0xff]  ;;  %v14172_v17 = vcombine.high %v3360_v19, %v3368_v29  ;;  %v14171_v23 = vcombine.low %v3360_v19, %v3368_v29 }
 0x504   : > { %6782 = vmatmul.mubr.bf16.vlgmr.msra.gmra.mrb[24].mxu1 %v17065_v46  ;;  %v14173_v20 = vcombine.low %v3361_v11, %v3369_v45 }
 0x505   : > { %6868 = vmatmul.mubr.bf16.vlgmr.msra.gmra.mrb[28].mxu0 %v17065_v46  ;;  %6879 = vmatpush1.bf16.msra.mxu1 %v14107_v30  ;;  %v14174_v30 = vcombine.high %v3361_v11, %v3369_v45  ;;  %v3424_v45 = vld [vmem:[#allocation12 + $0x430] sm:$0xff] }
 0x506   : > { %6910 = vmatprep.mubr.bf16.mxu1 %v17053_v54  ;;  %6965 = vmatpush1.bf16.msra.mxu0 %v14109_v36  ;;  %v3377_v36 = vld [vmem:[#allocation12 + $0x2b8] sm:$0xff] }
 0x507   : > { %6996 = vmatprep.mubr.bf16.mxu0 %v17053_v54  ;;  %6880 = vmatprep.subr.bf16.mxu1 %v14124_v24  ;;  %v14155_v54 = vcombine.low %v3344_v21, %v3352_v51  ;;  %v3385_v24 = vld [vmem:[#allocation12 + $0x2f8] sm:$0xff] }
 0x508   : > { %6966 = vmatprep.subr.bf16.mxu0 %v14126_v63  ;;  %v14188_v63 = vcombine.high %v3376_v42, %v3384_v31  ;;  %v14190_v61 = vcombine.high %v3377_v36, %v3385_v24  ;;  %v14189_v21 = vcombine.low %v3377_v36, %v3385_v24  ;;  %v3440_v24 = vld [vmem:[#allocation12 + $0x4b0] sm:$0xff] }
 0x509   : > { %6881 = vmatpush1.bf16.msra.mxu1 %v14123_v6  ;;  %v3400_v6 = vld [vmem:[#allocation12 + $0x370] sm:$0xff] }
 0x50a   : > { %6967 = vmatpush1.bf16.msra.mxu0 %v14125_v56  ;;  %6882 = vmatprep.subr.bf16.mxu1 %v14140_v3  ;;  %v3393_v56 = vld [vmem:[#allocation12 + $0x338] sm:$0xff]  ;;  %v14204_v51 = vcombine.high %v3392_v5, %v3400_v6 }
 0x50b   : > { %6968 = vmatprep.subr.bf16.mxu0 %v14142_v10  ;;  %v3401_v3 = vld [vmem:[#allocation12 + $0x378] sm:$0xff]  ;;  %v14187_v10 = vcombine.low %v3376_v42, %v3384_v31 }
 0x50c   : > { %v14206_v27 = vcombine.high %v3393_v56, %v3401_v3  ;;  %v14205_v19 = vcombine.low %v3393_v56, %v3401_v3  ;;  %v3456_v3 = vld [vmem:[#allocation12 + $0x530] sm:$0xff] }
 0x50d   : > { %6883 = vmatpush1.bf16.msra.mxu1 %v14139_v50  ;;  %v3416_v50 = vld [vmem:[#allocation12 + $0x3f0] sm:$0xff] }
 0x50e   : > { %6969 = vmatpush1.bf16.msra.mxu0 %v14141_v26  ;;  %6884 = vmatprep.subr.bf16.mxu1 %v14156_v53  ;;  %v3409_v26 = vld [vmem:[#allocation12 + $0x3b8] sm:$0xff]  ;;  %v14220_v29 = vcombine.high %v3408_v58, %v3416_v50 }
 0x50f   : > { %6970 = vmatprep.subr.bf16.mxu0 %v14158_v16  ;;  %v3417_v53 = vld [vmem:[#allocation12 + $0x3f8] sm:$0xff]  ;;  %v14203_v16 = vcombine.low %v3392_v5, %v3400_v6 }
 0x510   : > { %v14222_v11 = vcombine.high %v3409_v26, %v3417_v53  ;;  %v14221_v42 = vcombine.low %v3409_v26, %v3417_v53  ;;  %v3472_v53 = vld [vmem:[#allocation12 + $0x5b0] sm:$0xff] }
 0x511   : > { %6885 = vmatpush1.bf16.msra.mxu1 %v14155_v54  ;;  %v3432_v54 = vld [vmem:[#allocation12 + $0x470] sm:$0xff] }
 0x512   : > { %6971 = vmatpush1.bf16.msra.mxu0 %v14157_v9  ;;  %6886 = vmatprep.subr.bf16.mxu1 %v14172_v17  ;;  %v3425_v9 = vld [vmem:[#allocation12 + $0x438] sm:$0xff]  ;;  %v14236_v31 = vcombine.high %v3424_v45, %v3432_v54 }
 0x513   : > { %6972 = vmatprep.subr.bf16.mxu0 %v14174_v30  ;;  %v3433_v17 = vld [vmem:[#allocation12 + $0x478] sm:$0xff]  ;;  %v14219_v30 = vcombine.low %v3408_v58, %v3416_v50 }
 0x514   : > { %v14238_v36 = vcombine.high %v3425_v9, %v3433_v17  ;;  %v14237_v5 = vcombine.low %v3425_v9, %v3433_v17  ;;  %v3488_v17 = vld [vmem:[#allocation12 + $0x630] sm:$0xff] }
 0x515   : > { %6887 = vmatpush1.bf16.msra.mxu1 %v14171_v23  ;;  %v3448_v23 = vld [vmem:[#allocation12 + $0x4f0] sm:$0xff] }
 0x516   : > { %6973 = vmatpush1.bf16.msra.mxu0 %v14173_v20  ;;  %6888 = vmatprep.subr.bf16.mxu1 %v14188_v63  ;;  %v3441_v20 = vld [vmem:[#allocation12 + $0x4b8] sm:$0xff]  ;;  %v14252_v6 = vcombine.high %v3440_v24, %v3448_v23 }
 0x517   : > { %6974 = vmatprep.subr.bf16.mxu0 %v14190_v61  ;;  %v3449_v63 = vld [vmem:[#allocation12 + $0x4f8] sm:$0xff]  ;;  %v14235_v61 = vcombine.low %v3424_v45, %v3432_v54 }
 0x518   : > { %v14254_v56 = vcombine.high %v3441_v20, %v3449_v63  ;;  %v14253_v58 = vcombine.low %v3441_v20, %v3449_v63  ;;  %v3504_v63 = vld [vmem:[#allocation12 + $0x6b0] sm:$0xff] }
 0x519   : > { %6889 = vmatpush1.bf16.msra.mxu1 %v14187_v10  ;;  %v3464_v10 = vld [vmem:[#allocation12 + $0x570] sm:$0xff] }
 0x51a   : > { %6975 = vmatpush1.bf16.msra.mxu0 %v14189_v21  ;;  %6890 = vmatprep.subr.bf16.mxu1 %v14204_v51  ;;  %v3457_v21 = vld [vmem:[#allocation12 + $0x538] sm:$0xff]  ;;  %v14268_v50 = vcombine.high %v3456_v3, %v3464_v10 }
 0x51b   : > { %6976 = vmatprep.subr.bf16.mxu0 %v14206_v27  ;;  %v3465_v51 = vld [vmem:[#allocation12 + $0x578] sm:$0xff]  ;;  %v14251_v27 = vcombine.low %v3440_v24, %v3448_v23 }
 0x51c   : > { %v14270_v26 = vcombine.high %v3457_v21, %v3465_v51  ;;  %v14269_v45 = vcombine.low %v3457_v21, %v3465_v51  ;;  %v3520_v51 = vld [vmem:[#allocation12 + $0x730] sm:$0xff] }
 0x51d   : > { %6891 = vmatpush1.bf16.msra.mxu1 %v14203_v16  ;;  %v3480_v16 = vld [vmem:[#allocation12 + $0x5f0] sm:$0xff] }
 0x51e   : > { %6977 = vmatpush1.bf16.msra.mxu0 %v14205_v19  ;;  %6892 = vmatprep.subr.bf16.mxu1 %v14220_v29  ;;  %v3473_v19 = vld [vmem:[#allocation12 + $0x5b8] sm:$0xff]  ;;  %v14284_v54 = vcombine.high %v3472_v53, %v3480_v16 }
 0x51f   : > { %6978 = vmatprep.subr.bf16.mxu0 %v14222_v11  ;;  %v3481_v29 = vld [vmem:[#allocation12 + $0x5f8] sm:$0xff]  ;;  %v14267_v11 = vcombine.low %v3456_v3, %v3464_v10 }
 0x520   : > { %v14286_v9 = vcombine.high %v3473_v19, %v3481_v29  ;;  %v14285_v24 = vcombine.low %v3473_v19, %v3481_v29  ;;  %v3536_v29 = vld [vmem:[#allocation12 + $0x7b0] sm:$0xff] }
 0x521   : > { %6893 = vmatpush1.bf16.msra.mxu1 %v14219_v30  ;;  %v3496_v30 = vld [vmem:[#allocation12 + $0x670] sm:$0xff] }
 0x522   : > { %6979 = vmatpush1.bf16.msra.mxu0 %v14221_v42  ;;  %6894 = vmatprep.subr.bf16.mxu1 %v14236_v31  ;;  %v3489_v42 = vld [vmem:[#allocation12 + $0x638] sm:$0xff]  ;;  %v14300_v23 = vcombine.high %v3488_v17, %v3496_v30 }
 0x523   : > { %6980 = vmatprep.subr.bf16.mxu0 %v14238_v36  ;;  %v3497_v31 = vld [vmem:[#allocation12 + $0x678] sm:$0xff]  ;;  %v14283_v36 = vcombine.low %v3472_v53, %v3480_v16 }
 0x524   : > { %v14302_v20 = vcombine.high %v3489_v42, %v3497_v31  ;;  %v14301_v3 = vcombine.low %v3489_v42, %v3497_v31  ;;  %v3552_v31 = vld [vmem:[#allocation12 + $0x830] sm:$0xff] }
 0x525   : > { %6895 = vmatpush1.bf16.msra.mxu1 %v14235_v61  ;;  %v3512_v61 = vld [vmem:[#allocation12 + $0x6f0] sm:$0xff] }
 0x526   : > { %6981 = vmatpush1.bf16.msra.mxu0 %v14237_v5  ;;  %6896 = vmatprep.subr.bf16.mxu1 %v14252_v6  ;;  %v3505_v5 = vld [vmem:[#allocation12 + $0x6b8] sm:$0xff]  ;;  %v14316_v10 = vcombine.high %v3504_v63, %v3512_v61 }
 0x527   : > { %6982 = vmatprep.subr.bf16.mxu0 %v14254_v56  ;;  %v3513_v6 = vld [vmem:[#allocation12 + $0x6f8] sm:$0xff]  ;;  %v14299_v56 = vcombine.low %v3488_v17, %v3496_v30 }
 0x528   : > { %v14318_v21 = vcombine.high %v3505_v5, %v3513_v6  ;;  %v14317_v53 = vcombine.low %v3505_v5, %v3513_v6  ;;  %v3568_v6 = vld [vmem:[#allocation12 + $0x8b0] sm:$0xff] }
 0x529   : > { %6897 = vmatpush1.bf16.msra.mxu1 %v14251_v27  ;;  %v3528_v27 = vld [vmem:[#allocation12 + $0x770] sm:$0xff] }
 0x52a   : > { %6983 = vmatpush1.bf16.msra.mxu0 %v14253_v58  ;;  %6898 = vmatprep.subr.bf16.mxu1 %v14268_v50  ;;  %v3521_v58 = vld [vmem:[#allocation12 + $0x738] sm:$0xff]  ;;  %v14332_v16 = vcombine.high %v3520_v51, %v3528_v27 }
 0x52b   : > { %6984 = vmatprep.subr.bf16.mxu0 %v14270_v26  ;;  %v3529_v50 = vld [vmem:[#allocation12 + $0x778] sm:$0xff]  ;;  %v14315_v26 = vcombine.low %v3504_v63, %v3512_v61 }
 0x52c   : > { %v14334_v19 = vcombine.high %v3521_v58, %v3529_v50  ;;  %v14333_v17 = vcombine.low %v3521_v58, %v3529_v50  ;;  %v3584_v58 = vld [vmem:[#allocation12 + $0x930] sm:$0xff] }
 0x52d   : > { %6899 = vmatpush1.bf16.msra.mxu1 %v14267_v11  ;;  %v3544_v11 = vld [vmem:[#allocation12 + $0x7f0] sm:$0xff] }
 0x52e   : > { %6985 = vmatpush1.bf16.msra.mxu0 %v14269_v45  ;;  %6900 = vmatprep.subr.bf16.mxu1 %v14284_v54  ;;  %v3537_v45 = vld [vmem:[#allocation12 + $0x7b8] sm:$0xff]  ;;  %v14348_v30 = vcombine.high %v3536_v29, %v3544_v11  ;;  %v3592_v50 = vld [vmem:[#allocation12 + $0x970] sm:$0xff] }
 0x52f   : > { %6986 = vmatprep.subr.bf16.mxu0 %v14286_v9  ;;  %v3545_v54 = vld [vmem:[#allocation12 + $0x7f8] sm:$0xff]  ;;  %v14331_v9 = vcombine.low %v3520_v51, %v3528_v27 }
 0x530   : > { %v14350_v42 = vcombine.high %v3537_v45, %v3545_v54  ;;  %v14349_v63 = vcombine.low %v3537_v45, %v3545_v54  ;;  %v3600_v54 = vld [vmem:[#allocation12 + $0x9b0] sm:$0xff] }
 0x531   : > { %6901 = vmatpush1.bf16.msra.mxu1 %v14283_v36  ;;  %v3560_v36 = vld [vmem:[#allocation12 + $0x870] sm:$0xff] }
 0x532   : > { %6987 = vmatpush1.bf16.msra.mxu0 %v14285_v24  ;;  %6902 = vmatprep.subr.bf16.mxu1 %v14300_v23  ;;  %v3553_v24 = vld [vmem:[#allocation12 + $0x838] sm:$0xff]  ;;  %v14364_v61 = vcombine.high %v3552_v31, %v3560_v36 }
 0x533   : > { %6988 = vmatprep.subr.bf16.mxu0 %v14302_v20  ;;  %v3561_v23 = vld [vmem:[#allocation12 + $0x878] sm:$0xff]  ;;  %v14347_v20 = vcombine.low %v3536_v29, %v3544_v11  ;;  %v14396_v11 = vcombine.high %v3584_v58, %v3592_v50 }
 0x534   : > { %v14366_v5 = vcombine.high %v3553_v24, %v3561_v23  ;;  %v14365_v51 = vcombine.low %v3553_v24, %v3561_v23  ;;  %v3616_v24 = vld [vmem:[#allocation12 + $0xa30] sm:$0xff] }
 0x535   : > { %6903 = vmatpush1.bf16.msra.mxu1 %v14299_v56  ;;  %v3576_v56 = vld [vmem:[#allocation12 + $0x8f0] sm:$0xff] }
 0x536   : > { %6989 = vmatpush1.bf16.msra.mxu0 %v14301_v3  ;;  %6904 = vmatprep.subr.bf16.mxu1 %v14316_v10  ;;  %v14363_v3 = vcombine.low %v3552_v31, %v3560_v36  ;;  %v3569_v10 = vld [vmem:[#allocation12 + $0x8b8] sm:$0xff]  ;;  %v14380_v27 = vcombine.high %v3568_v6, %v3576_v56  ;;  %v3624_v23 = vld [vmem:[#allocation12 + $0xa70] sm:$0xff] }
 0x537   : > { %6990 = vmatprep.subr.bf16.mxu0 %v14318_v21  ;;  %v3577_v21 = vld [vmem:[#allocation12 + $0x8f8] sm:$0xff] }
 0x538   : > { %v14381_v29 = vcombine.low %v3569_v10, %v3577_v21 }
 0x539   : > { %6905 = vmatpush1.bf16.msra.mxu1 %v14315_v26  ;;  %v14382_v26 = vcombine.high %v3569_v10, %v3577_v21  ;;  %v17223_v21 = vsub.s32 7, %v16561_v40 }
 0x53a   : > { %6991 = vmatpush1.bf16.msra.mxu0 %v14317_v53  ;;  %6906 = vmatprep.subr.bf16.mxu1 %v14332_v16  ;;  %v3585_v53 = vld [vmem:[#allocation12 + $0x938] sm:$0xff] }
 0x53b   : > { %6992 = vmatprep.subr.bf16.mxu0 %v14334_v19  ;;  %v3593_v16 = vld [vmem:[#allocation12 + $0x978] sm:$0xff]  ;;  %v14379_v19 = vcombine.low %v3568_v6, %v3576_v56  ;;  %v14428_v6 = vcombine.high %v3616_v24, %v3624_v23  ;;  %v17217_v56 = vsub.s32 6, %v16561_v40  ;;  %19456 = vst [vmem:[#allocation30_spill] sm:$0xff] %v17223_v21 }
 0x53c   : > { %v14398_v45 = vcombine.high %v3585_v53, %v3593_v16 }
 0x53d   : > { %6907 = vmatpush1.bf16.msra.mxu1 %v14331_v9  ;;  %v3608_v9 = vld [vmem:[#allocation12 + $0x9f0] sm:$0xff]  ;;  %19454 = vst [vmem:[#allocation28_spill] sm:$0xff] %v17217_v56 }
 0x53e   : > { %6993 = vmatpush1.bf16.msra.mxu0 %v14333_v17  ;;  %6908 = vmatprep.subr.bf16.mxu1 %v14348_v30  ;;  %v3601_v17 = vld [vmem:[#allocation12 + $0x9b8] sm:$0xff]  ;;  %v14412_v31 = vcombine.high %v3600_v54, %v3608_v9 }
 0x53f   : > { %6994 = vmatprep.subr.bf16.mxu0 %v14350_v42  ;;  %v3609_v30 = vld [vmem:[#allocation12 + $0x9f8] sm:$0xff]  ;;  %v14395_v42 = vcombine.low %v3584_v58, %v3592_v50 }
 0x540   : > { %v14414_v36 = vcombine.high %v3601_v17, %v3609_v30  ;;  %v17225_v58 = vld [vmem:[#allocation12 + $0xab8] sm:$0xff] }
 0x541   : > { %6909 = vmatpush1.bf16.msra.mxu1 %v14347_v20  ;;  %v3617_v20 = vld [vmem:[#allocation12 + $0xa38] sm:$0xff] }
 0x542   : > { %6995 = vmatpush1.bf16.msra.mxu0 %v14349_v63  ;;  %6921 = vmatprep.subr.bf16.mxu1 %v14364_v61  ;;  %v3625_v63 = vld [vmem:[#allocation12 + $0xa78] sm:$0xff]  ;;  %v17214_v61 = vsub.s32 4, %v16561_v40 }
 0x543   : > { %7007 = vmatprep.subr.bf16.mxu0 %v14366_v5  ;;  %v14413_v5 = vcombine.low %v3601_v17, %v3609_v30  ;;  %v14430_v10 = vcombine.high %v3617_v20, %v3625_v63  ;;  %v17227_v50 = vld [vmem:[#allocation12 + $0xaf8] sm:$0xff]  ;;  %v17251_v17 = vrot.slane %v17115_v32, %v17223_v21 }
 0x544   : > { %6911 = vmatmul.mubr.bf16.vlgmr.msra.gmra.mrb[28].mxu1 %v17057_v44  ;;  %19453 = vst [vmem:[#allocation27_spill] sm:$0xff] %v17214_v61 }
 0x545   : > { %6997 = vmatmul.mubr.bf16.vlgmr.msra.gmra.mrb[32].mxu0 %v17057_v44  ;;  %6922 = vmatpush1.bf16.msra.mxu1 %v14363_v3  ;;  %v14397_v44 = vcombine.low %v3585_v53, %v3593_v16  ;;  %v17220_v3 = vsub.s32 5, %v16561_v40  ;;  %v14429_v53 = vcombine.low %v3617_v20, %v3625_v63  ;;  %v17231_v16 = vrot.slane %v17115_v32, %v17214_v61  ;;  %v17285_v20 = vld [vmem:[#allocation12 + $0xbb8] sm:$0xff] }
 0x546   : > { %6953 = vmatprep.mubr.bf16.mxu1 %v17061_v55  ;;  %7008 = vmatpush1.bf16.msra.mxu0 %v14365_v51  ;;  %v3632_v51 = vld [vmem:[#allocation12 + $0xab0] sm:$0xff]  ;;  %v17237_v40 = vrot.slane %v17115_v32, %v17217_v56  ;;  %v17287_v63 = vld [vmem:[#allocation12 + $0xbf8] sm:$0xff] }
 0x547   : > { %7039 = vmatprep.mubr.bf16.mxu0 %v17061_v55  ;;  %6923 = vmatprep.subr.bf16.mxu1 %v14380_v27  ;;  %v14411_v55 = vcombine.low %v3600_v54, %v3608_v9  ;;  %19455 = vst [vmem:[#allocation29_spill] sm:$0xff] %v17220_v3  ;;  %v3640_v27 = vld [vmem:[#allocation12 + $0xaf0] sm:$0xff]  ;;  %19457 = vst [vmem:[#allocation31_spill] sm:$0xff] %v17231_v16  ;;  %v17245_v54 = vld [vmem:[#allocation12 + $0xb38] sm:$0xff] }
 0x548   : > { %7009 = vmatprep.subr.bf16.mxu0 %v14382_v26  ;;  %v14427_v26 = vcombine.low %v3616_v24, %v3624_v23  ;;  %v17247_v9 = vld [vmem:[#allocation12 + $0xb78] sm:$0xff]  ;;  %v14443_v30 = vcombine.low %v3632_v51, %v3640_v27  ;;  %v17275_v24 = vrot.slane %v9133_v2, %v16572_v62  ;;  %v17281_v23 = vrot.slane %v9135_v8, %v16572_v62  ;;  %v17299_v2 = vld [vmem:[#allocation12 + $0xc70] sm:$0xff] }
 0x549   : > { %6924 = vmatpush1.bf16.msra.mxu1 %v14379_v19  ;;  %v17233_v19 = vld [vmem:[#allocation12 + $0xb30] sm:$0xff]  ;;  %v14461_v47 = vcombine.low %v17245_v54, %v17247_v9  ;;  %v14462_v52 = vcombine.high %v17245_v54, %v17247_v9  ;;  %v17305_v8 = vrot.slane %v9268_v15, %v16572_v62  ;;  %v17327_v15 = vrot.slane %v9271_v28, %v16572_v62 }
 0x54a   : > { %7010 = vmatpush1.bf16.msra.mxu0 %v14381_v29  ;;  %6925 = vmatprep.subr.bf16.mxu1 %v14396_v11  ;;  %v17241_v29 = vrot.slane %v17115_v32, %v17220_v3  ;;  %v14444_v11 = vcombine.high %v3632_v51, %v3640_v27  ;;  %v17269_v32 = vrot.slane %v9134_v33, %v16572_v62  ;;  %v17337_v27 = vld [vmem:[#allocation12 + $0xcf0] sm:$0xff] }
 0x54b   : > { %7011 = vmatprep.subr.bf16.mxu0 %v14398_v45  ;;  %v17243_v45 = vld [vmem:[#allocation12 + $0xb70] sm:$0xff]  ;;  %v14478_v28 = vcombine.high %v17285_v20, %v17287_v63 }
 0x54c   : > { %19458 = vst [vmem:[#allocation32_spill] sm:$0xff] %v17241_v29  ;;  %v14459_v33 = vcombine.low %v17233_v19, %v17243_v45  ;;  %v14460_v57 = vcombine.high %v17233_v19, %v17243_v45 }
 0x54d   : > { %6926 = vmatpush1.bf16.msra.mxu1 %v14395_v42  ;;  %v14445_v42 = vcombine.low %v17225_v58, %v17227_v50 }
 0x54e   : > { %7012 = vmatpush1.bf16.msra.mxu0 %v14397_v44  ;;  %6927 = vmatprep.subr.bf16.mxu1 %v14412_v31  ;;  %v14446_v44 = vcombine.high %v17225_v58, %v17227_v50  ;;  %v17257_v31 = vld [vmem:[#allocation12 + $0xbb0] sm:$0xff] }
 0x54f   : > { %7013 = vmatprep.subr.bf16.mxu0 %v14414_v36  ;;  %v17263_v36 = vrot.slane %v9132_v18, %v16572_v62  ;;  %v17283_v18 = vld [vmem:[#allocation12 + $0xbf0] sm:$0xff] }
 0x550   : > { %v14476_v59 = vcombine.high %v17257_v31, %v17283_v18 }
 0x551   : > { %6928 = vmatpush1.bf16.msra.mxu1 %v14411_v55  ;;  %v17311_v55 = vrot.slane %v9270_v38, %v16572_v62 }
 0x552   : > { %7014 = vmatpush1.bf16.msra.mxu0 %v14413_v5  ;;  %6929 = vmatprep.subr.bf16.mxu1 %v14428_v6  ;;  %v17317_v5 = vrot.slane %v9269_v22, %v16572_v62  ;;  %v17319_v6 = vld [vmem:[#allocation12 + $0xc38] sm:$0xff]  ;;  %v17335_v22 = vld [vmem:[#allocation12 + $0xcb0] sm:$0xff] }
 0x553   : > { %7015 = vmatprep.subr.bf16.mxu0 %v14430_v10  ;;  %v17321_v10 = vld [vmem:[#allocation12 + $0xc78] sm:$0xff] }
 0x554   : > { %v14494_v9 = vcombine.high %v17319_v6, %v17321_v10 }
 0x555   : > { %6930 = vmatpush1.bf16.msra.mxu1 %v14427_v26 }
 0x556   : > { %7016 = vmatpush1.bf16.msra.mxu0 %v14429_v53  ;;  %6931 = vmatprep.subr.bf16.mxu1 %v14444_v11 }
 0x557   : > { %v6611_v38 = vpop.f32.mrb[20].mxu1  ;;  %7017 = vmatprep.subr.bf16.mxu0 %v14446_v44 }
 0x558   : > { %v8976_v58 = vadd.f32 %v17231_v16, %v6611_v38  ;;  %v6697_v13 = vpop.f32.mrb[24].mxu0  ;;  %v6613_v0 = vpop.f32.mrb[21].mxu1 }
 0x559   : > { %v8978_v53 = vadd.f32 %v17237_v40, %v6697_v13  ;;  %v8977_v19 = vadd.f32 %v17241_v29, %v6613_v0  ;;  %v6699_v11 = vpop.f32.mrb[25].mxu0  ;;  %v6615_v45 = vpop.f32.mrb[22].mxu1  ;;  %6932 = vmatpush1.bf16.msra.mxu1 %v14443_v30 }
 0x55a   : > { %v8992_v44 = vmax.f32 %v8976_v58, 0.0  ;;  %v8979_v38 = vadd.f32 %v17251_v17, %v6699_v11  ;;  %v8984_v50 = vadd.f32 %v17231_v16, %v6615_v45  ;;  %v6701_v4 = vpop.f32.mrb[26].mxu0  ;;  %7018 = vmatpush1.bf16.msra.mxu0 %v14445_v42  ;;  %v6617_v26 = vpop.f32.mrb[23].mxu1  ;;  %6933 = vmatprep.subr.bf16.mxu1 %v14460_v57  ;;  %v17358_v58 = vld [vmem:[#allocation12 + $0xcb8] sm:$0xff] }
 0x55b   : > { %v8994_v0 = vmax.f32 %v8978_v53, 0.0  ;;  %v8993_v30 = vmax.f32 %v8977_v19, 0.0  ;;  %v8986_v51 = vadd.f32 %v17237_v40, %v6701_v4  ;;  %v8985_v54 = vadd.f32 %v17241_v29, %v6617_v26  ;;  %v6703_v25 = vpop.f32.mrb[27].mxu0  ;;  %7019 = vmatprep.subr.bf16.mxu0 %v14462_v52  ;;  %v17360_v11 = vld [vmem:[#allocation12 + $0xcf8] sm:$0xff] }
 0x55c   : > { %v8995_v45 = vmax.f32 %v8979_v38, 0.0  ;;  %v9000_v16 = vmax.f32 %v8984_v50, 0.0  ;;  %v8987_v42 = vadd.f32 %v17251_v17, %v6703_v25  ;;  %v14509_v52 = vcombine.low %v17358_v58, %v17360_v11  ;;  %v17367_v38 = vld [vmem:[#allocation12 + $0xd30] sm:$0xff] }
 0x55d   : > { %v9072_v13 = vcombine.low %v8992_v44, %v8993_v30  ;;  %v9073_v53 = vcombine.high %v8992_v44, %v8993_v30  ;;  %v9002_v19 = vmax.f32 %v8986_v51, 0.0  ;;  %v9001_v21 = vmax.f32 %v8985_v54, 0.0  ;;  %6934 = vmatpush1.bf16.msra.mxu1 %v14459_v33  ;;  %v17369_v50 = vld [vmem:[#allocation12 + $0xd70] sm:$0xff]  ;;  %v17377_v30 = vld [vmem:[#allocation12 + $0xd78] sm:$0xff] }
 0x55e   : > { %v9074_v4 = vcombine.low %v8994_v0, %v8995_v45  ;;  %v9075_v26 = vcombine.high %v8994_v0, %v8995_v45  ;;  %v9003_v29 = vmax.f32 %v8987_v42, 0.0  ;;  %7020 = vmatpush1.bf16.msra.mxu0 %v14461_v47  ;;  %6935 = vmatprep.subr.bf16.mxu1 %v14476_v59  ;;  %v17375_v0 = vld [vmem:[#allocation12 + $0xd38] sm:$0xff] }
 0x55f   : > { %v9110_v25 = vrot.slane %v9072_v13, %v16572_v62  ;;  %v9117_v57 = vrot.slane %v9073_v53, %v16572_v62  ;;  %v9208_v44 = vcombine.low %v9000_v16, %v9001_v21  ;;  %v9209_v51 = vcombine.high %v9000_v16, %v9001_v21  ;;  %7021 = vmatprep.subr.bf16.mxu0 %v14478_v28 }
 0x560   : > { %v9124_v33 = vrot.slane %v9074_v4, %v16572_v62  ;;  %v9131_v54 = vrot.slane %v9075_v26, %v16572_v62  ;;  %v9210_v47 = vcombine.low %v9002_v19, %v9003_v29  ;;  %v9211_v59 = vcombine.high %v9002_v19, %v9003_v29 }
 0x561   : > { %v9246_v45 = vrot.slane %v9208_v44, %v16572_v62  ;;  %v9253_v42 = vrot.slane %v9209_v51, %v16572_v62  ;;  %v19459_v13 = vcombine.low %v17257_v31, %v17283_v18  ;;  %v14510_v21 = vcombine.high %v17358_v58, %v17360_v11 }
 0x562   : > { %v14524_v16 = vcombine.high %v17367_v38, %v17369_v50  ;;  %v9136_v28 = vcombine.low %v9110_v25, %v9124_v33  ;;  %v9137_v29 = vcombine.high %v9110_v25, %v9124_v33  ;;  %v9138_v53 = vcombine.low %v9117_v57, %v9131_v54 }
 0x563   : > { %6936 = vmatpush1.bf16.msra.mxu1 %v19459_v13  ;;  %v9139_v19 = vcombine.high %v9117_v57, %v9131_v54  ;;  %v19460_v4 = vcombine.low %v17285_v20, %v17287_v63  ;;  %v9260_v26 = vrot.slane %v9210_v47, %v16572_v62  ;;  %v9267_v44 = vrot.slane %v9211_v59, %v16572_v62 }
 0x564   : > { %v19461_v31 = vcombine.high %v17297_v49, %v17299_v2  ;;  %v14526_v18 = vcombine.high %v17375_v0, %v17377_v30  ;;  %v9174_v25 = vrot.slane %v9136_v28, %v16572_v62  ;;  %v9181_v57 = vrot.slane %v9138_v53, %v16572_v62 }
 0x565   : > { %7022 = vmatpush1.bf16.msra.mxu0 %v19460_v4  ;;  %v9188_v51 = vrot.slane %v9137_v29, %v16572_v62  ;;  %v9195_v20 = vrot.slane %v9139_v19, %v16572_v62  ;;  %v9272_v63 = vcombine.low %v9246_v45, %v9260_v26  ;;  %v9273_v33 = vcombine.high %v9246_v45, %v9260_v26 }
 0x566   : > { %6937 = vmatprep.subr.bf16.mxu1 %v19461_v31  ;;  %7023 = vmatprep.subr.bf16.mxu0 %v14494_v9  ;;  %v9274_v54 = vcombine.low %v9253_v42, %v9267_v44  ;;  %v9275_v47 = vcombine.high %v9253_v42, %v9267_v44  ;;  %v19462_v59 = vcombine.low %v17297_v49, %v17299_v2  ;;  %v3728_v9 = vld [vmem:[#allocation12 + $0xdb0] sm:$0xff]  ;;  %v3729_v49 = vld [vmem:[#allocation12 + $0xdb8] sm:$0xff] }
 0x567   : > { %v17406_v13 = vcombine.low %v17263_v36, %v9174_v25  ;;  %v17409_v28 = vcombine.high %v17263_v36, %v9174_v25  ;;  %v17412_v53 = vcombine.low %v17269_v32, %v9181_v57  ;;  %v17415_v29 = vcombine.high %v17269_v32, %v9181_v57  ;;  %v3736_v42 = vld [vmem:[#allocation12 + $0xdf0] sm:$0xff]  ;;  %v3737_v2 = vld [vmem:[#allocation12 + $0xdf8] sm:$0xff] }
 0x568   : > { %6938 = vmatpush1.bf16.msra.mxu1 %v19462_v59  ;;  %v19467_v45 = vcombine.low %v17319_v6, %v17321_v10  ;;  %v17421_v19 = vcombine.low %v17275_v24, %v9188_v51  ;;  %v17424_v4 = vcombine.high %v17275_v24, %v9188_v51  ;;  %v17427_v36 = vcombine.low %v17281_v23, %v9195_v20  ;;  %v3761_v59 = vld [vmem:[#allocation12 + $0xeb8] sm:$0xff] }
 0x569   : > { %19463 = vst [vmem:[#allocation33_spill] sm:$0xff] %v17406_v13  ;;  %19464 = vst [vmem:[#allocation34_spill] sm:$0xff] %v17409_v28  ;;  %v17430_v26 = vcombine.high %v17281_v23, %v9195_v20  ;;  %v19472_v32 = vcombine.high %v17335_v22, %v17337_v27  ;;  %v9310_v6 = vrot.slane %v9272_v63, %v16572_v62 }
 0x56a   : > { %19465 = vst [vmem:[#allocation35_spill] sm:$0xff] %v17412_v53  ;;  %19466 = vst [vmem:[#allocation36_spill] sm:$0xff] %v17415_v29  ;;  %7024 = vmatpush1.bf16.msra.mxu0 %v19467_v45  ;;  %v9317_v10 = vrot.slane %v9274_v54, %v16572_v62  ;;  %v9324_v44 = vrot.slane %v9273_v33, %v16572_v62  ;;  %v9331_v31 = vrot.slane %v9275_v47, %v16572_v62  ;;  %v3753_v33 = vld [vmem:[#allocation12 + $0xe78] sm:$0xff]  ;;  %v3760_v54 = vld [vmem:[#allocation12 + $0xeb0] sm:$0xff] }
 0x56b   : > { %19468 = vst [vmem:[#allocation37_spill] sm:$0xff] %v17421_v19  ;;  %19469 = vst [vmem:[#allocation38_spill] sm:$0xff] %v17424_v4  ;;  %6939 = vmatprep.subr.bf16.mxu1 %v19472_v32  ;;  %7025 = vmatprep.subr.bf16.mxu0 %v14510_v21  ;;  %v19473_v24 = vcombine.low %v17335_v22, %v17337_v27  ;;  %v14523_v23 = vcombine.low %v17367_v38, %v17369_v50  ;;  %v3768_v47 = vld [vmem:[#allocation12 + $0xef0] sm:$0xff]  ;;  %v3769_v45 = vld [vmem:[#allocation12 + $0xef8] sm:$0xff] }
 0x56c   : > { %19470 = vst [vmem:[#allocation39_spill] sm:$0xff] %v17427_v36  ;;  %19471 = vst [vmem:[#allocation40_spill] sm:$0xff] %v17430_v26  ;;  %v14525_v25 = vcombine.low %v17375_v0, %v17377_v30  ;;  %v14540_v57 = vcombine.high %v3728_v9, %v3736_v42  ;;  %v14542_v51 = vcombine.high %v3729_v49, %v3737_v2  ;;  %v3744_v0 = vld [vmem:[#allocation12 + $0xe30] sm:$0xff]  ;;  %v3745_v30 = vld [vmem:[#allocation12 + $0xe38] sm:$0xff] }
 0x56d   : > { %6940 = vmatpush1.bf16.msra.mxu1 %v19473_v24  ;;  %v17447_v20 = vcombine.low %v17305_v8, %v9310_v6  ;;  %v17450_v63 = vcombine.high %v17305_v8, %v9310_v6  ;;  %v17453_v21 = vcombine.low %v17311_v55, %v9317_v10  ;;  %v17456_v22 = vcombine.high %v17311_v55, %v9317_v10  ;;  %v3752_v55 = vld [vmem:[#allocation12 + $0xe70] sm:$0xff]  ;;  %v3785_v10 = vld [vmem:[#allocation12 + $0xf78] sm:$0xff] }
 0x56e   : > { %7026 = vmatpush1.bf16.msra.mxu0 %v14509_v52  ;;  %v17462_v27 = vcombine.low %v17317_v5, %v9324_v44  ;;  %v17465_v38 = vcombine.high %v17317_v5, %v9324_v44  ;;  %v17468_v50 = vcombine.low %v17327_v15, %v9331_v31  ;;  %v17471_v8 = vcombine.high %v17327_v15, %v9331_v31  ;;  %v3776_v6 = vld [vmem:[#allocation12 + $0xf30] sm:$0xff] }
 0x56f   : > { %19474 = vst [vmem:[#allocation41_spill] sm:$0xff] %v17450_v63  ;;  %19475 = vst [vmem:[#allocation42_spill] sm:$0xff] %v17453_v21  ;;  %6941 = vmatprep.subr.bf16.mxu1 %v14524_v16  ;;  %7027 = vmatprep.subr.bf16.mxu0 %v14526_v18  ;;  %v14539_v58 = vcombine.low %v3728_v9, %v3736_v42  ;;  %v14541_v11 = vcombine.low %v3729_v49, %v3737_v2  ;;  %v3784_v9 = vld [vmem:[#allocation12 + $0xf70] sm:$0xff]  ;;  %v3777_v42 = vld [vmem:[#allocation12 + $0xf38] sm:$0xff] }
 0x570   : > { %19476 = vst [vmem:[#allocation43_spill] sm:$0xff] %v17456_v22  ;;  %19477 = vst [vmem:[#allocation44_spill] sm:$0xff] %v17465_v38  ;;  %v14556_v52 = vcombine.high %v3744_v0, %v3752_v55  ;;  %v14558_v5 = vcombine.high %v3745_v30, %v3753_v33  ;;  %v14555_v15 = vcombine.low %v3744_v0, %v3752_v55  ;;  %v3792_v24 = vld [vmem:[#allocation12 + $0xfb0] sm:$0xff] }
 0x571   : > { %19478 = vst [vmem:[#allocation45_spill] sm:$0xff] %v17468_v50  ;;  %19479 = vst [vmem:[#allocation46_spill] sm:$0xff] %v17471_v8  ;;  %6942 = vmatpush1.bf16.msra.mxu1 %v14523_v23  ;;  %v14557_v16 = vcombine.low %v3745_v30, %v3753_v33  ;;  %v14572_v18 = vcombine.high %v3760_v54, %v3768_v47  ;;  %v14574_v32 = vcombine.high %v3761_v59, %v3769_v45  ;;  %v3800_v23 = vld [vmem:[#allocation12 + $0xff0] sm:$0xff]  ;;  %v7050_v33 = vld [vmem:[#allocation13] sm:$0xff] }
 0x572   : > { %7028 = vmatpush1.bf16.msra.mxu0 %v14525_v25  ;;  %6943 = vmatprep.subr.bf16.mxu1 %v14540_v57  ;;  %v14571_v49 = vcombine.low %v3760_v54, %v3768_v47  ;;  %v14573_v2 = vcombine.low %v3761_v59, %v3769_v45  ;;  %v14588_v44 = vcombine.high %v3776_v6, %v3784_v9  ;;  %v3793_v25 = vld [vmem:[#allocation12 + $0xfb8] sm:$0xff]  ;;  %v7058_v45 = vld [vmem:[#allocation13 + $0x40] sm:$0xff]  ;;  %v19504_v38 = vld [vmem:[#allocation26_spill] sm:$0xff] }
 0x573   : > { %7029 = vmatprep.subr.bf16.mxu0 %v14542_v51  ;;  %v14590_v31 = vcombine.high %v3777_v42, %v3785_v10  ;;  %v3801_v57 = vld [vmem:[#allocation12 + $0xff8] sm:$0xff]  ;;  %v14587_v51 = vcombine.low %v3776_v6, %v3784_v9  ;;  %v14589_v0 = vcombine.low %v3777_v42, %v3785_v10  ;;  %v14604_v55 = vcombine.high %v3792_v24, %v3800_v23  ;;  %v7066_v10 = vld [vmem:[#allocation13 + $0x80] sm:$0xff] }
 0x574   : > { %v14606_v30 = vcombine.high %v3793_v25, %v3801_v57  ;;  %v14605_v54 = vcombine.low %v3793_v25, %v3801_v57  ;;  %v19480_v9 = vmov 0  ;;  %v19492_v56 = vrot.slane %v17409_v28, %v16564_v41 }
 0x575   : > { %6944 = vmatpush1.bf16.msra.mxu1 %v14539_v58  ;;  %v7054_v58 = vld [vmem:[#allocation13 + $0x20] sm:$0xff]  ;;  %v19481_v9 = vsel %vm17474_vm6, 4294967295, %v19480_v9 }
 0x576   : > { %7030 = vmatpush1.bf16.msra.mxu0 %v14541_v11  ;;  %6945 = vmatprep.subr.bf16.mxu1 %v14556_v52  ;;  %v7051_v11 = vld [vmem:[#allocation13 + $0x8] sm:$0xff]  ;;  %v14608_v47 = vcombine.high %v7050_v33, %v7054_v58  ;;  %19482 = vst [vmem:[#allocation47_spill] sm:$0xff] %v19481_v9 }
 0x577   : > { %7031 = vmatprep.subr.bf16.mxu0 %v14558_v5  ;;  %v7055_v52 = vld [vmem:[#allocation13 + $0x28] sm:$0xff]  ;;  %v14603_v5 = vcombine.low %v3792_v24, %v3800_v23 }
 0x578   : > { %v14610_v59 = vcombine.high %v7051_v11, %v7055_v52  ;;  %v14609_v6 = vcombine.low %v7051_v11, %v7055_v52  ;;  %v7082_v52 = vld [vmem:[#allocation13 + $0x100] sm:$0xff] }
 0x579   : > { %6946 = vmatpush1.bf16.msra.mxu1 %v14555_v15  ;;  %v7062_v15 = vld [vmem:[#allocation13 + $0x60] sm:$0xff] }
 0x57a   : > { %7032 = vmatpush1.bf16.msra.mxu0 %v14557_v16  ;;  %6947 = vmatprep.subr.bf16.mxu1 %v14572_v18  ;;  %v14607_v16 = vcombine.low %v7050_v33, %v7054_v58  ;;  %v7059_v18 = vld [vmem:[#allocation13 + $0x48] sm:$0xff]  ;;  %v14616_v42 = vcombine.high %v7058_v45, %v7062_v15  ;;  %v14615_v24 = vcombine.low %v7058_v45, %v7062_v15 }
 0x57b   : > { %7033 = vmatprep.subr.bf16.mxu0 %v14574_v32  ;;  %v7063_v32 = vld [vmem:[#allocation13 + $0x68] sm:$0xff] }
 0x57c   : > { %v14617_v23 = vcombine.low %v7059_v18, %v7063_v32 }
 0x57d   : > { %6948 = vmatpush1.bf16.msra.mxu1 %v14571_v49  ;;  %v7070_v49 = vld [vmem:[#allocation13 + $0xa0] sm:$0xff] }
 0x57e   : > { %7034 = vmatpush1.bf16.msra.mxu0 %v14573_v2  ;;  %6949 = vmatprep.subr.bf16.mxu1 %v14588_v44  ;;  %v14618_v2 = vcombine.high %v7059_v18, %v7063_v32  ;;  %v7067_v44 = vld [vmem:[#allocation13 + $0x88] sm:$0xff]  ;;  %v14624_v25 = vcombine.high %v7066_v10, %v7070_v49  ;;  %v7090_v18 = vld [vmem:[#allocation13 + $0x140] sm:$0xff] }
 0x57f   : > { %7035 = vmatprep.subr.bf16.mxu0 %v14590_v31  ;;  %v7071_v31 = vld [vmem:[#allocation13 + $0xa8] sm:$0xff]  ;;  %v7094_v32 = vld [vmem:[#allocation13 + $0x160] sm:$0xff] }
 0x580   : > { %v14626_v57 = vcombine.high %v7067_v44, %v7071_v31  ;;  %v14625_v33 = vcombine.low %v7067_v44, %v7071_v31  ;;  %v7098_v31 = vld [vmem:[#allocation13 + $0x180] sm:$0xff] }
 0x581   : > { %6950 = vmatpush1.bf16.msra.mxu1 %v14587_v51  ;;  %v7074_v51 = vld [vmem:[#allocation13 + $0xc0] sm:$0xff] }
 0x582   : > { %7036 = vmatpush1.bf16.msra.mxu0 %v14589_v0  ;;  %6951 = vmatprep.subr.bf16.mxu1 %v14604_v55  ;;  %v7078_v0 = vld [vmem:[#allocation13 + $0xe0] sm:$0xff]  ;;  %v7075_v55 = vld [vmem:[#allocation13 + $0xc8] sm:$0xff] }
 0x583   : > { %7037 = vmatprep.subr.bf16.mxu0 %v14606_v30  ;;  %v14623_v30 = vcombine.low %v7066_v10, %v7070_v49  ;;  %v14632_v58 = vcombine.high %v7074_v51, %v7078_v0 }
 0x585   : > { %6952 = vmatpush1.bf16.msra.mxu1 %v14603_v5  ;;  %v7086_v5 = vld [vmem:[#allocation13 + $0x120] sm:$0xff] }
 0x586   : > { %7038 = vmatpush1.bf16.msra.mxu0 %v14605_v54  ;;  %8586 = vmatprep.subr.bf16.mxu1 %v14608_v47  ;;  %v7083_v54 = vld [vmem:[#allocation13 + $0x108] sm:$0xff]  ;;  %v14640_v15 = vcombine.high %v7082_v52, %v7086_v5  ;;  %v14639_v10 = vcombine.low %v7082_v52, %v7086_v5 }
 0x587   : > { %8672 = vmatprep.subr.bf16.mxu0 %v14610_v59  ;;  %v7087_v47 = vld [vmem:[#allocation13 + $0x128] sm:$0xff]  ;;  %v14631_v59 = vcombine.low %v7074_v51, %v7078_v0 }
 0x588   : > { %6954 = vmatmul.mubr.bf16.vlgmr.msra.gmra.mrb[28].mxu1 %v17065_v46  ;;  %v14641_v49 = vcombine.low %v7083_v54, %v7087_v47 }
 0x589   : > { %7040 = vmatmul.mubr.bf16.vlgmr.msra.gmra.mrb[32].mxu0 %v17065_v46  ;;  %8587 = vmatpush1.bf16.msra.mxu1 %v14607_v16  ;;  %v7079_v46 = vld [vmem:[#allocation13 + $0xe8] sm:$0xff]  ;;  %v14642_v16 = vcombine.high %v7083_v54, %v7087_v47  ;;  %v7114_v47 = vld [vmem:[#allocation13 + $0x200] sm:$0xff] }
 0x58a   : > { %14865 = vmatprep.mubr.msk.bf16.mxu1 %vm17474_vm6, %v17090_v39  ;;  %8673 = vmatpush1.bf16.msra.mxu0 %v14609_v6  ;;  %v14634_v11 = vcombine.high %v7075_v55, %v7079_v46  ;;  %v14633_v45 = vcombine.low %v7075_v55, %v7079_v46  ;;  %v7091_v6 = vld [vmem:[#allocation13 + $0x148] sm:$0xff]  ;;  %v7106_v46 = vld [vmem:[#allocation13 + $0x1c0] sm:$0xff] }
 0x58b   : > { %14877 = vmatprep.mubr.msk.bf16.mxu0 %vm17474_vm6, %v17090_v39  ;;  %8588 = vmatprep.subr.bf16.mxu1 %v14616_v42  ;;  %v7095_v42 = vld [vmem:[#allocation13 + $0x168] sm:$0xff] }
 0x58c   : > { %8674 = vmatprep.subr.bf16.mxu0 %v14618_v2  ;;  %v14648_v2 = vcombine.high %v7090_v18, %v7094_v32  ;;  %v14650_v44 = vcombine.high %v7091_v6, %v7095_v42  ;;  %v14649_v51 = vcombine.low %v7091_v6, %v7095_v42  ;;  %v7122_v42 = vld [vmem:[#allocation13 + $0x240] sm:$0xff] }
 0x58d   : > { %8589 = vmatpush1.bf16.msra.mxu1 %v14615_v24  ;;  %v7102_v24 = vld [vmem:[#allocation13 + $0x1a0] sm:$0xff] }
 0x58e   : > { %8675 = vmatpush1.bf16.msra.mxu0 %v14617_v23  ;;  %8590 = vmatprep.subr.bf16.mxu1 %v14624_v25  ;;  %v7099_v23 = vld [vmem:[#allocation13 + $0x188] sm:$0xff]  ;;  %v14656_v0 = vcombine.high %v7098_v31, %v7102_v24 }
 0x58f   : > { %8676 = vmatprep.subr.bf16.mxu0 %v14626_v57  ;;  %v7103_v25 = vld [vmem:[#allocation13 + $0x1a8] sm:$0xff]  ;;  %v14647_v57 = vcombine.low %v7090_v18, %v7094_v32 }
 0x590   : > { %v14658_v55 = vcombine.high %v7099_v23, %v7103_v25  ;;  %v14657_v52 = vcombine.low %v7099_v23, %v7103_v25  ;;  %v7130_v25 = vld [vmem:[#allocation13 + $0x280] sm:$0xff] }
 0x591   : > { %8591 = vmatpush1.bf16.msra.mxu1 %v14623_v30  ;;  %v7110_v30 = vld [vmem:[#allocation13 + $0x1e0] sm:$0xff] }
 0x592   : > { %8677 = vmatpush1.bf16.msra.mxu0 %v14625_v33  ;;  %8592 = vmatprep.subr.bf16.mxu1 %v14632_v58  ;;  %v7107_v33 = vld [vmem:[#allocation13 + $0x1c8] sm:$0xff]  ;;  %v14664_v5 = vcombine.high %v7106_v46, %v7110_v30 }
 0x593   : > { %8678 = vmatprep.subr.bf16.mxu0 %v14634_v11  ;;  %v7111_v58 = vld [vmem:[#allocation13 + $0x1e8] sm:$0xff]  ;;  %v14655_v11 = vcombine.low %v7098_v31, %v7102_v24 }
 0x594   : > { %v14666_v54 = vcombine.high %v7107_v33, %v7111_v58  ;;  %v14665_v18 = vcombine.low %v7107_v33, %v7111_v58  ;;  %v7138_v58 = vld [vmem:[#allocation13 + $0x2c0] sm:$0xff] }
 0x595   : > { %8593 = vmatpush1.bf16.msra.mxu1 %v14631_v59  ;;  %v7118_v59 = vld [vmem:[#allocation13 + $0x220] sm:$0xff] }
 0x596   : > { %8679 = vmatpush1.bf16.msra.mxu0 %v14633_v45  ;;  %8594 = vmatprep.subr.bf16.mxu1 %v14640_v15  ;;  %v7115_v45 = vld [vmem:[#allocation13 + $0x208] sm:$0xff]  ;;  %v14672_v32 = vcombine.high %v7114_v47, %v7118_v59 }
 0x597   : > { %8680 = vmatprep.subr.bf16.mxu0 %v14642_v16  ;;  %v7119_v15 = vld [vmem:[#allocation13 + $0x228] sm:$0xff]  ;;  %v14663_v16 = vcombine.low %v7106_v46, %v7110_v30 }
 0x598   : > { %v14674_v6 = vcombine.high %v7115_v45, %v7119_v15  ;;  %v14673_v31 = vcombine.low %v7115_v45, %v7119_v15  ;;  %v7146_v15 = vld [vmem:[#allocation13 + $0x300] sm:$0xff] }
 0x599   : > { %8595 = vmatpush1.bf16.msra.mxu1 %v14639_v10  ;;  %v7126_v10 = vld [vmem:[#allocation13 + $0x260] sm:$0xff] }
 0x59a   : > { %8681 = vmatpush1.bf16.msra.mxu0 %v14641_v49  ;;  %8596 = vmatprep.subr.bf16.mxu1 %v14648_v2  ;;  %v7123_v49 = vld [vmem:[#allocation13 + $0x248] sm:$0xff]  ;;  %v14680_v24 = vcombine.high %v7122_v42, %v7126_v10 }
 0x59b   : > { %8682 = vmatprep.subr.bf16.mxu0 %v14650_v44  ;;  %v7127_v2 = vld [vmem:[#allocation13 + $0x268] sm:$0xff]  ;;  %v14671_v44 = vcombine.low %v7114_v47, %v7118_v59 }
 0x59c   : > { %v14682_v23 = vcombine.high %v7123_v49, %v7127_v2  ;;  %v14681_v46 = vcombine.low %v7123_v49, %v7127_v2  ;;  %v7154_v2 = vld [vmem:[#allocation13 + $0x340] sm:$0xff] }
 0x59d   : > { %8597 = vmatpush1.bf16.msra.mxu1 %v14647_v57  ;;  %v7134_v57 = vld [vmem:[#allocation13 + $0x2a0] sm:$0xff] }
 0x59e   : > { %8683 = vmatpush1.bf16.msra.mxu0 %v14649_v51  ;;  %8598 = vmatprep.subr.bf16.mxu1 %v14656_v0  ;;  %v7131_v51 = vld [vmem:[#allocation13 + $0x288] sm:$0xff]  ;;  %v14688_v30 = vcombine.high %v7130_v25, %v7134_v57 }
 0x59f   : > { %8684 = vmatprep.subr.bf16.mxu0 %v14658_v55  ;;  %v7135_v0 = vld [vmem:[#allocation13 + $0x2a8] sm:$0xff]  ;;  %v14679_v55 = vcombine.low %v7122_v42, %v7126_v10 }
 0x5a0   : > { %v14690_v33 = vcombine.high %v7131_v51, %v7135_v0  ;;  %v14689_v47 = vcombine.low %v7131_v51, %v7135_v0  ;;  %v7162_v0 = vld [vmem:[#allocation13 + $0x380] sm:$0xff] }
 0x5a1   : > { %8599 = vmatpush1.bf16.msra.mxu1 %v14655_v11  ;;  %v7142_v11 = vld [vmem:[#allocation13 + $0x2e0] sm:$0xff] }
 0x5a2   : > { %8685 = vmatpush1.bf16.msra.mxu0 %v14657_v52  ;;  %8600 = vmatprep.subr.bf16.mxu1 %v14664_v5  ;;  %v7139_v52 = vld [vmem:[#allocation13 + $0x2c8] sm:$0xff]  ;;  %v14696_v59 = vcombine.high %v7138_v58, %v7142_v11 }
 0x5a3   : > { %8686 = vmatprep.subr.bf16.mxu0 %v14666_v54  ;;  %v7143_v5 = vld [vmem:[#allocation13 + $0x2e8] sm:$0xff]  ;;  %v14687_v54 = vcombine.low %v7130_v25, %v7134_v57 }
 0x5a4   : > { %v14698_v45 = vcombine.high %v7139_v52, %v7143_v5  ;;  %v14697_v42 = vcombine.low %v7139_v52, %v7143_v5  ;;  %v7170_v5 = vld [vmem:[#allocation13 + $0x3c0] sm:$0xff] }
 0x5a5   : > { %8601 = vmatpush1.bf16.msra.mxu1 %v14663_v16  ;;  %v7150_v16 = vld [vmem:[#allocation13 + $0x320] sm:$0xff] }
 0x5a6   : > { %8687 = vmatpush1.bf16.msra.mxu0 %v14665_v18  ;;  %8602 = vmatprep.subr.bf16.mxu1 %v14672_v32  ;;  %v7147_v18 = vld [vmem:[#allocation13 + $0x308] sm:$0xff]  ;;  %v14704_v10 = vcombine.high %v7146_v15, %v7150_v16 }
 0x5a7   : > { %8688 = vmatprep.subr.bf16.mxu0 %v14674_v6  ;;  %v7151_v32 = vld [vmem:[#allocation13 + $0x328] sm:$0xff]  ;;  %v14695_v6 = vcombine.low %v7138_v58, %v7142_v11 }
 0x5a8   : > { %v14706_v49 = vcombine.high %v7147_v18, %v7151_v32  ;;  %v14705_v25 = vcombine.low %v7147_v18, %v7151_v32  ;;  %v7178_v32 = vld [vmem:[#allocation13 + $0x400] sm:$0xff] }
 0x5a9   : > { %8603 = vmatpush1.bf16.msra.mxu1 %v14671_v44  ;;  %v7158_v44 = vld [vmem:[#allocation13 + $0x360] sm:$0xff] }
 0x5aa   : > { %8689 = vmatpush1.bf16.msra.mxu0 %v14673_v31  ;;  %8604 = vmatprep.subr.bf16.mxu1 %v14680_v24  ;;  %v7155_v31 = vld [vmem:[#allocation13 + $0x348] sm:$0xff]  ;;  %v14712_v57 = vcombine.high %v7154_v2, %v7158_v44 }
 0x5ab   : > { %8690 = vmatprep.subr.bf16.mxu0 %v14682_v23  ;;  %v7159_v24 = vld [vmem:[#allocation13 + $0x368] sm:$0xff]  ;;  %v14703_v23 = vcombine.low %v7146_v15, %v7150_v16 }
 0x5ac   : > { %v14714_v51 = vcombine.high %v7155_v31, %v7159_v24  ;;  %v14713_v58 = vcombine.low %v7155_v31, %v7159_v24  ;;  %v7186_v24 = vld [vmem:[#allocation13 + $0x440] sm:$0xff] }
 0x5ad   : > { %8605 = vmatpush1.bf16.msra.mxu1 %v14679_v55  ;;  %v7166_v55 = vld [vmem:[#allocation13 + $0x3a0] sm:$0xff] }
 0x5ae   : > { %8691 = vmatpush1.bf16.msra.mxu0 %v14681_v46  ;;  %8606 = vmatprep.subr.bf16.mxu1 %v14688_v30  ;;  %v7163_v46 = vld [vmem:[#allocation13 + $0x388] sm:$0xff]  ;;  %v14720_v11 = vcombine.high %v7162_v0, %v7166_v55 }
 0x5af   : > { %8692 = vmatprep.subr.bf16.mxu0 %v14690_v33  ;;  %v7167_v30 = vld [vmem:[#allocation13 + $0x3a8] sm:$0xff]  ;;  %v14711_v33 = vcombine.low %v7154_v2, %v7158_v44 }
 0x5b0   : > { %v14722_v52 = vcombine.high %v7163_v46, %v7167_v30  ;;  %v14721_v15 = vcombine.low %v7163_v46, %v7167_v30  ;;  %v7194_v46 = vld [vmem:[#allocation13 + $0x480] sm:$0xff] }
 0x5b1   : > { %8607 = vmatpush1.bf16.msra.mxu1 %v14687_v54  ;;  %v7174_v54 = vld [vmem:[#allocation13 + $0x3e0] sm:$0xff] }
 0x5b2   : > { %8693 = vmatpush1.bf16.msra.mxu0 %v14689_v47  ;;  %8608 = vmatprep.subr.bf16.mxu1 %v14696_v59  ;;  %v7171_v47 = vld [vmem:[#allocation13 + $0x3c8] sm:$0xff]  ;;  %v14728_v16 = vcombine.high %v7170_v5, %v7174_v54  ;;  %v7198_v30 = vld [vmem:[#allocation13 + $0x4a0] sm:$0xff] }
 0x5b3   : > { %8694 = vmatprep.subr.bf16.mxu0 %v14698_v45  ;;  %v7175_v59 = vld [vmem:[#allocation13 + $0x3e8] sm:$0xff]  ;;  %v14719_v45 = vcombine.low %v7162_v0, %v7166_v55 }
 0x5b4   : > { %v14730_v18 = vcombine.high %v7171_v47, %v7175_v59  ;;  %v14729_v2 = vcombine.low %v7171_v47, %v7175_v59  ;;  %v7202_v59 = vld [vmem:[#allocation13 + $0x4c0] sm:$0xff] }
 0x5b5   : > { %8609 = vmatpush1.bf16.msra.mxu1 %v14695_v6  ;;  %v7182_v6 = vld [vmem:[#allocation13 + $0x420] sm:$0xff] }
 0x5b6   : > { %8695 = vmatpush1.bf16.msra.mxu0 %v14697_v42  ;;  %8610 = vmatprep.subr.bf16.mxu1 %v14704_v10  ;;  %v7179_v42 = vld [vmem:[#allocation13 + $0x408] sm:$0xff]  ;;  %v14736_v44 = vcombine.high %v7178_v32, %v7182_v6 }
 0x5b7   : > { %8696 = vmatprep.subr.bf16.mxu0 %v14706_v49  ;;  %v7183_v10 = vld [vmem:[#allocation13 + $0x428] sm:$0xff]  ;;  %v14727_v49 = vcombine.low %v7170_v5, %v7174_v54  ;;  %v14752_v54 = vcombine.high %v7194_v46, %v7198_v30 }
 0x5b8   : > { %v14738_v31 = vcombine.high %v7179_v42, %v7183_v10  ;;  %v14737_v0 = vcombine.low %v7179_v42, %v7183_v10  ;;  %v7210_v10 = vld [vmem:[#allocation13 + $0x500] sm:$0xff] }
 0x5b9   : > { %8611 = vmatpush1.bf16.msra.mxu1 %v14703_v23  ;;  %v7190_v23 = vld [vmem:[#allocation13 + $0x460] sm:$0xff] }
 0x5ba   : > { %8697 = vmatpush1.bf16.msra.mxu0 %v14705_v25  ;;  %8612 = vmatprep.subr.bf16.mxu1 %v14712_v57  ;;  %v14735_v25 = vcombine.low %v7178_v32, %v7182_v6  ;;  %v7187_v57 = vld [vmem:[#allocation13 + $0x448] sm:$0xff]  ;;  %v14744_v55 = vcombine.high %v7186_v24, %v7190_v23 }
 0x5bb   : > { %8698 = vmatprep.subr.bf16.mxu0 %v14714_v51  ;;  %v7191_v51 = vld [vmem:[#allocation13 + $0x468] sm:$0xff] }
 0x5bc   : > { %v14745_v5 = vcombine.low %v7187_v57, %v7191_v51 }
 0x5bd   : > { %8613 = vmatpush1.bf16.msra.mxu1 %v14711_v33  ;;  %v14746_v33 = vcombine.high %v7187_v57, %v7191_v51  ;;  %v7218_v57 = vld [vmem:[#allocation13 + $0x540] sm:$0xff] }
 0x5be   : > { %8699 = vmatpush1.bf16.msra.mxu0 %v14713_v58  ;;  %8614 = vmatprep.subr.bf16.mxu1 %v14720_v11  ;;  %v7195_v58 = vld [vmem:[#allocation13 + $0x488] sm:$0xff]  ;;  %v7222_v51 = vld [vmem:[#allocation13 + $0x560] sm:$0xff] }
 0x5bf   : > { %8700 = vmatprep.subr.bf16.mxu0 %v14722_v52  ;;  %v7199_v11 = vld [vmem:[#allocation13 + $0x4a8] sm:$0xff]  ;;  %v14743_v52 = vcombine.low %v7186_v24, %v7190_v23 }
 0x5c0   : > { %v14754_v47 = vcombine.high %v7195_v58, %v7199_v11  ;;  %v14753_v32 = vcombine.low %v7195_v58, %v7199_v11  ;;  %v7226_v11 = vld [vmem:[#allocation13 + $0x580] sm:$0xff] }
 0x5c1   : > { %8615 = vmatpush1.bf16.msra.mxu1 %v14719_v45  ;;  %v7206_v45 = vld [vmem:[#allocation13 + $0x4e0] sm:$0xff] }
 0x5c2   : > { %8701 = vmatpush1.bf16.msra.mxu0 %v14721_v15  ;;  %8616 = vmatprep.subr.bf16.mxu1 %v14728_v16  ;;  %v7203_v15 = vld [vmem:[#allocation13 + $0x4c8] sm:$0xff]  ;;  %v14760_v6 = vcombine.high %v7202_v59, %v7206_v45 }
 0x5c3   : > { %8702 = vmatprep.subr.bf16.mxu0 %v14730_v18  ;;  %v7207_v16 = vld [vmem:[#allocation13 + $0x4e8] sm:$0xff]  ;;  %v14751_v18 = vcombine.low %v7194_v46, %v7198_v30 }
 0x5c4   : > { %v14762_v42 = vcombine.high %v7203_v15, %v7207_v16  ;;  %v14761_v24 = vcombine.low %v7203_v15, %v7207_v16  ;;  %v7234_v16 = vld [vmem:[#allocation13 + $0x5c0] sm:$0xff] }
 0x5c5   : > { %8617 = vmatpush1.bf16.msra.mxu1 %v14727_v49  ;;  %v7214_v49 = vld [vmem:[#allocation13 + $0x520] sm:$0xff] }
 0x5c6   : > { %8703 = vmatpush1.bf16.msra.mxu0 %v14729_v2  ;;  %8629 = vmatprep.subr.bf16.mxu1 %v14736_v44  ;;  %v7211_v2 = vld [vmem:[#allocation13 + $0x508] sm:$0xff]  ;;  %v14768_v23 = vcombine.high %v7210_v10, %v7214_v49  ;;  %v14767_v46 = vcombine.low %v7210_v10, %v7214_v49 }
 0x5c7   : > { %8715 = vmatprep.subr.bf16.mxu0 %v14738_v31  ;;  %v7215_v44 = vld [vmem:[#allocation13 + $0x528] sm:$0xff]  ;;  %v14759_v31 = vcombine.low %v7202_v59, %v7206_v45 }
 0x5c8   : > { %14868 = vmatmul.mubr.msk.bf16.vlgmr.msra.gmra.mrb[24].mxu1 %vm17474_vm6, %v17092_v7  ;;  %v14769_v30 = vcombine.low %v7211_v2, %v7215_v44 }
 0x5c9   : > { %14880 = vmatmul.mubr.msk.bf16.vlgmr.msra.gmra.mrb[28].mxu0 %vm17474_vm6, %v17092_v7  ;;  %8630 = vmatpush1.bf16.msra.mxu1 %v14735_v25  ;;  %v14770_v25 = vcombine.high %v7211_v2, %v7215_v44  ;;  %v7242_v44 = vld [vmem:[#allocation13 + $0x600] sm:$0xff] }
 0x5ca   : > { %14871 = vmatprep.mubr.msk.bf16.mxu1 %vm17474_vm6, %v17094_v48  ;;  %8716 = vmatpush1.bf16.msra.mxu0 %v14737_v0  ;;  %v7219_v0 = vld [vmem:[#allocation13 + $0x548] sm:$0xff] }
 0x5cb   : > { %14883 = vmatprep.mubr.msk.bf16.mxu0 %vm17474_vm6, %v17094_v48  ;;  %8631 = vmatprep.subr.bf16.mxu1 %v14744_v55  ;;  %v7223_v55 = vld [vmem:[#allocation13 + $0x568] sm:$0xff] }
 0x5cc   : > { %8717 = vmatprep.subr.bf16.mxu0 %v14746_v33  ;;  %v14776_v33 = vcombine.high %v7218_v57, %v7222_v51  ;;  %v14778_v58 = vcombine.high %v7219_v0, %v7223_v55  ;;  %v14777_v59 = vcombine.low %v7219_v0, %v7223_v55  ;;  %v7250_v55 = vld [vmem:[#allocation13 + $0x640] sm:$0xff] }
 0x5cd   : > { %8632 = vmatpush1.bf16.msra.mxu1 %v14743_v52  ;;  %v7230_v52 = vld [vmem:[#allocation13 + $0x5a0] sm:$0xff] }
 0x5ce   : > { %8718 = vmatpush1.bf16.msra.mxu0 %v14745_v5  ;;  %8633 = vmatprep.subr.bf16.mxu1 %v14752_v54  ;;  %v7227_v5 = vld [vmem:[#allocation13 + $0x588] sm:$0xff]  ;;  %v14784_v45 = vcombine.high %v7226_v11, %v7230_v52 }
 0x5cf   : > { %8719 = vmatprep.subr.bf16.mxu0 %v14754_v47  ;;  %v7231_v54 = vld [vmem:[#allocation13 + $0x5a8] sm:$0xff]  ;;  %v14775_v47 = vcombine.low %v7218_v57, %v7222_v51 }
 0x5d0   : > { %v14786_v15 = vcombine.high %v7227_v5, %v7231_v54  ;;  %v14785_v10 = vcombine.low %v7227_v5, %v7231_v54  ;;  %v7258_v54 = vld [vmem:[#allocation13 + $0x680] sm:$0xff] }
 0x5d1   : > { %8634 = vmatpush1.bf16.msra.mxu1 %v14751_v18  ;;  %v7238_v18 = vld [vmem:[#allocation13 + $0x5e0] sm:$0xff] }
 0x5d2   : > { %8720 = vmatpush1.bf16.msra.mxu0 %v14753_v32  ;;  %8635 = vmatprep.subr.bf16.mxu1 %v14760_v6  ;;  %v7235_v32 = vld [vmem:[#allocation13 + $0x5c8] sm:$0xff]  ;;  %v14792_v49 = vcombine.high %v7234_v16, %v7238_v18 }
 0x5d3   : > { %8721 = vmatprep.subr.bf16.mxu0 %v14762_v42  ;;  %v7239_v6 = vld [vmem:[#allocation13 + $0x5e8] sm:$0xff]  ;;  %v14783_v42 = vcombine.low %v7226_v11, %v7230_v52 }
 0x5d4   : > { %v14794_v2 = vcombine.high %v7235_v32, %v7239_v6  ;;  %v14793_v57 = vcombine.low %v7235_v32, %v7239_v6  ;;  %v7266_v6 = vld [vmem:[#allocation13 + $0x6c0] sm:$0xff] }
 0x5d5   : > { %8636 = vmatpush1.bf16.msra.mxu1 %v14759_v31  ;;  %v7246_v31 = vld [vmem:[#allocation13 + $0x620] sm:$0xff] }
 0x5d6   : > { %8722 = vmatpush1.bf16.msra.mxu0 %v14761_v24  ;;  %8637 = vmatprep.subr.bf16.mxu1 %v14768_v23  ;;  %v7243_v24 = vld [vmem:[#allocation13 + $0x608] sm:$0xff]  ;;  %v14800_v51 = vcombine.high %v7242_v44, %v7246_v31 }
 0x5d7   : > { %8723 = vmatprep.subr.bf16.mxu0 %v14770_v25  ;;  %v7247_v23 = vld [vmem:[#allocation13 + $0x628] sm:$0xff]  ;;  %v14791_v25 = vcombine.low %v7234_v16, %v7238_v18 }
 0x5d8   : > { %v14802_v0 = vcombine.high %v7243_v24, %v7247_v23  ;;  %v14801_v11 = vcombine.low %v7243_v24, %v7247_v23  ;;  %v7274_v23 = vld [vmem:[#allocation13 + $0x700] sm:$0xff] }
 0x5d9   : > { %8638 = vmatpush1.bf16.msra.mxu1 %v14767_v46  ;;  %v7254_v46 = vld [vmem:[#allocation13 + $0x660] sm:$0xff] }
 0x5da   : > { %8724 = vmatpush1.bf16.msra.mxu0 %v14769_v30  ;;  %8639 = vmatprep.subr.bf16.mxu1 %v14776_v33  ;;  %v7251_v30 = vld [vmem:[#allocation13 + $0x648] sm:$0xff]  ;;  %v14808_v52 = vcombine.high %v7250_v55, %v7254_v46 }
 0x5db   : > { %8725 = vmatprep.subr.bf16.mxu0 %v14778_v58  ;;  %v7255_v33 = vld [vmem:[#allocation13 + $0x668] sm:$0xff]  ;;  %v14799_v58 = vcombine.low %v7242_v44, %v7246_v31 }
 0x5dc   : > { %v14810_v5 = vcombine.high %v7251_v30, %v7255_v33  ;;  %v14809_v16 = vcombine.low %v7251_v30, %v7255_v33  ;;  %v7282_v33 = vld [vmem:[#allocation13 + $0x740] sm:$0xff] }
 0x5dd   : > { %8640 = vmatpush1.bf16.msra.mxu1 %v14775_v47  ;;  %v7262_v47 = vld [vmem:[#allocation13 + $0x6a0] sm:$0xff] }
 0x5de   : > { %8726 = vmatpush1.bf16.msra.mxu0 %v14777_v59  ;;  %8641 = vmatprep.subr.bf16.mxu1 %v14784_v45  ;;  %v7259_v59 = vld [vmem:[#allocation13 + $0x688] sm:$0xff]  ;;  %v14816_v18 = vcombine.high %v7258_v54, %v7262_v47 }
 0x5df   : > { %8727 = vmatprep.subr.bf16.mxu0 %v14786_v15  ;;  %v7263_v45 = vld [vmem:[#allocation13 + $0x6a8] sm:$0xff]  ;;  %v14807_v15 = vcombine.low %v7250_v55, %v7254_v46 }
 0x5e0   : > { %v14818_v32 = vcombine.high %v7259_v59, %v7263_v45  ;;  %v14817_v44 = vcombine.low %v7259_v59, %v7263_v45  ;;  %v7290_v45 = vld [vmem:[#allocation13 + $0x780] sm:$0xff] }
 0x5e1   : > { %8642 = vmatpush1.bf16.msra.mxu1 %v14783_v42  ;;  %v7270_v42 = vld [vmem:[#allocation13 + $0x6e0] sm:$0xff] }
 0x5e2   : > { %8728 = vmatpush1.bf16.msra.mxu0 %v14785_v10  ;;  %8643 = vmatprep.subr.bf16.mxu1 %v14792_v49  ;;  %v7267_v10 = vld [vmem:[#allocation13 + $0x6c8] sm:$0xff]  ;;  %v14824_v31 = vcombine.high %v7266_v6, %v7270_v42 }
 0x5e3   : > { %8729 = vmatprep.subr.bf16.mxu0 %v14794_v2  ;;  %v7271_v49 = vld [vmem:[#allocation13 + $0x6e8] sm:$0xff]  ;;  %v14815_v2 = vcombine.low %v7258_v54, %v7262_v47 }
 0x5e4   : > { %v14826_v24 = vcombine.high %v7267_v10, %v7271_v49  ;;  %v14825_v55 = vcombine.low %v7267_v10, %v7271_v49  ;;  %v7298_v49 = vld [vmem:[#allocation13 + $0x7c0] sm:$0xff] }
 0x5e5   : > { %8644 = vmatpush1.bf16.msra.mxu1 %v14791_v25  ;;  %v7278_v25 = vld [vmem:[#allocation13 + $0x720] sm:$0xff] }
 0x5e6   : > { %8730 = vmatpush1.bf16.msra.mxu0 %v14793_v57  ;;  %8645 = vmatprep.subr.bf16.mxu1 %v14800_v51  ;;  %v7275_v57 = vld [vmem:[#allocation13 + $0x708] sm:$0xff]  ;;  %v14832_v46 = vcombine.high %v7274_v23, %v7278_v25 }
 0x5e7   : > { %8731 = vmatprep.subr.bf16.mxu0 %v14802_v0  ;;  %v7279_v51 = vld [vmem:[#allocation13 + $0x728] sm:$0xff]  ;;  %v14823_v0 = vcombine.low %v7266_v6, %v7270_v42 }
 0x5e8   : > { %v14834_v30 = vcombine.high %v7275_v57, %v7279_v51  ;;  %v14833_v54 = vcombine.low %v7275_v57, %v7279_v51  ;;  %v7052_v51 = vld [vmem:[#allocation13 + $0x10] sm:$0xff] }
 0x5e9   : > { %8646 = vmatpush1.bf16.msra.mxu1 %v14799_v58  ;;  %v7286_v58 = vld [vmem:[#allocation13 + $0x760] sm:$0xff] }
 0x5ea   : > { %8732 = vmatpush1.bf16.msra.mxu0 %v14801_v11  ;;  %8647 = vmatprep.subr.bf16.mxu1 %v14808_v52  ;;  %v7283_v11 = vld [vmem:[#allocation13 + $0x748] sm:$0xff]  ;;  %v14840_v47 = vcombine.high %v7282_v33, %v7286_v58 }
 0x5eb   : > { %8733 = vmatprep.subr.bf16.mxu0 %v14810_v5  ;;  %v7287_v52 = vld [vmem:[#allocation13 + $0x768] sm:$0xff]  ;;  %v14831_v5 = vcombine.low %v7274_v23, %v7278_v25 }
 0x5ec   : > { %v14842_v59 = vcombine.high %v7283_v11, %v7287_v52  ;;  %v14841_v6 = vcombine.low %v7283_v11, %v7287_v52  ;;  %v7060_v52 = vld [vmem:[#allocation13 + $0x50] sm:$0xff] }
 0x5ed   : > { %8648 = vmatpush1.bf16.msra.mxu1 %v14807_v15  ;;  %v7294_v15 = vld [vmem:[#allocation13 + $0x7a0] sm:$0xff] }
 0x5ee   : > { %8734 = vmatpush1.bf16.msra.mxu0 %v14809_v16  ;;  %8649 = vmatprep.subr.bf16.mxu1 %v14816_v18  ;;  %v7291_v16 = vld [vmem:[#allocation13 + $0x788] sm:$0xff]  ;;  %v14848_v42 = vcombine.high %v7290_v45, %v7294_v15 }
 0x5ef   : > { %8735 = vmatprep.subr.bf16.mxu0 %v14818_v32  ;;  %v7295_v18 = vld [vmem:[#allocation13 + $0x7a8] sm:$0xff]  ;;  %v14839_v32 = vcombine.low %v7282_v33, %v7286_v58 }
 0x5f0   : > { %v14850_v10 = vcombine.high %v7291_v16, %v7295_v18  ;;  %v14849_v23 = vcombine.low %v7291_v16, %v7295_v18  ;;  %v7068_v16 = vld [vmem:[#allocation13 + $0x90] sm:$0xff] }
 0x5f1   : > { %8650 = vmatpush1.bf16.msra.mxu1 %v14815_v2  ;;  %v7302_v2 = vld [vmem:[#allocation13 + $0x7e0] sm:$0xff]  ;;  %v7072_v18 = vld [vmem:[#allocation13 + $0xb0] sm:$0xff] }
 0x5f2   : > { %8736 = vmatpush1.bf16.msra.mxu0 %v14817_v44  ;;  %8651 = vmatprep.subr.bf16.mxu1 %v14824_v31  ;;  %v7299_v44 = vld [vmem:[#allocation13 + $0x7c8] sm:$0xff]  ;;  %v14856_v25 = vcombine.high %v7298_v49, %v7302_v2 }
 0x5f3   : > { %8737 = vmatprep.subr.bf16.mxu0 %v14826_v24  ;;  %v7303_v31 = vld [vmem:[#allocation13 + $0x7e8] sm:$0xff]  ;;  %v14847_v24 = vcombine.low %v7290_v45, %v7294_v15 }
 0x5f4   : > { %v14858_v57 = vcombine.high %v7299_v44, %v7303_v31  ;;  %v14857_v33 = vcombine.low %v7299_v44, %v7303_v31  ;;  %v7076_v31 = vld [vmem:[#allocation13 + $0xd0] sm:$0xff] }
 0x5f5   : > { %8652 = vmatpush1.bf16.msra.mxu1 %v14823_v0  ;;  %v7056_v0 = vld [vmem:[#allocation13 + $0x30] sm:$0xff] }
 0x5f6   : > { %8738 = vmatpush1.bf16.msra.mxu0 %v14825_v55  ;;  %8653 = vmatprep.subr.bf16.mxu1 %v14832_v46  ;;  %v7053_v55 = vld [vmem:[#allocation13 + $0x18] sm:$0xff]  ;;  %v14612_v58 = vcombine.high %v7052_v51, %v7056_v0 }
 0x5f7   : > { %8739 = vmatprep.subr.bf16.mxu0 %v14834_v30  ;;  %v7057_v46 = vld [vmem:[#allocation13 + $0x38] sm:$0xff]  ;;  %v14855_v30 = vcombine.low %v7298_v49, %v7302_v2  ;;  %v14628_v2 = vcombine.high %v7068_v16, %v7072_v18 }
 0x5f8   : > { %v14614_v11 = vcombine.high %v7053_v55, %v7057_v46  ;;  %v14613_v45 = vcombine.low %v7053_v55, %v7057_v46  ;;  %v7084_v46 = vld [vmem:[#allocation13 + $0x110] sm:$0xff] }
 0x5f9   : > { %8654 = vmatpush1.bf16.msra.mxu1 %v14831_v5  ;;  %v7064_v5 = vld [vmem:[#allocation13 + $0x70] sm:$0xff] }
 0x5fa   : > { %8740 = vmatpush1.bf16.msra.mxu0 %v14833_v54  ;;  %8655 = vmatprep.subr.bf16.mxu1 %v14840_v47  ;;  %v14611_v54 = vcombine.low %v7052_v51, %v7056_v0  ;;  %v7061_v47 = vld [vmem:[#allocation13 + $0x58] sm:$0xff]  ;;  %v14620_v15 = vcombine.high %v7060_v52, %v7064_v5 }
 0x5fb   : > { %8741 = vmatprep.subr.bf16.mxu0 %v14842_v59  ;;  %v7065_v59 = vld [vmem:[#allocation13 + $0x78] sm:$0xff] }
 0x5fc   : > { %v14621_v49 = vcombine.low %v7061_v47, %v7065_v59 }
 0x5fd   : > { %8656 = vmatpush1.bf16.msra.mxu1 %v14839_v32  ;;  %v14622_v32 = vcombine.high %v7061_v47, %v7065_v59  ;;  %v7096_v47 = vld [vmem:[#allocation13 + $0x170] sm:$0xff]  ;;  %v7093_v59 = vld [vmem:[#allocation13 + $0x158] sm:$0xff] }
 0x5fe   : > { %8742 = vmatpush1.bf16.msra.mxu0 %v14841_v6  ;;  %8657 = vmatprep.subr.bf16.mxu1 %v14848_v42  ;;  %v7069_v6 = vld [vmem:[#allocation13 + $0x98] sm:$0xff] }
 0x5ff   : > { %8743 = vmatprep.subr.bf16.mxu0 %v14850_v10  ;;  %v7073_v42 = vld [vmem:[#allocation13 + $0xb8] sm:$0xff]  ;;  %v14619_v10 = vcombine.low %v7060_v52, %v7064_v5 }
 0x600   : > { %v14630_v44 = vcombine.high %v7069_v6, %v7073_v42  ;;  %v14629_v51 = vcombine.low %v7069_v6, %v7073_v42  ;;  %v7100_v6 = vld [vmem:[#allocation13 + $0x190] sm:$0xff] }
 0x601   : > { %8658 = vmatpush1.bf16.msra.mxu1 %v14847_v24  ;;  %v7080_v24 = vld [vmem:[#allocation13 + $0xf0] sm:$0xff] }
 0x602   : > { %8744 = vmatpush1.bf16.msra.mxu0 %v14849_v23  ;;  %8659 = vmatprep.subr.bf16.mxu1 %v14856_v25  ;;  %v7077_v23 = vld [vmem:[#allocation13 + $0xd8] sm:$0xff]  ;;  %v14636_v0 = vcombine.high %v7076_v31, %v7080_v24  ;;  %v7104_v42 = vld [vmem:[#allocation13 + $0x1b0] sm:$0xff] }
 0x603   : > { %8745 = vmatprep.subr.bf16.mxu0 %v14858_v57  ;;  %v7081_v25 = vld [vmem:[#allocation13 + $0xf8] sm:$0xff]  ;;  %v14627_v57 = vcombine.low %v7068_v16, %v7072_v18 }
 0x604   : > { %v14638_v55 = vcombine.high %v7077_v23, %v7081_v25 }
 0x605   : > { %8660 = vmatpush1.bf16.msra.mxu1 %v14855_v30  ;;  %v7088_v30 = vld [vmem:[#allocation13 + $0x130] sm:$0xff] }
 0x606   : > { %8746 = vmatpush1.bf16.msra.mxu0 %v14857_v33  ;;  %8758 = vmatprep.subr.bf16.mxu1 %v14612_v58  ;;  %v7085_v33 = vld [vmem:[#allocation13 + $0x118] sm:$0xff]  ;;  %v14644_v52 = vcombine.high %v7084_v46, %v7088_v30 }
 0x607   : > { %8844 = vmatprep.subr.bf16.mxu0 %v14614_v11  ;;  %v7089_v58 = vld [vmem:[#allocation13 + $0x138] sm:$0xff]  ;;  %v14637_v11 = vcombine.low %v7077_v23, %v7081_v25  ;;  %v7108_v23 = vld [vmem:[#allocation13 + $0x1d0] sm:$0xff] }
 0x608   : > { %14874 = vmatmul.mubr.msk.bf16.vlgmr.msra.gmra.mrb[24].mxu1 %vm17474_vm6, %v17097_v1  ;;  %v14646_v5 = vcombine.high %v7085_v33, %v7089_v58  ;;  %v14645_v16 = vcombine.low %v7085_v33, %v7089_v58  ;;  %v7112_v25 = vld [vmem:[#allocation13 + $0x1f0] sm:$0xff] }
 0x609   : > { %14886 = vmatmul.mubr.msk.bf16.vlgmr.msra.gmra.mrb[28].mxu0 %vm17474_vm6, %v17097_v1  ;;  %8759 = vmatpush1.bf16.msra.mxu1 %v14611_v54  ;;  %v7092_v54 = vld [vmem:[#allocation13 + $0x150] sm:$0xff] }
 0x60a   : > { %14889 = vmatprep.mubr.msk.bf16.mxu1 %vm17474_vm6, %v17090_v39  ;;  %8845 = vmatpush1.bf16.msra.mxu0 %v14613_v45  ;;  %v7097_v45 = vld [vmem:[#allocation13 + $0x178] sm:$0xff]  ;;  %v14652_v18 = vcombine.high %v7092_v54, %v7096_v47  ;;  %v7116_v33 = vld [vmem:[#allocation13 + $0x210] sm:$0xff] }
 0x60b   : > { %14901 = vmatprep.mubr.msk.bf16.mxu0 %vm17474_vm6, %v17090_v39  ;;  %8760 = vmatprep.subr.bf16.mxu1 %v14620_v15  ;;  %v14635_v39 = vcombine.low %v7076_v31, %v7080_v24  ;;  %v14643_v15 = vcombine.low %v7084_v46, %v7088_v30  ;;  %v14660_v31 = vcombine.high %v7100_v6, %v7104_v42  ;;  %v7120_v58 = vld [vmem:[#allocation13 + $0x230] sm:$0xff] }
 0x60c   : > { %8846 = vmatprep.subr.bf16.mxu0 %v14622_v32  ;;  %v14654_v32 = vcombine.high %v7093_v59, %v7097_v45  ;;  %v14668_v46 = vcombine.high %v7108_v23, %v7112_v25 }
 0x60d   : > { %8761 = vmatpush1.bf16.msra.mxu1 %v14619_v10  ;;  %v7101_v10 = vld [vmem:[#allocation13 + $0x198] sm:$0xff] }
 0x60e   : > { %8847 = vmatpush1.bf16.msra.mxu0 %v14621_v49  ;;  %8762 = vmatprep.subr.bf16.mxu1 %v14628_v2  ;;  %v7105_v49 = vld [vmem:[#allocation13 + $0x1b8] sm:$0xff]  ;;  %v14651_v2 = vcombine.low %v7092_v54, %v7096_v47  ;;  %v14676_v54 = vcombine.high %v7116_v33, %v7120_v58 }
 0x60f   : > { %8848 = vmatprep.subr.bf16.mxu0 %v14630_v44  ;;  %v14653_v44 = vcombine.low %v7093_v59, %v7097_v45  ;;  %v14662_v24 = vcombine.high %v7101_v10, %v7105_v49  ;;  %v7124_v59 = vld [vmem:[#allocation13 + $0x250] sm:$0xff] }
 0x610   : > { %v7128_v45 = vld [vmem:[#allocation13 + $0x270] sm:$0xff] }
 0x611   : > { %8763 = vmatpush1.bf16.msra.mxu1 %v14627_v57  ;;  %v7109_v57 = vld [vmem:[#allocation13 + $0x1d8] sm:$0xff] }
 0x612   : > { %8849 = vmatpush1.bf16.msra.mxu0 %v14629_v51  ;;  %8764 = vmatprep.subr.bf16.mxu1 %v14636_v0  ;;  %v7113_v51 = vld [vmem:[#allocation13 + $0x1f8] sm:$0xff]  ;;  %v14659_v0 = vcombine.low %v7100_v6, %v7104_v42  ;;  %v14684_v6 = vcombine.high %v7124_v59, %v7128_v45 }
 0x613   : > { %8850 = vmatprep.subr.bf16.mxu0 %v14638_v55  ;;  %v14661_v55 = vcombine.low %v7101_v10, %v7105_v49  ;;  %v14670_v30 = vcombine.high %v7109_v57, %v7113_v51  ;;  %v7132_v10 = vld [vmem:[#allocation13 + $0x290] sm:$0xff] }
 0x614   : > { %v7136_v49 = vld [vmem:[#allocation13 + $0x2b0] sm:$0xff] }
 0x615   : > { %8765 = vmatpush1.bf16.msra.mxu1 %v14635_v39  ;;  %v7117_v39 = vld [vmem:[#allocation13 + $0x218] sm:$0xff] }
 0x616   : > { %8851 = vmatpush1.bf16.msra.mxu0 %v14637_v11  ;;  %8766 = vmatprep.subr.bf16.mxu1 %v14644_v52  ;;  %v7121_v11 = vld [vmem:[#allocation13 + $0x238] sm:$0xff]  ;;  %v14667_v52 = vcombine.low %v7108_v23, %v7112_v25  ;;  %v14692_v23 = vcombine.high %v7132_v10, %v7136_v49 }
 0x617   : > { %8852 = vmatprep.subr.bf16.mxu0 %v14646_v5  ;;  %v14669_v5 = vcombine.low %v7109_v57, %v7113_v51  ;;  %v14678_v47 = vcombine.high %v7117_v39, %v7121_v11  ;;  %v7140_v57 = vld [vmem:[#allocation13 + $0x2d0] sm:$0xff] }
 0x618   : > { %v7144_v51 = vld [vmem:[#allocation13 + $0x2f0] sm:$0xff] }
 0x619   : > { %8767 = vmatpush1.bf16.msra.mxu1 %v14643_v15  ;;  %v7125_v15 = vld [vmem:[#allocation13 + $0x258] sm:$0xff] }
 0x61a   : > { %8853 = vmatpush1.bf16.msra.mxu0 %v14645_v16  ;;  %8768 = vmatprep.subr.bf16.mxu1 %v14652_v18  ;;  %v7129_v16 = vld [vmem:[#allocation13 + $0x278] sm:$0xff]  ;;  %v14675_v18 = vcombine.low %v7116_v33, %v7120_v58  ;;  %v14700_v33 = vcombine.high %v7140_v57, %v7144_v51 }
 0x61b   : > { %8854 = vmatprep.subr.bf16.mxu0 %v14654_v32  ;;  %v14677_v32 = vcombine.low %v7117_v39, %v7121_v11  ;;  %v14686_v42 = vcombine.high %v7125_v15, %v7129_v16  ;;  %v7148_v39 = vld [vmem:[#allocation13 + $0x310] sm:$0xff] }
 0x61c   : > { %v7152_v11 = vld [vmem:[#allocation13 + $0x330] sm:$0xff] }
 0x61d   : > { %8769 = vmatpush1.bf16.msra.mxu1 %v14651_v2  ;;  %v7133_v2 = vld [vmem:[#allocation13 + $0x298] sm:$0xff] }
 0x61e   : > { %8855 = vmatpush1.bf16.msra.mxu0 %v14653_v44  ;;  %8770 = vmatprep.subr.bf16.mxu1 %v14660_v31  ;;  %v7137_v44 = vld [vmem:[#allocation13 + $0x2b8] sm:$0xff]  ;;  %v14683_v31 = vcombine.low %v7124_v59, %v7128_v45  ;;  %v14708_v59 = vcombine.high %v7148_v39, %v7152_v11 }
 0x61f   : > { %8856 = vmatprep.subr.bf16.mxu0 %v14662_v24  ;;  %v14685_v24 = vcombine.low %v7125_v15, %v7129_v16  ;;  %v14694_v25 = vcombine.high %v7133_v2, %v7137_v44  ;;  %v7156_v15 = vld [vmem:[#allocation13 + $0x350] sm:$0xff] }
 0x620   : > { %v7160_v16 = vld [vmem:[#allocation13 + $0x370] sm:$0xff] }
 0x621   : > { %8771 = vmatpush1.bf16.msra.mxu1 %v14659_v0  ;;  %v7141_v0 = vld [vmem:[#allocation13 + $0x2d8] sm:$0xff] }
 0x622   : > { %8857 = vmatpush1.bf16.msra.mxu0 %v14661_v55  ;;  %8772 = vmatprep.subr.bf16.mxu1 %v14668_v46  ;;  %v7145_v55 = vld [vmem:[#allocation13 + $0x2f8] sm:$0xff]  ;;  %v14691_v46 = vcombine.low %v7132_v10, %v7136_v49  ;;  %v14716_v10 = vcombine.high %v7156_v15, %v7160_v16 }
 0x623   : > { %8858 = vmatprep.subr.bf16.mxu0 %v14670_v30  ;;  %v14693_v30 = vcombine.low %v7133_v2, %v7137_v44  ;;  %v14702_v58 = vcombine.high %v7141_v0, %v7145_v55  ;;  %v7164_v2 = vld [vmem:[#allocation13 + $0x390] sm:$0xff] }
 0x624   : > { %v7168_v44 = vld [vmem:[#allocation13 + $0x3b0] sm:$0xff] }
 0x625   : > { %8773 = vmatpush1.bf16.msra.mxu1 %v14667_v52  ;;  %v7149_v52 = vld [vmem:[#allocation13 + $0x318] sm:$0xff] }
 0x626   : > { %8859 = vmatpush1.bf16.msra.mxu0 %v14669_v5  ;;  %8774 = vmatprep.subr.bf16.mxu1 %v14676_v54  ;;  %v7153_v5 = vld [vmem:[#allocation13 + $0x338] sm:$0xff]  ;;  %v14699_v54 = vcombine.low %v7140_v57, %v7144_v51  ;;  %v14724_v57 = vcombine.high %v7164_v2, %v7168_v44 }
 0x627   : > { %8860 = vmatprep.subr.bf16.mxu0 %v14678_v47  ;;  %v14701_v47 = vcombine.low %v7141_v0, %v7145_v55  ;;  %v14710_v45 = vcombine.high %v7149_v52, %v7153_v5  ;;  %v7172_v0 = vld [vmem:[#allocation13 + $0x3d0] sm:$0xff] }
 0x628   : > { %v7176_v55 = vld [vmem:[#allocation13 + $0x3f0] sm:$0xff] }
 0x629   : > { %8775 = vmatpush1.bf16.msra.mxu1 %v14675_v18  ;;  %v7157_v18 = vld [vmem:[#allocation13 + $0x358] sm:$0xff] }
 0x62a   : > { %8861 = vmatpush1.bf16.msra.mxu0 %v14677_v32  ;;  %8776 = vmatprep.subr.bf16.mxu1 %v14684_v6  ;;  %v7161_v32 = vld [vmem:[#allocation13 + $0x378] sm:$0xff]  ;;  %v14707_v6 = vcombine.low %v7148_v39, %v7152_v11  ;;  %v14732_v39 = vcombine.high %v7172_v0, %v7176_v55 }
 0x62b   : > { %8862 = vmatprep.subr.bf16.mxu0 %v14686_v42  ;;  %v14709_v42 = vcombine.low %v7149_v52, %v7153_v5  ;;  %v14718_v49 = vcombine.high %v7157_v18, %v7161_v32  ;;  %v7180_v52 = vld [vmem:[#allocation13 + $0x410] sm:$0xff] }
 0x62c   : > { %v7184_v5 = vld [vmem:[#allocation13 + $0x430] sm:$0xff] }
 0x62d   : > { %8777 = vmatpush1.bf16.msra.mxu1 %v14683_v31  ;;  %v7165_v31 = vld [vmem:[#allocation13 + $0x398] sm:$0xff] }
 0x62e   : > { %8863 = vmatpush1.bf16.msra.mxu0 %v14685_v24  ;;  %8778 = vmatprep.subr.bf16.mxu1 %v14692_v23  ;;  %v7169_v24 = vld [vmem:[#allocation13 + $0x3b8] sm:$0xff]  ;;  %v14715_v23 = vcombine.low %v7156_v15, %v7160_v16  ;;  %v14740_v15 = vcombine.high %v7180_v52, %v7184_v5 }
 0x62f   : > { %8864 = vmatprep.subr.bf16.mxu0 %v14694_v25  ;;  %v14717_v25 = vcombine.low %v7157_v18, %v7161_v32  ;;  %v14726_v51 = vcombine.high %v7165_v31, %v7169_v24  ;;  %v7188_v18 = vld [vmem:[#allocation13 + $0x450] sm:$0xff] }
 0x630   : > { %v7192_v32 = vld [vmem:[#allocation13 + $0x470] sm:$0xff] }
 0x631   : > { %8779 = vmatpush1.bf16.msra.mxu1 %v14691_v46  ;;  %v7173_v46 = vld [vmem:[#allocation13 + $0x3d8] sm:$0xff] }
 0x632   : > { %8865 = vmatpush1.bf16.msra.mxu0 %v14693_v30  ;;  %8780 = vmatprep.subr.bf16.mxu1 %v14700_v33  ;;  %v7177_v30 = vld [vmem:[#allocation13 + $0x3f8] sm:$0xff]  ;;  %v14723_v33 = vcombine.low %v7164_v2, %v7168_v44  ;;  %v14748_v2 = vcombine.high %v7188_v18, %v7192_v32  ;;  %v7196_v44 = vld [vmem:[#allocation13 + $0x490] sm:$0xff] }
 0x633   : > { %8866 = vmatprep.subr.bf16.mxu0 %v14702_v58  ;;  %v14725_v58 = vcombine.low %v7165_v31, %v7169_v24  ;;  %v14734_v11 = vcombine.high %v7173_v46, %v7177_v30  ;;  %v7200_v31 = vld [vmem:[#allocation13 + $0x4b0] sm:$0xff] }
 0x635   : > { %8781 = vmatpush1.bf16.msra.mxu1 %v14699_v54  ;;  %v7181_v54 = vld [vmem:[#allocation13 + $0x418] sm:$0xff] }
 0x636   : > { %8867 = vmatpush1.bf16.msra.mxu0 %v14701_v47  ;;  %8782 = vmatprep.subr.bf16.mxu1 %v14708_v59  ;;  %v7185_v47 = vld [vmem:[#allocation13 + $0x438] sm:$0xff]  ;;  %v14731_v59 = vcombine.low %v7172_v0, %v7176_v55  ;;  %v14756_v0 = vcombine.high %v7196_v44, %v7200_v31 }
 0x637   : > { %8868 = vmatprep.subr.bf16.mxu0 %v14710_v45  ;;  %v14733_v45 = vcombine.low %v7173_v46, %v7177_v30  ;;  %v14742_v16 = vcombine.high %v7181_v54, %v7185_v47  ;;  %v7204_v46 = vld [vmem:[#allocation13 + $0x4d0] sm:$0xff] }
 0x638   : > { %v7208_v30 = vld [vmem:[#allocation13 + $0x4f0] sm:$0xff] }
 0x639   : > { %8783 = vmatpush1.bf16.msra.mxu1 %v14707_v6  ;;  %v14739_v6 = vcombine.low %v7180_v52, %v7184_v5  ;;  %v7212_v5 = vld [vmem:[#allocation13 + $0x510] sm:$0xff] }
 0x63a   : > { %8869 = vmatpush1.bf16.msra.mxu0 %v14709_v42  ;;  %8784 = vmatprep.subr.bf16.mxu1 %v14716_v10  ;;  %v7189_v42 = vld [vmem:[#allocation13 + $0x458] sm:$0xff] }
 0x63b   : > { %8870 = vmatprep.subr.bf16.mxu0 %v14718_v49  ;;  %v7193_v10 = vld [vmem:[#allocation13 + $0x478] sm:$0xff]  ;;  %v14741_v49 = vcombine.low %v7181_v54, %v7185_v47  ;;  %v7216_v54 = vld [vmem:[#allocation13 + $0x530] sm:$0xff] }
 0x63c   : > { %v14750_v24 = vcombine.high %v7189_v42, %v7193_v10  ;;  %v7213_v47 = vld [vmem:[#allocation13 + $0x518] sm:$0xff] }
 0x63d   : > { %8785 = vmatpush1.bf16.msra.mxu1 %v14715_v23  ;;  %v7197_v23 = vld [vmem:[#allocation13 + $0x498] sm:$0xff] }
 0x63e   : > { %8871 = vmatpush1.bf16.msra.mxu0 %v14717_v25  ;;  %8786 = vmatprep.subr.bf16.mxu1 %v14724_v57  ;;  %v7201_v25 = vld [vmem:[#allocation13 + $0x4b8] sm:$0xff]  ;;  %v14747_v57 = vcombine.low %v7188_v18, %v7192_v32  ;;  %v7220_v18 = vld [vmem:[#allocation13 + $0x550] sm:$0xff] }
 0x63f   : > { %8872 = vmatprep.subr.bf16.mxu0 %v14726_v51  ;;  %v14749_v51 = vcombine.low %v7189_v42, %v7193_v10  ;;  %v14758_v55 = vcombine.high %v7197_v23, %v7201_v25  ;;  %v7224_v32 = vld [vmem:[#allocation13 + $0x570] sm:$0xff]  ;;  %v7225_v42 = vld [vmem:[#allocation13 + $0x578] sm:$0xff]  ;;  %v14771_v10 = vcombine.low %v7212_v5, %v7216_v54 }
 0x641   : > { %8787 = vmatpush1.bf16.msra.mxu1 %v14723_v33  ;;  %v7205_v33 = vld [vmem:[#allocation13 + $0x4d8] sm:$0xff] }
 0x642   : > { %8873 = vmatpush1.bf16.msra.mxu0 %v14725_v58  ;;  %8788 = vmatprep.subr.bf16.mxu1 %v14732_v39  ;;  %v14755_v58 = vcombine.low %v7196_v44, %v7200_v31  ;;  %v14757_v39 = vcombine.low %v7197_v23, %v7201_v25  ;;  %v7228_v31 = vld [vmem:[#allocation13 + $0x590] sm:$0xff]  ;;  %v7229_v23 = vld [vmem:[#allocation13 + $0x598] sm:$0xff] }
 0x643   : > { %8874 = vmatprep.subr.bf16.mxu0 %v14734_v11  ;;  %v14764_v11 = vcombine.high %v7204_v46, %v7208_v30  ;;  %v7233_v25 = vld [vmem:[#allocation13 + $0x5b8] sm:$0xff] }
 0x645   : > { %8789 = vmatpush1.bf16.msra.mxu1 %v14731_v59  ;;  %v7217_v59 = vld [vmem:[#allocation13 + $0x538] sm:$0xff] }
 0x646   : > { %8875 = vmatpush1.bf16.msra.mxu0 %v14733_v45  ;;  %8801 = vmatprep.subr.bf16.mxu1 %v14740_v15  ;;  %v14772_v15 = vcombine.high %v7212_v5, %v7216_v54  ;;  %v7244_v5 = vld [vmem:[#allocation13 + $0x610] sm:$0xff] }
 0x647   : > { %8887 = vmatprep.subr.bf16.mxu0 %v14742_v16  ;;  %v14774_v16 = vcombine.high %v7213_v47, %v7217_v59  ;;  %v7248_v54 = vld [vmem:[#allocation13 + $0x630] sm:$0xff] }
 0x648   : > { %14892 = vmatmul.mubr.msk.bf16.vlgmr.msra.gmra.mrb[28].mxu1 %vm17474_vm6, %v17092_v7 }
 0x649   : > { %14904 = vmatmul.mubr.msk.bf16.vlgmr.msra.gmra.mrb[32].mxu0 %vm17474_vm6, %v17092_v7  ;;  %8802 = vmatpush1.bf16.msra.mxu1 %v14739_v6  ;;  %v7209_v7 = vld [vmem:[#allocation13 + $0x4f8] sm:$0xff] }
 0x64a   : > { %14895 = vmatprep.mubr.msk.bf16.mxu1 %vm17474_vm6, %v17094_v48  ;;  %8888 = vmatpush1.bf16.msra.mxu0 %v14741_v49  ;;  %v14766_v52 = vcombine.high %v7205_v33, %v7209_v7  ;;  %v14765_v45 = vcombine.low %v7205_v33, %v7209_v7  ;;  %v7221_v6 = vld [vmem:[#allocation13 + $0x558] sm:$0xff]  ;;  %v14773_v49 = vcombine.low %v7213_v47, %v7217_v59 }
 0x64b   : > { %14907 = vmatprep.mubr.msk.bf16.mxu0 %vm17474_vm6, %v17094_v48  ;;  %8803 = vmatprep.subr.bf16.mxu1 %v14748_v2  ;;  %v14763_v48 = vcombine.low %v7204_v46, %v7208_v30  ;;  %v14780_v2 = vcombine.high %v7220_v18, %v7224_v32  ;;  %v14782_v44 = vcombine.high %v7221_v6, %v7225_v42  ;;  %v7236_v46 = vld [vmem:[#allocation13 + $0x5d0] sm:$0xff]  ;;  %v7237_v33 = vld [vmem:[#allocation13 + $0x5d8] sm:$0xff] }
 0x64c   : > { %8889 = vmatprep.subr.bf16.mxu0 %v14750_v24  ;;  %v7232_v24 = vld [vmem:[#allocation13 + $0x5b0] sm:$0xff]  ;;  %v7241_v7 = vld [vmem:[#allocation13 + $0x5f8] sm:$0xff] }
 0x64d   : > { %8804 = vmatpush1.bf16.msra.mxu1 %v14747_v57  ;;  %v14779_v57 = vcombine.low %v7220_v18, %v7224_v32  ;;  %v7240_v30 = vld [vmem:[#allocation13 + $0x5f0] sm:$0xff]  ;;  %v7245_v47 = vld [vmem:[#allocation13 + $0x618] sm:$0xff] }
 0x64e   : > { %8890 = vmatpush1.bf16.msra.mxu0 %v14749_v51  ;;  %8805 = vmatprep.subr.bf16.mxu1 %v14756_v0  ;;  %v14781_v51 = vcombine.low %v7221_v6, %v7225_v42  ;;  %v14788_v0 = vcombine.high %v7228_v31, %v7232_v24  ;;  %v7249_v59 = vld [vmem:[#allocation13 + $0x638] sm:$0xff]  ;;  %v7252_v18 = vld [vmem:[#allocation13 + $0x650] sm:$0xff] }
 0x64f   : > { %8891 = vmatprep.subr.bf16.mxu0 %v14758_v55  ;;  %v14790_v55 = vcombine.high %v7229_v23, %v7233_v25  ;;  %v7256_v32 = vld [vmem:[#allocation13 + $0x670] sm:$0xff]  ;;  %v7253_v6 = vld [vmem:[#allocation13 + $0x658] sm:$0xff] }
 0x650   : > { %v7257_v42 = vld [vmem:[#allocation13 + $0x678] sm:$0xff] }
 0x651   : > { %8806 = vmatpush1.bf16.msra.mxu1 %v14755_v58  ;;  %v14787_v58 = vcombine.low %v7228_v31, %v7232_v24  ;;  %v7260_v31 = vld [vmem:[#allocation13 + $0x690] sm:$0xff] }
 0x652   : > { %8892 = vmatpush1.bf16.msra.mxu0 %v14757_v39  ;;  %8807 = vmatprep.subr.bf16.mxu1 %v14764_v11  ;;  %v14789_v39 = vcombine.low %v7229_v23, %v7233_v25  ;;  %v14796_v11 = vcombine.high %v7236_v46, %v7240_v30  ;;  %v7264_v24 = vld [vmem:[#allocation13 + $0x6b0] sm:$0xff]  ;;  %v7261_v23 = vld [vmem:[#allocation13 + $0x698] sm:$0xff] }
 0x653   : > { %8893 = vmatprep.subr.bf16.mxu0 %v14766_v52  ;;  %v14798_v52 = vcombine.high %v7237_v33, %v7241_v7  ;;  %v7265_v25 = vld [vmem:[#allocation13 + $0x6b8] sm:$0xff] }
 0x655   : > { %8808 = vmatpush1.bf16.msra.mxu1 %v14763_v48  ;;  %v14795_v48 = vcombine.low %v7236_v46, %v7240_v30  ;;  %v7268_v46 = vld [vmem:[#allocation13 + $0x6d0] sm:$0xff] }
 0x656   : > { %8894 = vmatpush1.bf16.msra.mxu0 %v14765_v45  ;;  %8809 = vmatprep.subr.bf16.mxu1 %v14772_v15  ;;  %v14797_v45 = vcombine.low %v7237_v33, %v7241_v7  ;;  %v14804_v15 = vcombine.high %v7244_v5, %v7248_v54  ;;  %v7272_v30 = vld [vmem:[#allocation13 + $0x6f0] sm:$0xff]  ;;  %v7269_v33 = vld [vmem:[#allocation13 + $0x6d8] sm:$0xff] }
 0x657   : > { %8895 = vmatprep.subr.bf16.mxu0 %v14774_v16  ;;  %v14806_v16 = vcombine.high %v7245_v47, %v7249_v59  ;;  %v7273_v7 = vld [vmem:[#allocation13 + $0x6f8] sm:$0xff] }
 0x659   : > { %8810 = vmatpush1.bf16.msra.mxu1 %v14771_v10  ;;  %v14803_v10 = vcombine.low %v7244_v5, %v7248_v54  ;;  %v7276_v5 = vld [vmem:[#allocation13 + $0x710] sm:$0xff] }
 0x65a   : > { %8896 = vmatpush1.bf16.msra.mxu0 %v14773_v49  ;;  %8811 = vmatprep.subr.bf16.mxu1 %v14780_v2  ;;  %v14805_v49 = vcombine.low %v7245_v47, %v7249_v59  ;;  %v14812_v2 = vcombine.high %v7252_v18, %v7256_v32  ;;  %v7280_v54 = vld [vmem:[#allocation13 + $0x730] sm:$0xff]  ;;  %v7277_v47 = vld [vmem:[#allocation13 + $0x718] sm:$0xff] }
 0x65b   : > { %8897 = vmatprep.subr.bf16.mxu0 %v14782_v44  ;;  %v14814_v44 = vcombine.high %v7253_v6, %v7257_v42  ;;  %v7281_v59 = vld [vmem:[#allocation13 + $0x738] sm:$0xff] }
 0x65d   : > { %8812 = vmatpush1.bf16.msra.mxu1 %v14779_v57  ;;  %v14811_v57 = vcombine.low %v7252_v18, %v7256_v32  ;;  %v7284_v18 = vld [vmem:[#allocation13 + $0x750] sm:$0xff] }
 0x65e   : > { %8898 = vmatpush1.bf16.msra.mxu0 %v14781_v51  ;;  %8813 = vmatprep.subr.bf16.mxu1 %v14788_v0  ;;  %v14813_v51 = vcombine.low %v7253_v6, %v7257_v42  ;;  %v14820_v0 = vcombine.high %v7260_v31, %v7264_v24  ;;  %v7288_v32 = vld [vmem:[#allocation13 + $0x770] sm:$0xff]  ;;  %v7285_v6 = vld [vmem:[#allocation13 + $0x758] sm:$0xff] }
 0x65f   : > { %8899 = vmatprep.subr.bf16.mxu0 %v14790_v55  ;;  %v14822_v55 = vcombine.high %v7261_v23, %v7265_v25  ;;  %v7289_v42 = vld [vmem:[#allocation13 + $0x778] sm:$0xff] }
 0x661   : > { %8814 = vmatpush1.bf16.msra.mxu1 %v14787_v58  ;;  %v14819_v58 = vcombine.low %v7260_v31, %v7264_v24  ;;  %v7292_v31 = vld [vmem:[#allocation13 + $0x790] sm:$0xff] }
 0x662   : > { %8900 = vmatpush1.bf16.msra.mxu0 %v14789_v39  ;;  %8815 = vmatprep.subr.bf16.mxu1 %v14796_v11  ;;  %v14821_v39 = vcombine.low %v7261_v23, %v7265_v25  ;;  %v14828_v11 = vcombine.high %v7268_v46, %v7272_v30  ;;  %v7296_v24 = vld [vmem:[#allocation13 + $0x7b0] sm:$0xff]  ;;  %v7293_v23 = vld [vmem:[#allocation13 + $0x798] sm:$0xff] }
 0x663   : > { %8901 = vmatprep.subr.bf16.mxu0 %v14798_v52  ;;  %v14830_v52 = vcombine.high %v7269_v33, %v7273_v7  ;;  %v7297_v25 = vld [vmem:[#allocation13 + $0x7b8] sm:$0xff] }
 0x665   : > { %8816 = vmatpush1.bf16.msra.mxu1 %v14795_v48  ;;  %v14827_v48 = vcombine.low %v7268_v46, %v7272_v30  ;;  %v7300_v46 = vld [vmem:[#allocation13 + $0x7d0] sm:$0xff] }
 0x666   : > { %8902 = vmatpush1.bf16.msra.mxu0 %v14797_v45  ;;  %8817 = vmatprep.subr.bf16.mxu1 %v14804_v15  ;;  %v14829_v45 = vcombine.low %v7269_v33, %v7273_v7  ;;  %v14836_v15 = vcombine.high %v7276_v5, %v7280_v54  ;;  %v7304_v30 = vld [vmem:[#allocation13 + $0x7f0] sm:$0xff]  ;;  %v7301_v33 = vld [vmem:[#allocation13 + $0x7d8] sm:$0xff] }
 0x667   : > { %8903 = vmatprep.subr.bf16.mxu0 %v14806_v16  ;;  %v14838_v16 = vcombine.high %v7277_v47, %v7281_v59  ;;  %v7305_v7 = vld [vmem:[#allocation13 + $0x7f8] sm:$0xff] }
 0x669   : > { %8818 = vmatpush1.bf16.msra.mxu1 %v14803_v10  ;;  %v14835_v10 = vcombine.low %v7276_v5, %v7280_v54  ;;  %v14859_v5 = vcombine.low %v7300_v46, %v7304_v30  ;;  %v14861_v54 = vcombine.low %v7301_v33, %v7305_v7 }
 0x66a   : > { %8904 = vmatpush1.bf16.msra.mxu0 %v14805_v49  ;;  %8819 = vmatprep.subr.bf16.mxu1 %v14812_v2  ;;  %v14837_v49 = vcombine.low %v7277_v47, %v7281_v59  ;;  %v14844_v2 = vcombine.high %v7284_v18, %v7288_v32  ;;  %v15648_v47 = vld [vmem:[#allocation16 + $0x40] sm:$0xff]  }
 0x66b   : > { %8905 = vmatprep.subr.bf16.mxu0 %v14814_v44  ;;  %v14846_v44 = vcombine.high %v7285_v6, %v7289_v42  ;;  %v15649_v59 = vld [vmem:[#allocation16 + $0xc0] sm:$0xff]  }
 0x66d   : > { %8820 = vmatpush1.bf16.msra.mxu1 %v14811_v57  ;;  %v14843_v57 = vcombine.low %v7284_v18, %v7288_v32 }
 0x66e   : > { %8906 = vmatpush1.bf16.msra.mxu0 %v14813_v51  ;;  %8821 = vmatprep.subr.bf16.mxu1 %v14820_v0  ;;  %v14845_v51 = vcombine.low %v7285_v6, %v7289_v42  ;;  %v14852_v0 = vcombine.high %v7292_v31, %v7296_v24 }
 0x66f   : > { %8907 = vmatprep.subr.bf16.mxu0 %v14822_v55  ;;  %v14854_v55 = vcombine.high %v7293_v23, %v7297_v25 }
 0x671   : > { %8822 = vmatpush1.bf16.msra.mxu1 %v14819_v58  ;;  %v14851_v58 = vcombine.low %v7292_v31, %v7296_v24 }
 0x672   : > { %8908 = vmatpush1.bf16.msra.mxu0 %v14821_v39  ;;  %8823 = vmatprep.subr.bf16.mxu1 %v14828_v11  ;;  %v14853_v39 = vcombine.low %v7293_v23, %v7297_v25  ;;  %v14860_v11 = vcombine.high %v7300_v46, %v7304_v30 }
 0x673   : > { %8909 = vmatprep.subr.bf16.mxu0 %v14830_v52  ;;  %v14862_v52 = vcombine.high %v7301_v33, %v7305_v7 }
 0x675   : > { %8824 = vmatpush1.bf16.msra.mxu1 %v14827_v48 }
 0x676   : > { %8910 = vmatpush1.bf16.msra.mxu0 %v14829_v45  ;;  %8825 = vmatprep.subr.bf16.mxu1 %v14836_v15 }
 0x677   : > { %8911 = vmatprep.subr.bf16.mxu0 %v14838_v16 }
 0x679   : > { %8826 = vmatpush1.bf16.msra.mxu1 %v14835_v10 }
 0x67a   : > { %8912 = vmatpush1.bf16.msra.mxu0 %v14837_v49  ;;  %8827 = vmatprep.subr.bf16.mxu1 %v14844_v2 }
 0x67b   : > { %8913 = vmatprep.subr.bf16.mxu0 %v14846_v44 }
 0x67d   : > { %8828 = vmatpush1.bf16.msra.mxu1 %v14843_v57 }
 0x67e   : > { %8914 = vmatpush1.bf16.msra.mxu0 %v14845_v51  ;;  %8829 = vmatprep.subr.bf16.mxu1 %v14852_v0  ;;  %v15650_v51 = vld [vmem:[#allocation16] sm:$0xff]  }
 0x67f   : > { %8915 = vmatprep.subr.bf16.mxu0 %v14854_v55  ;;  %v15651_v0 = vld [vmem:[#allocation16 + $0x80] sm:$0xff]  }
 0x681   : > { %8830 = vmatpush1.bf16.msra.mxu1 %v14851_v58 }
 0x682   : > { %8916 = vmatpush1.bf16.msra.mxu0 %v14853_v39  ;;  %8831 = vmatprep.subr.bf16.mxu1 %v14860_v11 }
 0x683   : > { %8917 = vmatprep.subr.bf16.mxu0 %v14862_v52 }
 0x685   : > { %8832 = vmatpush1.bf16.msra.mxu1 %v14859_v5 }
 0x686   : > { %8918 = vmatpush1.bf16.msra.mxu0 %v14861_v54  ;;  %15107 = vmatprep.subr.bf16.mxu1 %v15648_v47 }
 0x687   : > { %15135 = vmatprep.subr.bf16.mxu0 %v15649_v59 }
 0x688   : > { %14898 = vmatmul.mubr.msk.bf16.vlgmr.msra.gmra.mrb[28].mxu1 %vm17474_vm6, %v17097_v1 }
 0x689   : > { %14910 = vmatmul.mubr.msk.bf16.vlgmr.msra.gmra.mrb[32].mxu0 %vm17474_vm6, %v17097_v1  ;;  %15108 = vmatpush3.bf16.msra.mxu1 %v15650_v51  ;;  %v15657_v51 = vld [vmem:[#allocation16 + $0xd0] sm:$0xff]  }
 0x68a   : > { %15136 = vmatpush3.bf16.msra.mxu0 %v15651_v0  ;;  %v15658_v0 = vld [vmem:[#allocation16 + $0x10] sm:$0xff]  }
 0x6db   : > { %v8663_v48 = vpop.f32.mrb[24].mxu1 }
 0x6dc   : > { %v9020_v45 = vadd.f32 %v17119_v14, %v8663_v48  ;;  %v8749_v15 = vpop.f32.mrb[28].mxu0  ;;  %v8665_v16 = vpop.f32.mrb[25].mxu1 }
 0x6dd   : > { %v9022_v18 = vadd.f32 %v17123_v12, %v8749_v15  ;;  %v9021_v32 = vadd.f32 %v17127_v34, %v8665_v16  ;;  %v8751_v6 = vpop.f32.mrb[29].mxu0  ;;  %v8667_v42 = vpop.f32.mrb[26].mxu1 }
 0x6de   : > { %v9036_v10 = vmax.f32 %v9020_v45, 0.0  ;;  %v9023_v49 = vadd.f32 %v17131_v60, %v8751_v6  ;;  %v9028_v2 = vadd.f32 %v17119_v14, %v8667_v42  ;;  %v8753_v44 = vpop.f32.mrb[30].mxu0  ;;  %v8669_v31 = vpop.f32.mrb[27].mxu1 }
 0x6df   : > { %v9038_v24 = vmax.f32 %v9022_v18, 0.0  ;;  %v9037_v1 = vmax.f32 %v9021_v32, 0.0  ;;  %v9030_v23 = vadd.f32 %v17123_v12, %v8753_v44  ;;  %v9029_v25 = vadd.f32 %v17127_v34, %v8669_v31  ;;  %v8755_v57 = vpop.f32.mrb[31].mxu0 }
 0x6e0   : > { %v9039_v55 = vmax.f32 %v9023_v49, 0.0  ;;  %v9044_v46 = vmax.f32 %v9028_v2, 0.0  ;;  %v9031_v30 = vadd.f32 %v17131_v60, %v8755_v57  ;;  %v15652_v49 = vld [vmem:[#allocation16 + $0x48] sm:$0xff]   ;;  %v15656_v57 = vld [vmem:[#allocation16 + $0x50] sm:$0xff]  }
 0x6e1   : > { %v9356_v33 = vcombine.low %v9036_v10, %v9037_v1  ;;  %v9357_v7 = vcombine.high %v9036_v10, %v9037_v1  ;;  %v9046_v58 = vmax.f32 %v9030_v23, 0.0  ;;  %v9045_v39 = vmax.f32 %v9029_v25, 0.0  ;;  %v15653_v2 = vld [vmem:[#allocation16 + $0xc8] sm:$0xff]   ;;  %15109 = vmatprep.subr.bf16.mxu1 %v15652_v49  ;;  %v15673_v49 = vld [vmem:[#allocation16 + $0xf0] sm:$0xff]  }
 0x6e2   : > { %v9358_v14 = vcombine.low %v9038_v24, %v9039_v55  ;;  %v9359_v11 = vcombine.high %v9038_v24, %v9039_v55  ;;  %v9047_v52 = vmax.f32 %v9031_v30, 0.0  ;;  %v15654_v23 = vld [vmem:[#allocation16 + $0x8] sm:$0xff]   ;;  %15137 = vmatprep.subr.bf16.mxu0 %v15653_v2  ;;  %v15659_v55 = vld [vmem:[#allocation16 + $0x90] sm:$0xff]   ;;  %v15661_v30 = vld [vmem:[#allocation16 + $0xd8] sm:$0xff]  }
 0x6e3   : > { %v17537_v12 = vrot.slane %v9356_v33, %v16572_v62  ;;  %v17540_v34 = vrot.slane %v9357_v7, %v16572_v62  ;;  %v9492_v5 = vcombine.low %v9044_v46, %v9045_v39  ;;  %v9493_v54 = vcombine.high %v9044_v46, %v9045_v39  ;;  %v15655_v25 = vld [vmem:[#allocation16 + $0x88] sm:$0xff]   ;;  %15110 = vmatpush3.bf16.msra.mxu1 %v15654_v23  ;;  %v15660_v46 = vld [vmem:[#allocation16 + $0x58] sm:$0xff]   ;;  %v15665_v39 = vld [vmem:[#allocation16 + $0xe0] sm:$0xff]  }
 0x6e4   : > { %v17543_v47 = vrot.slane %v9358_v14, %v16572_v62  ;;  %v17546_v60 = vrot.slane %v9359_v11, %v16572_v62  ;;  %v9494_v59 = vcombine.low %v9046_v58, %v9047_v52  ;;  %v9495_v48 = vcombine.high %v9046_v58, %v9047_v52  ;;  %15138 = vmatpush3.bf16.msra.mxu0 %v15655_v25  ;;  %v15662_v33 = vld [vmem:[#allocation16 + $0x18] sm:$0xff]   ;;  %v15664_v58 = vld [vmem:[#allocation16 + $0x60] sm:$0xff]   ;;  %v15668_v52 = vld [vmem:[#allocation16 + $0x68] sm:$0xff]  }
 0x6e5   : > { %v17549_v45 = vrot.slane %v9492_v5, %v16572_v62  ;;  %v17552_v15 = vrot.slane %v9493_v54, %v16572_v62  ;;  %15111 = vmatprep.subr.bf16.mxu1 %v15656_v57  ;;  %15139 = vmatprep.subr.bf16.mxu0 %v15657_v51  ;;  %v15663_v7 = vld [vmem:[#allocation16 + $0x98] sm:$0xff]   ;;  %v15666_v14 = vld [vmem:[#allocation16 + $0x20] sm:$0xff]   ;;  %v15669_v5 = vld [vmem:[#allocation16 + $0xe8] sm:$0xff]  }
 0x6e6   : > { %v9420_v16 = vcombine.low %v17537_v12, %v17543_v47  ;;  %v9421_v18 = vcombine.high %v17537_v12, %v17543_v47  ;;  %v9422_v32 = vcombine.low %v17540_v34, %v17546_v60  ;;  %v9423_v6 = vcombine.high %v17540_v34, %v17546_v60  ;;  %v15667_v11 = vld [vmem:[#allocation16 + $0xa0] sm:$0xff]   ;;  %v15670_v54 = vld [vmem:[#allocation16 + $0x28] sm:$0xff]   ;;  %v15674_v2 = vld [vmem:[#allocation16 + $0x30] sm:$0xff]  }
 0x6e7   : > { %v17563_v42 = vrot.slane %v9494_v59, %v16572_v62  ;;  %v17566_v10 = vrot.slane %v9495_v48, %v16572_v62  ;;  %15112 = vmatpush3.bf16.msra.mxu1 %v15658_v0  ;;  %v15671_v59 = vld [vmem:[#allocation16 + $0xa8] sm:$0xff]   ;;  %v15672_v48 = vld [vmem:[#allocation16 + $0x70] sm:$0xff]   ;;  %v15676_v25 = vld [vmem:[#allocation16 + $0x78] sm:$0xff]  }
 0x6e8   : > { %15140 = vmatpush3.bf16.msra.mxu0 %v15659_v55  ;;  %15113 = vmatprep.subr.bf16.mxu1 %v15660_v46  ;;  %v15675_v23 = vld [vmem:[#allocation16 + $0xb0] sm:$0xff]   ;;  %v15677_v57 = vld [vmem:[#allocation16 + $0xf8] sm:$0xff]   ;;  %v15680_v55 = vld [vmem:[#allocation16 + $0x140] sm:$0xff]  }
 0x6e9   : > { %v9556_v44 = vcombine.low %v17549_v45, %v17563_v42  ;;  %v9557_v31 = vcombine.high %v17549_v45, %v17563_v42  ;;  %v9558_v24 = vcombine.low %v17552_v15, %v17566_v10  ;;  %15141 = vmatprep.subr.bf16.mxu0 %v15661_v30  ;;  %v15678_v51 = vld [vmem:[#allocation16 + $0x38] sm:$0xff]   ;;  %v15681_v46 = vld [vmem:[#allocation16 + $0x1c0] sm:$0xff]  }
 0x6ea   : > { %v15679_v0 = vld [vmem:[#allocation16 + $0xb8] sm:$0xff]  }
 0x6eb   : > { %15114 = vmatpush3.bf16.msra.mxu1 %v15662_v33  ;;  %v9570_v34 = vrot.slane %v9556_v44, %v16572_v62  ;;  %v9577_v60 = vrot.slane %v9558_v24, %v16572_v62  ;;  %v19486_v44 = vcombine.high %v17552_v15, %v17566_v10 }
 0x6ec   : > { %15142 = vmatpush3.bf16.msra.mxu0 %v15663_v7  ;;  %15115 = vmatprep.subr.bf16.mxu1 %v15664_v58 }
 0x6ed   : > { %15143 = vmatprep.subr.bf16.mxu0 %v15665_v39 }
 0x6ef   : > { %15116 = vmatpush3.bf16.msra.mxu1 %v15666_v14 }
 0x6f0   : > { %15144 = vmatpush3.bf16.msra.mxu0 %v15667_v11  ;;  %15117 = vmatprep.subr.bf16.mxu1 %v15668_v52 }
 0x6f1   : > { %15145 = vmatprep.subr.bf16.mxu0 %v15669_v5 }
 0x6f3   : > { %15118 = vmatpush3.bf16.msra.mxu1 %v15670_v54  ;;  %v9441_v54 = vrot.slane %v9422_v32, %v16572_v62 }
 0x6f4   : > { %15146 = vmatpush3.bf16.msra.mxu0 %v15671_v59  ;;  %15119 = vmatprep.subr.bf16.mxu1 %v15672_v48 }
 0x6f5   : > { %15147 = vmatprep.subr.bf16.mxu0 %v15673_v49 }
 0x6f7   : > { %15120 = vmatpush3.bf16.msra.mxu1 %v15674_v2 }
 0x6f8   : > { %15148 = vmatpush3.bf16.msra.mxu0 %v15675_v23  ;;  %15121 = vmatprep.subr.bf16.mxu1 %v15676_v25  ;;  %v19485_v25 = vld [vmem:[#allocation32_spill] sm:$0xff] }
 0x6f9   : > { %15149 = vmatprep.subr.bf16.mxu0 %v15677_v57  ;;  %v9434_v57 = vrot.slane %v9420_v16, %v16572_v62 }
 0x6fb   : > { %15122 = vmatpush3.bf16.msra.mxu1 %v15678_v51 }
 0x6fc   : > { %15150 = vmatpush3.bf16.msra.mxu0 %v15679_v0  ;;  %15163 = vmatprep.subr.bf16.mxu1 %v15680_v55  ;;  %v19484_v0 = vld [vmem:[#allocation31_spill] sm:$0xff] }
 0x6fd   : > { %15191 = vmatprep.subr.bf16.mxu0 %v15681_v46  ;;  %v9448_v46 = vrot.slane %v9421_v18, %v16572_v62 }
 0x75b   : > { %v8835_v49 = vpop.f32.mrb[28].mxu1 }
 0x75c   : > { %v9024_v48 = vadd.f32 %v19484_v0, %v8835_v49  ;;  %v8921_v59 = vpop.f32.mrb[32].mxu0  ;;  %v8837_v55 = vpop.f32.mrb[29].mxu1 }
 0x75d   : > { %v9026_v51 = vadd.f32 %v17237_v40, %v8921_v59  ;;  %v9025_v49 = vadd.f32 %v19485_v25, %v8837_v55  ;;  %v8923_v5 = vpop.f32.mrb[33].mxu0  ;;  %v8839_v52 = vpop.f32.mrb[30].mxu1 }
 0x75e   : > { %v9040_v23 = vmax.f32 %v9024_v48, 0.0  ;;  %v9027_v11 = vadd.f32 %v17251_v17, %v8923_v5  ;;  %v9032_v14 = vadd.f32 %v19484_v0, %v8839_v52  ;;  %v8925_v16 = vpop.f32.mrb[34].mxu0  ;;  %v8841_v39 = vpop.f32.mrb[31].mxu1 }
 0x75f   : > { %v9042_v59 = vmax.f32 %v9026_v51, 0.0  ;;  %v9041_v58 = vmax.f32 %v9025_v49, 0.0  ;;  %v9034_v55 = vadd.f32 %v17237_v40, %v8925_v16  ;;  %v9033_v7 = vadd.f32 %v19485_v25, %v8841_v39  ;;  %v8927_v33 = vpop.f32.mrb[35].mxu0 }
 0x760   : > { %v9043_v32 = vmax.f32 %v9027_v11, 0.0  ;;  %v9048_v48 = vmax.f32 %v9032_v14, 0.0  ;;  %v9035_v5 = vadd.f32 %v17251_v17, %v8927_v33  ;;  %v9455_v40 = vrot.slane %v9423_v6, %v16572_v62 }
 0x761   : > { %v9360_v30 = vcombine.low %v9040_v23, %v9041_v58  ;;  %v9361_v52 = vcombine.high %v9040_v23, %v9041_v58  ;;  %v9050_v0 = vmax.f32 %v9034_v55, 0.0  ;;  %v9049_v1 = vmax.f32 %v9033_v7, 0.0 }
 0x762   : > { %v9362_v39 = vcombine.low %v9042_v59, %v9043_v32  ;;  %v9363_v25 = vcombine.high %v9042_v59, %v9043_v32  ;;  %v9051_v51 = vmax.f32 %v9035_v5, 0.0  ;;  %v9584_v16 = vrot.slane %v9557_v31, %v16572_v62 }
 0x763   : > { %v9398_v49 = vrot.slane %v9360_v30, %v16572_v62  ;;  %v9405_v12 = vrot.slane %v9361_v52, %v16572_v62  ;;  %v9496_v47 = vcombine.low %v9048_v48, %v9049_v1  ;;  %v9497_v18 = vcombine.high %v9048_v48, %v9049_v1 }
 0x764   : > { %v9412_v17 = vrot.slane %v9362_v39, %v16572_v62  ;;  %v9419_v33 = vrot.slane %v9363_v25, %v16572_v62  ;;  %v9498_v58 = vcombine.low %v9050_v0, %v9051_v51  ;;  %v9499_v7 = vcombine.high %v9050_v0, %v9051_v51 }
 0x765   : > { %v9534_v6 = vrot.slane %v9496_v47, %v16572_v62  ;;  %v9541_v1 = vrot.slane %v9497_v18, %v16572_v62  ;;  %v9591_v59 = vrot.slane %v19486_v44, %v16572_v62 }
 0x766   : > { %v9424_v30 = vcombine.low %v9398_v49, %v9412_v17  ;;  %v9425_v14 = vcombine.high %v9398_v49, %v9412_v17  ;;  %v9426_v11 = vcombine.low %v9405_v12, %v9419_v33  ;;  %v9427_v23 = vcombine.high %v9405_v12, %v9419_v33 }
 0x767   : > { %v9548_v24 = vrot.slane %v9498_v58, %v16572_v62  ;;  %v9555_v55 = vrot.slane %v9499_v7, %v16572_v62 }
 0x768   : > { %v9462_v32 = vrot.slane %v9424_v30, %v16572_v62  ;;  %v9469_v48 = vrot.slane %v9426_v11, %v16572_v62  ;;  %v9476_v5 = vrot.slane %v9425_v14, %v16572_v62  ;;  %v9483_v52 = vrot.slane %v9427_v23, %v16572_v62 }
 0x769   : > { %v9560_v0 = vcombine.low %v9534_v6, %v9548_v24  ;;  %v9561_v45 = vcombine.high %v9534_v6, %v9548_v24  ;;  %v9562_v42 = vcombine.low %v9541_v1, %v9555_v55  ;;  %v9563_v31 = vcombine.high %v9541_v1, %v9555_v55 }
 0x76a   : > { %v17882_v39 = vcombine.low %v9434_v57, %v9462_v32  ;;  %v17884_v15 = vcombine.high %v9434_v57, %v9462_v32  ;;  %v17886_v10 = vcombine.low %v9441_v54, %v9469_v48  ;;  %v17888_v25 = vcombine.high %v9441_v54, %v9469_v48 }
 0x76b   : > { %v17890_v51 = vcombine.low %v9448_v46, %v9476_v5  ;;  %v17892_v49 = vcombine.high %v9448_v46, %v9476_v5  ;;  %v17894_v12 = vcombine.low %v9455_v40, %v9483_v52  ;;  %v17896_v47 = vcombine.high %v9455_v40, %v9483_v52 }
 0x76c   : > { %v9598_v18 = vrot.slane %v9560_v0, %v16572_v62  ;;  %v9605_v17 = vrot.slane %v9562_v42, %v16572_v62  ;;  %v9612_v33 = vrot.slane %v9561_v45, %v16572_v62  ;;  %v9619_v57 = vrot.slane %v9563_v31, %v16572_v62 }
 0x76d   : > { %19487 = vst [vmem:[#allocation31_spill] sm:$0xff] %v17896_v47  ;;  %v10271_v54 = vrot.slane %v17882_v39, %v16564_v41  ;;  %v10275_v58 = vrot.slane %v17882_v39, %v16567_v43  ;;  %v10303_v46 = vrot.slane %v17890_v51, %v16564_v41  ;;  %v10307_v40 = vrot.slane %v17890_v51, %v16567_v43 }
 0x76e   : > { %v17910_v7 = vcombine.low %v9570_v34, %v9598_v18  ;;  %v17912_v6 = vcombine.high %v9570_v34, %v9598_v18  ;;  %v17914_v1 = vcombine.low %v9577_v60, %v9605_v17  ;;  %v17916_v30 = vcombine.high %v9577_v60, %v9605_v17 }
 0x76f   : > { %v17918_v62 = vcombine.low %v9584_v16, %v9612_v33  ;;  %v17920_v14 = vcombine.high %v9584_v16, %v9612_v33  ;;  %v17922_v11 = vcombine.low %v9591_v59, %v9619_v57  ;;  %v17924_v23 = vcombine.high %v9591_v59, %v9619_v57 }
 0x770   : > { %v10335_v44 = vrot.slane %v17884_v15, %v16564_v41  ;;  %v10339_v24 = vrot.slane %v17884_v15, %v16567_v43  ;;  %v10367_v34 = vrot.slane %v17892_v49, %v16564_v41  ;;  %v10371_v60 = vrot.slane %v17892_v49, %v16567_v43 }
 0x771   : > { %v10399_v16 = vrot.slane %v17886_v10, %v16564_v41  ;;  %v10403_v55 = vrot.slane %v17886_v10, %v16567_v43  ;;  %v10431_v59 = vrot.slane %v17894_v12, %v16564_v41  ;;  %v10435_v32 = vrot.slane %v17894_v12, %v16567_v43 }
 0x772   : > { %v10463_v48 = vrot.slane %v17888_v25, %v16564_v41  ;;  %v10467_v5 = vrot.slane %v17888_v25, %v16567_v43  ;;  %v10495_v52 = vrot.slane %v17896_v47, %v16564_v41  ;;  %v10499_v0 = vrot.slane %v17896_v47, %v16567_v43 }
 0x773   : > { %v19488_v45 = vrot.slane %v17406_v13, %v16564_v41  ;;  %v19489_v31 = vrot.slane %v17406_v13, %v16567_v43  ;;  %v19490_v17 = vrot.slane %v17421_v19, %v16564_v41  ;;  %v19491_v57 = vrot.slane %v17421_v19, %v16567_v43 }
 0x775   : > { %v10908_v42 = vsel %vm994_vm2, %v19488_v45, %v10271_v54  ;;  %v10909_v18 = vsel %vm994_vm2, %v19489_v31, %v10275_v58  ;;  %v10916_v33 = vsel %vm994_vm2, %v19490_v17, %v10303_v46  ;;  %v10917_v9 = vsel %vm994_vm2, %v19491_v57, %v10307_v40 }
 0x776   : > { %v10924_v54 = vsel %vm994_vm2, %v19492_v56, %v10335_v44  ;;  %v19493_v45 = vrot.slane %v17409_v28, %v16567_v43  ;;  %v19494_v31 = vrot.slane %v17424_v4, %v16564_v41  ;;  %v19495_v17 = vrot.slane %v17424_v4, %v16567_v43 }
 0x777   : > { %v19496_v57 = vrot.slane %v17412_v53, %v16564_v41  ;;  %v19497_v44 = vrot.slane %v17412_v53, %v16567_v43  ;;  %v11198_v3 = vcombine.low %v10916_v33, %v10917_v9 }
 0x778   : > { %v10925_v58 = vsel %vm994_vm2, %v19493_v45, %v10339_v24  ;;  %v10932_v46 = vsel %vm994_vm2, %v19494_v31, %v10367_v34  ;;  %v10933_v40 = vsel %vm994_vm2, %v19495_v17, %v10371_v60  ;;  %v19498_v45 = vrot.slane %v17427_v36, %v16564_v41 }
 0x779   : > { %v10940_v56 = vsel %vm994_vm2, %v19496_v57, %v10399_v16  ;;  %v10941_v24 = vsel %vm994_vm2, %v19497_v44, %v10403_v55  ;;  %v19499_v31 = vrot.slane %v17427_v36, %v16567_v43  ;;  %v19500_v17 = vrot.slane %v17415_v29, %v16564_v41 }
 0x77a   : > { %v10948_v34 = vsel %vm994_vm2, %v19498_v45, %v10431_v59  ;;  %v19501_v57 = vrot.slane %v17415_v29, %v16567_v43  ;;  %v19502_v44 = vrot.slane %v17430_v26, %v16564_v41  ;;  %v19503_v45 = vrot.slane %v17430_v26, %v16567_v43 }
 0x77b   : > { %v10949_v60 = vsel %vm994_vm2, %v19499_v31, %v10435_v32  ;;  %v10956_v16 = vsel %vm994_vm2, %v19500_v17, %v10463_v48  ;;  %v11164_v31 = vcombine.low %v10908_v42, %v10909_v18  ;;  %v11232_v61 = vcombine.low %v10924_v54, %v10925_v58 }
 0x77c   : > { %v10957_v55 = vsel %vm994_vm2, %v19501_v57, %v10467_v5  ;;  %v10964_v59 = vsel %vm994_vm2, %v19502_v44, %v10495_v52  ;;  %v10965_v32 = vsel %vm994_vm2, %v19503_v45, %v10499_v0  ;;  %v11266_v22 = vcombine.low %v10932_v46, %v10933_v40 }
 0x77d   : > { %v11300_v48 = vcombine.low %v10940_v56, %v10941_v24  ;;  %v11334_v17 = vcombine.low %v10948_v34, %v10949_v60  ;;  %v11368_v50 = vcombine.low %v10956_v16, %v10957_v55  ;;  %v11402_v21 = vcombine.low %v10964_v59, %v10965_v32 }
 0x77e   : > { %v11172_v5 = vrot.slane %v11164_v31, %v19504_v38  ;;  %v11206_v57 = vrot.slane %v11198_v3, %v19504_v38  ;;  %v11240_v63 = vrot.slane %v11232_v61, %v19504_v38  ;;  %v11274_v52 = vrot.slane %v11266_v22, %v19504_v38 }
 0x77f   : > { %v11308_v44 = vrot.slane %v11300_v48, %v19504_v38  ;;  %v11342_v0 = vrot.slane %v11334_v17, %v19504_v38  ;;  %v11376_v9 = vrot.slane %v11368_v50, %v19504_v38  ;;  %v11410_v42 = vrot.slane %v11402_v21, %v19504_v38 }
 0x780   : > { %v14911_v18 = vcombine.low %v11172_v5, %v11206_v57  ;;  %v14913_v33 = vcombine.low %v11240_v63, %v11274_v52  ;;  %v10279_v54 = vrot.slane %v17882_v39, %v16650_v37  ;;  %v10283_v22 = vrot.slane %v17882_v39, %v16653_v35 }
 0x781   : > { %v14919_v58 = vcombine.low %v11308_v44, %v11342_v0  ;;  %v14921_v61 = vcombine.low %v11376_v9, %v11410_v42  ;;  %v10311_v46 = vrot.slane %v17890_v51, %v16650_v37  ;;  %v10315_v63 = vrot.slane %v17890_v51, %v16653_v35 }
 0x782   : > { %v11718_v50 = vrot.slane %v14911_v18, %v19504_v38  ;;  %v11732_v21 = vrot.slane %v14913_v33, %v19504_v38  ;;  %v10343_v40 = vrot.slane %v17884_v15, %v16650_v37  ;;  %v10347_v34 = vrot.slane %v17884_v15, %v16653_v35 }
 0x783   : > { %v11790_v56 = vrot.slane %v14919_v58, %v19504_v38  ;;  %v11804_v24 = vrot.slane %v14921_v61, %v19504_v38  ;;  %v10375_v60 = vrot.slane %v17892_v49, %v16650_v37  ;;  %v10379_v55 = vrot.slane %v17892_v49, %v16653_v35 }
 0x784   : > { %v18042_v16 = vcombine.high %v11718_v50, %v11732_v21  ;;  %v10407_v59 = vrot.slane %v17886_v10, %v16650_v37  ;;  %v10411_v45 = vrot.slane %v17886_v10, %v16653_v35  ;;  %v10439_v31 = vrot.slane %v17894_v12, %v16650_v37 }
 0x785   : > { %v18050_v32 = vcombine.high %v11790_v56, %v11804_v24  ;;  %v10443_v48 = vrot.slane %v17894_v12, %v16653_v35  ;;  %v10471_v17 = vrot.slane %v17888_v25, %v16650_v37  ;;  %v10475_v57 = vrot.slane %v17888_v25, %v16653_v35 }
 0x786   : > { %19505 = vst [vmem:[#allocation32_spill] sm:$0xff] %v18042_v16  ;;  %v10503_v52 = vrot.slane %v17896_v47, %v16650_v37  ;;  %v10507_v44 = vrot.slane %v17896_v47, %v16653_v35  ;;  %v19507_v9 = vrot.slane %v17406_v13, %v16650_v37  ;;  %v19508_v18 = vrot.slane %v17406_v13, %v16653_v35 }
 0x787   : > { %19506 = vst [vmem:[#allocation26_spill] sm:$0xff] %v18050_v32  ;;  %v12029_v0 = vpack.c.bf16 %v18050_v32, %v18042_v16  ;;  %v19509_v58 = vrot.slane %v17421_v19, %v16650_v37  ;;  %v19510_v5 = vrot.slane %v17421_v19, %v16653_v35  ;;  %v19511_v16 = vrot.slane %v17409_v28, %v16650_v37  ;;  %v15692_v19 = vld [vmem:[#allocation16 + $0x158] sm:$0xff]  }
 0x788   : > { %v10910_v42 = vsel %vm994_vm2, %v19507_v9, %v10279_v54  ;;  %v10911_v33 = vsel %vm994_vm2, %v19508_v18, %v10283_v22  ;;  %v19512_v9 = vrot.slane %v17409_v28, %v16653_v35  ;;  %v19513_v18 = vrot.slane %v17424_v4, %v16650_v37 }
 0x789   : > { %v10918_v61 = vsel %vm994_vm2, %v19509_v58, %v10311_v46  ;;  %v10919_v3 = vsel %vm994_vm2, %v19510_v5, %v10315_v63  ;;  %v10926_v54 = vsel %vm994_vm2, %v19511_v16, %v10343_v40  ;;  %12700 = vmatprep.mubr.bf16.mxu1 %v12029_v0  ;;  %v19514_v58 = vrot.slane %v17424_v4, %v16653_v35 }
 0x78a   : > { %v10927_v22 = vsel %vm994_vm2, %v19512_v9, %v10347_v34  ;;  %v10934_v46 = vsel %vm994_vm2, %v19513_v18, %v10375_v60  ;;  %v19515_v5 = vrot.slane %v17412_v53, %v16650_v37  ;;  %v19516_v16 = vrot.slane %v17412_v53, %v16653_v35 }
 0x78b   : > { %v10935_v63 = vsel %vm994_vm2, %v19514_v58, %v10379_v55  ;;  %v19517_v9 = vrot.slane %v17427_v36, %v16650_v37  ;;  %v19518_v0 = vrot.slane %v17427_v36, %v16653_v35  ;;  %v19519_v18 = vrot.slane %v17415_v29, %v16650_v37 }
 0x78c   : > { %v10942_v40 = vsel %vm994_vm2, %v19515_v5, %v10407_v59  ;;  %v10943_v34 = vsel %vm994_vm2, %v19516_v16, %v10411_v45  ;;  %v19520_v58 = vrot.slane %v17415_v29, %v16653_v35  ;;  %v19521_v5 = vrot.slane %v17430_v26, %v16650_v37 }
 0x78d   : > { %v10950_v60 = vsel %vm994_vm2, %v19517_v9, %v10439_v31  ;;  %v10951_v55 = vsel %vm994_vm2, %v19518_v0, %v10443_v48  ;;  %v10958_v59 = vsel %vm994_vm2, %v19519_v18, %v10471_v17  ;;  %v19522_v16 = vrot.slane %v17430_v26, %v16653_v35 }
 0x78e   : > { %v10959_v45 = vsel %vm994_vm2, %v19520_v58, %v10475_v57  ;;  %v10966_v31 = vsel %vm994_vm2, %v19521_v5, %v10503_v52  ;;  %v11165_v9 = vcombine.low %v10910_v42, %v10911_v33  ;;  %v11199_v0 = vcombine.low %v10918_v61, %v10919_v3 }
 0x78f   : > { %v10967_v48 = vsel %vm994_vm2, %v19522_v16, %v10507_v44  ;;  %v11233_v2 = vcombine.low %v10926_v54, %v10927_v22  ;;  %v11267_v36 = vcombine.low %v10934_v46, %v10935_v63  ;;  %v11301_v17 = vcombine.low %v10942_v40, %v10943_v34  ;;  %v15682_v63 = vld [vmem:[#allocation16 + $0x100] sm:$0xff]  }
 0x790   : > { %v11335_v18 = vcombine.low %v10950_v60, %v10951_v55  ;;  %v11369_v53 = vcombine.low %v10958_v59, %v10959_v45  ;;  %v11179_v29 = vrot.slane %v11165_v9, %v19504_v38  ;;  %v11213_v57 = vrot.slane %v11199_v0, %v19504_v38  ;;  %v15686_v0 = vld [vmem:[#allocation16 + $0x108] sm:$0xff]  }
 0x791   : > { %v11247_v58 = vrot.slane %v11233_v2, %v19504_v38  ;;  %v11403_v4 = vcombine.low %v10966_v31, %v10967_v48  ;;  %v11281_v52 = vrot.slane %v11267_v36, %v19504_v38  ;;  %v11315_v5 = vrot.slane %v11301_v17, %v19504_v38 }
 0x792   : > { %v11349_v44 = vrot.slane %v11335_v18, %v19504_v38  ;;  %v11383_v3 = vrot.slane %v11369_v53, %v19504_v38  ;;  %v14912_v33 = vcombine.low %v11179_v29, %v11213_v57  ;;  %v18139_v61 = vcombine.low %v11718_v50, %v11732_v21 }
 0x793   : > { %v11417_v42 = vrot.slane %v11403_v4, %v19504_v38  ;;  %v18141_v54 = vcombine.low %v11790_v56, %v11804_v24  ;;  %v14914_v46 = vcombine.low %v11247_v58, %v11281_v52  ;;  %v10527_v36 = vrot.slane %v17910_v7, %v16564_v41  ;;  %v15684_v4 = vld [vmem:[#allocation16 + $0x148] sm:$0xff]   ;;  %v19533_v24 = vld [vmem:[#allocation41_spill] sm:$0xff] }
 0x794   : > { %19523 = vst [vmem:[#allocation48_spill] sm:$0xff] %v18139_v61  ;;  %v14920_v2 = vcombine.low %v11315_v5, %v11349_v44  ;;  %v11725_v40 = vrot.slane %v14912_v33, %v19504_v38  ;;  %v10531_v29 = vrot.slane %v17910_v7, %v16567_v43  ;;  %v10559_v55 = vrot.slane %v17918_v62, %v16564_v41 }
 0x795   : > { %19524 = vst [vmem:[#allocation49_spill] sm:$0xff] %v18141_v54  ;;  %v14922_v34 = vcombine.low %v11383_v3, %v11417_v42  ;;  %v12028_v53 = vpack.c.bf16 %v18141_v54, %v18139_v61  ;;  %v11739_v50 = vrot.slane %v14914_v46, %v19504_v38  ;;  %v10563_v59 = vrot.slane %v17918_v62, %v16567_v43  ;;  %v19539_v61 = vld [vmem:[#allocation42_spill] sm:$0xff] }
 0x796   : > { %v11797_v21 = vrot.slane %v14920_v2, %v19504_v38  ;;  %v10591_v45 = vrot.slane %v17912_v6, %v16564_v41  ;;  %v10595_v48 = vrot.slane %v17912_v6, %v16567_v43  ;;  %v10623_v9 = vrot.slane %v17920_v14, %v16564_v41  ;;  %v15683_v2 = vld [vmem:[#allocation16 + $0x180] sm:$0xff]  }
 0x797   : > { %v11811_v60 = vrot.slane %v14922_v34, %v19504_v38  ;;  %12701 = vmatmul.mubr.bf16.vlgmr.msra.gmra.mrb[32].mxu1 %v12028_v53  ;;  %v18162_v31 = vcombine.high %v11725_v40, %v11739_v50  ;;  %v18164_v16 = vcombine.low %v11725_v40, %v11739_v50  ;;  %v10627_v57 = vrot.slane %v17920_v14, %v16567_v43  ;;  %v15685_v50 = vld [vmem:[#allocation16 + $0x1c8] sm:$0xff]  }
 0x798   : > { %15164 = vmatpush3.bf16.msra.mxu1 %v15682_v63  ;;  %v10655_v58 = vrot.slane %v17914_v1, %v16564_v41  ;;  %v10659_v44 = vrot.slane %v17914_v1, %v16567_v43  ;;  %v10687_v3 = vrot.slane %v17922_v11, %v16564_v41  ;;  %v10691_v63 = vrot.slane %v17922_v11, %v16567_v43 }
 0x799   : > { %19525 = vst [vmem:[#allocation50_spill] sm:$0xff] %v18162_v31  ;;  %19526 = vst [vmem:[#allocation51_spill] sm:$0xff] %v18164_v16  ;;  %v18170_v17 = vcombine.high %v11797_v21, %v11811_v60  ;;  %v18172_v18 = vcombine.low %v11797_v21, %v11811_v60  ;;  %15165 = vmatprep.subr.bf16.mxu1 %v15684_v4  ;;  %v10719_v40 = vrot.slane %v17916_v30, %v16564_v41 }
 0x79a   : > { %v10723_v34 = vrot.slane %v17916_v30, %v16567_v43  ;;  %v10751_v53 = vrot.slane %v17924_v23, %v16564_v41  ;;  %v10755_v4 = vrot.slane %v17924_v23, %v16567_v43  ;;  %v19529_v21 = vrot.slane %v17447_v20, %v16564_v41 }
 0x79b   : > { %19527 = vst [vmem:[#allocation52_spill] sm:$0xff] %v18170_v17  ;;  %19528 = vst [vmem:[#allocation53_spill] sm:$0xff] %v18172_v18  ;;  %v12031_v42 = vpack.c.bf16 %v18170_v17, %v18162_v31  ;;  %v12030_v46 = vpack.c.bf16 %v18172_v18, %v18164_v16  ;;  %v19530_v5 = vrot.slane %v17447_v20, %v16567_v43  ;;  %v19536_v16 = vld [vmem:[#allocation44_spill] sm:$0xff]  ;;  %v19542_v31 = vld [vmem:[#allocation45_spill] sm:$0xff] }
 0x79c   : > { %15166 = vmatpush3.bf16.msra.mxu1 %v15686_v0  ;;  %v10972_v60 = vsel %vm994_vm2, %v19529_v21, %v10527_v36  ;;  %v19531_v52 = vrot.slane %v17462_v27, %v16564_v41  ;;  %v19532_v22 = vrot.slane %v17462_v27, %v16567_v43  ;;  %v19534_v36 = vrot.slane %v19533_v24, %v16564_v41  ;;  %v19545_v17 = vld [vmem:[#allocation43_spill] sm:$0xff] }
 0x79d   : > { %12749 = vmatprep.mubr.bf16.mxu0 %v12031_v42  ;;  %v10973_v56 = vsel %vm994_vm2, %v19530_v5, %v10531_v29  ;;  %v15688_v42 = vld [vmem:[#allocation16 + $0x150] sm:$0xff]   ;;  %v19535_v29 = vrot.slane %v19533_v24, %v16567_v43  ;;  %v19546_v32 = vrot.slane %v19545_v17, %v16564_v41 }
 0x79e   : > { %v10980_v33 = vsel %vm994_vm2, %v19531_v52, %v10559_v55  ;;  %v10981_v0 = vsel %vm994_vm2, %v19532_v22, %v10563_v59  ;;  %12750 = vmatmul.mubr.bf16.vlgmr.msra.gmra.mrb[36].mxu0 %v12030_v46  ;;  %v10988_v21 = vsel %vm994_vm2, %v19534_v36, %v10591_v45  ;;  %v19537_v55 = vrot.slane %v19536_v16, %v16564_v41  ;;  %v15690_v46 = vld [vmem:[#allocation16 + $0x110] sm:$0xff]  }
 0x79f   : > { %v10989_v5 = vsel %vm994_vm2, %v19535_v29, %v10595_v48  ;;  %v19538_v22 = vrot.slane %v19536_v16, %v16567_v43  ;;  %15192 = vmatpush3.bf16.msra.mxu0 %v15683_v2  ;;  %v19540_v45 = vrot.slane %v19539_v61, %v16564_v41  ;;  %v19541_v48 = vrot.slane %v19539_v61, %v16567_v43 }
 0x7a0   : > { %v10996_v52 = vsel %vm994_vm2, %v19537_v55, %v10623_v9  ;;  %v19543_v9 = vrot.slane %v19542_v31, %v16564_v41  ;;  %15193 = vmatprep.subr.bf16.mxu0 %v15685_v50  ;;  %v11436_v26 = vcombine.low %v10972_v60, %v10973_v56  ;;  %v11470_v28 = vcombine.low %v10980_v33, %v10981_v0  ;;  %v15691_v56 = vld [vmem:[#allocation16 + $0x190] sm:$0xff]  }
 0x7a1   : > { %v10997_v59 = vsel %vm994_vm2, %v19538_v22, %v10627_v57  ;;  %v11004_v36 = vsel %vm994_vm2, %v19540_v45, %v10655_v58  ;;  %v11005_v29 = vsel %vm994_vm2, %v19541_v48, %v10659_v44  ;;  %v19544_v57 = vrot.slane %v19542_v31, %v16567_v43  ;;  %v15687_v22 = vld [vmem:[#allocation16 + $0x188] sm:$0xff]   ;;  %15167 = vmatprep.subr.bf16.mxu1 %v15688_v42 }
 0x7a2   : > { %v11012_v55 = vsel %vm994_vm2, %v19543_v9, %v10687_v3  ;;  %v11020_v58 = vsel %vm994_vm2, %v19546_v32, %v10719_v40  ;;  %v19547_v45 = vrot.slane %v19545_v17, %v16567_v43  ;;  %v19548_v48 = vrot.slane %v17471_v8, %v16564_v41  ;;  %15168 = vmatpush3.bf16.msra.mxu1 %v15690_v46  ;;  %v15694_v41 = vld [vmem:[#allocation16 + $0x118] sm:$0xff]  }
 0x7a3   : > { %v11013_v2 = vsel %vm994_vm2, %v19544_v57, %v10691_v63  ;;  %v19549_v9 = vrot.slane %v17471_v8, %v16567_v43  ;;  %v15689_v57 = vld [vmem:[#allocation16 + $0x1d0] sm:$0xff]   ;;  %v11504_v32 = vcombine.low %v10988_v21, %v10989_v5  ;;  %v11538_v40 = vcombine.low %v10996_v52, %v10997_v59  ;;  %15194 = vmatpush3.bf16.msra.mxu0 %v15687_v22  ;;  %v15693_v21 = vld [vmem:[#allocation16 + $0x1d8] sm:$0xff]   ;;  %v15696_v59 = vld [vmem:[#allocation16 + $0x160] sm:$0xff]  }
 0x7a4   : > { %v11021_v44 = vsel %vm994_vm2, %v19547_v45, %v10723_v34  ;;  %v11028_v3 = vsel %vm994_vm2, %v19548_v48, %v10751_v53  ;;  %v11572_v13 = vcombine.low %v11004_v36, %v11005_v29  ;;  %v11606_v34 = vcombine.low %v11012_v55, %v11013_v2  ;;  %15195 = vmatprep.subr.bf16.mxu0 %v15689_v57  ;;  %v15697_v57 = vld [vmem:[#allocation16 + $0x1e0] sm:$0xff]  }
 0x7a5   : > { %v11029_v63 = vsel %vm994_vm2, %v19549_v9, %v10755_v4  ;;  %v11640_v45 = vcombine.low %v11020_v58, %v11021_v44  ;;  %v11444_v53 = vrot.slane %v11436_v26, %v19504_v38  ;;  %v11478_v43 = vrot.slane %v11470_v28, %v19504_v38  ;;  %15169 = vmatprep.subr.bf16.mxu1 %v15692_v19  ;;  %v15695_v58 = vld [vmem:[#allocation16 + $0x198] sm:$0xff]   ;;  %v15700_v44 = vld [vmem:[#allocation16 + $0x168] sm:$0xff]  }
 0x7a6   : > { %v11674_v47 = vcombine.low %v11028_v3, %v11029_v63  ;;  %v11512_v4 = vrot.slane %v11504_v32, %v19504_v38  ;;  %v11546_v50 = vrot.slane %v11538_v40, %v19504_v38  ;;  %v11580_v33 = vrot.slane %v11572_v13, %v19504_v38  ;;  %15170 = vmatpush3.bf16.msra.mxu1 %v15694_v41 }
 0x7a7   : > { %v11614_v60 = vrot.slane %v11606_v34, %v19504_v38  ;;  %v11648_v0 = vrot.slane %v11640_v45, %v19504_v38  ;;  %v14927_v5 = vcombine.low %v11444_v53, %v11478_v43  ;;  %v10535_v52 = vrot.slane %v17910_v7, %v16650_v37  ;;  %15196 = vmatpush3.bf16.msra.mxu0 %v15691_v56 }
 0x7a8   : > { %v11682_v42 = vrot.slane %v11674_v47, %v19504_v38  ;;  %v14929_v28 = vcombine.low %v11512_v4, %v11546_v50  ;;  %v10539_v13 = vrot.slane %v17910_v7, %v16653_v35  ;;  %v10567_v29 = vrot.slane %v17918_v62, %v16650_v37  ;;  %v15698_v47 = vld [vmem:[#allocation16 + $0x120] sm:$0xff]   ;;  %15197 = vmatprep.subr.bf16.mxu0 %v15693_v21 }
 0x7a9   : > { %v14935_v46 = vcombine.low %v11580_v33, %v11614_v60  ;;  %v18279_v55 = vrot.slane %v14927_v5, %v19504_v38  ;;  %v10571_v19 = vrot.slane %v17918_v62, %v16653_v35  ;;  %v10599_v22 = vrot.slane %v17912_v6, %v16650_v37  ;;  %15171 = vmatprep.subr.bf16.mxu1 %v15696_v59 }
 0x7aa   : > { %v14937_v36 = vcombine.low %v11648_v0, %v11682_v42  ;;  %v18282_v2 = vrot.slane %v14929_v28, %v19504_v38  ;;  %v10603_v9 = vrot.slane %v17912_v6, %v16653_v35  ;;  %v10631_v63 = vrot.slane %v17920_v14, %v16650_v37  ;;  %15172 = vmatpush3.bf16.msra.mxu1 %v15698_v47  ;;  %v15699_v0 = vld [vmem:[#allocation16 + $0x1a0] sm:$0xff]   ;;  %v15701_v47 = vld [vmem:[#allocation16 + $0x1e8] sm:$0xff]  }
 0x7ab   : > { %v18289_v48 = vrot.slane %v14935_v46, %v19504_v38  ;;  %v10635_v40 = vrot.slane %v17920_v14, %v16653_v35  ;;  %v10663_v34 = vrot.slane %v17914_v1, %v16650_v37  ;;  %v10667_v45 = vrot.slane %v17914_v1, %v16653_v35  ;;  %15198 = vmatpush3.bf16.msra.mxu0 %v15695_v58 }
 0x7ac   : > { %v18292_v3 = vrot.slane %v14937_v36, %v19504_v38  ;;  %v18300_v32 = vcombine.high %v18279_v55, %v18282_v2  ;;  %v10695_v53 = vrot.slane %v17922_v11, %v16650_v37  ;;  %v10699_v43 = vrot.slane %v17922_v11, %v16653_v35  ;;  %15173 = vmatprep.subr.bf16.mxu1 %v15700_v44 }
 0x7ad   : > { %v10727_v4 = vrot.slane %v17916_v30, %v16650_v37  ;;  %v10731_v56 = vrot.slane %v17916_v30, %v16653_v35  ;;  %v10759_v33 = vrot.slane %v17924_v23, %v16650_v37  ;;  %v10763_v60 = vrot.slane %v17924_v23, %v16653_v35  ;;  %15199 = vmatprep.subr.bf16.mxu0 %v15697_v57 }
 0x7ae   : > { %19550 = vst [vmem:[#allocation41_spill] sm:$0xff] %v18300_v32  ;;  %v18310_v41 = vcombine.high %v18289_v48, %v18292_v3  ;;  %v19552_v21 = vrot.slane %v17447_v20, %v16650_v37  ;;  %v19553_v28 = vrot.slane %v17447_v20, %v16653_v35  ;;  %v19554_v46 = vrot.slane %v17462_v27, %v16650_v37 }
 0x7af   : > { %v19555_v58 = vrot.slane %v17462_v27, %v16653_v35  ;;  %v19563_v50 = vrot.slane %v19542_v31, %v16653_v35  ;;  %15200 = vmatpush3.bf16.msra.mxu0 %v15699_v0 }
 0x7b0   : > { %19551 = vst [vmem:[#allocation44_spill] sm:$0xff] %v18310_v41  ;;  %v12037_v42 = vpack.c.bf16 %v18310_v41, %v18300_v32  ;;  %v10974_v5 = vsel %vm994_vm2, %v19552_v21, %v10535_v52  ;;  %v10975_v59 = vsel %vm994_vm2, %v19553_v28, %v10539_v13  ;;  %v10982_v36 = vsel %vm994_vm2, %v19554_v46, %v10567_v29  ;;  %v15702_v46 = vld [vmem:[#allocation16 + $0x128] sm:$0xff]  }
 0x7b1   : > { %v10983_v44 = vsel %vm994_vm2, %v19555_v58, %v10571_v19  ;;  %v19556_v52 = vrot.slane %v19533_v24, %v16650_v37  ;;  %v19557_v13 = vrot.slane %v19533_v24, %v16653_v35  ;;  %v19558_v29 = vrot.slane %v19536_v16, %v16650_v37  ;;  %15201 = vmatprep.subr.bf16.mxu0 %v15701_v47 }
 0x7b2   : > { %12708 = vmatprep.mubr.bf16.mxu1 %v12037_v42  ;;  %v19559_v19 = vrot.slane %v19536_v16, %v16653_v35  ;;  %v11437_v26 = vcombine.low %v10974_v5, %v10975_v59  ;;  %v11471_v32 = vcombine.low %v10982_v36, %v10983_v44  ;;  %15174 = vmatpush3.bf16.msra.mxu1 %v15702_v46  ;;  %v15707_v44 = vld [vmem:[#allocation16 + $0x1b0] sm:$0xff]  }
 0x7b3   : > { %v10990_v21 = vsel %vm994_vm2, %v19556_v52, %v10599_v22  ;;  %v10991_v28 = vsel %vm994_vm2, %v19557_v13, %v10603_v9  ;;  %v10998_v57 = vsel %vm994_vm2, %v19558_v29, %v10631_v63  ;;  %v19560_v22 = vrot.slane %v19539_v61, %v16650_v37  ;;  %v15704_v29 = vld [vmem:[#allocation16 + $0x170] sm:$0xff]  }
 0x7b4   : > { %v10999_v58 = vsel %vm994_vm2, %v19559_v19, %v10635_v40  ;;  %v19561_v9 = vrot.slane %v19539_v61, %v16653_v35  ;;  %v19562_v63 = vrot.slane %v19542_v31, %v16650_v37  ;;  %v11015_v40 = vsel %vm994_vm2, %v19563_v50, %v10699_v43  ;;  %15175 = vmatprep.subr.bf16.mxu1 %v15704_v29  ;;  %v19570_v46 = vld [vmem:[#allocation27_spill] sm:$0xff] }
 0x7b5   : > { %v11006_v52 = vsel %vm994_vm2, %v19560_v22, %v10663_v34  ;;  %v19564_v19 = vrot.slane %v19545_v17, %v16650_v37  ;;  %v19565_v22 = vrot.slane %v19545_v17, %v16653_v35  ;;  %v19567_v43 = vrot.slane %v17471_v8, %v16653_v35 }
 0x7b6   : > { %v11007_v13 = vsel %vm994_vm2, %v19561_v9, %v10667_v45  ;;  %v11014_v42 = vsel %vm994_vm2, %v19562_v63, %v10695_v53  ;;  %v19566_v9 = vrot.slane %v17471_v8, %v16650_v37  ;;  %v15703_v63 = vld [vmem:[#allocation16 + $0x1a8] sm:$0xff]   ;;  %v11539_v17 = vcombine.low %v10998_v57, %v10999_v58  ;;  %v15706_v37 = vld [vmem:[#allocation16 + $0x130] sm:$0xff]  }
 0x7b7   : > { %v11022_v34 = vsel %vm994_vm2, %v19564_v19, %v10727_v4  ;;  %v11023_v45 = vsel %vm994_vm2, %v19565_v22, %v10731_v56  ;;  %v11031_v50 = vsel %vm994_vm2, %v19567_v43, %v10763_v60  ;;  %v11505_v4 = vcombine.low %v10990_v21, %v10991_v28  ;;  %v15705_v19 = vld [vmem:[#allocation16 + $0x1f0] sm:$0xff]   ;;  %v15708_v60 = vld [vmem:[#allocation16 + $0x178] sm:$0xff]   ;;  %15202 = vmatpush3.bf16.msra.mxu0 %v15703_v63 }
 0x7b8   : > { %v11030_v53 = vsel %vm994_vm2, %v19566_v9, %v10759_v33  ;;  %v11573_v31 = vcombine.low %v11006_v52, %v11007_v13  ;;  %v11607_v56 = vcombine.low %v11014_v42, %v11015_v40  ;;  %v11641_v22 = vcombine.low %v11022_v34, %v11023_v45  ;;  %15203 = vmatprep.subr.bf16.mxu0 %v15705_v19  ;;  %v15709_v52 = vld [vmem:[#allocation16 + $0x1f8] sm:$0xff]  }
 0x7b9   : > { %v11451_v33 = vrot.slane %v11437_v26, %v19504_v38  ;;  %v11485_v0 = vrot.slane %v11471_v32, %v19504_v38  ;;  %v11519_v9 = vrot.slane %v11505_v4, %v19504_v38  ;;  %v11675_v35 = vcombine.low %v11030_v53, %v11031_v50  ;;  %15176 = vmatpush3.bf16.msra.mxu1 %v15706_v37  ;;  %v19571_v34 = vld [vmem:[#allocation29_spill] sm:$0xff] }
 0x7ba   : > { %v11553_v5 = vrot.slane %v11539_v17, %v19504_v38  ;;  %v11587_v59 = vrot.slane %v11573_v31, %v19504_v38  ;;  %v11621_v36 = vrot.slane %v11607_v56, %v19504_v38  ;;  %v11655_v47 = vrot.slane %v11641_v22, %v19504_v38  ;;  %15177 = vmatprep.subr.bf16.mxu1 %v15708_v60  ;;  %v15711_v53 = vld [vmem:[#allocation16 + $0x1b8] sm:$0xff]  }
 0x7bb   : > { %v11689_v21 = vrot.slane %v11675_v35, %v19504_v38  ;;  %v14928_v26 = vcombine.low %v11451_v33, %v11485_v0  ;;  %v18401_v32 = vcombine.low %v18279_v55, %v18282_v2  ;;  %v18405_v28 = vcombine.low %v18289_v48, %v18292_v3  ;;  %v15710_v48 = vld [vmem:[#allocation16 + $0x138] sm:$0xff]   ;;  %15204 = vmatpush3.bf16.msra.mxu0 %v15707_v44 }
 0x7bc   : > { %v14930_v17 = vcombine.low %v11519_v9, %v11553_v5  ;;  %v14936_v57 = vcombine.low %v11587_v59, %v11621_v36  ;;  %v10287_v58 = vrot.slane %v17882_v39, %v19570_v46  ;;  %v10291_v45 = vrot.slane %v17882_v39, %v19571_v34  ;;  %v15712_v63 = vld [vmem:[%s19322_s11 + $0x40] sm:$0xff]   ;;  %15205 = vmatprep.subr.bf16.mxu0 %v15709_v52  ;;  %v19586_v36 = vld [vmem:[#allocation34_spill] sm:$0xff] }
 0x7bd   : > { %19568 = vst [vmem:[#allocation42_spill] sm:$0xff] %v18401_v32  ;;  %19569 = vst [vmem:[#allocation54_spill] sm:$0xff] %v18405_v28  ;;  %v11869_v13 = vrot.slane %v14928_v26, %v19504_v38  ;;  %v14938_v42 = vcombine.low %v11655_v47, %v11689_v21  ;;  %v12036_v55 = vpack.c.bf16 %v18405_v28, %v18401_v32  ;;  %v19387_v2 = vrot.slane %v18401_v32, 1  ;;  %v15713_v22 = vld [vmem:[%s19322_s11 + $0xc0] sm:$0xff]  }
 0x7be   : > { %v11883_v3 = vrot.slane %v14930_v17, %v19504_v38  ;;  %v11941_v29 = vrot.slane %v14936_v57, %v19504_v38  ;;  %v19572_v50 = vrot.slane %v18141_v54, 1  ;;  %v10319_v19 = vrot.slane %v17890_v51, %v19570_v46  ;;  %15178 = vmatpush3.bf16.msra.mxu1 %v15710_v48 }
 0x7bf   : > { %v11955_v43 = vrot.slane %v14938_v42, %v19504_v38  ;;  %12709 = vmatmul.mubr.bf16.gmra.mrb[36].mxu1 %v12036_v55  ;;  %v10323_v56 = vrot.slane %v17890_v51, %v19571_v34  ;;  %v10351_v0 = vrot.slane %v17884_v15, %v19570_v46  ;;  %v10355_v9 = vrot.slane %v17884_v15, %v19571_v34 }
 0x7c0   : > { %v18428_v4 = vsel %vm1069_vm3, %v19572_v50, %v19387_v2  ;;  %v18437_v37 = vcombine.high %v11869_v13, %v11883_v3  ;;  %v18439_v33 = vcombine.low %v11869_v13, %v11883_v3  ;;  %v10383_v5 = vrot.slane %v17892_v49, %v19570_v46  ;;  %15206 = vmatpush3.bf16.msra.mxu0 %v15711_v53  ;;  %v19583_v2 = vld [vmem:[#allocation37_spill] sm:$0xff] }
 0x7c1   : > { %19573 = vst [vmem:[#allocation27_spill] sm:$0xff] %v18428_v4  ;;  %v18445_v35 = vcombine.high %v11941_v29, %v11955_v43  ;;  %v18447_v60 = vcombine.low %v11941_v29, %v11955_v43  ;;  %v10387_v59 = vrot.slane %v17892_v49, %v19571_v34  ;;  %v10415_v44 = vrot.slane %v17886_v10, %v19570_v46  ;;  %v19579_v29 = vld [vmem:[#allocation31_spill] sm:$0xff]  ;;  %v19580_v43 = vld [vmem:[#allocation33_spill] sm:$0xff] }
 0x7c2   : > { %19574 = vst [vmem:[#allocation29_spill] sm:$0xff] %v18437_v37  ;;  %19575 = vst [vmem:[#allocation55_spill] sm:$0xff] %v18439_v33  ;;  %v19386_v47 = vrot.slane %v18439_v33, 1  ;;  %v10419_v21 = vrot.slane %v17886_v10, %v19571_v34  ;;  %15219 = vmatprep.subr.bf16.mxu1 %v15712_v63  ;;  %v10447_v52 = vrot.slane %v17894_v12, %v19570_v46  ;;  %15247 = vmatprep.subr.bf16.mxu0 %v15713_v22 }
 0x7c3   : > { %19576 = vst [vmem:[#allocation56_spill] sm:$0xff] %v18445_v35  ;;  %v12039_v26 = vpack.c.bf16 %v18445_v35, %v18437_v37  ;;  %v12038_v57 = vpack.c.bf16 %v18447_v60, %v18439_v33  ;;  %v19577_v13 = vrot.slane %v18172_v18, 1  ;;  %v10451_v55 = vrot.slane %v17894_v12, %v19571_v34 }
 0x7c4   : > { %v10479_v48 = vrot.slane %v17888_v25, %v19570_v46  ;;  %v10483_v3 = vrot.slane %v17888_v25, %v19571_v34  ;;  %v10511_v53 = vrot.slane %v19579_v29, %v19570_v46  ;;  %v10515_v63 = vrot.slane %v19579_v29, %v19571_v34 }
 0x7c5   : > { %v18471_v42 = vsel %vm1069_vm3, %v19577_v13, %v19386_v47  ;;  %12757 = vmatprep.mubr.bf16.mxu0 %v12039_v26  ;;  %v19581_v50 = vrot.slane %v19580_v43, %v19570_v46  ;;  %v19582_v13 = vrot.slane %v19580_v43, %v19571_v34  ;;  %v19584_v26 = vrot.slane %v19583_v2, %v19570_v46 }
 0x7c6   : > { %19578 = vst [vmem:[#allocation57_spill] sm:$0xff] %v18471_v42  ;;  %12758 = vmatmul.mubr.bf16.gmra.mrb[40].mxu0 %v12038_v57  ;;  %v19585_v17 = vrot.slane %v19583_v2, %v19571_v34  ;;  %v19587_v33 = vrot.slane %v19586_v36, %v19570_v46  ;;  %v19589_v57 = vld [vmem:[#allocation38_spill] sm:$0xff] }
 0x7c7   : > { %v10912_v22 = vsel %vm994_vm2, %v19581_v50, %v10287_v58  ;;  %v10913_v47 = vsel %vm994_vm2, %v19582_v13, %v10291_v45  ;;  %v10920_v40 = vsel %vm994_vm2, %v19584_v26, %v10319_v19  ;;  %v19588_v50 = vrot.slane %v19586_v36, %v19571_v34 }
 0x7c8   : > { %v10921_v31 = vsel %vm994_vm2, %v19585_v17, %v10323_v56  ;;  %v10928_v58 = vsel %vm994_vm2, %v19587_v33, %v10351_v0  ;;  %v19590_v13 = vrot.slane %v19589_v57, %v19570_v46  ;;  %v19591_v26 = vrot.slane %v19589_v57, %v19571_v34  ;;  %v19592_v17 = vld [vmem:[#allocation35_spill] sm:$0xff] }
 0x7c9   : > { %v10929_v45 = vsel %vm994_vm2, %v19588_v50, %v10355_v9  ;;  %v19593_v32 = vrot.slane %v19592_v17, %v19570_v46  ;;  %v19594_v0 = vrot.slane %v19592_v17, %v19571_v34  ;;  %v19595_v50 = vld [vmem:[#allocation39_spill] sm:$0xff]  ;;  %v11215_v42 = vcombine.low %v10920_v40, %v10921_v31 }
 0x7ca   : > { %v10936_v19 = vsel %vm994_vm2, %v19590_v13, %v10383_v5  ;;  %v10937_v56 = vsel %vm994_vm2, %v19591_v26, %v10387_v59  ;;  %v19596_v28 = vrot.slane %v19595_v50, %v19570_v46  ;;  %v19597_v13 = vrot.slane %v19595_v50, %v19571_v34  ;;  %v19598_v26 = vld [vmem:[#allocation36_spill] sm:$0xff] }
 0x7cb   : > { %v10944_v33 = vsel %vm994_vm2, %v19593_v32, %v10415_v44  ;;  %v10945_v9 = vsel %vm994_vm2, %v19594_v0, %v10419_v21  ;;  %v19599_v35 = vrot.slane %v19598_v26, %v19570_v46  ;;  %v19600_v44 = vrot.slane %v19598_v26, %v19571_v34  ;;  %v19601_v0 = vld [vmem:[#allocation40_spill] sm:$0xff] }
 0x7cc   : > { %v10952_v5 = vsel %vm994_vm2, %v19596_v28, %v10447_v52  ;;  %v10953_v59 = vsel %vm994_vm2, %v19597_v13, %v10451_v55  ;;  %v19602_v41 = vrot.slane %v19601_v0, %v19570_v46  ;;  %v19603_v52 = vrot.slane %v19601_v0, %v19571_v34 }
 0x7cd   : > { %v10960_v32 = vsel %vm994_vm2, %v19599_v35, %v10479_v48  ;;  %v10961_v21 = vsel %vm994_vm2, %v19600_v44, %v10483_v3  ;;  %v11181_v13 = vcombine.low %v10912_v22, %v10913_v47  ;;  %v11249_v4 = vcombine.low %v10928_v58, %v10929_v45 }
 0x7ce   : > { %v10968_v28 = vsel %vm994_vm2, %v19602_v41, %v10511_v53  ;;  %v10969_v55 = vsel %vm994_vm2, %v19603_v52, %v10515_v63  ;;  %v11283_v18 = vcombine.low %v10936_v19, %v10937_v56  ;;  %v11317_v35 = vcombine.low %v10944_v33, %v10945_v9  ;;  %v19605_v56 = vld [vmem:[#allocation30_spill] sm:$0xff] }
 0x7cf   : > { %v11351_v48 = vcombine.low %v10952_v5, %v10953_v59  ;;  %v11189_v54 = vrot.slane %v11181_v13, %v19504_v38  ;;  %v11223_v3 = vrot.slane %v11215_v42, %v19504_v38  ;;  %v11385_v44 = vcombine.low %v10960_v32, %v10961_v21  ;;  %v19604_v42 = vld [vmem:[#allocation28_spill] sm:$0xff] }
 0x7d0   : > { %v11419_v37 = vcombine.low %v10968_v28, %v10969_v55  ;;  %v11257_v8 = vrot.slane %v11249_v4, %v19504_v38  ;;  %v11291_v41 = vrot.slane %v11283_v18, %v19504_v38  ;;  %v11325_v53 = vrot.slane %v11317_v35, %v19504_v38 }
 0x7d1   : > { %v11359_v63 = vrot.slane %v11351_v48, %v19504_v38  ;;  %v12088_v31 = vrot.slane %v18447_v60, 1  ;;  %v11393_v40 = vrot.slane %v11385_v44, %v19504_v38  ;;  %v14915_v22 = vcombine.low %v11189_v54, %v11223_v3 }
 0x7d2   : > { %v11427_v47 = vrot.slane %v11419_v37, %v19504_v38  ;;  %v14917_v58 = vcombine.low %v11257_v8, %v11291_v41  ;;  %v10295_v19 = vrot.slane %v17882_v39, %v19604_v42  ;;  %v10299_v4 = vrot.slane %v17882_v39, %v19605_v56 }
 0x7d3   : > { %v14923_v45 = vcombine.low %v11325_v53, %v11359_v63  ;;  %v11754_v18 = vrot.slane %v14915_v22, %v19504_v38  ;;  %v10327_v9 = vrot.slane %v17890_v51, %v19604_v42  ;;  %v10331_v5 = vrot.slane %v17890_v51, %v19605_v56 }
 0x7d4   : > { %v14925_v33 = vcombine.low %v11393_v40, %v11427_v47  ;;  %v11768_v37 = vrot.slane %v14917_v58, %v19504_v38  ;;  %v10359_v54 = vrot.slane %v17884_v15, %v19604_v42  ;;  %v10363_v59 = vrot.slane %v17884_v15, %v19605_v56 }
 0x7d5   : > { %v11826_v8 = vrot.slane %v14923_v45, %v19504_v38  ;;  %v10391_v32 = vrot.slane %v17892_v49, %v19604_v42  ;;  %v10395_v21 = vrot.slane %v17892_v49, %v19605_v56  ;;  %v10423_v51 = vrot.slane %v17886_v10, %v19604_v42 }
 0x7d6   : > { %v11840_v39 = vrot.slane %v14925_v33, %v19504_v38  ;;  %v18578_v28 = vcombine.low %v11754_v18, %v11768_v37  ;;  %v18580_v52 = vcombine.high %v11754_v18, %v11768_v37  ;;  %v10427_v55 = vrot.slane %v17886_v10, %v19605_v56 }
 0x7d7   : > { %v10455_v15 = vrot.slane %v17894_v12, %v19604_v42  ;;  %v10459_v49 = vrot.slane %v17894_v12, %v19605_v56  ;;  %v10487_v48 = vrot.slane %v17888_v25, %v19604_v42  ;;  %v10491_v10 = vrot.slane %v17888_v25, %v19605_v56 }
 0x7d8   : > { %v18586_v13 = vcombine.low %v11826_v8, %v11840_v39  ;;  %v18588_v35 = vcombine.high %v11826_v8, %v11840_v39  ;;  %v10519_v41 = vrot.slane %v19579_v29, %v19604_v42  ;;  %v10523_v12 = vrot.slane %v19579_v29, %v19605_v56 }
 0x7d9   : > { %v19606_v40 = vrot.slane %v19580_v43, %v19604_v42  ;;  %v19607_v22 = vrot.slane %v19580_v43, %v19605_v56  ;;  %v19608_v58 = vrot.slane %v19583_v2, %v19604_v42  ;;  %v19609_v18 = vrot.slane %v19583_v2, %v19605_v56 }
 0x7da   : > { %v12033_v53 = vpack.c.bf16 %v18588_v35, %v18580_v52  ;;  %v12057_v63 = vrot.slane %v18586_v13, 1  ;;  %v19610_v33 = vrot.slane %v19586_v36, %v19604_v42  ;;  %v19611_v43 = vrot.slane %v19586_v36, %v19605_v56 }
 0x7db   : > { %v10914_v47 = vsel %vm994_vm2, %v19606_v40, %v10295_v19  ;;  %v10915_v25 = vsel %vm994_vm2, %v19607_v22, %v10299_v4  ;;  %v10922_v45 = vsel %vm994_vm2, %v19608_v58, %v10327_v9  ;;  %v10923_v29 = vsel %vm994_vm2, %v19609_v18, %v10331_v5 }
 0x7dc   : > { %v10930_v19 = vsel %vm994_vm2, %v19610_v33, %v10359_v54  ;;  %12798 = vmatprep.mubr.bf16.mxu1 %v12033_v53  ;;  %v10931_v4 = vsel %vm994_vm2, %v19611_v43, %v10363_v59  ;;  %v19612_v37 = vrot.slane %v19589_v57, %v19604_v42  ;;  %v19613_v2 = vrot.slane %v19589_v57, %v19605_v56 }
 0x7dd   : > { %v19614_v8 = vrot.slane %v19592_v17, %v19604_v42  ;;  %v19615_v36 = vrot.slane %v19592_v17, %v19605_v56  ;;  %v19616_v39 = vrot.slane %v19595_v50, %v19604_v42  ;;  %v19617_v57 = vrot.slane %v19595_v50, %v19605_v56 }
 0x7de   : > { %v10938_v9 = vsel %vm994_vm2, %v19612_v37, %v10391_v32  ;;  %v10939_v5 = vsel %vm994_vm2, %v19613_v2, %v10395_v21  ;;  %v19618_v53 = vrot.slane %v19598_v26, %v19604_v42  ;;  %v19619_v17 = vrot.slane %v19598_v26, %v19605_v56 }
 0x7df   : > { %v10946_v54 = vsel %vm994_vm2, %v19614_v8, %v10423_v51  ;;  %v10947_v59 = vsel %vm994_vm2, %v19615_v36, %v10427_v55  ;;  %v10954_v32 = vsel %vm994_vm2, %v19616_v39, %v10455_v15  ;;  %v10955_v21 = vsel %vm994_vm2, %v19617_v57, %v10459_v49 }
 0x7e0   : > { %v10962_v51 = vsel %vm994_vm2, %v19618_v53, %v10487_v48  ;;  %v10963_v55 = vsel %vm994_vm2, %v19619_v17, %v10491_v10  ;;  %v19620_v40 = vrot.slane %v19601_v0, %v19604_v42  ;;  %v19621_v50 = vrot.slane %v19601_v0, %v19605_v56  ;;  %v15718_v17 = vld [vmem:[%s19322_s11 + $0x8] sm:$0xff]  }
 0x7e1   : > { %v11182_v22 = vcombine.low %v10914_v47, %v10915_v25  ;;  %v11216_v58 = vcombine.low %v10922_v45, %v10923_v29  ;;  %v11250_v18 = vcombine.low %v10930_v19, %v10931_v4  ;;  %v11284_v33 = vcombine.low %v10938_v9, %v10939_v5  ;;  %v15716_v19 = vld [vmem:[%s19322_s11 + $0x48] sm:$0xff]  }
 0x7e2   : > { %v10970_v15 = vsel %vm994_vm2, %v19620_v40, %v10519_v41  ;;  %v10971_v49 = vsel %vm994_vm2, %v19621_v50, %v10523_v12  ;;  %v11318_v48 = vcombine.low %v10946_v54, %v10947_v59  ;;  %v11352_v26 = vcombine.low %v10954_v32, %v10955_v21  ;;  %v15714_v12 = vld [vmem:[%s19322_s11] sm:$0xff]  }
 0x7e3   : > { %v11196_v43 = vrot.slane %v11182_v22, %v19504_v38  ;;  %v11386_v37 = vcombine.low %v10962_v51, %v10963_v55  ;;  %v11420_v10 = vcombine.low %v10970_v15, %v10971_v49  ;;  %v11230_v2 = vrot.slane %v11216_v58, %v19504_v38  ;;  %v15720_v49 = vld [vmem:[%s19322_s11 + $0x50] sm:$0xff]  }
 0x7e4   : > { %v11264_v8 = vrot.slane %v11250_v18, %v19504_v38  ;;  %v11298_v41 = vrot.slane %v11284_v33, %v19504_v38  ;;  %v11332_v0 = vrot.slane %v11318_v48, %v19504_v38  ;;  %v11366_v47 = vrot.slane %v11352_v26, %v19504_v38 }
 0x7e5   : > { %v11400_v25 = vrot.slane %v11386_v37, %v19504_v38  ;;  %v11434_v45 = vrot.slane %v11420_v10, %v19504_v38  ;;  %v12032_v29 = vpack.c.bf16 %v18586_v13, %v18578_v28  ;;  %v14916_v9 = vcombine.low %v11196_v43, %v11230_v2 }
 0x7e6   : > { %v14918_v5 = vcombine.low %v11264_v8, %v11298_v41  ;;  %v10543_v54 = vrot.slane %v17910_v7, %v19570_v46  ;;  %v14924_v36 = vcombine.low %v11332_v0, %v11366_v47  ;;  %v10547_v39 = vrot.slane %v17910_v7, %v19571_v34 }
 0x7e7   : > { %v14926_v59 = vcombine.low %v11400_v25, %v11434_v45  ;;  %12799 = vmatmul.mubr.bf16.vlgmr.msra.gmra.mrb[40].mxu1 %v12032_v29  ;;  %v10575_v32 = vrot.slane %v17918_v62, %v19570_v46  ;;  %v11761_v57 = vrot.slane %v14916_v9, %v19504_v38  ;;  %v10579_v53 = vrot.slane %v17918_v62, %v19571_v34  ;;  %v15715_v45 = vld [vmem:[%s19322_s11 + $0x80] sm:$0xff]  }
 0x7e8   : > { %v11775_v21 = vrot.slane %v14918_v5, %v19504_v38  ;;  %v10607_v51 = vrot.slane %v17912_v6, %v19570_v46  ;;  %15220 = vmatpush3.bf16.msra.mxu1 %v15714_v12  ;;  %v11833_v55 = vrot.slane %v14924_v36, %v19504_v38  ;;  %v10611_v15 = vrot.slane %v17912_v6, %v19571_v34 }
 0x7e9   : > { %v11847_v40 = vrot.slane %v14926_v59, %v19504_v38  ;;  %v10639_v50 = vrot.slane %v17920_v14, %v19570_v46  ;;  %15221 = vmatprep.subr.bf16.mxu1 %v15716_v19  ;;  %v10643_v18 = vrot.slane %v17920_v14, %v19571_v34  ;;  %v10671_v33 = vrot.slane %v17914_v1, %v19570_v46 }
 0x7ea   : > { %v18710_v22 = vcombine.low %v11761_v57, %v11775_v21  ;;  %v18712_v58 = vcombine.high %v11761_v57, %v11775_v21  ;;  %v10675_v26 = vrot.slane %v17914_v1, %v19571_v34  ;;  %v10703_v37 = vrot.slane %v17922_v11, %v19570_v46  ;;  %v15717_v57 = vld [vmem:[%s19322_s11 + $0xc8] sm:$0xff]  }
 0x7eb   : > { %v18718_v48 = vcombine.low %v11833_v55, %v11847_v40  ;;  %v18720_v43 = vcombine.high %v11833_v55, %v11847_v40  ;;  %v10707_v8 = vrot.slane %v17922_v11, %v19571_v34  ;;  %v10735_v41 = vrot.slane %v17916_v30, %v19570_v46 }
 0x7ec   : > { %15222 = vmatpush3.bf16.msra.mxu1 %v15718_v17  ;;  %v10739_v25 = vrot.slane %v17916_v30, %v19571_v34  ;;  %v10767_v29 = vrot.slane %v17924_v23, %v19570_v46  ;;  %v10771_v19 = vrot.slane %v17924_v23, %v19571_v34  ;;  %v19622_v9 = vrot.slane %v17447_v20, %v19570_v46 }
 0x7ed   : > { %v12035_v0 = vpack.c.bf16 %v18720_v43, %v18712_v58  ;;  %v12063_v12 = vrot.slane %v18718_v48, 1  ;;  %v12034_v47 = vpack.c.bf16 %v18718_v48, %v18710_v22  ;;  %15223 = vmatprep.subr.bf16.mxu1 %v15720_v49  ;;  %v19623_v36 = vrot.slane %v17447_v20, %v19571_v34  ;;  %v15752_v48 = vld [vmem:[%s19322_s11 + $0x150] sm:$0xff]  }
 0x7ee   : > { %v10976_v5 = vsel %vm994_vm2, %v19622_v9, %v10543_v54  ;;  %v19624_v21 = vrot.slane %v17462_v27, %v19570_v46  ;;  %v19625_v55 = vrot.slane %v17462_v27, %v19571_v34  ;;  %v19626_v40 = vrot.slane %v19533_v24, %v19570_v46  ;;  %v15722_v9 = vld [vmem:[%s19322_s11 + $0x10] sm:$0xff]  }
 0x7ef   : > { %v10977_v59 = vsel %vm994_vm2, %v19623_v36, %v10547_v39  ;;  %12847 = vmatprep.mubr.bf16.mxu0 %v12035_v0  ;;  %v19627_v49 = vrot.slane %v19533_v24, %v19571_v34  ;;  %v19629_v36 = vrot.slane %v19536_v16, %v19571_v34 }
 0x7f0   : > { %v10984_v17 = vsel %vm994_vm2, %v19624_v21, %v10575_v32  ;;  %v10985_v54 = vsel %vm994_vm2, %v19625_v55, %v10579_v53  ;;  %v10992_v39 = vsel %vm994_vm2, %v19626_v40, %v10607_v51  ;;  %12848 = vmatmul.mubr.bf16.vlgmr.msra.gmra.mrb[44].mxu0 %v12034_v47  ;;  %v19628_v32 = vrot.slane %v19536_v16, %v19570_v46  ;;  %v15724_v40 = vld [vmem:[%s19322_s11 + $0x58] sm:$0xff]  }
 0x7f1   : > { %v10993_v0 = vsel %vm994_vm2, %v19627_v49, %v10611_v15  ;;  %v11001_v51 = vsel %vm994_vm2, %v19629_v36, %v10643_v18  ;;  %v19630_v21 = vrot.slane %v19539_v61, %v19570_v46  ;;  %v19631_v55 = vrot.slane %v19539_v61, %v19571_v34  ;;  %15248 = vmatpush3.bf16.msra.mxu0 %v15715_v45 }
 0x7f2   : > { %v11000_v53 = vsel %vm994_vm2, %v19628_v32, %v10639_v50  ;;  %v19632_v50 = vld [vmem:[#allocation45_spill] sm:$0xff]  ;;  %v11487_v2 = vcombine.low %v10984_v17, %v10985_v54  ;;  %15249 = vmatprep.subr.bf16.mxu0 %v15717_v57  ;;  %v11521_v45 = vcombine.low %v10992_v39, %v10993_v0  ;;  %15224 = vmatpush3.bf16.msra.mxu1 %v15722_v9 }
 0x7f3   : > { %v11008_v15 = vsel %vm994_vm2, %v19630_v21, %v10671_v33  ;;  %v11009_v47 = vsel %vm994_vm2, %v19631_v55, %v10675_v26  ;;  %v19633_v49 = vrot.slane %v19632_v50, %v19570_v46  ;;  %v19634_v18 = vrot.slane %v19632_v50, %v19571_v34  ;;  %v19635_v33 = vld [vmem:[#allocation43_spill] sm:$0xff]  ;;  %15225 = vmatprep.subr.bf16.mxu1 %v15724_v40 }
 0x7f4   : > { %v19636_v21 = vrot.slane %v19635_v33, %v19570_v46  ;;  %v19637_v26 = vrot.slane %v19635_v33, %v19571_v34  ;;  %v11589_v44 = vcombine.low %v11008_v15, %v11009_v47  ;;  %v10555_v15 = vrot.slane %v17910_v7, %v19605_v56  ;;  %v15730_v47 = vld [vmem:[%s19322_s11 + $0x20] sm:$0xff]  }
 0x7f5   : > { %v11016_v32 = vsel %vm994_vm2, %v19633_v49, %v10703_v37  ;;  %v11017_v36 = vsel %vm994_vm2, %v19634_v18, %v10707_v8  ;;  %v15719_v37 = vld [vmem:[%s19322_s11 + $0x88] sm:$0xff]  }
 0x7f6   : > { %v11024_v10 = vsel %vm994_vm2, %v19636_v21, %v10735_v41  ;;  %v11025_v55 = vsel %vm994_vm2, %v19637_v26, %v10739_v25  ;;  %v19638_v49 = vld [vmem:[#allocation46_spill] sm:$0xff]  ;;  %v11453_v21 = vcombine.low %v10976_v5, %v10977_v59  ;;  %v15721_v25 = vld [vmem:[%s19322_s11 + $0xd0] sm:$0xff]   ;;  %v11555_v26 = vcombine.low %v11000_v53, %v11001_v51  ;;  %v15728_v5 = vld [vmem:[%s19322_s11 + $0x60] sm:$0xff]   ;;  %15250 = vmatpush3.bf16.msra.mxu0 %v15719_v37 }
 0x7f7   : > { %v19639_v3 = vrot.slane %v19638_v49, %v19570_v46  ;;  %v19640_v18 = vrot.slane %v19638_v49, %v19571_v34  ;;  %v11623_v4 = vcombine.low %v11016_v32, %v11017_v36  ;;  %v15726_v46 = vld [vmem:[%s19322_s11 + $0x18] sm:$0xff]   ;;  %v11529_v59 = vrot.slane %v11521_v45, %v19504_v38  ;;  %15251 = vmatprep.subr.bf16.mxu0 %v15721_v25 }
 0x7f8   : > { %v11461_v34 = vrot.slane %v11453_v21, %v19504_v38  ;;  %v11563_v57 = vrot.slane %v11555_v26, %v19504_v38  ;;  %v11597_v17 = vrot.slane %v11589_v44, %v19504_v38  ;;  %v15725_v53 = vld [vmem:[%s19322_s11 + $0xd8] sm:$0xff]   ;;  %15226 = vmatpush3.bf16.msra.mxu1 %v15726_v46  ;;  %v10583_v36 = vrot.slane %v17918_v62, %v19604_v42 }
 0x7f9   : > { %v11032_v8 = vsel %vm994_vm2, %v19639_v3, %v10767_v29  ;;  %v11033_v41 = vsel %vm994_vm2, %v19640_v18, %v10771_v19  ;;  %v11495_v3 = vrot.slane %v11487_v2, %v19504_v38  ;;  %v11657_v29 = vcombine.low %v11024_v10, %v11025_v55  ;;  %v15723_v2 = vld [vmem:[%s19322_s11 + $0x90] sm:$0xff]   ;;  %15227 = vmatprep.subr.bf16.mxu1 %v15728_v5 }
 0x7fa   : > { %v11691_v19 = vcombine.low %v11032_v8, %v11033_v41  ;;  %v11631_v54 = vrot.slane %v11623_v4, %v19504_v38  ;;  %v12066_v10 = vrot.slane %v18720_v43, 1  ;;  %v14933_v44 = vcombine.low %v11529_v59, %v11563_v57  ;;  %15252 = vmatpush3.bf16.msra.mxu0 %v15723_v2 }
 0x7fb   : > { %v11665_v39 = vrot.slane %v11657_v29, %v19504_v38  ;;  %v14931_v9 = vcombine.low %v11461_v34, %v11495_v3  ;;  %v10551_v4 = vrot.slane %v17910_v7, %v19604_v42  ;;  %v10587_v55 = vrot.slane %v17918_v62, %v19605_v56  ;;  %v15732_v7 = vld [vmem:[%s19322_s11 + $0x68] sm:$0xff]   ;;  %v15727_v62 = vld [vmem:[%s19322_s11 + $0x98] sm:$0xff]   ;;  %15253 = vmatprep.subr.bf16.mxu0 %v15725_v53 }
 0x7fc   : > { %v11699_v0 = vrot.slane %v11691_v19, %v19504_v38  ;;  %v14939_v51 = vcombine.low %v11597_v17, %v11631_v54  ;;  %v18864_v37 = vrot.slane %v14933_v44, %v19504_v38  ;;  %v10615_v18 = vrot.slane %v17912_v6, %v19604_v42  ;;  %15228 = vmatpush3.bf16.msra.mxu1 %v15730_v47  ;;  %v15734_v29 = vld [vmem:[%s19322_s11 + $0x28] sm:$0xff]  }
 0x7fd   : > { %v18854_v40 = vrot.slane %v14931_v9, %v19504_v38  ;;  %v10619_v41 = vrot.slane %v17912_v6, %v19605_v56  ;;  %v10647_v25 = vrot.slane %v17920_v14, %v19604_v42  ;;  %v10651_v45 = vrot.slane %v17920_v14, %v19605_v56  ;;  %v15729_v6 = vld [vmem:[%s19322_s11 + $0xe0] sm:$0xff]   ;;  %15229 = vmatprep.subr.bf16.mxu1 %v15732_v7 }
 0x7fe   : > { %v14941_v32 = vcombine.low %v11665_v39, %v11699_v0  ;;  %v18867_v8 = vrot.slane %v14939_v51, %v19504_v38  ;;  %v10679_v26 = vrot.slane %v17914_v1, %v19604_v42  ;;  %v10683_v34 = vrot.slane %v17914_v1, %v19605_v56  ;;  %15254 = vmatpush3.bf16.msra.mxu0 %v15727_v62 }
 0x7ff   : > { %v18890_v46 = vcombine.high %v18854_v40, %v18864_v37  ;;  %v10711_v3 = vrot.slane %v17922_v11, %v19604_v42  ;;  %v10715_v14 = vrot.slane %v17922_v11, %v19605_v56  ;;  %v10743_v5 = vrot.slane %v17916_v30, %v19604_v42  ;;  %15255 = vmatprep.subr.bf16.mxu0 %v15729_v6 }
 0x800   : > { %v18877_v21 = vrot.slane %v14941_v32, %v19504_v38  ;;  %v10747_v1 = vrot.slane %v17916_v30, %v19605_v56  ;;  %v10775_v59 = vrot.slane %v17924_v23, %v19604_v42  ;;  %v10779_v57 = vrot.slane %v17924_v23, %v19605_v56  ;;  %v15731_v30 = vld [vmem:[%s19322_s11 + $0xa0] sm:$0xff]   ;;  %15230 = vmatpush3.bf16.msra.mxu1 %v15734_v29 }
 0x801   : > { %v12078_v11 = vrot.slane %v18890_v46, 1  ;;  %v19641_v17 = vrot.slane %v17447_v20, %v19604_v42  ;;  %v19642_v2 = vrot.slane %v17447_v20, %v19605_v56  ;;  %v19643_v23 = vrot.slane %v17462_v27, %v19604_v42 }
 0x802   : > { %v18903_v19 = vcombine.high %v18867_v8, %v18877_v21  ;;  %v19644_v53 = vrot.slane %v17462_v27, %v19605_v56  ;;  %v19645_v44 = vrot.slane %v19533_v24, %v19604_v42  ;;  %v19647_v27 = vrot.slane %v19536_v16, %v19604_v42  ;;  %15256 = vmatpush3.bf16.msra.mxu0 %v15731_v30 }
 0x803   : > { %v10978_v54 = vsel %vm994_vm2, %v19641_v17, %v10551_v4  ;;  %v10979_v39 = vsel %vm994_vm2, %v19642_v2, %v10555_v15  ;;  %v10986_v9 = vsel %vm994_vm2, %v19643_v23, %v10583_v36  ;;  %v15733_v4 = vld [vmem:[%s19322_s11 + $0xe8] sm:$0xff]   ;;  %v19646_v15 = vrot.slane %v19533_v24, %v19605_v56  ;;  %v15736_v24 = vld [vmem:[%s19322_s11 + $0x70] sm:$0xff]  }
 0x804   : > { %v12041_v0 = vpack.c.bf16 %v18903_v19, %v18890_v46  ;;  %v10987_v20 = vsel %vm994_vm2, %v19644_v53, %v10587_v55  ;;  %v10994_v51 = vsel %vm994_vm2, %v19645_v44, %v10615_v18  ;;  %v11002_v32 = vsel %vm994_vm2, %v19647_v27, %v10647_v25  ;;  %15257 = vmatprep.subr.bf16.mxu0 %v15733_v4  ;;  %v15742_v44 = vld [vmem:[%s19322_s11 + $0x38] sm:$0xff]   ;;  %v15739_v27 = vld [vmem:[%s19322_s11 + $0xb0] sm:$0xff]  }
 0x805   : > { %v10995_v47 = vsel %vm994_vm2, %v19646_v15, %v10619_v41  ;;  %v19648_v36 = vrot.slane %v19536_v16, %v19605_v56  ;;  %v19649_v7 = vrot.slane %v19539_v61, %v19604_v42  ;;  %v19650_v41 = vrot.slane %v19539_v61, %v19605_v56  ;;  %v15738_v61 = vld [vmem:[%s19322_s11 + $0x30] sm:$0xff]   ;;  %15231 = vmatprep.subr.bf16.mxu1 %v15736_v24  ;;  %v19659_v24 = vld [vmem:[#allocation32_spill] sm:$0xff] }
 0x806   : > { %12806 = vmatprep.mubr.bf16.mxu1 %v12041_v0  ;;  %v19651_v16 = vrot.slane %v19632_v50, %v19604_v42  ;;  %v19653_v6 = vrot.slane %v19635_v33, %v19604_v42  ;;  %v15735_v0 = vld [vmem:[%s19322_s11 + $0xa8] sm:$0xff]   ;;  %v11488_v23 = vcombine.low %v10986_v9, %v10987_v20  ;;  %15232 = vmatpush3.bf16.msra.mxu1 %v15738_v61 }
 0x807   : > { %v11003_v55 = vsel %vm994_vm2, %v19648_v36, %v10651_v45  ;;  %v11010_v18 = vsel %vm994_vm2, %v19649_v7, %v10679_v26  ;;  %v11011_v62 = vsel %vm994_vm2, %v19650_v41, %v10683_v34  ;;  %v19652_v45 = vrot.slane %v19632_v50, %v19605_v56  ;;  %15258 = vmatpush3.bf16.msra.mxu0 %v15735_v0  ;;  %v19657_v7 = vld [vmem:[#allocation26_spill] sm:$0xff] }
 0x808   : > { %v11018_v25 = vsel %vm994_vm2, %v19651_v16, %v10711_v3  ;;  %v11026_v29 = vsel %vm994_vm2, %v19653_v6, %v10743_v5  ;;  %v19654_v34 = vrot.slane %v19635_v33, %v19605_v56  ;;  %v19655_v3 = vrot.slane %v19638_v49, %v19604_v42  ;;  %v15737_v42 = vld [vmem:[%s19322_s11 + $0xf0] sm:$0xff]  }
 0x809   : > { %v11019_v26 = vsel %vm994_vm2, %v19652_v45, %v10715_v14  ;;  %v19656_v14 = vrot.slane %v19638_v49, %v19605_v56  ;;  %v11454_v5 = vcombine.low %v10978_v54, %v10979_v39  ;;  %v11522_v33 = vcombine.low %v10994_v51, %v10995_v47  ;;  %v15740_v54 = vld [vmem:[%s19322_s11 + $0x78] sm:$0xff]   ;;  %15259 = vmatprep.subr.bf16.mxu0 %v15737_v42 }
 0x80a   : > { %v11027_v17 = vsel %vm994_vm2, %v19654_v34, %v10747_v1  ;;  %v11034_v50 = vsel %vm994_vm2, %v19655_v3, %v10775_v59  ;;  %v11556_v53 = vcombine.low %v11002_v32, %v11003_v55  ;;  %v11590_v1 = vcombine.low %v11010_v18, %v11011_v62  ;;  %15233 = vmatprep.subr.bf16.mxu1 %v15740_v54  ;;  %v15745_v54 = vld [vmem:[%s19322_s11 + $0x1c0] sm:$0xff]  }
 0x80b   : > { %v11035_v2 = vsel %vm994_vm2, %v19656_v14, %v10779_v57  ;;  %v11468_v59 = vrot.slane %v11454_v5, %v19504_v38  ;;  %v11624_v56 = vcombine.low %v11018_v25, %v11019_v26  ;;  %v11658_v49 = vcombine.low %v11026_v29, %v11027_v17  ;;  %v19661_v25 = vld [vmem:[#allocation41_spill] sm:$0xff]  ;;  %15234 = vmatpush3.bf16.msra.mxu1 %v15742_v44  ;;  %v15743_v5 = vld [vmem:[%s19322_s11 + $0xb8] sm:$0xff]  }
 0x80c   : > { %v11692_v57 = vcombine.low %v11034_v50, %v11035_v2  ;;  %v11502_v39 = vrot.slane %v11488_v23, %v19504_v38  ;;  %v11536_v30 = vrot.slane %v11522_v33, %v19504_v38  ;;  %v11570_v9 = vrot.slane %v11556_v53, %v19504_v38  ;;  %v15744_v17 = vld [vmem:[%s19322_s11 + $0x140] sm:$0xff]   ;;  %15260 = vmatpush3.bf16.msra.mxu0 %v15739_v27  ;;  %v19664_v33 = vld [vmem:[#allocation52_spill] sm:$0xff] }
 0x80d   : > { %v11604_v20 = vrot.slane %v11590_v1, %v19504_v38  ;;  %v11638_v51 = vrot.slane %v11624_v56, %v19504_v38  ;;  %v11672_v4 = vrot.slane %v11658_v49, %v19504_v38  ;;  %v19014_v47 = vcombine.low %v18854_v40, %v18864_v37  ;;  %v19666_v1 = vld [vmem:[#allocation50_spill] sm:$0xff]  ;;  %v19673_v27 = vld [vmem:[#allocation48_spill] sm:$0xff]  ;;  %15275 = vmatprep.subr.bf16.mxu1 %v15744_v17 }
 0x80e   : > { %v11706_v15 = vrot.slane %v11692_v57, %v19504_v38  ;;  %v14932_v32 = vcombine.low %v11468_v59, %v11502_v39  ;;  %v14934_v36 = vcombine.low %v11536_v30, %v11570_v9  ;;  %v19021_v55 = vcombine.low %v18867_v8, %v18877_v21  ;;  %v15741_v8 = vld [vmem:[%s19322_s11 + $0xf8] sm:$0xff]   ;;  %v19668_v59 = vld [vmem:[#allocation29_spill] sm:$0xff] }
 0x80f   : > { %v19658_v18 = vrot.slane %v19657_v7, 1  ;;  %v19660_v41 = vrot.slane %v19659_v24, 1  ;;  %v14940_v40 = vcombine.low %v11604_v20, %v11638_v51  ;;  %v12076_v16 = vrot.slane %v19014_v47, 1  ;;  %15261 = vmatprep.subr.bf16.mxu0 %v15741_v8  ;;  %v19675_v7 = vld [vmem:[#allocation53_spill] sm:$0xff]  ;;  %v19677_v24 = vld [vmem:[#allocation51_spill] sm:$0xff] }
 0x810   : > { %v14942_v37 = vcombine.low %v11672_v4, %v11706_v15  ;;  %v19662_v45 = vrot.slane %v19661_v25, 1  ;;  %v12094_v21 = vrot.slane %v18903_v19, 1  ;;  %v11905_v29 = vrot.slane %v14932_v32, %v19504_v38  ;;  %v19671_v4 = vld [vmem:[#allocation49_spill] sm:$0xff]  ;;  %15262 = vmatpush3.bf16.msra.mxu0 %v15743_v5  ;;  %v15749_v19 = vld [vmem:[%s19322_s11 + $0x1c8] sm:$0xff]  }
 0x811   : > { %v12049_v62 = vsel %vm1069_vm3, %v19660_v41, %v19658_v18  ;;  %v19663_v26 = vmov %v19658_v18  ;;  %v11919_v61 = vrot.slane %v14934_v36, %v19504_v38  ;;  %v12040_v34 = vpack.c.bf16 %v19021_v55, %v19014_v47  ;;  %15303 = vmatprep.subr.bf16.mxu0 %v15745_v54  ;;  %v15754_v47 = vld [vmem:[%s19322_s11 + $0x110] sm:$0xff]  }
 0x812   : > { %v12071_v6 = vsel %vm1069_vm3, %v19663_v26, %v19662_v45  ;;  %v11977_v3 = vrot.slane %v14940_v40, %v19504_v38  ;;  %v11991_v50 = vrot.slane %v14942_v37, %v19504_v38  ;;  %v19052_v14 = vsel %vm1069_vm3, %v12057_v63, %v12076_v16 }
 0x813   : > { %v12141_v2 = vpack.c.bf16 %v12071_v6, %v12049_v62  ;;  %v11923_v0 = vcombine.high %v11905_v29, %v11919_v61  ;;  %12807 = vmatmul.mubr.bf16.gmra.mrb[44].mxu1 %v12040_v34  ;;  %v11922_v23 = vcombine.low %v11905_v29, %v11919_v61  ;;  %v19665_v53 = vrot.slane %v19664_v33, 1  ;;  %v19679_v6 = vld [vmem:[#allocation27_spill] sm:$0xff]  ;;  %v19680_v29 = vld [vmem:[#allocation57_spill] sm:$0xff]  ;;  %v19681_v34 = vld [vmem:[#allocation44_spill] sm:$0xff] }
 0x814   : > { %v19667_v38 = vrot.slane %v19666_v1, 1  ;;  %v19669_v56 = vrot.slane %v19668_v59, 1  ;;  %v11995_v39 = vcombine.high %v11977_v3, %v11991_v50  ;;  %v12092_v30 = vrot.slane %v19021_v55, 1  ;;  %v15746_v1 = vld [vmem:[%s19322_s11 + $0x100] sm:$0xff]  }
 0x815   : > { %v19670_v49 = vmov %v19665_v53  ;;  %v11994_v9 = vcombine.low %v11977_v3, %v11991_v50  ;;  %13408 = vmatprep.mubr.bf16.mxu1 %v12141_v2  ;;  %v12082_v44 = vrot.slane %v11923_v0, 1  ;;  %v12080_v51 = vrot.slane %v11922_v23, 1 }
 0x816   : > { %v12055_v42 = vsel %vm1069_vm3, %v19667_v38, %v19665_v53  ;;  %v12075_v57 = vsel %vm1069_vm3, %v19670_v49, %v19669_v56  ;;  %v19672_v15 = vrot.slane %v19671_v4, 1  ;;  %v19674_v32 = vrot.slane %v19673_v27, 1  ;;  %v19688_v38 = vld [vmem:[#allocation54_spill] sm:$0xff] }
 0x817   : > { %v12143_v20 = vpack.c.bf16 %v12075_v57, %v12055_v42  ;;  %v19676_v18 = vrot.slane %v19675_v7, 1  ;;  %v19678_v41 = vrot.slane %v19677_v24, 1  ;;  %v12043_v55 = vpack.c.bf16 %v11995_v39, %v11923_v0  ;;  %v19685_v0 = vld [vmem:[#allocation56_spill] sm:$0xff]  ;;  %v19692_v57 = vld [vmem:[#allocation55_spill] sm:$0xff]  ;;  %v15748_v4 = vld [vmem:[%s19322_s11 + $0x148] sm:$0xff]  }
 0x818   : > { %v12046_v36 = vsel %vm1069_vm3, %v19674_v32, %v19672_v15  ;;  %v12098_v40 = vrot.slane %v11995_v39, 1  ;;  %v12042_v37 = vpack.c.bf16 %v11994_v9, %v11922_v23  ;;  %v12096_v45 = vrot.slane %v11994_v9, 1 }
 0x819   : > { %v12052_v62 = vsel %vm1069_vm3, %v19678_v41, %v19676_v18  ;;  %v19084_v26 = vsel %vm1069_vm3, %v12063_v12, %v12080_v51  ;;  %v12140_v8 = vpack.c.bf16 %v19679_v6, %v12046_v36  ;;  %v19682_v3 = vrot.slane %v19681_v34, 1  ;;  %12855 = vmatprep.mubr.bf16.mxu0 %v12043_v55  ;;  %v15762_v34 = vld [vmem:[%s19322_s11 + $0x120] sm:$0xff]  }
 0x81a   : > { %v12142_v61 = vpack.c.bf16 %v19680_v29, %v12052_v62  ;;  %v19683_v50 = vrot.slane %v19661_v25, 1  ;;  %v19686_v23 = vrot.slane %v19685_v0, 1  ;;  %v19687_v33 = vmov %v19669_v56  ;;  %v19690_v56 = vld [vmem:[#allocation42_spill] sm:$0xff]  ;;  %12856 = vmatmul.mubr.bf16.gmra.mrb[48].mxu0 %v12042_v37  ;;  %v15763_v0 = vld [vmem:[%s19322_s11 + $0x1a0] sm:$0xff]  }
 0x81b   : > { %v19684_v2 = vmov %v19682_v3  ;;  %v19689_v42 = vrot.slane %v19688_v38, 1  ;;  %v19691_v25 = vrot.slane %v19690_v56, 1  ;;  %v19693_v54 = vrot.slane %v19692_v57, 1  ;;  %13457 = vmatprep.mubr.bf16.mxu0 %v12143_v20  ;;  %13409 = vmatmul.mubr.bf16.vlgmr.msra.gmra.mrb[48].mxu1 %v12140_v8  ;;  %v15769_v38 = vld [vmem:[%s19322_s11 + $0x1f0] sm:$0xff]  }
 0x81c   : > { %v12087_v17 = vsel %vm1069_vm3, %v19683_v50, %v19682_v3  ;;  %v12091_v53 = vsel %vm1069_vm3, %v19687_v33, %v19686_v23  ;;  %v19694_v59 = vmov %v19686_v23  ;;  %v19696_v36 = vrot.slane %v18588_v35, 1  ;;  %15276 = vmatpush3.bf16.msra.mxu1 %v15746_v1  ;;  %v15764_v3 = vld [vmem:[%s19322_s11 + $0x168] sm:$0xff]   ;;  %v15759_v50 = vld [vmem:[%s19322_s11 + $0x198] sm:$0xff]   ;;  %v15770_v33 = vld [vmem:[%s19322_s11 + $0x130] sm:$0xff]  }
 0x81d   : > { %v15072_v5 = vpack.c.bf16 %v19684_v2, %v12087_v17  ;;  %v12085_v49 = vsel %vm1069_vm3, %v19691_v25, %v19689_v42  ;;  %v12089_v39 = vsel %vm1069_vm3, %v19693_v54, %v12088_v31  ;;  %v15078_v9 = vpack.c.bf16 %v19694_v59, %v12091_v53  ;;  %15277 = vmatprep.subr.bf16.mxu1 %v15748_v4  ;;  %v15761_v17 = vld [vmem:[%s19322_s11 + $0x1e0] sm:$0xff]   ;;  %v15766_v2 = vld [vmem:[%s19322_s11 + $0x128] sm:$0xff]   ;;  %v15772_v53 = vld [vmem:[%s19322_s11 + $0x178] sm:$0xff]  }
 0x81e   : > { %v19695_v15 = vmov %v19689_v42  ;;  %v15081_v32 = vpack.c.bf16 %v12088_v31, %v12089_v39  ;;  %v19697_v7 = vrot.slane %v18580_v52, 1  ;;  %v19698_v24 = vmov %v19696_v36  ;;  %v15765_v23 = vld [vmem:[%s19322_s11 + $0x1e8] sm:$0xff]   ;;  %v15774_v42 = vld [vmem:[%s19322_s11 + $0x138] sm:$0xff]   ;;  %v15771_v56 = vld [vmem:[%s19322_s11 + $0x1b0] sm:$0xff]  }
 0x81f   : > { %v15075_v27 = vpack.c.bf16 %v19695_v15, %v12085_v49  ;;  %v12079_v41 = vsel %vm1069_vm3, %v19698_v24, %v12078_v11  ;;  %v19699_v62 = vrot.slane %v18712_v58, 1  ;;  %v12083_v31 = vsel %vm1069_vm3, %v12066_v10, %v12082_v44  ;;  %15073 = vmatprep.mubr.msk.bf16.mxu1 %vm17474_vm6, %v15072_v5  ;;  %v15768_v5 = vld [vmem:[%s19322_s11 + $0x170] sm:$0xff]   ;;  %v15767_v1 = vld [vmem:[%s19322_s11 + $0x1a8] sm:$0xff]   ;;  %v15773_v25 = vld [vmem:[%s19322_s11 + $0x1f8] sm:$0xff]  }
 0x820   : > { %v12061_v18 = vsel %vm1069_vm3, %v19697_v7, %v19696_v36  ;;  %v19700_v52 = vrot.slane %v18578_v28, 1  ;;  %v19701_v58 = vrot.slane %v18710_v22, 1  ;;  %v15750_v28 = vld [vmem:[%s19322_s11 + $0x108] sm:$0xff]   ;;  %v12099_v22 = vsel %vm1069_vm3, %v12082_v44, %v12098_v40  ;;  %v15775_v49 = vld [vmem:[%s19322_s11 + $0x1b8] sm:$0xff]  }
 0x821   : > { %v12067_v60 = vsel %vm1069_vm3, %v19699_v62, %v12066_v10  ;;  %v12145_v35 = vpack.c.bf16 %v12079_v41, %v12061_v18  ;;  %v19176_v6 = vpack.c.bf16 %v12098_v40, %v12099_v22  ;;  %v12093_v8 = vsel %vm1069_vm3, %v12076_v16, %v12092_v30  ;;  %15278 = vmatpush3.bf16.msra.mxu1 %v15750_v28  ;;  %v15756_v16 = vld [vmem:[%s19322_s11 + $0x158] sm:$0xff]   ;;  %v15760_v40 = vld [vmem:[%s19322_s11 + $0x160] sm:$0xff]  }
 0x822   : > { %v19145_v20 = vsel %vm1069_vm3, %v19700_v52, %v12057_v63  ;;  %v12147_v55 = vpack.c.bf16 %v12083_v31, %v12067_v60  ;;  %v19154_v43 = vsel %vm1069_vm3, %v19701_v58, %v12063_v12  ;;  %v12095_v63 = vsel %vm1069_vm3, %v12078_v11, %v12094_v21  ;;  %v15747_v11 = vld [vmem:[%s19322_s11 + $0x180] sm:$0xff]   ;;  %13458 = vmatmul.mubr.bf16.vlgmr.msra.gmra.mrb[52].mxu0 %v12142_v61  ;;  %v15757_v61 = vld [vmem:[%s19322_s11 + $0x1d8] sm:$0xff]  }
 0x823   : > { %v12144_v37 = vpack.c.bf16 %v19052_v14, %v19145_v20  ;;  %v12146_v13 = vpack.c.bf16 %v19084_v26, %v19154_v43  ;;  %v19174_v12 = vpack.c.bf16 %v12094_v21, %v12095_v63  ;;  %v12097_v46 = vsel %vm1069_vm3, %v12080_v51, %v12096_v45  ;;  %15279 = vmatprep.subr.bf16.mxu1 %v15752_v48  ;;  %v15751_v21 = vld [vmem:[%s19322_s11 + $0x188] sm:$0xff]   ;;  %v15758_v51 = vld [vmem:[%s19322_s11 + $0x118] sm:$0xff]  }
 0x824   : > { %v19185_v44 = vpack.c.bf16 %v12092_v30, %v12093_v8  ;;  %v19187_v29 = vpack.c.bf16 %v12096_v45, %v12097_v46  ;;  %15079 = vmatprep.mubr.msk.bf16.mxu0 %vm17474_vm6, %v15078_v9  ;;  %15304 = vmatpush3.bf16.msra.mxu0 %v15747_v11  ;;  %v15753_v30 = vld [vmem:[%s19322_s11 + $0x1d0] sm:$0xff]  }
 0x825   : > { %15305 = vmatprep.subr.bf16.mxu0 %v15749_v19  ;;  %15076 = vmatmul.mubr.msk.bf16.gmra.mrb[52].mxu1 %vm17474_vm6, %v15075_v27  ;;  %v15755_v45 = vld [vmem:[%s19322_s11 + $0x190] sm:$0xff]  }
 0x826   : > { %15280 = vmatpush3.bf16.msra.mxu1 %v15754_v47  ;;  %13506 = vmatprep.mubr.bf16.mxu1 %v12145_v35 }
 0x827   : > { %15281 = vmatprep.subr.bf16.mxu1 %v15756_v16 }
 0x828   : > { %15306 = vmatpush3.bf16.msra.mxu0 %v15751_v21 }
 0x829   : > { %15307 = vmatprep.subr.bf16.mxu0 %v15753_v30 }
 0x82a   : > { %15282 = vmatpush3.bf16.msra.mxu1 %v15758_v51  ;;  %15082 = vmatmul.mubr.msk.bf16.gmra.mrb[56].mxu0 %vm17474_vm6, %v15081_v32 }
 0x82b   : > { %15283 = vmatprep.subr.bf16.mxu1 %v15760_v40  ;;  %13555 = vmatprep.mubr.bf16.mxu0 %v12147_v55 }
 0x82c   : > { %15308 = vmatpush3.bf16.msra.mxu0 %v15755_v45 }
 0x82d   : > { %15309 = vmatprep.subr.bf16.mxu0 %v15757_v61 }
 0x82e   : > { %15284 = vmatpush3.bf16.msra.mxu1 %v15762_v34 }
 0x82f   : > { %15285 = vmatprep.subr.bf16.mxu1 %v15764_v3 }
 0x830   : > { %15310 = vmatpush3.bf16.msra.mxu0 %v15759_v50 }
 0x831   : > { %15311 = vmatprep.subr.bf16.mxu0 %v15761_v17 }
 0x832   : > { %15286 = vmatpush3.bf16.msra.mxu1 %v15766_v2 }
 0x833   : > { %15287 = vmatprep.subr.bf16.mxu1 %v15768_v5 }
 0x834   : > { %15312 = vmatpush3.bf16.msra.mxu0 %v15763_v0 }
 0x835   : > { %15313 = vmatprep.subr.bf16.mxu0 %v15765_v23 }
 0x836   : > { %15288 = vmatpush3.bf16.msra.mxu1 %v15770_v33 }
 0x837   : > { %15289 = vmatprep.subr.bf16.mxu1 %v15772_v53 }
 0x838   : > { %15314 = vmatpush3.bf16.msra.mxu0 %v15767_v1 }
 0x839   : > { %15315 = vmatprep.subr.bf16.mxu0 %v15769_v38 }
 0x83a   : > { %15290 = vmatpush3.bf16.msra.mxu1 %v15774_v42 }
 0x83c   : > { %15316 = vmatpush3.bf16.msra.mxu0 %v15771_v56 }
 0x83d   : > { %15317 = vmatprep.subr.bf16.mxu0 %v15773_v25  ;;  %13507 = vmatmul.mubr.bf16.vlgmr.msra.gmra.mrb[56].mxu1 %v12144_v37 }
 0x83e   : > { %15085 = vmatprep.mubr.msk.bf16.mxu1 %vm17474_vm6, %v19174_v12 }
 0x840   : > { %15318 = vmatpush3.bf16.msra.mxu0 %v15775_v49 }
 0x843   : > { %13556 = vmatmul.mubr.bf16.vlgmr.msra.gmra.mrb[60].mxu0 %v12146_v13 }
 0x844   : > { %15091 = vmatprep.mubr.msk.bf16.mxu0 %vm17474_vm6, %v19176_v6 }
 0x845   : > { %15088 = vmatmul.mubr.msk.bf16.gmra.mrb[60].mxu1 %vm17474_vm6, %v19185_v44 }
 0x84b   : > { %15094 = vmatmul.mubr.msk.bf16.gmra.mrb[64].mxu0 %vm17474_vm6, %v19187_v29 }
 0x86a   : > { %v15123_v14 = vpop.f32.mrb[32].mxu1 }
 0x86b   : > { %v15124_v57 = vpop.f32.mrb[33].mxu1 }
 0x86c   : > { %v15125_v54 = vadd.f32 %v15124_v57, %v15123_v14  ;;  %v15126_v39 = vpop.f32.mrb[34].mxu1 }
 0x86d   : > { %v15127_v59 = vpop.f32.mrb[35].mxu1 }
 0x86e   : > { %v15128_v9 = vadd.f32 %v15127_v59, %v15126_v39 }
 0x871   : > { %v15151_v26 = vpop.f32.mrb[36].mxu0 }
 0x872   : > { %v15152_v4 = vpop.f32.mrb[37].mxu0 }
 0x873   : > { %v15153_v15 = vadd.f32 %v15152_v4, %v15151_v26  ;;  %v15154_v27 = vpop.f32.mrb[38].mxu0 }
 0x874   : > { %v15155_v32 = vpop.f32.mrb[39].mxu0 }
 0x875   : > { %v12752_v36 = vadd.f32 %v15153_v15, %v15125_v54  ;;  %v15156_v7 = vadd.f32 %v15155_v32, %v15154_v27 }
 0x877   : > { %v12755_v18 = vadd.f32 %v15156_v7, %v15128_v9 }
 0x892   : > { %v15129_v24 = vpop.f32.mrb[36].mxu1 }
 0x893   : > { %v15130_v41 = vpop.f32.mrb[37].mxu1 }
 0x894   : > { %v15131_v62 = vadd.f32 %v15130_v41, %v15129_v24  ;;  %v15132_v60 = vpop.f32.mrb[38].mxu1 }
 0x895   : > { %v15133_v31 = vpop.f32.mrb[39].mxu1 }
 0x896   : > { %v15134_v52 = vadd.f32 %v15133_v31, %v15132_v60 }
 0x899   : > { %v15157_v20 = vpop.f32.mrb[40].mxu0 }
 0x89a   : > { %v15158_v35 = vpop.f32.mrb[41].mxu0 }
 0x89b   : > { %v15159_v55 = vadd.f32 %v15158_v35, %v15157_v20  ;;  %v15160_v37 = vpop.f32.mrb[42].mxu0 }
 0x89c   : > { %v15161_v58 = vpop.f32.mrb[43].mxu0 }
 0x89d   : > { %v12760_v43 = vadd.f32 %v15159_v55, %v15131_v62  ;;  %v15162_v10 = vadd.f32 %v15161_v58, %v15160_v37 }
 0x89f   : > { %v12763_v28 = vadd.f32 %v15162_v10, %v15134_v52 }
 0x8ba   : > { %v15179_v13 = vpop.f32.mrb[40].mxu1 }
 0x8bb   : > { %v15180_v63 = vpop.f32.mrb[41].mxu1 }
 0x8bc   : > { %v15181_v22 = vadd.f32 %v15180_v63, %v15179_v13  ;;  %v15182_v48 = vpop.f32.mrb[42].mxu1 }
 0x8bd   : > { %v15183_v12 = vpop.f32.mrb[43].mxu1 }
 0x8be   : > { %v12801_v6 = vadd.f32 %v15181_v22, %v12752_v36  ;;  %v15184_v8 = vadd.f32 %v15183_v12, %v15182_v48 }
 0x8c0   : > { %v12804_v46 = vadd.f32 %v15184_v8, %v12755_v18 }
 0x8c3   : > { %v15207_v11 = vpop.f32.mrb[44].mxu0 }
 0x8c4   : > { %v15208_v44 = vpop.f32.mrb[45].mxu0 }
 0x8c5   : > { %v15209_v29 = vadd.f32 %v15208_v44, %v15207_v11  ;;  %v15210_v19 = vpop.f32.mrb[46].mxu0 }
 0x8c6   : > { %v15211_v47 = vpop.f32.mrb[47].mxu0 }
 0x8c7   : > { %v15212_v16 = vadd.f32 %v15211_v47, %v15210_v19  ;;  %v19288_v21 = vadd.f32 %v15209_v29, %v12801_v6 }
 0x8c9   : > { %v19290_v30 = vadd.f32 %v15212_v16, %v12804_v46 }
 0x8e6   : > { %v15185_v51 = vpop.f32.mrb[44].mxu1 }
 0x8e7   : > { %v15186_v40 = vpop.f32.mrb[45].mxu1 }
 0x8e8   : > { %v15187_v45 = vadd.f32 %v15186_v40, %v15185_v51  ;;  %v15188_v61 = vpop.f32.mrb[46].mxu1 }
 0x8e9   : > { %v15189_v34 = vpop.f32.mrb[47].mxu1 }
 0x8ea   : > { %v12809_v3 = vadd.f32 %v15187_v45, %v12760_v43  ;;  %v15190_v50 = vadd.f32 %v15189_v34, %v15188_v61 }
 0x8ec   : > { %v12812_v2 = vadd.f32 %v15190_v50, %v12763_v28 }
 0x8ed   : > { %v15213_v17 = vpop.f32.mrb[48].mxu0 }
 0x8ee   : > { %v15214_v5 = vpop.f32.mrb[49].mxu0  ;;  %v15235_v33 = vpop.f32.mrb[48].mxu1 }
 0x8ef   : > { %v15215_v0 = vadd.f32 %v15214_v5, %v15213_v17  ;;  %v15216_v23 = vpop.f32.mrb[50].mxu0  ;;  %v15236_v1 = vpop.f32.mrb[49].mxu1 }
 0x8f0   : > { %v15217_v53 = vpop.f32.mrb[51].mxu0  ;;  %v15237_v42 = vadd.f32 %v15236_v1, %v15235_v33  ;;  %v15238_v56 = vpop.f32.mrb[50].mxu1 }
 0x8f1   : > { %v15218_v38 = vadd.f32 %v15217_v53, %v15216_v23  ;;  %v19292_v25 = vadd.f32 %v15215_v0, %v12809_v3  ;;  %v15239_v49 = vpop.f32.mrb[51].mxu1  ;;  %v15095_v53 = vld [vmem:[#allocation18] ss:$0 sm:$0xff] }
 0x8f2   : > { %v15240_v14 = vadd.f32 %v15239_v49, %v15238_v56 }
 0x8f3   : > { %v19294_v57 = vadd.f32 %v15218_v38, %v12812_v2  ;;  %v13579_v38 = vadd.f32 %v15095_v53, %v19288_v21  ;;  %v13581_v49 = vadd.f32 %v15095_v53, %v19292_v25 }
 0x8f5   : > { %v15263_v54 = vpop.f32.mrb[52].mxu0 }
 0x8f6   : > { %v15264_v39 = vpop.f32.mrb[53].mxu0 }
 0x8f7   : > { %v15265_v59 = vadd.f32 %v15264_v39, %v15263_v54  ;;  %v15266_v9 = vpop.f32.mrb[54].mxu0 }
 0x8f8   : > { %v15241_v26 = vpop.f32.mrb[52].mxu1  ;;  %v15267_v4 = vpop.f32.mrb[55].mxu0 }
 0x8f9   : > { %v15242_v15 = vpop.f32.mrb[53].mxu1  ;;  %v13460_v27 = vadd.f32 %v15265_v59, %v15237_v42  ;;  %v15268_v32 = vadd.f32 %v15267_v4, %v15266_v9  ;;  %v13580_v42 = vadd.f32 %v15095_v53, %v19290_v30  ;;  %v15098_v59 = vmul.f32 -1.442695, %v13581_v49 }
 0x8fa   : > { %v15243_v36 = vadd.f32 %v15242_v15, %v15241_v26  ;;  %v15244_v7 = vpop.f32.mrb[54].mxu1  ;;  %v13582_v9 = vadd.f32 %v15095_v53, %v19294_v57 }
 0x8fb   : > { %v15245_v18 = vpop.f32.mrb[55].mxu1  ;;  %v13463_v24 = vadd.f32 %v15268_v32, %v15240_v14  ;;  %v15096_v14 = vmul.f32 -1.442695, %v13579_v38  ;;  %v15097_v54 = vmul.f32 -1.442695, %v13580_v42 }
 0x8fc   : > { %v15246_v41 = vadd.f32 %v15245_v18, %v15244_v7  ;;  %v15099_v32 = vmul.f32 -1.442695, %v13582_v9 }
 0x8fd   : > { %v15269_v62 = vpop.f32.mrb[56].mxu0  ;;  %15776 = vpow2.f32 %v15096_v14 }
 0x8fe   : > { %v15270_v60 = vpop.f32.mrb[57].mxu0  ;;  %15778 = vpow2.f32 %v15097_v54 }
 0x8ff   : > { %v15271_v31 = vadd.f32 %v15270_v60, %v15269_v62  ;;  %v15272_v52 = vpop.f32.mrb[58].mxu0  ;;  %15780 = vpow2.f32 %v15098_v59 }
 0x900   : > { %v15273_v20 = vpop.f32.mrb[59].mxu0  ;;  %15782 = vpow2.f32 %v15099_v32 }
 0x901   : > { %v13468_v35 = vadd.f32 %v15271_v31, %v15243_v36  ;;  %v15274_v55 = vadd.f32 %v15273_v20, %v15272_v52 }
 0x903   : > { %v13471_v37 = vadd.f32 %v15274_v55, %v15246_v41 }
 0x907   : > { %v15777_v52 = vpop.eup %15776 }
 0x908   : > { %v15779_v20 = vpop.eup %15778 }
 0x909   : > { %v15781_v55 = vpop.eup %15780 }
 0x910   : > { %v15291_v58 = vpop.f32.mrb[56].mxu1 }
 0x911   : > { %v15292_v43 = vpop.f32.mrb[57].mxu1 }
 0x912   : > { %v15293_v10 = vadd.f32 %v15292_v43, %v15291_v58  ;;  %v15294_v28 = vpop.f32.mrb[58].mxu1  ;;  %v13597_v58 = vadd.f32 1.0, %v15781_v55  ;;  %v15783_v43 = vpop.eup %15782 }
 0x913   : > { %v15295_v13 = vpop.f32.mrb[59].mxu1 }
 0x914   : > { %v13509_v63 = vadd.f32 %v15293_v10, %v13460_v27  ;;  %v15296_v22 = vadd.f32 %v15295_v13, %v15294_v28 }
 0x916   : > { %v15319_v48 = vpop.f32.mrb[60].mxu0  ;;  %v13512_v12 = vadd.f32 %v15296_v22, %v13463_v24 }
 0x917   : > { %v15320_v6 = vpop.f32.mrb[61].mxu0 }
 0x918   : > { %v15321_v8 = vadd.f32 %v15320_v6, %v15319_v48  ;;  %v15322_v46 = vpop.f32.mrb[62].mxu0  ;;  %v15297_v11 = vpop.f32.mrb[60].mxu1  ;;  %v13598_v48 = vadd.f32 1.0, %v15783_v43 }
 0x919   : > { %v15323_v44 = vpop.f32.mrb[63].mxu0  ;;  %v15298_v29 = vpop.f32.mrb[61].mxu1 }
 0x91a   : > { %v15324_v19 = vadd.f32 %v15323_v44, %v15322_v46  ;;  %v13558_v47 = vadd.f32 %v15321_v8, %v13509_v63  ;;  %v15299_v16 = vadd.f32 %v15298_v29, %v15297_v11  ;;  %v15300_v51 = vpop.f32.mrb[62].mxu1 }
 0x91b   : > { %v15301_v40 = vpop.f32.mrb[63].mxu1 }
 0x91c   : > { %v13561_v45 = vadd.f32 %v15324_v19, %v13512_v12  ;;  %13611 = vrot.lane.b32.xlu0 %v13558_v47, %s16172_s26  ;;  %v13517_v61 = vadd.f32 %v15299_v16, %v13468_v35  ;;  %v15302_v34 = vadd.f32 %v15301_v40, %v15300_v51 }
 0x91e   : > { %v15325_v3 = vpop.f32.mrb[64].mxu0  ;;  %v13520_v50 = vadd.f32 %v15302_v34, %v13471_v37  ;;  %v13595_v37 = vadd.f32 1.0, %v15777_v52 }
 0x91f   : > { %v15326_v17 = vpop.f32.mrb[65].mxu0 }
 0x920   : > { %v15327_v2 = vadd.f32 %v15326_v17, %v15325_v3  ;;  %v15328_v5 = vpop.f32.mrb[66].mxu0  ;;  %13613 = vrot.lane.b32.xlu0 %v13561_v45, %s16172_s26 }
 0x921   : > { %v15329_v0 = vpop.f32.mrb[67].mxu0 }
 0x922   : > { %v15330_v23 = vadd.f32 %v15329_v0, %v15328_v5  ;;  %v13566_v33 = vadd.f32 %v15327_v2, %v13517_v61 }
 0x924   : > { %v13569_v1 = vadd.f32 %v15330_v23, %v13520_v50  ;;  %13615 = vrot.lane.b32.xlu1 %v13566_v33, %s16172_s26  ;;  %13627 = vrot.lane.b32.xlu0 %v15095_v53, %s16172_s26 }
 0x928   : > { %13617 = vrot.lane.b32.xlu1 %v13569_v1, %s16172_s26 }
 0x98e   : > { %v13612_v56 = vpop.permute.xlu0 %13611 }
 0x98f   : > { %v13623_v26 = vadd.f32 %v13612_v56, %v19288_v21 }
 0x992   : > { %v13614_v39 = vpop.permute.xlu0 %13613 }
 0x993   : > { %v13624_v4 = vadd.f32 %v13614_v39, %v19290_v30 }
 0x996   : > { %v13616_v15 = vpop.permute.xlu1 %13615  ;;  %v13628_v27 = vpop.permute.xlu0 %13627 }
 0x997   : > { %v13625_v36 = vadd.f32 %v13616_v15, %v19292_v25  ;;  %v13630_v7 = vadd.f32 %v13628_v27, %v13623_v26  ;;  %v13631_v18 = vadd.f32 %v13628_v27, %v13624_v4  ;;  %v13596_v25 = vadd.f32 1.0, %v15779_v20 }
 0x999   : > { %v13632_v24 = vadd.f32 %v13628_v27, %v13625_v36  ;;  %v15100_v41 = vmul.f32 -1.442695, %v13630_v7  ;;  %v15101_v62 = vmul.f32 -1.442695, %v13631_v18 }
 0x99a   : > { %v13618_v60 = vpop.permute.xlu1 %13617 }
 0x99b   : > { %15784 = vpow2.f32 %v15100_v41  ;;  %v15102_v31 = vmul.f32 -1.442695, %v13632_v24  ;;  %v13626_v21 = vadd.f32 %v13618_v60, %v19294_v57 }
 0x99c   : > { %15786 = vpow2.f32 %v15101_v62 }
 0x99d   : > { %15788 = vpow2.f32 %v15102_v31  ;;  %v13633_v30 = vadd.f32 %v13628_v27, %v13626_v21 }
 0x99f   : > { %v15103_v35 = vmul.f32 -1.442695, %v13633_v30 }
 0x9a1   : > { %15790 = vpow2.f32 %v15103_v35 }
 0x9a2   : > { %15792 = vrcp.f32 %v13595_v37 }
 0x9a3   : > { %15794 = vrcp.f32 %v13596_v25 }
 0x9a4   : > { %15796 = vrcp.f32 %v13597_v58 }
 0x9a5   : > { %v15785_v10 = vpop.eup %15784 }
 0x9a6   : > { %v15787_v28 = vpop.eup %15786  ;;  %v13646_v13 = vadd.f32 1.0, %v15785_v10 }
 0x9a7   : > { %v15789_v63 = vpop.eup %15788  ;;  %v13647_v57 = vadd.f32 1.0, %v15787_v28 }
 0x9a8   : > { %v13648_v22 = vadd.f32 1.0, %v15789_v63  ;;  %15798 = vrcp.f32 %v13646_v13 }
 0x9a9   : > { %15800 = vrcp.f32 %v13647_v57 }
 0x9aa   : > { %15802 = vrcp.f32 %v13648_v22 }
 0x9ab   : > { %v15791_v12 = vpop.eup %15790  ;;  %15804 = vrcp.f32 %v13598_v48 }
 0x9ac   : > { %v13649_v6 = vadd.f32 1.0, %v15791_v12  ;;  %v15793_v8 = vpop.eup %15792 }
 0x9ad   : > { %v15795_v46 = vpop.eup %15794 }
 0x9ae   : > { %15806 = vrcp.f32 %v13649_v6  ;;  %v15797_v11 = vpop.eup %15796 }
 0x9b2   : > { %v15799_v44 = vpop.eup %15798 }
 0x9b3   : > { %v15801_v29 = vpop.eup %15800  ;;  %v13659_v19 = vsel %vm13658_vm7, %v15793_v8, %v15799_v44 }
 0x9b4   : > { %v15803_v47 = vpop.eup %15802  ;;  %v13660_v16 = vsel %vm13658_vm7, %v15795_v46, %v15801_v29  ;;  %13663 = vst [vmem:[%s589_s18] sm:$0xff] %v13659_v19 }
 0x9b5   : > { %v13661_v51 = vsel %vm13658_vm7, %v15797_v11, %v15803_v47  ;;  %13664 = vst [vmem:[%s589_s18 + $0x8] sm:$0xff] %v13660_v16  ;;  %v15805_v40 = vpop.eup %15804 }
 0x9b6   : > { %13665 = vst [vmem:[%s589_s18 + $0x10] sm:$0xff] %v13661_v51 }
 0x9b8   : > { %v15807_v45 = vpop.eup %15806 }
 0x9b9   : > { %v13662_v61 = vsel %vm13658_vm7, %v15805_v40, %v15807_v45 }
 0x9ba   : > { %13666 = vst [vmem:[%s589_s18 + $0x18] sm:$0xff] %v13662_v61 }
 0x9bb PF: > { %s19704_s28 = sld [smem:[#allocation25_spill]] }
 0x9c1   : > { %s29_s25 = sadd.s32 1, %s19704_s28  }
 0x9c2   : > { %p26_p11 = scmp.ge.s32.totalorder %s29_s25, 4  }
 0x9c4   :  { %28 = sbr.rel (!%p26_p11) target bundleno = 10 (0xa), region = 147 }
 0x9cb   :  { %13688 = vsyncpa [#allocation3], 1 }
 0x9cc   :  { %13690 = vsyncpa [#allocation3 + $0x1], 1 }
 0x9cd   :  { %13691 = vsyncpa [#allocation5], 1 }
 0x9ce   :  { %13692 = vsyncpa [#allocation8], 1 }
 0x9cf   :  { %13693 = vsyncpa [#allocation11], 1 }
 0x9d0   :  { %13694 = vsyncpa [#allocation14], 1 }
 0x9d1   :  { %13695 = vsyncpa [#allocation17], 1 }

</bundles_post_ra>
